<compile_context>
chip_gen: v6e
topology: v6e:2x2x1
jax: 0.10.0
libtpu: 0.0.40
codegen_flags: <defaults>
</compile_context>

<pallas_src>
import jax
import jax.numpy as jnp
from jax.experimental import pallas as pl
from jax.experimental.pallas import tpu as pltpu

EPS = 1e-5


def _relu_conv1x1_bn_kernel(x_ref, w_ref, gamma_ref, beta_ref, o_ref):
    # x_ref:     (Cin, M)   f32  -- full flattened input, resident across grid steps
    # w_ref:     (TN, Cin)  f32  -- tile of 1x1-conv weight rows (cast to bf16 here)
    # gamma_ref: (Cout, 1)  f32  -- resident, sliced per tile
    # beta_ref:  (Cout, 1)  f32  -- resident, sliced per tile
    # o_ref:     (TN, M)    f32
    j = pl.program_id(0)
    tn = o_ref.shape[0]
    m = o_ref.shape[1]
    inv_m = 1.0 / m

    # ReLU + bf16 cast of the resident input (cheap VPU work, overlaps DMA/MXU).
    x = jnp.maximum(x_ref[...], 0.0).astype(jnp.bfloat16)

    # Weight tile cast in-kernel: avoids a wrapper-side HBM convert pass.
    w = w_ref[...].astype(jnp.bfloat16)

    # 1x1 conv == matmul: (TN, Cin) @ (Cin, M) -> (TN, M), f32 MXU accumulation.
    y = jax.lax.dot_general(
        w, x,
        (((1,), (0,)), ((), ())),
        preferred_element_type=jnp.float32,
    )

    # Single-pass per-channel batch statistics (biased variance, training-mode BN).
    s1 = jnp.sum(y, axis=1, keepdims=True)                  # (TN, 1)
    s2 = jnp.sum(y * y, axis=1, keepdims=True)              # (TN, 1)
    mean = s1 * inv_m
    var = s2 * inv_m - mean * mean

    row0 = pl.multiple_of(j * tn, tn)
    gamma = gamma_ref[pl.ds(row0, tn), :]                   # (TN, 1)
    beta = beta_ref[pl.ds(row0, tn), :]                     # (TN, 1)

    scale = gamma * jax.lax.rsqrt(var + EPS)                # folded affine
    shift = beta - mean * scale
    o_ref[...] = y * scale + shift                          # single fused epilogue pass


def relu_conv1x1_bn(x_nchw, weight, gamma, beta, *, tn=512):
    """x_nchw: (N, Cin, H, W); weight: (Cout, Cin, 1, 1); gamma/beta: (Cout,)."""
    n, c_in, h, w_sp = x_nchw.shape
    c_out = weight.shape[0]
    m = n * h * w_sp

    tn = min(tn, c_out)
    assert c_out % tn == 0, (c_out, tn)

    # Channel-major flattening: for N=1 this is a pure reshape (no copy).
    x_cm = jnp.moveaxis(x_nchw, 0, 1).reshape(c_in, m).astype(jnp.float32)
    # No dtype conversion here: the kernel casts its (tn, Cin) tile to bf16,
    # so the weight is read from HBM exactly once in whatever dtype it is stored.
    w2 = weight.reshape(c_out, c_in)
    g2 = gamma.reshape(c_out, 1).astype(jnp.float32)
    b2 = beta.reshape(c_out, 1).astype(jnp.float32)

    x_bytes = x_cm.size * x_cm.dtype.itemsize
    w_bytes = w2.size * w2.dtype.itemsize
    out_bytes = c_out * m * 4
    cost = pl.CostEstimate(
        flops=2 * c_out * c_in * m,
        transcendentals=0,
        bytes_accessed=int(x_bytes + w_bytes + out_bytes + 2 * c_out * 4),
    )

    out_cm = pl.pallas_call(
        _relu_conv1x1_bn_kernel,
        out_shape=jax.ShapeDtypeStruct((c_out, m), jnp.float32),
        grid=(c_out // tn,),
        in_specs=[
            pl.BlockSpec((c_in, m), lambda j: (0, 0)),     # x: resident
            pl.BlockSpec((tn, c_in), lambda j: (j, 0)),    # weight rows: streamed/double-buffered
            pl.BlockSpec((c_out, 1), lambda j: (0, 0)),    # gamma: resident, sliced in-kernel
            pl.BlockSpec((c_out, 1), lambda j: (0, 0)),    # beta: resident, sliced in-kernel
        ],
        out_specs=pl.BlockSpec((tn, m), lambda j: (j, 0)),
        compiler_params=pltpu.CompilerParams(
            dimension_semantics=("parallel",),             # 2 independent Cout tiles -> megacore on v7x
            vmem_limit_bytes=32 * 1024 * 1024,
        ),
        cost_estimate=cost,
    )(x_cm, w2, g2, b2)

    # (Cout, M) is already NCHW for N=1; general N via a (degenerate for N=1) moveaxis.
    return jnp.moveaxis(out_cm.reshape(c_out, n, h, w_sp), 0, 1)


def _reference(x, weight, gamma, beta):
    xr = jnp.maximum(x, 0.0)
    y = jnp.einsum("nchw,oc->nohw", xr, weight[:, :, 0, 0])
    mean = jnp.mean(y, axis=(0, 2, 3), keepdims=True)
    var = jnp.mean((y - mean) ** 2, axis=(0, 2, 3), keepdims=True)
    return (y - mean) / jnp.sqrt(var + EPS) * gamma.reshape(1, -1, 1, 1) \
        + beta.reshape(1, -1, 1, 1)


if __name__ == "__main__":
    # Shapes of the module: Conv2d(1024, 1024, 1x1) on a 1x1024x14x14 input.
    N, C, H, W = 1, 1024, 14, 14

    key = jax.random.PRNGKey(0)
    k1, k2, k3, k4 = jax.random.split(key, 4)
    x = jax.random.normal(k1, (N, C, H, W), dtype=jnp.float32)
    weight = jax.random.normal(k2, (C, C, 1, 1), dtype=jnp.float32) * 0.02   # conv2d42.weight
    gamma = 1.0 + 0.1 * jax.random.normal(k3, (C,), dtype=jnp.float32)       # batchnorm2d42.weight
    beta = 0.1 * jax.random.normal(k4, (C,), dtype=jnp.float32)              # batchnorm2d42.bias

    out = jax.block_until_ready(relu_conv1x1_bn(x, weight, gamma, beta))
    assert out.shape == (N, C, H, W), out.shape

    ref = jax.block_until_ready(_reference(x, weight, gamma, beta))
    max_err = float(jnp.max(jnp.abs(out - ref)))
    # Loose tolerance: bf16 MXU operands vs f32 XLA einsum reference.
    assert max_err < 5e-2, f"max abs error {max_err}"

    print("KERNEL_OK")
</pallas_src>

<mosaic_0001>
module attributes {stable_mosaic.version = 11 : i64} {
  func.func @_relu_conv1x1_bn_kernel(%arg0: i32, %arg1: memref<1024x196xf32, #tpu.memory_space<vmem>>, %arg2: memref<512x1024xf32, #tpu.memory_space<vmem>>, %arg3: memref<1024x1xf32, #tpu.memory_space<vmem>>, %arg4: memref<1024x1xf32, #tpu.memory_space<vmem>>, %arg5: memref<512x196xf32, #tpu.memory_space<vmem>>) attributes {dimension_semantics = [#tpu.dimension_semantics<parallel>], iteration_bounds = array<i64: 2>, scalar_prefetch = 0 : i64, scratch_operands = 0 : i64, tpu.core_type = #tpu.core_type<tc>, window_params = [{pipeline_mode = #tpu.pipeline_mode<synchronous>, transform_indices = @transform_0, window_bounds = array<i64: 1024, 196>}, {transform_indices = @transform_1, window_bounds = array<i64: 512, 1024>}, {pipeline_mode = #tpu.pipeline_mode<synchronous>, transform_indices = @transform_2, window_bounds = array<i64: 1024, 1>}, {pipeline_mode = #tpu.pipeline_mode<synchronous>, transform_indices = @transform_3, window_bounds = array<i64: 1024, 1>}, {transform_indices = @transform_4, window_bounds = array<i64: 512, 196>}]} {
    %c0 = arith.constant 0 : index
    %c0_0 = arith.constant 0 : index
    %0 = vector.load %arg1[%c0, %c0_0] : memref<1024x196xf32, #tpu.memory_space<vmem>>, vector<1024x196xf32>
    %cst = arith.constant 0.000000e+00 : f32
    %1 = vector.broadcast %cst : f32 to vector<1024x196xf32>
    %2 = arith.maximumf %0, %1 : vector<1024x196xf32>
    %3 = arith.truncf %2 : vector<1024x196xf32> to vector<1024x196xbf16>
    %c0_1 = arith.constant 0 : index
    %c0_2 = arith.constant 0 : index
    %4 = vector.load %arg2[%c0_1, %c0_2] : memref<512x1024xf32, #tpu.memory_space<vmem>>, vector<512x1024xf32>
    %5 = arith.truncf %4 : vector<512x1024xf32> to vector<512x1024xbf16>
    %cst_3 = arith.constant dense<0.000000e+00> : vector<512x196xf32>
    %6 = tpu.matmul %5, %3, %cst_3 {dimension_numbers = #tpu.dot_dimension_numbers<[1], [0], [0], [1], [0, 0, 1, 1], [], []>} : vector<512x1024xbf16>, vector<1024x196xbf16>, vector<512x196xf32> -> vector<512x196xf32>
    %cst_4 = arith.constant dense<0.000000e+00> : vector<512xf32>
    %7 = vector.multi_reduction <add>, %6, %cst_4 [1] : vector<512x196xf32> to vector<512xf32>
    %8 = vector.shape_cast %7 : vector<512xf32> to vector<512x1xf32>
    %9 = arith.mulf %6, %6 : vector<512x196xf32>
    %cst_5 = arith.constant dense<0.000000e+00> : vector<512xf32>
    %10 = vector.multi_reduction <add>, %9, %cst_5 [1] : vector<512x196xf32> to vector<512xf32>
    %11 = vector.shape_cast %10 : vector<512xf32> to vector<512x1xf32>
    %cst_6 = arith.constant 0.00510204071 : f32
    %12 = vector.broadcast %cst_6 : f32 to vector<512x1xf32>
    %13 = arith.mulf %8, %12 : vector<512x1xf32>
    %cst_7 = arith.constant 0.00510204071 : f32
    %14 = vector.broadcast %cst_7 : f32 to vector<512x1xf32>
    %15 = arith.mulf %11, %14 : vector<512x1xf32>
    %16 = arith.mulf %13, %13 : vector<512x1xf32>
    %17 = arith.subf %15, %16 : vector<512x1xf32>
    %c512_i32 = arith.constant 512 : i32
    %18 = arith.muli %arg0, %c512_i32 : i32
    %19 = tpu.assume_multiple %18, 512 : i32
    %20 = arith.index_cast %19 : i32 to index
    %c0_8 = arith.constant 0 : index
    %21 = vector.load %arg3[%20, %c0_8] : memref<1024x1xf32, #tpu.memory_space<vmem>>, vector<512x1xf32>
    %22 = arith.index_cast %19 : i32 to index
    %c0_9 = arith.constant 0 : index
    %23 = vector.load %arg4[%22, %c0_9] : memref<1024x1xf32, #tpu.memory_space<vmem>>, vector<512x1xf32>
    %cst_10 = arith.constant 9.99999974E-6 : f32
    %24 = vector.broadcast %cst_10 : f32 to vector<512x1xf32>
    %25 = arith.addf %17, %24 : vector<512x1xf32>
    %26 = math.rsqrt %25 : vector<512x1xf32>
    %27 = arith.mulf %21, %26 : vector<512x1xf32>
    %28 = arith.mulf %13, %27 : vector<512x1xf32>
    %29 = arith.subf %23, %28 : vector<512x1xf32>
    %30 = vector.broadcast %27 : vector<512x1xf32> to vector<512x196xf32>
    %31 = arith.mulf %6, %30 : vector<512x196xf32>
    %32 = vector.broadcast %29 : vector<512x1xf32> to vector<512x196xf32>
    %33 = arith.addf %31, %32 : vector<512x196xf32>
    %c0_11 = arith.constant 0 : index
    %c0_12 = arith.constant 0 : index
    %34 = vector.load %arg5[%c0_11, %c0_12] : memref<512x196xf32, #tpu.memory_space<vmem>>, vector<512x196xf32>
    tpu.vector_store %arg5[%c0_11, %c0_12], %33 {strides = array<i32>} : memref<512x196xf32, #tpu.memory_space<vmem>>, vector<512x196xf32>,
    return
  }
  func.func @transform_0(%arg0: i32) -> (i32, i32) {
    %c0_i32 = arith.constant 0 : i32
    %c0_i32_0 = arith.constant 0 : i32
    %c0_i32_1 = arith.constant 0 : i32
    return %c0_i32, %c0_i32_0 : i32, i32
  }
  func.func @transform_1(%arg0: i32) -> (i32, i32) {
    %c0_i32 = arith.constant 0 : i32
    %c0_i32_0 = arith.constant 0 : i32
    return %arg0, %c0_i32 : i32, i32
  }
  func.func @transform_2(%arg0: i32) -> (i32, i32) {
    %c0_i32 = arith.constant 0 : i32
    %c0_i32_0 = arith.constant 0 : i32
    %c0_i32_1 = arith.constant 0 : i32
    return %c0_i32, %c0_i32_0 : i32, i32
  }
  func.func @transform_3(%arg0: i32) -> (i32, i32) {
    %c0_i32 = arith.constant 0 : i32
    %c0_i32_0 = arith.constant 0 : i32
    %c0_i32_1 = arith.constant 0 : i32
    return %c0_i32, %c0_i32_0 : i32, i32
  }
  func.func @transform_4(%arg0: i32) -> (i32, i32) {
    %c0_i32 = arith.constant 0 : i32
    %c0_i32_0 = arith.constant 0 : i32
    return %arg0, %c0_i32 : i32, i32
  }
}

</mosaic_0001>

<bundles_post_ra>
// kernel: tpu_custom_call.1
= control target key start
LH: loop header
LB: loop body
LE: loop exit
PB: predicated region body
PF: predicated region fallthrough
CT: control target
= control target key end

     0   :  { %9 = vsyncpa [#allocation3], 0  ;;  %s9535_s0 = inlined_call_operand.vmem [shape: f32[1024,196], index: 0, kind: input, shape index: {}]   ;;  %s9536_s1 = inlined_call_operand.hbm [shape: f32[1024,1024], index: 1, kind: input, shape index: {}]   ;;  %s9537_s2 = inlined_call_operand.vmem [shape: f32[1024,1], index: 2, kind: input, shape index: {}]   ;;  %s9538_s3 = inlined_call_operand.vmem [shape: f32[1024,1], index: 3, kind: input, shape index: {}]   ;;  %s9539_s4 = inlined_call_operand.vmem [shape: f32[1024,196], index: 4, kind: output, shape index: {}]  }
   0x1   :  { %11 = vsyncpa [#allocation3 + $0x1], 0  ;;  %s5772_s15 = smov 0   ;;  %s5774_s16 = smov 0  }
   0x2   :  { %s5776_s17 = smov 0   ;;  %s5778_s18 = smov 0  }
   0x3 LB: > { %s5791_s19 = sadd.s32 4294967295, %s5741_s18   ;;  %s5794_s20 = sadd.s32 1, %s5741_s18   ;;  %s5741_s18 = sphi %s5778_s18, %s10169_s18   ;;  %s5737_s17 = sphi %s5776_s17, %s10168_s17   ;;  %s5733_s16 = sphi %s5774_s16, %s10167_s16   ;;  %s5729_s15 = sphi %s5772_s15, %s10166_s15  }
   0x4   : > { %s42_s21 = ssub.s32 %s5741_s18, %s5794_s20  ;;  %s45_s22 = sadd.s32 1, %s5737_s17 }
   0x5   : > { %p43_p0 = scmp.eq.s32.totalorder %s42_s21, 0  ;;  %p52_p1 = scmp.ne.s32.totalorder %s5737_s17, %s5733_s16 }
   0x6   : > { %p53_p2 = scmp.eq.s32.totalorder %s5741_s18, 0  ;;  %p58_p3 = scmp.ne.s32.totalorder %s5733_s16, %s5729_s15 }
   0x7   : > { %s5804_s23 = scalar_select %p43_p0, %s5737_s17, %s45_s22  }
   0x8   : > { %p54_p4 = por %p53_p2, %p52_p1  ;;  %p59_p5 = scmp.eq.s32.totalorder %s5791_s19, 0 }
   0x9   : > { %p5513_p6 = scmp.lt.s32.totalorder %s5741_s18, 2  ;;  %s159_s25 = sand.u32 1, %s5737_s17  }
   0xa   : > { %p5808_p7 = por %p59_p5, %p58_p3  ;;  %s5492_s26 = sshll.u32 %s159_s25, 12 }
   0xb   : > { %s5505_s27 = sshll.u32 %s5741_s18, 16  ;;  %s163_s5 = scalar_lea.vmem [#allocation2], %s5492_s26 }
   0xc   : > { %s9654_s24 = scalar_select %p5808_p7, 1, 0 }
   0xd   : > { %s5817_s30 = scalar_lea.hbm %s9536_s1, %s5505_s27  ;;  %s171_s6 = sshll.u32 %s163_s5, 4  ;;  %s5819_s6 = int_to_ptr.vmem [resolvable:$true] %s171_s6 }
   0xe   : > { %p5821_p8 = pnand %p5513_p6, %p54_p4  ;;  %s5826_s8 = scalar_lea.sflag [#allocation3], %s159_s25 }
   0xf   : > { %s5679_s9 = scalar_lea.hbm %s5817_s30, 65536  ;;  %s5684_s12 = scalar_lea.hbm %s9536_s1, 131072 }
  0x10   : > { %p5680_p10 = scmp.ne.s32.totalorder %s5817_s30, %s5679_s9  ;;  %p5681_p11 = pneg %p5821_p8 }
  0x11   : > { %p5685_p0 = scmp.lt.s32.totalorder %s5817_s30, %s9536_s1  ;;  %p5686_p1 = scmp.lt.s32.totalorder %s5684_s12, %s5679_s9 }
  0x12   : > { %p5682_p12 = pnand %p5681_p11, %p5680_p10 }
  0x13   : > { %p5687_p2 = por %p5686_p1, %p5685_p0 }
  0x14   : > { %p5683_p13 = pneg %p5682_p12 }
  0x16   : > { %p5688_p3 = pnand %p5687_p2, %p5683_p13 }
  0x18   : > { %5691 = shalt.err (!%p5688_p3)
}
  0x19   : > { %s5692_s15 = scalar_lea.vmem %s5819_s6, 65536  ;;  %s5743_s21 = smov [#allocation2]  }
  0x1a   : > { %p5693_p4 = scmp.ne.s32.totalorder %s5819_s6, %s5692_s15  ;;  %s5697_s22 = sshll.u32 %s5743_s21, 4  ;;  %s5698_s22 = int_to_ptr.vmem [resolvable:$false] %s5697_s22 }
  0x1b   : > { %s5699_s25 = scalar_lea.vmem %s5698_s22, 131072  ;;  %p5700_p10 = scmp.lt.s32.totalorder %s5819_s6, %s5698_s22 }
  0x1c   : > { %p5695_p5 = pnand %p5693_p4, %p5681_p11  ;;  %p5701_p12 = scmp.lt.s32.totalorder %s5699_s25, %s5692_s15 }
  0x1e   : > { %p5696_p6 = pneg %p5695_p5  ;;  %p5702_p9 = por %p5701_p12, %p5700_p10 }
  0x20   : > { %p5703_p7 = pnand %p5702_p9, %p5696_p6 }
  0x22   : > { %5706 = shalt.err (!%p5703_p7)
}
  0x23   : > { %s5744_s26 = smov 1024   ;;  %s5745_s27 = smov 64  }
  0x24   : > { %5512 = dma.hbm_to_vmem [thread:$0]  (!%p5821_p8), %s5817_s30, 65536, %s5819_s6, %s5826_s8, %s5744_s26, %s5744_s26, %s5745_s27  }
  0x25   : > { %p179_p11 = scmp.lt.s32.totalorder %s5741_s18, 3  ;;  %p9656_p13 = scmp.ge.s32.totalorder %s5741_s18, 1 }
  0x27   : > { %p180_p0 = pnand %p9656_p13, %p179_p11 }
  0x29   : > { %183 = sbr.rel (%p180_p0) target bundleno = 1740 (0x6cc), region = 36 }
  0x2e   : > { %s185_s28 = sand.u32 1, %s5733_s16   ;;  %p9657_p7 = scmp.ne.s32.totalorder %s9654_s24, 0 }
  0x2f   : > { %s5497_s29 = sshll.u32 %s185_s28, 12  ;;  %s186_s5 = scalar_lea.sflag [#allocation3], %s185_s28 }
  0x30   : > { %s5851_s9 = scalar_lea.vmem [#allocation2], %s5497_s29 }
  0x31   : > { %5724 = dma.done.wait (%p9657_p7), %s186_s5, 65536  }
  0x32   : > { %5726 = vsyncadd (%p9657_p7), %s186_s5, 4294901760  ;;  %v252_v0 = vld [vmem:[%s9535_s0 + $0xe8] sm:$0xff]  ;;  %v254_v1 = vld [vmem:[%s9535_s0 + $0xf8] sm:$0xff]  ;;  %vm3043_vm0 = vcmask 556032   ;;  %s5498_s29 = sshll.u32 %s5791_s19, 6 }
  0x33   : > { %v316_v2 = vld [vmem:[%s9535_s0 + $0x2e8] sm:$0xff]  ;;  %v508_v3 = vmax.f32 %v252_v0, 0.0  ;;  %v510_v4 = vmax.f32 %v254_v1, 0.0  ;;  %v318_v5 = vld [vmem:[%s9535_s0 + $0x2f8] sm:$0xff]  ;;  %v251_v7 = vld [vmem:[%s9535_s0 + $0xe0] sm:$0xff]  ;;  %p217_p8 = scmp.lt.s32.totalorder %s5498_s29, 127 }
  0x34   : > { %v572_v6 = vmax.f32 %v316_v2, 0.0  ;;  %v253_v8 = vld [vmem:[%s9535_s0 + $0xf0] sm:$0xff]  ;;  %v574_v9 = vmax.f32 %v318_v5, 0.0  ;;  %v507_v10 = vmax.f32 %v251_v7, 0.0  ;;  %v315_v12 = vld [vmem:[%s9535_s0 + $0x2e0] sm:$0xff]  ;;  %v248_v14 = vld [vmem:[%s9535_s0 + $0xc8] sm:$0xff] }
  0x35   : > { %v509_v11 = vmax.f32 %v253_v8, 0.0  ;;  %v317_v13 = vld [vmem:[%s9535_s0 + $0x2f0] sm:$0xff]  ;;  %v750_v15 = vpack.c.bf16 %v510_v4, %v508_v3  ;;  %v571_v16 = vmax.f32 %v315_v12, 0.0  ;;  %v250_v18 = vld [vmem:[%s9535_s0 + $0xd8] sm:$0xff]  ;;  %v504_v19 = vmax.f32 %v248_v14, 0.0  ;;  %v312_v20 = vld [vmem:[%s9535_s0 + $0x2c8] sm:$0xff] }
  0x36   : > { %v573_v17 = vmax.f32 %v317_v13, 0.0  ;;  %v314_v21 = vld [vmem:[%s9535_s0 + $0x2d8] sm:$0xff]  ;;  %v782_v22 = vpack.c.bf16 %v574_v9, %v572_v6  ;;  %v506_v24 = vmax.f32 %v250_v18, 0.0  ;;  %v568_v25 = vmax.f32 %v312_v20, 0.0  ;;  %v247_v26 = vld [vmem:[%s9535_s0 + $0xc0] sm:$0xff]  ;;  %v249_v27 = vld [vmem:[%s9535_s0 + $0xd0] sm:$0xff] }
  0x37   : > { %v749_v23 = vpack.c.bf16 %v509_v11, %v507_v10  ;;  %v311_v28 = vld [vmem:[%s9535_s0 + $0x2c0] sm:$0xff]  ;;  %1631 = vmatprep.subr.bf16.mxu0 %v750_v15  ;;  %v570_v30 = vmax.f32 %v314_v21, 0.0  ;;  %v503_v31 = vmax.f32 %v247_v26, 0.0  ;;  %v505_v32 = vmax.f32 %v249_v27, 0.0  ;;  %v313_v33 = vld [vmem:[%s9535_s0 + $0x2d0] sm:$0xff]  ;;  %v244_v34 = vld [vmem:[%s9535_s0 + $0xa8] sm:$0xff] }
  0x38   : > { %v781_v29 = vpack.c.bf16 %v573_v17, %v571_v16  ;;  %v246_v35 = vld [vmem:[%s9535_s0 + $0xb8] sm:$0xff]  ;;  %1984 = vmatprep.subr.bf16.mxu1 %v782_v22  ;;  %v748_v36 = vpack.c.bf16 %v506_v24, %v504_v19  ;;  %v567_v37 = vmax.f32 %v311_v28, 0.0  ;;  %v569_v38 = vmax.f32 %v313_v33, 0.0  ;;  %v308_v40 = vld [vmem:[%s9535_s0 + $0x2a8] sm:$0xff]  ;;  %v243_v42 = vld [vmem:[%s9535_s0 + $0xa0] sm:$0xff]  ;;  %s10171_s29 = smov (!%p217_p8, %s5498_s29), 127 }
  0x39   : > { %1632 = vmatpush1.bf16.msra.mxu0 %v749_v23  ;;  %v500_v39 = vmax.f32 %v244_v34, 0.0  ;;  %v310_v41 = vld [vmem:[%s9535_s0 + $0x2b8] sm:$0xff]  ;;  %v780_v43 = vpack.c.bf16 %v570_v30, %v568_v25  ;;  %v747_v44 = vpack.c.bf16 %v505_v32, %v503_v31  ;;  %v502_v45 = vmax.f32 %v246_v35, 0.0  ;;  %v245_v47 = vld [vmem:[%s9535_s0 + $0xb0] sm:$0xff]  ;;  %v307_v48 = vld [vmem:[%s9535_s0 + $0x2a0] sm:$0xff]  ;;  %s5506_s5 = sshll.u32 %s10171_s29, 4 }
  0x3a   : > { %1985 = vmatpush1.bf16.msra.mxu1 %v781_v29  ;;  %v564_v46 = vmax.f32 %v308_v40, 0.0  ;;  %v309_v49 = vld [vmem:[%s9535_s0 + $0x2b0] sm:$0xff]  ;;  %1633 = vmatprep.subr.bf16.mxu0 %v748_v36  ;;  %v779_v50 = vpack.c.bf16 %v569_v38, %v567_v37  ;;  %v566_v51 = vmax.f32 %v310_v41, 0.0  ;;  %v499_v52 = vmax.f32 %v243_v42, 0.0  ;;  %v240_v54 = vld [vmem:[%s9535_s0 + $0x88] sm:$0xff]  ;;  %v242_v55 = vld [vmem:[%s9535_s0 + $0x98] sm:$0xff]  ;;  %s8304_s11 = scalar_lea.vmem %s9539_s4, %s5506_s5 }
  0x3b   : > { %v501_v53 = vmax.f32 %v245_v47, 0.0  ;;  %v304_v56 = vld [vmem:[%s9535_s0 + $0x288] sm:$0xff]  ;;  %1986 = vmatprep.subr.bf16.mxu1 %v780_v43  ;;  %v746_v57 = vpack.c.bf16 %v502_v45, %v500_v39  ;;  %v563_v58 = vmax.f32 %v307_v48, 0.0  ;;  %v565_v59 = vmax.f32 %v309_v49, 0.0  ;;  %v306_v61 = vld [vmem:[%s9535_s0 + $0x298] sm:$0xff]  ;;  %v239_v62 = vld [vmem:[%s9535_s0 + $0x80] sm:$0xff] }
  0x3c   : > { %v496_v60 = vmax.f32 %v240_v54, 0.0  ;;  %v241_v63 = vld [vmem:[%s9535_s0 + $0x90] sm:$0xff]  ;;  %v778_v0 = vpack.c.bf16 %v566_v51, %v564_v46  ;;  %v498_v2 = vmax.f32 %v242_v55, 0.0  ;;  %v560_v3 = vmax.f32 %v304_v56, 0.0  ;;  %v303_v4 = vld [vmem:[%s9535_s0 + $0x280] sm:$0xff]  ;;  %v236_v6 = vld [vmem:[%s9535_s0 + $0x68] sm:$0xff] }
  0x3d   : > { %1634 = vmatpush1.bf16.msra.mxu0 %v747_v44  ;;  %v745_v1 = vpack.c.bf16 %v501_v53, %v499_v52  ;;  %v305_v5 = vld [vmem:[%s9535_s0 + $0x290] sm:$0xff]  ;;  %v777_v7 = vpack.c.bf16 %v565_v59, %v563_v58  ;;  %v562_v8 = vmax.f32 %v306_v61, 0.0  ;;  %v495_v9 = vmax.f32 %v239_v62, 0.0  ;;  %v238_v11 = vld [vmem:[%s9535_s0 + $0x78] sm:$0xff]  ;;  %v300_v12 = vld [vmem:[%s9535_s0 + $0x268] sm:$0xff] }
  0x3e   : > { %1987 = vmatpush1.bf16.msra.mxu1 %v779_v50  ;;  %1635 = vmatprep.subr.bf16.mxu0 %v746_v57  ;;  %v497_v10 = vmax.f32 %v241_v63, 0.0  ;;  %v302_v13 = vld [vmem:[%s9535_s0 + $0x278] sm:$0xff]  ;;  %v744_v14 = vpack.c.bf16 %v498_v2, %v496_v60  ;;  %v559_v15 = vmax.f32 %v303_v4, 0.0  ;;  %v561_v16 = vmax.f32 %v305_v5, 0.0  ;;  %v235_v18 = vld [vmem:[%s9535_s0 + $0x60] sm:$0xff]  ;;  %v237_v19 = vld [vmem:[%s9535_s0 + $0x70] sm:$0xff] }
  0x3f   : > { %1988 = vmatprep.subr.bf16.mxu1 %v778_v0  ;;  %v492_v17 = vmax.f32 %v236_v6, 0.0  ;;  %v299_v20 = vld [vmem:[%s9535_s0 + $0x260] sm:$0xff]  ;;  %v776_v21 = vpack.c.bf16 %v562_v8, %v560_v3  ;;  %v494_v23 = vmax.f32 %v238_v11, 0.0  ;;  %v556_v24 = vmax.f32 %v300_v12, 0.0  ;;  %v301_v25 = vld [vmem:[%s9535_s0 + $0x270] sm:$0xff]  ;;  %v232_v26 = vld [vmem:[%s9535_s0 + $0x48] sm:$0xff] }
  0x40   : > { %v743_v22 = vpack.c.bf16 %v497_v10, %v495_v9  ;;  %v234_v27 = vld [vmem:[%s9535_s0 + $0x58] sm:$0xff]  ;;  %v775_v28 = vpack.c.bf16 %v561_v16, %v559_v15  ;;  %v558_v29 = vmax.f32 %v302_v13, 0.0  ;;  %v491_v30 = vmax.f32 %v235_v18, 0.0  ;;  %v296_v32 = vld [vmem:[%s9535_s0 + $0x248] sm:$0xff]  ;;  %v231_v34 = vld [vmem:[%s9535_s0 + $0x40] sm:$0xff] }
  0x41   : > { %1636 = vmatpush1.bf16.msra.mxu0 %v745_v1  ;;  %v493_v31 = vmax.f32 %v237_v19, 0.0  ;;  %v298_v33 = vld [vmem:[%s9535_s0 + $0x258] sm:$0xff]  ;;  %v742_v35 = vpack.c.bf16 %v494_v23, %v492_v17  ;;  %v555_v36 = vmax.f32 %v299_v20, 0.0  ;;  %v557_v37 = vmax.f32 %v301_v25, 0.0  ;;  %v233_v39 = vld [vmem:[%s9535_s0 + $0x50] sm:$0xff]  ;;  %v295_v40 = vld [vmem:[%s9535_s0 + $0x240] sm:$0xff] }
  0x42   : > { %1989 = vmatpush1.bf16.msra.mxu1 %v777_v7  ;;  %1637 = vmatprep.subr.bf16.mxu0 %v744_v14  ;;  %v488_v38 = vmax.f32 %v232_v26, 0.0  ;;  %v774_v41 = vpack.c.bf16 %v558_v29, %v556_v24  ;;  %v490_v42 = vmax.f32 %v234_v27, 0.0  ;;  %v552_v43 = vmax.f32 %v296_v32, 0.0  ;;  %v297_v44 = vld [vmem:[%s9535_s0 + $0x250] sm:$0xff]  ;;  %v228_v45 = vld [vmem:[%s9535_s0 + $0x28] sm:$0xff]  ;;  %v230_v46 = vld [vmem:[%s9535_s0 + $0x38] sm:$0xff] }
  0x43   : > { %1990 = vmatprep.subr.bf16.mxu1 %v776_v21  ;;  %v554_v47 = vmax.f32 %v298_v33, 0.0  ;;  %v487_v48 = vmax.f32 %v231_v34, 0.0  ;;  %v489_v49 = vmax.f32 %v233_v39, 0.0  ;;  %v292_v50 = vld [vmem:[%s9535_s0 + $0x228] sm:$0xff]  ;;  %v294_v51 = vld [vmem:[%s9535_s0 + $0x238] sm:$0xff]  ;;  %v741_v52 = vpack.c.bf16 %v493_v31, %v491_v30  ;;  %v227_v55 = vld [vmem:[%s9535_s0 + $0x20] sm:$0xff] }
  0x44   : > { %v773_v53 = vpack.c.bf16 %v557_v37, %v555_v36  ;;  %v551_v54 = vmax.f32 %v295_v40, 0.0  ;;  %v229_v56 = vld [vmem:[%s9535_s0 + $0x30] sm:$0xff]  ;;  %v291_v57 = vld [vmem:[%s9535_s0 + $0x220] sm:$0xff]  ;;  %v740_v58 = vpack.c.bf16 %v490_v42, %v488_v38  ;;  %v553_v59 = vmax.f32 %v297_v44, 0.0  ;;  %v224_v63 = vld [vmem:[%s9535_s0 + $0x8] sm:$0xff] }
  0x45   : > { %1638 = vmatpush1.bf16.msra.mxu0 %v743_v22  ;;  %v484_v60 = vmax.f32 %v228_v45, 0.0  ;;  %v486_v61 = vmax.f32 %v230_v46, 0.0  ;;  %v293_v62 = vld [vmem:[%s9535_s0 + $0x230] sm:$0xff]  ;;  %v226_v0 = vld [vmem:[%s9535_s0 + $0x18] sm:$0xff]  ;;  %v772_v1 = vpack.c.bf16 %v554_v47, %v552_v43  ;;  %v548_v2 = vmax.f32 %v292_v50, 0.0  ;;  %v288_v7 = vld [vmem:[%s9535_s0 + $0x208] sm:$0xff] }
  0x46   : > { %1991 = vmatpush1.bf16.msra.mxu1 %v775_v28  ;;  %1639 = vmatprep.subr.bf16.mxu0 %v742_v35  ;;  %v550_v3 = vmax.f32 %v294_v51, 0.0  ;;  %v739_v4 = vpack.c.bf16 %v489_v49, %v487_v48  ;;  %v483_v5 = vmax.f32 %v227_v55, 0.0  ;;  %v485_v6 = vmax.f32 %v229_v56, 0.0  ;;  %v290_v8 = vld [vmem:[%s9535_s0 + $0x218] sm:$0xff]  ;;  %v223_v13 = vld [vmem:[%s9535_s0] sm:$0xff]  ;;  %v225_v14 = vld [vmem:[%s9535_s0 + $0x10] sm:$0xff] }
  0x47   : > { %1992 = vmatprep.subr.bf16.mxu1 %v774_v41  ;;  %v547_v9 = vmax.f32 %v291_v57, 0.0  ;;  %v549_v10 = vmax.f32 %v293_v62, 0.0  ;;  %v480_v11 = vmax.f32 %v224_v63, 0.0  ;;  %v482_v12 = vmax.f32 %v226_v0, 0.0  ;;  %v287_v17 = vld [vmem:[%s9535_s0 + $0x200] sm:$0xff]  ;;  %v289_v21 = vld [vmem:[%s9535_s0 + $0x210] sm:$0xff] }
  0x48   : > { %v771_v15 = vpack.c.bf16 %v553_v59, %v551_v54  ;;  %v738_v16 = vpack.c.bf16 %v486_v61, %v484_v60  ;;  %v770_v18 = vpack.c.bf16 %v550_v3, %v548_v2  ;;  %v544_v19 = vmax.f32 %v288_v7, 0.0  ;;  %v284_v22 = vld [vmem:[%s9535_s0 + $0x1e8] sm:$0xff]  ;;  %v286_v23 = vld [vmem:[%s9535_s0 + $0x1f8] sm:$0xff]  ;;  %v283_v28 = vld [vmem:[%s9535_s0 + $0x1e0] sm:$0xff] }
  0x49   : > { %1640 = vmatpush1.bf16.msra.mxu0 %v741_v52  ;;  %v546_v20 = vmax.f32 %v290_v8, 0.0  ;;  %v479_v24 = vmax.f32 %v223_v13, 0.0  ;;  %v481_v25 = vmax.f32 %v225_v14, 0.0  ;;  %v348_v26 = vld [vmem:[%s9535_s0 + $0x3e8] sm:$0xff]  ;;  %v350_v27 = vld [vmem:[%s9535_s0 + $0x3f8] sm:$0xff]  ;;  %v737_v29 = vpack.c.bf16 %v485_v6, %v483_v5  ;;  %v285_v32 = vld [vmem:[%s9535_s0 + $0x1f0] sm:$0xff] }
  0x4a   : > { %1993 = vmatpush1.bf16.msra.mxu1 %v773_v53  ;;  %1641 = vmatprep.subr.bf16.mxu0 %v740_v58  ;;  %v769_v30 = vpack.c.bf16 %v549_v10, %v547_v9  ;;  %v736_v31 = vpack.c.bf16 %v482_v12, %v480_v11  ;;  %v347_v33 = vld [vmem:[%s9535_s0 + $0x3e0] sm:$0xff]  ;;  %v349_v34 = vld [vmem:[%s9535_s0 + $0x3f0] sm:$0xff]  ;;  %v543_v35 = vmax.f32 %v287_v17, 0.0  ;;  %v545_v36 = vmax.f32 %v289_v21, 0.0  ;;  %v280_v39 = vld [vmem:[%s9535_s0 + $0x1c8] sm:$0xff] }
  0x4b   : > { %1994 = vmatprep.subr.bf16.mxu1 %v772_v1  ;;  %v540_v37 = vmax.f32 %v284_v22, 0.0  ;;  %v542_v38 = vmax.f32 %v286_v23, 0.0  ;;  %v282_v40 = vld [vmem:[%s9535_s0 + $0x1d8] sm:$0xff]  ;;  %v768_v41 = vpack.c.bf16 %v546_v20, %v544_v19  ;;  %v604_v42 = vmax.f32 %v348_v26, 0.0  ;;  %v344_v47 = vld [vmem:[%s9535_s0 + $0x3c8] sm:$0xff]  ;;  %v279_v53 = vld [vmem:[%s9535_s0 + $0x1c0] sm:$0xff] }
  0x4c   : > { %v606_v43 = vmax.f32 %v350_v27, 0.0  ;;  %v735_v44 = vpack.c.bf16 %v481_v25, %v479_v24  ;;  %v539_v45 = vmax.f32 %v283_v28, 0.0  ;;  %v541_v46 = vmax.f32 %v285_v32, 0.0  ;;  %v346_v48 = vld [vmem:[%s9535_s0 + $0x3d8] sm:$0xff]  ;;  %v281_v54 = vld [vmem:[%s9535_s0 + $0x1d0] sm:$0xff]  ;;  %v343_v57 = vld [vmem:[%s9535_s0 + $0x3c0] sm:$0xff] }
  0x4d   : > { %1642 = vmatpush1.bf16.msra.mxu0 %v739_v4  ;;  %v603_v49 = vmax.f32 %v347_v33, 0.0  ;;  %v605_v50 = vmax.f32 %v349_v34, 0.0  ;;  %v536_v51 = vmax.f32 %v280_v39, 0.0  ;;  %v538_v52 = vmax.f32 %v282_v40, 0.0  ;;  %v345_v61 = vld [vmem:[%s9535_s0 + $0x3d0] sm:$0xff]  ;;  %v276_v62 = vld [vmem:[%s9535_s0 + $0x1a8] sm:$0xff] }
  0x4e   : > { %1995 = vmatpush1.bf16.msra.mxu1 %v771_v15  ;;  %1643 = vmatprep.subr.bf16.mxu0 %v738_v16  ;;  %v767_v55 = vpack.c.bf16 %v545_v36, %v543_v35  ;;  %v766_v56 = vpack.c.bf16 %v542_v38, %v540_v37  ;;  %v798_v58 = vpack.c.bf16 %v606_v43, %v604_v42  ;;  %v600_v59 = vmax.f32 %v344_v47, 0.0  ;;  %v278_v63 = vld [vmem:[%s9535_s0 + $0x1b8] sm:$0xff]  ;;  %v340_v2 = vld [vmem:[%s9535_s0 + $0x3a8] sm:$0xff]  ;;  %v275_v4 = vld [vmem:[%s9535_s0 + $0x1a0] sm:$0xff] }
  0x4f   : > { %1996 = vmatprep.subr.bf16.mxu1 %v770_v18  ;;  %v602_v60 = vmax.f32 %v346_v48, 0.0  ;;  %v535_v0 = vmax.f32 %v279_v53, 0.0  ;;  %v537_v1 = vmax.f32 %v281_v54, 0.0  ;;  %v342_v3 = vld [vmem:[%s9535_s0 + $0x3b8] sm:$0xff]  ;;  %v765_v5 = vpack.c.bf16 %v541_v46, %v539_v45  ;;  %v277_v8 = vld [vmem:[%s9535_s0 + $0x1b0] sm:$0xff]  ;;  %v339_v9 = vld [vmem:[%s9535_s0 + $0x3a0] sm:$0xff] }
  0x50   : > { %v797_v6 = vpack.c.bf16 %v605_v50, %v603_v49  ;;  %v764_v7 = vpack.c.bf16 %v538_v52, %v536_v51  ;;  %v341_v10 = vld [vmem:[%s9535_s0 + $0x3b0] sm:$0xff]  ;;  %v599_v11 = vmax.f32 %v343_v57, 0.0  ;;  %v601_v12 = vmax.f32 %v345_v61, 0.0  ;;  %v272_v15 = vld [vmem:[%s9535_s0 + $0x188] sm:$0xff]  ;;  %v274_v16 = vld [vmem:[%s9535_s0 + $0x198] sm:$0xff] }
  0x51   : > { %1644 = vmatpush1.bf16.msra.mxu0 %v737_v29  ;;  %v532_v13 = vmax.f32 %v276_v62, 0.0  ;;  %v534_v14 = vmax.f32 %v278_v63, 0.0  ;;  %v796_v17 = vpack.c.bf16 %v602_v60, %v600_v59  ;;  %v596_v18 = vmax.f32 %v340_v2, 0.0  ;;  %v336_v23 = vld [vmem:[%s9535_s0 + $0x388] sm:$0xff]  ;;  %v338_v24 = vld [vmem:[%s9535_s0 + $0x398] sm:$0xff]  ;;  %v271_v29 = vld [vmem:[%s9535_s0 + $0x180] sm:$0xff] }
  0x52   : > { %1997 = vmatpush1.bf16.msra.mxu1 %v769_v30  ;;  %1645 = vmatprep.subr.bf16.mxu0 %v736_v31  ;;  %v598_v19 = vmax.f32 %v342_v3, 0.0  ;;  %v763_v20 = vpack.c.bf16 %v537_v1, %v535_v0  ;;  %v531_v21 = vmax.f32 %v275_v4, 0.0  ;;  %v533_v22 = vmax.f32 %v277_v8, 0.0  ;;  %v273_v30 = vld [vmem:[%s9535_s0 + $0x190] sm:$0xff]  ;;  %v335_v33 = vld [vmem:[%s9535_s0 + $0x380] sm:$0xff]  ;;  %v268_v38 = vld [vmem:[%s9535_s0 + $0x168] sm:$0xff] }
  0x53   : > { %1998 = vmatprep.subr.bf16.mxu1 %v768_v41  ;;  %v595_v25 = vmax.f32 %v339_v9, 0.0  ;;  %v597_v26 = vmax.f32 %v341_v10, 0.0  ;;  %v528_v27 = vmax.f32 %v272_v15, 0.0  ;;  %v530_v28 = vmax.f32 %v274_v16, 0.0  ;;  %v337_v37 = vld [vmem:[%s9535_s0 + $0x390] sm:$0xff]  ;;  %v270_v39 = vld [vmem:[%s9535_s0 + $0x178] sm:$0xff] }
  0x54   : > { %v795_v31 = vpack.c.bf16 %v601_v12, %v599_v11  ;;  %v762_v32 = vpack.c.bf16 %v534_v14, %v532_v13  ;;  %v794_v34 = vpack.c.bf16 %v598_v19, %v596_v18  ;;  %v592_v35 = vmax.f32 %v336_v23, 0.0  ;;  %v332_v42 = vld [vmem:[%s9535_s0 + $0x368] sm:$0xff]  ;;  %v334_v43 = vld [vmem:[%s9535_s0 + $0x378] sm:$0xff]  ;;  %v269_v48 = vld [vmem:[%s9535_s0 + $0x170] sm:$0xff] }
  0x55   : > { %1646 = vmatpush1.bf16.msra.mxu0 %v735_v44  ;;  %v594_v36 = vmax.f32 %v338_v24, 0.0  ;;  %v527_v40 = vmax.f32 %v271_v29, 0.0  ;;  %v529_v41 = vmax.f32 %v273_v30, 0.0  ;;  %v267_v44 = vld [vmem:[%s9535_s0 + $0x160] sm:$0xff]  ;;  %v761_v45 = vpack.c.bf16 %v533_v22, %v531_v21  ;;  %v333_v50 = vld [vmem:[%s9535_s0 + $0x370] sm:$0xff]  ;;  %v328_v60 = vld [vmem:[%s9535_s0 + $0x348] sm:$0xff] }
  0x56   : > { %1999 = vmatpush1.bf16.msra.mxu1 %v767_v55  ;;  %1647 = vmatprep.subr.bf16.mxu0 %v766_v56  ;;  %v793_v46 = vpack.c.bf16 %v597_v26, %v595_v25  ;;  %v760_v47 = vpack.c.bf16 %v530_v28, %v528_v27  ;;  %v331_v49 = vld [vmem:[%s9535_s0 + $0x360] sm:$0xff]  ;;  %v591_v51 = vmax.f32 %v335_v33, 0.0  ;;  %v593_v52 = vmax.f32 %v337_v37, 0.0  ;;  %v264_v55 = vld [vmem:[%s9535_s0 + $0x148] sm:$0xff]  ;;  %v266_v56 = vld [vmem:[%s9535_s0 + $0x158] sm:$0xff] }
  0x57   : > { %2000 = vmatprep.subr.bf16.mxu1 %v798_v58  ;;  %v524_v53 = vmax.f32 %v268_v38, 0.0  ;;  %v526_v54 = vmax.f32 %v270_v39, 0.0  ;;  %v792_v57 = vpack.c.bf16 %v594_v36, %v592_v35  ;;  %v588_v58 = vmax.f32 %v332_v42, 0.0  ;;  %v330_v61 = vld [vmem:[%s9535_s0 + $0x358] sm:$0xff]  ;;  %v263_v62 = vld [vmem:[%s9535_s0 + $0x140] sm:$0xff]  ;;  %v265_v2 = vld [vmem:[%s9535_s0 + $0x150] sm:$0xff] }
  0x58   : > { %v590_v59 = vmax.f32 %v334_v43, 0.0  ;;  %v759_v63 = vpack.c.bf16 %v529_v41, %v527_v40  ;;  %v523_v0 = vmax.f32 %v267_v44, 0.0  ;;  %v525_v1 = vmax.f32 %v269_v48, 0.0  ;;  %v864_v3 = vld [vmem:[%s5851_s9 + $0x8] sm:$0xff]  ;;  %v866_v9 = vld [vmem:[%s5851_s9 + $0x18] sm:$0xff]  ;;  %v327_v13 = vld [vmem:[%s9535_s0 + $0x340] sm:$0xff] }
  0x59   : > { %1648 = vmatpush2.bf16.msra.mxu0 %v765_v5  ;;  %v872_v4 = vld [vmem:[%s5851_s9 + $0x48] sm:$0xff]  ;;  %v587_v5 = vmax.f32 %v331_v49, 0.0  ;;  %v522_v8 = vmax.f32 %v266_v56, 0.0  ;;  %v874_v10 = vld [vmem:[%s5851_s9 + $0x58] sm:$0xff]  ;;  %v791_v11 = vpack.c.bf16 %v593_v52, %v591_v51  ;;  %v758_v12 = vpack.c.bf16 %v526_v54, %v524_v53  ;;  %v259_v25 = vld [vmem:[%s9535_s0 + $0x120] sm:$0xff] }
  0x5a   : > { %2001 = vmatpush2.bf16.msra.mxu1 %v797_v6  ;;  %1649 = vmatprep.subr.bf16.mxu0 %v764_v7  ;;  %v589_v6 = vmax.f32 %v333_v50, 0.0  ;;  %v520_v7 = vmax.f32 %v264_v55, 0.0  ;;  %v790_v14 = vpack.c.bf16 %v590_v59, %v588_v58  ;;  %v584_v15 = vmax.f32 %v328_v60, 0.0  ;;  %v260_v18 = vld [vmem:[%s9535_s0 + $0x128] sm:$0xff]  ;;  %v262_v19 = vld [vmem:[%s9535_s0 + $0x138] sm:$0xff]  ;;  %v261_v30 = vld [vmem:[%s9535_s0 + $0x130] sm:$0xff] }
  0x5b   : > { %2002 = vmatprep.subr.bf16.mxu1 %v796_v17  ;;  %v586_v16 = vmax.f32 %v330_v61, 0.0  ;;  %v329_v17 = vld [vmem:[%s9535_s0 + $0x350] sm:$0xff]  ;;  %v519_v21 = vmax.f32 %v263_v62, 0.0  ;;  %v521_v22 = vmax.f32 %v265_v2, 0.0  ;;  %v324_v23 = vld [vmem:[%s9535_s0 + $0x328] sm:$0xff]  ;;  %v326_v24 = vld [vmem:[%s9535_s0 + $0x338] sm:$0xff]  ;;  %v1378_v26 = vpack.c.bf16 %v874_v10, %v866_v9 }
  0x5c   : > { %v757_v27 = vpack.c.bf16 %v525_v1, %v523_v0  ;;  %v789_v28 = vpack.c.bf16 %v589_v6, %v587_v5  ;;  %v756_v29 = vpack.c.bf16 %v522_v8, %v520_v7  ;;  %v583_v33 = vmax.f32 %v327_v13, 0.0  ;;  %v256_v37 = vld [vmem:[%s9535_s0 + $0x108] sm:$0xff]  ;;  %v258_v38 = vld [vmem:[%s9535_s0 + $0x118] sm:$0xff]  ;;  %v255_v53 = vld [vmem:[%s9535_s0 + $0x100] sm:$0xff] }
  0x5d   : > { %1650 = vmatpush2.bf16.msra.mxu0 %v763_v20  ;;  %v1376_v20 = vpack.c.bf16 %v872_v4, %v864_v3  ;;  %v516_v35 = vmax.f32 %v260_v18, 0.0  ;;  %v518_v36 = vmax.f32 %v262_v19, 0.0  ;;  %v788_v39 = vpack.c.bf16 %v586_v16, %v584_v15  ;;  %2016 = vmatprep.mubr.bf16.mxu1 %v1378_v26  ;;  %v257_v54 = vld [vmem:[%s9535_s0 + $0x110] sm:$0xff]  ;;  %v319_v55 = vld [vmem:[%s9535_s0 + $0x300] sm:$0xff]  ;;  %v380_v60 = vld [vmem:[%s9535_s0 + $0x4e8] sm:$0xff] }
  0x5e   : > { %2003 = vmatpush2.bf16.msra.mxu1 %v795_v31  ;;  %1651 = vmatprep.subr.bf16.mxu0 %v762_v32  ;;  %v323_v31 = vld [vmem:[%s9535_s0 + $0x320] sm:$0xff]  ;;  %v325_v32 = vld [vmem:[%s9535_s0 + $0x330] sm:$0xff]  ;;  %v580_v40 = vmax.f32 %v324_v23, 0.0  ;;  %v582_v41 = vmax.f32 %v326_v24, 0.0  ;;  %v755_v42 = vpack.c.bf16 %v521_v22, %v519_v21  ;;  %v515_v43 = vmax.f32 %v259_v25, 0.0  ;;  %v382_v61 = vld [vmem:[%s9535_s0 + $0x4f8] sm:$0xff] }
  0x5f   : > { %2004 = vmatprep.subr.bf16.mxu1 %v794_v34  ;;  %1663 = vmatprep.mubr.bf16.mxu0 %v1376_v20  ;;  %v585_v34 = vmax.f32 %v329_v17, 0.0  ;;  %v517_v44 = vmax.f32 %v261_v30, 0.0  ;;  %v581_v48 = vmax.f32 %v325_v32, 0.0  ;;  %v512_v49 = vmax.f32 %v256_v37, 0.0  ;;  %v321_v59 = vld [vmem:[%s9535_s0 + $0x310] sm:$0xff]  ;;  %v446_v0 = vld [vmem:[%s9535_s0 + $0x6f8] sm:$0xff] }
  0x60   : > { %v514_v50 = vmax.f32 %v258_v38, 0.0  ;;  %v754_v52 = vpack.c.bf16 %v518_v36, %v516_v35  ;;  %v786_v56 = vpack.c.bf16 %v582_v41, %v580_v40  ;;  %v511_v3 = vmax.f32 %v255_v53, 0.0  ;;  %v379_v5 = vld [vmem:[%s9535_s0 + $0x4e0] sm:$0xff]  ;;  %v381_v6 = vld [vmem:[%s9535_s0 + $0x4f0] sm:$0xff]  ;;  %v376_v22 = vld [vmem:[%s9535_s0 + $0x4c8] sm:$0xff] }
  0x61   : > { %1652 = vmatpush2.bf16.msra.mxu0 %v761_v45  ;;  %v320_v45 = vld [vmem:[%s9535_s0 + $0x308] sm:$0xff]  ;;  %v787_v51 = vpack.c.bf16 %v585_v34, %v583_v33  ;;  %v753_v62 = vpack.c.bf16 %v517_v44, %v515_v43  ;;  %v513_v4 = vmax.f32 %v257_v54, 0.0  ;;  %v575_v7 = vmax.f32 %v319_v55, 0.0  ;;  %v6264_v9 = vld [vmem:[%s5851_s9] sm:$0xff]  ;;  %v445_v18 = vld [vmem:[%s9535_s0 + $0x6f0] sm:$0xff] }
  0x62   : > { %2005 = vmatpush2.bf16.msra.mxu1 %v793_v46  ;;  %1653 = vmatprep.subr.bf16.mxu0 %v760_v47  ;;  %v322_v46 = vld [vmem:[%s9535_s0 + $0x318] sm:$0xff]  ;;  %v579_v47 = vmax.f32 %v323_v31, 0.0  ;;  %v752_v2 = vpack.c.bf16 %v514_v50, %v512_v49  ;;  %v577_v8 = vmax.f32 %v321_v59, 0.0  ;;  %v6267_v10 = vld [vmem:[%s5851_s9 + $0x40] sm:$0xff]  ;;  %v702_v16 = vmax.f32 %v446_v0, 0.0  ;;  %v6279_v19 = vld [vmem:[%s5851_s9 + $0x50] sm:$0xff] }
  0x63   : > { %2006 = vmatprep.subr.bf16.mxu1 %v792_v57  ;;  %v576_v57 = vmax.f32 %v320_v45, 0.0  ;;  %v578_v58 = vmax.f32 %v322_v46, 0.0  ;;  %v443_v17 = vld [vmem:[%s9535_s0 + $0x6e0] sm:$0xff]  ;;  %v635_v20 = vmax.f32 %v379_v5, 0.0  ;;  %v637_v21 = vmax.f32 %v381_v6, 0.0  ;;  %v378_v23 = vld [vmem:[%s9535_s0 + $0x4d8] sm:$0xff] }
  0x64   : > { %v785_v1 = vpack.c.bf16 %v581_v48, %v579_v47  ;;  %v751_v24 = vpack.c.bf16 %v513_v4, %v511_v3  ;;  %v6288_v25 = vld [vmem:[%s5851_s9 + $0x88] sm:$0xff]  ;;  %v783_v30 = vpack.c.bf16 %v577_v8, %v575_v7  ;;  %v699_v32 = vmax.f32 %v443_v17, 0.0  ;;  %v377_v34 = vld [vmem:[%s9535_s0 + $0x4d0] sm:$0xff]  ;;  %v439_v35 = vld [vmem:[%s9535_s0 + $0x6c0] sm:$0xff] }
  0x65   : > { %1654 = vmatpush2.bf16.msra.mxu0 %v759_v63  ;;  %v444_v63 = vld [vmem:[%s9535_s0 + $0x6e8] sm:$0xff]  ;;  %v784_v13 = vpack.c.bf16 %v578_v58, %v576_v57  ;;  %v701_v33 = vmax.f32 %v445_v18, 0.0  ;;  %v441_v36 = vld [vmem:[%s9535_s0 + $0x6d0] sm:$0xff]  ;;  %v1375_v37 = vpack.c.bf16 %v6267_v10, %v6264_v9  ;;  %v632_v40 = vmax.f32 %v376_v22, 0.0  ;;  %v374_v43 = vld [vmem:[%s9535_s0 + $0x4b8] sm:$0xff] }
  0x66   : > { %2007 = vmatpush2.bf16.msra.mxu1 %v791_v11  ;;  %1655 = vmatprep.subr.bf16.mxu0 %v758_v12  ;;  %v636_v11 = vmax.f32 %v380_v60, 0.0  ;;  %v638_v12 = vmax.f32 %v382_v61, 0.0  ;;  %v700_v15 = vmax.f32 %v444_v63, 0.0  ;;  %v6291_v26 = vld [vmem:[%s5851_s9 + $0xc8] sm:$0xff]  ;;  %v634_v41 = vmax.f32 %v378_v23, 0.0  ;;  %v890_v46 = vld [vmem:[%s5851_s9 + $0xd8] sm:$0xff] }
  0x67   : > { %2008 = vmatprep.subr.bf16.mxu1 %v790_v14  ;;  %v6270_v14 = vld [vmem:[%s5851_s9 + $0x10] sm:$0xff]  ;;  %v813_v45 = vpack.c.bf16 %v637_v21, %v635_v20  ;;  %v436_v49 = vld [vmem:[%s9535_s0 + $0x6a8] sm:$0xff]  ;;  %v438_v50 = vld [vmem:[%s9535_s0 + $0x6b8] sm:$0xff]  ;;  %v695_v53 = vmax.f32 %v439_v35, 0.0  ;;  %v697_v54 = vmax.f32 %v441_v36, 0.0  ;;  %v845_v55 = vpack.c.bf16 %v701_v33, %v699_v32 }
  0x68   : > { %v814_v31 = vpack.c.bf16 %v638_v12, %v636_v11  ;;  %v846_v38 = vpack.c.bf16 %v702_v16, %v700_v15  ;;  %v1377_v44 = vpack.c.bf16 %v6279_v19, %v6270_v14  ;;  %v630_v58 = vmax.f32 %v374_v43, 0.0  ;;  %v879_v60 = vld [vmem:[%s5851_s9 + $0x80] sm:$0xff]  ;;  %v373_v0 = vld [vmem:[%s9535_s0 + $0x4b0] sm:$0xff]  ;;  %v896_v6 = vld [vmem:[%s5851_s9 + $0x108] sm:$0xff] }
  0x69   : > { %1656 = vmatpush2.bf16.msra.mxu0 %v757_v27  ;;  %v375_v27 = vld [vmem:[%s9535_s0 + $0x4c0] sm:$0xff]  ;;  %v881_v4 = vld [vmem:[%s5851_s9 + $0x90] sm:$0xff]  ;;  %v904_v9 = vld [vmem:[%s5851_s9 + $0x148] sm:$0xff]  ;;  %v843_v11 = vpack.c.bf16 %v697_v54, %v695_v53  ;;  %v629_v17 = vmax.f32 %v373_v0, 0.0 }
  0x6a   : > { %2009 = vmatpush2.bf16.msra.mxu1 %v789_v28  ;;  %1657 = vmatprep.subr.bf16.mxu0 %v756_v29  ;;  %v440_v28 = vld [vmem:[%s9535_s0 + $0x6c8] sm:$0xff]  ;;  %v442_v29 = vld [vmem:[%s9535_s0 + $0x6d8] sm:$0xff]  ;;  %v887_v61 = vld [vmem:[%s5851_s9 + $0xc0] sm:$0xff] }
  0x6b   : > { %2010 = vmatprep.subr.bf16.mxu1 %v788_v39  ;;  %v882_v39 = vld [vmem:[%s5851_s9 + $0x98] sm:$0xff]  ;;  %v696_v47 = vmax.f32 %v440_v28, 0.0  ;;  %v698_v48 = vmax.f32 %v442_v29, 0.0  ;;  %v371_v63 = vld [vmem:[%s9535_s0 + $0x4a0] sm:$0xff]  ;;  %v889_v5 = vld [vmem:[%s5851_s9 + $0xd0] sm:$0xff]  ;;  %v1383_v28 = vpack.c.bf16 %v887_v61, %v879_v60 }
  0x6c   : > { %v1386_v59 = vpack.c.bf16 %v890_v46, %v882_v39  ;;  %v435_v3 = vld [vmem:[%s9535_s0 + $0x6a0] sm:$0xff]  ;;  %v437_v8 = vld [vmem:[%s9535_s0 + $0x6b0] sm:$0xff]  ;;  %v368_v12 = vld [vmem:[%s9535_s0 + $0x488] sm:$0xff]  ;;  %v627_v16 = vmax.f32 %v371_v63, 0.0  ;;  %v1385_v33 = vpack.c.bf16 %v889_v5, %v881_v4 }
  0x6d   : > { %1658 = vmatpush2.bf16.msra.mxu0 %v755_v42  ;;  %v372_v42 = vld [vmem:[%s9535_s0 + $0x4a8] sm:$0xff]  ;;  %v844_v7 = vpack.c.bf16 %v698_v48, %v696_v47  ;;  %v898_v14 = vld [vmem:[%s5851_s9 + $0x118] sm:$0xff]  ;;  %v691_v18 = vmax.f32 %v435_v3, 0.0  ;;  %v693_v23 = vmax.f32 %v437_v8, 0.0  ;;  %v433_v32 = vld [vmem:[%s9535_s0 + $0x690] sm:$0xff] }
  0x6e   : > { %2011 = vmatpush2.bf16.msra.mxu1 %v787_v51  ;;  %1659 = vmatprep.subr.bf16.mxu0 %v754_v52  ;;  %v631_v51 = vmax.f32 %v375_v27, 0.0  ;;  %v633_v52 = vmax.f32 %v377_v34, 0.0  ;;  %v628_v57 = vmax.f32 %v372_v42, 0.0  ;;  %v432_v19 = vld [vmem:[%s9535_s0 + $0x688] sm:$0xff]  ;;  %v434_v20 = vld [vmem:[%s9535_s0 + $0x698] sm:$0xff]  ;;  %v369_v27 = vld [vmem:[%s9535_s0 + $0x490] sm:$0xff]  ;;  %v1392_v34 = vpack.c.bf16 %v904_v9, %v896_v6 }
  0x6f   : > { %2012 = vmatprep.subr.bf16.mxu1 %v786_v56  ;;  %v1384_v56 = vpack.c.bf16 %v6291_v26, %v6288_v25  ;;  %v906_v21 = vld [vmem:[%s5851_s9 + $0x158] sm:$0xff]  ;;  %v367_v26 = vld [vmem:[%s9535_s0 + $0x480] sm:$0xff]  ;;  %v688_v29 = vmax.f32 %v432_v19, 0.0  ;;  %v809_v36 = vpack.c.bf16 %v629_v17, %v627_v16  ;;  %v905_v46 = vld [vmem:[%s5851_s9 + $0x150] sm:$0xff] }
  0x70   : > { %v811_v10 = vpack.c.bf16 %v633_v52, %v631_v51  ;;  %v810_v15 = vpack.c.bf16 %v630_v58, %v628_v57  ;;  %v1394_v35 = vpack.c.bf16 %v906_v21, %v898_v14  ;;  %v895_v39 = vld [vmem:[%s5851_s9 + $0x100] sm:$0xff]  ;;  %v912_v47 = vld [vmem:[%s5851_s9 + $0x188] sm:$0xff]  ;;  %v366_v52 = vld [vmem:[%s9535_s0 + $0x478] sm:$0xff] }
  0x71   : > { %1660 = vmatpush2.bf16.msra.mxu0 %v753_v62  ;;  %v812_v62 = vpack.c.bf16 %v634_v41, %v632_v40  ;;  %v903_v40 = vld [vmem:[%s5851_s9 + $0x140] sm:$0xff]  ;;  %v841_v41 = vpack.c.bf16 %v693_v23, %v691_v18  ;;  %v920_v48 = vld [vmem:[%s5851_s9 + $0x1c8] sm:$0xff]  ;;  %v365_v57 = vld [vmem:[%s9535_s0 + $0x470] sm:$0xff] }
  0x72   : > { %2013 = vmatpush2.bf16.msra.mxu1 %v785_v1  ;;  %1661 = vmatprep.subr.bf16.mxu0 %v752_v2  ;;  %v692_v1 = vmax.f32 %v436_v49, 0.0  ;;  %v694_v2 = vmax.f32 %v438_v50, 0.0  ;;  %v914_v50 = vld [vmem:[%s5851_s9 + $0x198] sm:$0xff]  ;;  %v364_v51 = vld [vmem:[%s9535_s0 + $0x468] sm:$0xff]  ;;  %v363_v53 = vld [vmem:[%s9535_s0 + $0x460] sm:$0xff]  ;;  %v621_v63 = vmax.f32 %v365_v57, 0.0  ;;  %v1391_v4 = vpack.c.bf16 %v903_v40, %v895_v39 }
  0x73   : > { %2014 = vmatprep.subr.bf16.mxu1 %v784_v13  ;;  %v370_v13 = vld [vmem:[%s9535_s0 + $0x498] sm:$0xff]  ;;  %v619_v58 = vmax.f32 %v363_v53, 0.0  ;;  %v429_v3 = vld [vmem:[%s9535_s0 + $0x670] sm:$0xff]  ;;  %v1400_v9 = vpack.c.bf16 %v920_v48, %v912_v47  ;;  %v919_v14 = vld [vmem:[%s5851_s9 + $0x1c0] sm:$0xff] }
  0x74   : > { %v842_v22 = vpack.c.bf16 %v694_v2, %v692_v1  ;;  %v626_v25 = vmax.f32 %v370_v13, 0.0  ;;  %v430_v60 = vld [vmem:[%s9535_s0 + $0x678] sm:$0xff]  ;;  %v427_v2 = vld [vmem:[%s9535_s0 + $0x660] sm:$0xff]  ;;  %v913_v16 = vld [vmem:[%s5851_s9 + $0x190] sm:$0xff] }
  0x75   : > { %1662 = vmatpush2.bf16.msra.mxu0 %v751_v24  ;;  %v624_v24 = vmax.f32 %v368_v12, 0.0  ;;  %v922_v61 = vld [vmem:[%s5851_s9 + $0x1d8] sm:$0xff]  ;;  %v686_v1 = vmax.f32 %v430_v60, 0.0  ;;  %v683_v6 = vmax.f32 %v427_v2, 0.0  ;;  %v805_v12 = vpack.c.bf16 %v621_v63, %v619_v58  ;;  %v911_v13 = vld [vmem:[%s5851_s9 + $0x180] sm:$0xff]  ;;  %v921_v17 = vld [vmem:[%s5851_s9 + $0x1d0] sm:$0xff] }
  0x76   : > { %2015 = vmatpush2.bf16.msra.mxu1 %v783_v30  ;;  %2337 = vmatprep.subr.bf16.mxu0 %v814_v31  ;;  %v690_v30 = vmax.f32 %v434_v20, 0.0  ;;  %v431_v31 = vld [vmem:[%s9535_s0 + $0x680] sm:$0xff]  ;;  %v928_v18 = vld [vmem:[%s5851_s9 + $0x208] sm:$0xff]  ;;  %v930_v20 = vld [vmem:[%s5851_s9 + $0x218] sm:$0xff]  ;;  %v1401_v40 = vpack.c.bf16 %v921_v17, %v913_v16 }
  0x77   : > { %2690 = vmatprep.subr.bf16.mxu1 %v846_v38  ;;  %v625_v38 = vmax.f32 %v369_v27, 0.0  ;;  %v808_v42 = vpack.c.bf16 %v626_v25, %v624_v24  ;;  %v687_v43 = vmax.f32 %v431_v31, 0.0  ;;  %v936_v19 = vld [vmem:[%s5851_s9 + $0x248] sm:$0xff]  ;;  %v359_v23 = vld [vmem:[%s9535_s0 + $0x440] sm:$0xff]  ;;  %v929_v48 = vld [vmem:[%s5851_s9 + $0x210] sm:$0xff] }
  0x78   : > { %1664 = vmatmul.mubr.bf16.vlgmr.msra.gmra.mxu0 %v1375_v37  ;;  %v623_v37 = vmax.f32 %v367_v26, 0.0  ;;  %v840_v49 = vpack.c.bf16 %v690_v30, %v688_v29  ;;  %v360_v21 = vld [vmem:[%s9535_s0 + $0x448] sm:$0xff]  ;;  %v361_v26 = vld [vmem:[%s9535_s0 + $0x450] sm:$0xff]  ;;  %v615_v27 = vmax.f32 %v359_v23, 0.0  ;;  %v426_v29 = vld [vmem:[%s9535_s0 + $0x658] sm:$0xff] }
  0x79   : > { %2017 = vmatmul.mubr.bf16.vlgmr.msra.gmra.mxu1 %v1377_v44  ;;  %2338 = vmatpush1.bf16.msra.mxu0 %v813_v45  ;;  %v689_v44 = vmax.f32 %v433_v32, 0.0  ;;  %v897_v45 = vld [vmem:[%s5851_s9 + $0x110] sm:$0xff]  ;;  %v616_v24 = vmax.f32 %v360_v21, 0.0  ;;  %v938_v30 = vld [vmem:[%s5851_s9 + $0x258] sm:$0xff]  ;;  %v617_v31 = vmax.f32 %v361_v26, 0.0  ;;  %v935_v47 = vld [vmem:[%s5851_s9 + $0x240] sm:$0xff] }
  0x7a   : > { %2691 = vmatpush1.bf16.msra.mxu1 %v845_v55  ;;  %1673 = vmatprep.mubr.bf16.mxu0 %v1384_v56  ;;  %v807_v54 = vpack.c.bf16 %v625_v38, %v623_v37  ;;  %v620_v55 = vmax.f32 %v364_v51, 0.0  ;;  %v622_v56 = vmax.f32 %v366_v52, 0.0  ;;  %v1393_v8 = vpack.c.bf16 %v905_v46, %v897_v45  ;;  %v927_v46 = vld [vmem:[%s5851_s9 + $0x200] sm:$0xff]  ;;  %v952_v51 = vld [vmem:[%s5851_s9 + $0x2c8] sm:$0xff]  ;;  %v946_v52 = vld [vmem:[%s5851_s9 + $0x298] sm:$0xff] }
  0x7b   : > { %2026 = vmatprep.mubr.bf16.mxu1 %v1386_v59  ;;  %2339 = vmatprep.subr.bf16.mxu0 %v812_v62  ;;  %v428_v59 = vld [vmem:[%s9535_s0 + $0x668] sm:$0xff]  ;;  %v839_v62 = vpack.c.bf16 %v689_v44, %v687_v43  ;;  %v1410_v44 = vpack.c.bf16 %v938_v30, %v930_v20  ;;  %v357_v58 = vld [vmem:[%s9535_s0 + $0x430] sm:$0xff]  ;;  %v419_v2 = vld [vmem:[%s9535_s0 + $0x620] sm:$0xff] }
  0x7c   : > { %2692 = vmatprep.subr.bf16.mxu1 %v844_v7  ;;  %v684_v0 = vmax.f32 %v428_v59, 0.0  ;;  %v806_v5 = vpack.c.bf16 %v622_v56, %v620_v55  ;;  %v685_v7 = vmax.f32 %v429_v3, 0.0  ;;  %v356_v53 = vld [vmem:[%s9535_s0 + $0x428] sm:$0xff]  ;;  %v355_v55 = vld [vmem:[%s9535_s0 + $0x420] sm:$0xff]  ;;  %v613_v63 = vmax.f32 %v357_v58, 0.0  ;;  %v421_v3 = vld [vmem:[%s9535_s0 + $0x630] sm:$0xff] }
  0x7d   : > { %2340 = vmatpush1.bf16.msra.mxu0 %v811_v10  ;;  %v612_v56 = vmax.f32 %v356_v53, 0.0  ;;  %v611_v59 = vmax.f32 %v355_v55, 0.0  ;;  %v420_v60 = vld [vmem:[%s9535_s0 + $0x628] sm:$0xff]  ;;  %v945_v16 = vld [vmem:[%s5851_s9 + $0x290] sm:$0xff]  ;;  %v962_v20 = vld [vmem:[%s5851_s9 + $0x318] sm:$0xff] }
  0x7e   : > { %2693 = vmatpush1.bf16.msra.mxu1 %v843_v11  ;;  %2341 = vmatprep.subr.bf16.mxu0 %v810_v15  ;;  %v838_v10 = vpack.c.bf16 %v686_v1, %v684_v0  ;;  %v1402_v11 = vpack.c.bf16 %v922_v61, %v914_v50  ;;  %v837_v15 = vpack.c.bf16 %v685_v7, %v683_v6  ;;  %v944_v50 = vld [vmem:[%s5851_s9 + $0x288] sm:$0xff]  ;;  %v422_v61 = vld [vmem:[%s9535_s0 + $0x638] sm:$0xff]  ;;  %v676_v0 = vmax.f32 %v420_v60, 0.0  ;;  %v953_v17 = vld [vmem:[%s5851_s9 + $0x2d0] sm:$0xff] }
  0x7f   : > { %2694 = vmatprep.subr.bf16.mxu1 %v842_v22  ;;  %v362_v22 = vld [vmem:[%s9535_s0 + $0x458] sm:$0xff]  ;;  %v678_v1 = vmax.f32 %v422_v61, 0.0  ;;  %v675_v6 = vmax.f32 %v419_v2, 0.0  ;;  %v677_v7 = vmax.f32 %v421_v3, 0.0  ;;  %v352_v21 = vld [vmem:[%s9535_s0 + $0x408] sm:$0xff]  ;;  %v351_v23 = vld [vmem:[%s9535_s0 + $0x400] sm:$0xff] }
  0x80   : > { %1674 = vmatmul.mubr.bf16.gmra.mxu0 %v1383_v28  ;;  %v618_v25 = vmax.f32 %v362_v22, 0.0  ;;  %v424_v28 = vld [vmem:[%s9535_s0 + $0x648] sm:$0xff]  ;;  %v354_v22 = vld [vmem:[%s9535_s0 + $0x418] sm:$0xff]  ;;  %v353_v26 = vld [vmem:[%s9535_s0 + $0x410] sm:$0xff] }
  0x81   : > { %2027 = vmatmul.mubr.bf16.gmra.mxu1 %v1385_v33  ;;  %1683 = vmatprep.mubr.bf16.mxu0 %v1392_v34  ;;  %v680_v32 = vmax.f32 %v424_v28, 0.0  ;;  %v682_v33 = vmax.f32 %v426_v29, 0.0  ;;  %v423_v34 = vld [vmem:[%s9535_s0 + $0x640] sm:$0xff]  ;;  %v416_v28 = vld [vmem:[%s9535_s0 + $0x608] sm:$0xff]  ;;  %v418_v29 = vld [vmem:[%s9535_s0 + $0x618] sm:$0xff] }
  0x82   : > { %2036 = vmatprep.mubr.bf16.mxu1 %v1394_v35  ;;  %2342 = vmatpush1.bf16.msra.mxu0 %v809_v36  ;;  %v425_v35 = vld [vmem:[%s9535_s0 + $0x650] sm:$0xff]  ;;  %v1399_v36 = vpack.c.bf16 %v919_v14, %v911_v13  ;;  %v804_v37 = vpack.c.bf16 %v618_v25, %v616_v24  ;;  %v679_v38 = vmax.f32 %v423_v34, 0.0  ;;  %v833_v13 = vpack.c.bf16 %v677_v7, %v675_v6  ;;  %v943_v14 = vld [vmem:[%s5851_s9 + $0x280] sm:$0xff]  ;;  %v970_v30 = vld [vmem:[%s5851_s9 + $0x358] sm:$0xff] }
  0x83   : > { %2695 = vmatpush1.bf16.msra.mxu1 %v841_v41  ;;  %2343 = vmatprep.subr.bf16.mxu0 %v808_v42  ;;  %v681_v39 = vmax.f32 %v425_v35, 0.0  ;;  %v1408_v41 = vpack.c.bf16 %v936_v19, %v928_v18  ;;  %v803_v42 = vpack.c.bf16 %v617_v31, %v615_v27  ;;  %v836_v43 = vpack.c.bf16 %v682_v33, %v680_v32  ;;  %v960_v18 = vld [vmem:[%s5851_s9 + $0x308] sm:$0xff]  ;;  %v415_v34 = vld [vmem:[%s9535_s0 + $0x600] sm:$0xff]  ;;  %v417_v35 = vld [vmem:[%s9535_s0 + $0x610] sm:$0xff] }
  0x84   : > { %2696 = vmatprep.subr.bf16.mxu1 %v840_v49  ;;  %v937_v49 = vld [vmem:[%s5851_s9 + $0x250] sm:$0xff]  ;;  %v968_v19 = vld [vmem:[%s5851_s9 + $0x348] sm:$0xff]  ;;  %v608_v24 = vmax.f32 %v352_v21, 0.0  ;;  %v610_v25 = vmax.f32 %v354_v22, 0.0  ;;  %v607_v27 = vmax.f32 %v351_v23, 0.0  ;;  %v609_v31 = vmax.f32 %v353_v26, 0.0 }
  0x85   : > { %v835_v45 = vpack.c.bf16 %v681_v39, %v679_v38  ;;  %v672_v32 = vmax.f32 %v416_v28, 0.0  ;;  %v674_v33 = vmax.f32 %v418_v29, 0.0  ;;  %v671_v38 = vmax.f32 %v415_v34, 0.0  ;;  %v412_v53 = vld [vmem:[%s9535_s0 + $0x5e8] sm:$0xff]  ;;  %v411_v55 = vld [vmem:[%s9535_s0 + $0x5e0] sm:$0xff]  ;;  %v413_v58 = vld [vmem:[%s9535_s0 + $0x5f0] sm:$0xff] }
  0x86   : > { %2344 = vmatpush1.bf16.msra.mxu0 %v807_v54  ;;  %v358_v54 = vld [vmem:[%s9535_s0 + $0x438] sm:$0xff]  ;;  %v673_v39 = vmax.f32 %v417_v35, 0.0  ;;  %v476_v60 = vld [vmem:[%s9535_s0 + $0x7e8] sm:$0xff]  ;;  %v475_v2 = vld [vmem:[%s9535_s0 + $0x7e0] sm:$0xff] }
  0x87   : > { %2697 = vmatpush1.bf16.msra.mxu1 %v839_v62  ;;  %2345 = vmatprep.subr.bf16.mxu0 %v806_v5  ;;  %v614_v57 = vmax.f32 %v358_v54, 0.0  ;;  %v954_v62 = vld [vmem:[%s5851_s9 + $0x2d8] sm:$0xff]  ;;  %v477_v3 = vld [vmem:[%s9535_s0 + $0x7f0] sm:$0xff]  ;;  %v731_v6 = vmax.f32 %v475_v2, 0.0  ;;  %v408_v21 = vld [vmem:[%s9535_s0 + $0x5c8] sm:$0xff] }
  0x88   : > { %1684 = vmatmul.mubr.bf16.gmra.mxu0 %v1391_v4  ;;  %2698 = vmatprep.subr.bf16.mxu1 %v838_v10  ;;  %v1407_v4 = vpack.c.bf16 %v935_v47, %v927_v46  ;;  %v801_v10 = vpack.c.bf16 %v613_v63, %v611_v59  ;;  %v959_v46 = vld [vmem:[%s5851_s9 + $0x300] sm:$0xff]  ;;  %v414_v54 = vld [vmem:[%s9535_s0 + $0x5f8] sm:$0xff]  ;;  %v667_v59 = vmax.f32 %v411_v55, 0.0  ;;  %v669_v63 = vmax.f32 %v413_v58, 0.0  ;;  %v409_v26 = vld [vmem:[%s9535_s0 + $0x5d0] sm:$0xff] }
  0x89   : > { %2037 = vmatmul.mubr.bf16.gmra.mxu1 %v1393_v8  ;;  %1693 = vmatprep.mubr.bf16.mxu0 %v1400_v9  ;;  %v802_v5 = vpack.c.bf16 %v614_v57, %v612_v56  ;;  %v1409_v8 = vpack.c.bf16 %v937_v49, %v929_v48  ;;  %v1416_v9 = vpack.c.bf16 %v952_v51, %v944_v50  ;;  %v967_v47 = vld [vmem:[%s5851_s9 + $0x340] sm:$0xff]  ;;  %v961_v48 = vld [vmem:[%s5851_s9 + $0x310] sm:$0xff]  ;;  %v976_v50 = vld [vmem:[%s5851_s9 + $0x388] sm:$0xff]  ;;  %v668_v56 = vmax.f32 %v412_v53, 0.0 }
  0x8a   : > { %2046 = vmatprep.mubr.bf16.mxu1 %v1402_v11  ;;  %2346 = vmatpush1.bf16.msra.mxu0 %v805_v12  ;;  %v834_v11 = vpack.c.bf16 %v678_v1, %v676_v0  ;;  %v1418_v12 = vpack.c.bf16 %v954_v62, %v946_v52  ;;  %v969_v49 = vld [vmem:[%s5851_s9 + $0x350] sm:$0xff]  ;;  %v984_v51 = vld [vmem:[%s5851_s9 + $0x3c8] sm:$0xff]  ;;  %v978_v52 = vld [vmem:[%s5851_s9 + $0x398] sm:$0xff]  ;;  %v670_v57 = vmax.f32 %v414_v54, 0.0  ;;  %v732_v0 = vmax.f32 %v476_v60, 0.0 }
  0x8b   : > { %2699 = vmatpush1.bf16.msra.mxu1 %v837_v15  ;;  %2347 = vmatprep.subr.bf16.mxu0 %v804_v37  ;;  %v951_v15 = vld [vmem:[%s5851_s9 + $0x2c0] sm:$0xff]  ;;  %v800_v37 = vpack.c.bf16 %v610_v25, %v608_v24  ;;  %v478_v61 = vld [vmem:[%s9535_s0 + $0x7f8] sm:$0xff]  ;;  %v733_v7 = vmax.f32 %v477_v3, 0.0  ;;  %v664_v24 = vmax.f32 %v408_v21, 0.0  ;;  %v472_v28 = vld [vmem:[%s9535_s0 + $0x7c8] sm:$0xff] }
  0x8c   : > { %2700 = vmatprep.subr.bf16.mxu1 %v836_v43  ;;  %v832_v43 = vpack.c.bf16 %v674_v33, %v672_v32  ;;  %v986_v62 = vld [vmem:[%s5851_s9 + $0x3d8] sm:$0xff]  ;;  %v734_v1 = vmax.f32 %v478_v61, 0.0  ;;  %v407_v23 = vld [vmem:[%s9535_s0 + $0x5c0] sm:$0xff]  ;;  %v728_v32 = vmax.f32 %v472_v28, 0.0  ;;  %v473_v35 = vld [vmem:[%s9535_s0 + $0x7d0] sm:$0xff] }
  0x8d   : > { %v410_v22 = vld [vmem:[%s9535_s0 + $0x5d8] sm:$0xff]  ;;  %v471_v34 = vld [vmem:[%s9535_s0 + $0x7c0] sm:$0xff]  ;;  %v404_v53 = vld [vmem:[%s9535_s0 + $0x5a8] sm:$0xff] }
  0x8e   : > { %2348 = vmatpush1.bf16.msra.mxu0 %v803_v42  ;;  %v799_v42 = vpack.c.bf16 %v609_v31, %v607_v27  ;;  %v666_v25 = vmax.f32 %v410_v22, 0.0  ;;  %v663_v27 = vmax.f32 %v407_v23, 0.0  ;;  %v474_v29 = vld [vmem:[%s9535_s0 + $0x7d8] sm:$0xff]  ;;  %v665_v31 = vmax.f32 %v409_v26, 0.0  ;;  %v403_v55 = vld [vmem:[%s9535_s0 + $0x5a0] sm:$0xff]  ;;  %v405_v58 = vld [vmem:[%s9535_s0 + $0x5b0] sm:$0xff] }
  0x8f   : > { %2701 = vmatpush1.bf16.msra.mxu1 %v835_v45  ;;  %2349 = vmatprep.subr.bf16.mxu0 %v802_v5  ;;  %v831_v45 = vpack.c.bf16 %v673_v39, %v671_v38  ;;  %v830_v5 = vpack.c.bf16 %v670_v57, %v668_v56  ;;  %v730_v33 = vmax.f32 %v474_v29, 0.0  ;;  %v727_v38 = vmax.f32 %v471_v34, 0.0  ;;  %v406_v54 = vld [vmem:[%s9535_s0 + $0x5b8] sm:$0xff]  ;;  %v468_v60 = vld [vmem:[%s9535_s0 + $0x7a8] sm:$0xff]  ;;  %v467_v2 = vld [vmem:[%s9535_s0 + $0x7a0] sm:$0xff] }
  0x90   : > { %1694 = vmatmul.mubr.bf16.gmra.mxu0 %v1399_v36  ;;  %2702 = vmatprep.subr.bf16.mxu1 %v834_v11  ;;  %v1415_v36 = vpack.c.bf16 %v951_v15, %v943_v14  ;;  %v862_v11 = vpack.c.bf16 %v734_v1, %v732_v0  ;;  %v975_v14 = vld [vmem:[%s5851_s9 + $0x380] sm:$0xff]  ;;  %v729_v39 = vmax.f32 %v473_v35, 0.0  ;;  %v660_v56 = vmax.f32 %v404_v53, 0.0  ;;  %v470_v61 = vld [vmem:[%s9535_s0 + $0x7b8] sm:$0xff]  ;;  %v469_v3 = vld [vmem:[%s9535_s0 + $0x7b0] sm:$0xff] }
  0x91   : > { %2047 = vmatmul.mubr.bf16.gmra.mxu1 %v1401_v40  ;;  %1703 = vmatprep.mubr.bf16.mxu0 %v1408_v41  ;;  %v1417_v40 = vpack.c.bf16 %v953_v17, %v945_v16  ;;  %v1424_v41 = vpack.c.bf16 %v968_v19, %v960_v18  ;;  %v983_v15 = vld [vmem:[%s5851_s9 + $0x3c0] sm:$0xff]  ;;  %v977_v16 = vld [vmem:[%s5851_s9 + $0x390] sm:$0xff]  ;;  %v992_v18 = vld [vmem:[%s5851_s9 + $0x408] sm:$0xff]  ;;  %v662_v57 = vmax.f32 %v406_v54, 0.0  ;;  %v724_v0 = vmax.f32 %v468_v60, 0.0 }
  0x92   : > { %2056 = vmatprep.mubr.bf16.mxu1 %v1410_v44  ;;  %2350 = vmatpush1.bf16.msra.mxu0 %v801_v10  ;;  %v1426_v44 = vpack.c.bf16 %v970_v30, %v962_v20  ;;  %v829_v10 = vpack.c.bf16 %v669_v63, %v667_v59  ;;  %v985_v17 = vld [vmem:[%s5851_s9 + $0x3d0] sm:$0xff]  ;;  %v1000_v19 = vld [vmem:[%s5851_s9 + $0x448] sm:$0xff]  ;;  %v994_v20 = vld [vmem:[%s5851_s9 + $0x418] sm:$0xff]  ;;  %v659_v59 = vmax.f32 %v403_v55, 0.0  ;;  %v661_v63 = vmax.f32 %v405_v58, 0.0 }
  0x93   : > { %2703 = vmatpush1.bf16.msra.mxu1 %v833_v13  ;;  %2351 = vmatprep.subr.bf16.mxu0 %v800_v37  ;;  %v861_v13 = vpack.c.bf16 %v733_v7, %v731_v6  ;;  %v1002_v30 = vld [vmem:[%s5851_s9 + $0x458] sm:$0xff]  ;;  %v828_v37 = vpack.c.bf16 %v666_v25, %v664_v24  ;;  %v726_v1 = vmax.f32 %v470_v61, 0.0  ;;  %v723_v6 = vmax.f32 %v467_v2, 0.0  ;;  %v400_v21 = vld [vmem:[%s9535_s0 + $0x588] sm:$0xff]  ;;  %v399_v23 = vld [vmem:[%s9535_s0 + $0x580] sm:$0xff] }
  0x94   : > { %2704 = vmatprep.subr.bf16.mxu1 %v832_v43  ;;  %v860_v43 = vpack.c.bf16 %v730_v33, %v728_v32  ;;  %v725_v7 = vmax.f32 %v469_v3, 0.0  ;;  %v402_v22 = vld [vmem:[%s9535_s0 + $0x598] sm:$0xff]  ;;  %v656_v24 = vmax.f32 %v400_v21, 0.0  ;;  %v401_v26 = vld [vmem:[%s9535_s0 + $0x590] sm:$0xff]  ;;  %v464_v28 = vld [vmem:[%s9535_s0 + $0x788] sm:$0xff] }
  0x95   : > { %v658_v25 = vmax.f32 %v402_v22, 0.0  ;;  %v466_v29 = vld [vmem:[%s9535_s0 + $0x798] sm:$0xff]  ;;  %v720_v32 = vmax.f32 %v464_v28, 0.0  ;;  %v463_v34 = vld [vmem:[%s9535_s0 + $0x780] sm:$0xff]  ;;  %v465_v35 = vld [vmem:[%s9535_s0 + $0x790] sm:$0xff] }
  0x96   : > { %2352 = vmatpush1.bf16.msra.mxu0 %v799_v42  ;;  %v827_v42 = vpack.c.bf16 %v665_v31, %v663_v27  ;;  %v655_v27 = vmax.f32 %v399_v23, 0.0  ;;  %v657_v31 = vmax.f32 %v401_v26, 0.0  ;;  %v722_v33 = vmax.f32 %v466_v29, 0.0  ;;  %v396_v53 = vld [vmem:[%s9535_s0 + $0x568] sm:$0xff]  ;;  %v398_v54 = vld [vmem:[%s9535_s0 + $0x578] sm:$0xff]  ;;  %v395_v55 = vld [vmem:[%s9535_s0 + $0x560] sm:$0xff] }
  0x97   : > { %2705 = vmatpush1.bf16.msra.mxu1 %v831_v45  ;;  %2353 = vmatprep.subr.bf16.mxu0 %v830_v5  ;;  %v859_v45 = vpack.c.bf16 %v729_v39, %v727_v38  ;;  %v826_v5 = vpack.c.bf16 %v662_v57, %v660_v56  ;;  %v719_v38 = vmax.f32 %v463_v34, 0.0  ;;  %v721_v39 = vmax.f32 %v465_v35, 0.0  ;;  %v397_v58 = vld [vmem:[%s9535_s0 + $0x570] sm:$0xff]  ;;  %v460_v60 = vld [vmem:[%s9535_s0 + $0x768] sm:$0xff]  ;;  %v462_v61 = vld [vmem:[%s9535_s0 + $0x778] sm:$0xff] }
  0x98   : > { %1704 = vmatmul.mubr.bf16.gmra.mxu0 %v1407_v4  ;;  %v1423_v4 = vpack.c.bf16 %v967_v47, %v959_v46  ;;  %2706 = vmatprep.subr.bf16.mxu1 %v862_v11  ;;  %v991_v46 = vld [vmem:[%s5851_s9 + $0x400] sm:$0xff]  ;;  %v858_v11 = vpack.c.bf16 %v726_v1, %v724_v0  ;;  %v652_v56 = vmax.f32 %v396_v53, 0.0  ;;  %v654_v57 = vmax.f32 %v398_v54, 0.0  ;;  %v461_v3 = vld [vmem:[%s9535_s0 + $0x770] sm:$0xff]  ;;  %v394_v21 = vld [vmem:[%s9535_s0 + $0x558] sm:$0xff] }
  0x99   : > { %2057 = vmatmul.mubr.bf16.gmra.mxu1 %v1409_v8  ;;  %1713 = vmatprep.mubr.bf16.mxu0 %v1416_v9  ;;  %v1425_v8 = vpack.c.bf16 %v969_v49, %v961_v48  ;;  %v1432_v9 = vpack.c.bf16 %v984_v51, %v976_v50  ;;  %v999_v47 = vld [vmem:[%s5851_s9 + $0x440] sm:$0xff]  ;;  %v993_v48 = vld [vmem:[%s5851_s9 + $0x410] sm:$0xff]  ;;  %v1008_v50 = vld [vmem:[%s5851_s9 + $0x488] sm:$0xff]  ;;  %v716_v0 = vmax.f32 %v460_v60, 0.0  ;;  %v718_v1 = vmax.f32 %v462_v61, 0.0 }
  0x9a   : > { %2066 = vmatprep.mubr.bf16.mxu1 %v1418_v12  ;;  %v1434_v12 = vpack.c.bf16 %v986_v62, %v978_v52  ;;  %2354 = vmatpush2.bf16.msra.mxu0 %v829_v10  ;;  %v1001_v49 = vld [vmem:[%s5851_s9 + $0x450] sm:$0xff]  ;;  %v1016_v51 = vld [vmem:[%s5851_s9 + $0x4c8] sm:$0xff]  ;;  %v1010_v52 = vld [vmem:[%s5851_s9 + $0x498] sm:$0xff]  ;;  %v825_v10 = vpack.c.bf16 %v661_v63, %v659_v59  ;;  %v651_v59 = vmax.f32 %v395_v55, 0.0  ;;  %v653_v63 = vmax.f32 %v397_v58, 0.0 }
  0x9b   : > { %2707 = vmatpush2.bf16.msra.mxu1 %v861_v13  ;;  %2355 = vmatprep.subr.bf16.mxu0 %v828_v37  ;;  %v1018_v62 = vld [vmem:[%s5851_s9 + $0x4d8] sm:$0xff]  ;;  %v857_v13 = vpack.c.bf16 %v725_v7, %v723_v6  ;;  %v824_v37 = vpack.c.bf16 %v658_v25, %v656_v24  ;;  %v459_v2 = vld [vmem:[%s9535_s0 + $0x760] sm:$0xff]  ;;  %v717_v7 = vmax.f32 %v461_v3, 0.0  ;;  %v650_v26 = vmax.f32 %v394_v21, 0.0  ;;  %v1073_v60 = vld [vmem:[%s5851_s9 + $0x690] sm:$0xff] }
  0x9c   : > { %2708 = vmatprep.subr.bf16.mxu1 %v860_v43  ;;  %v856_v43 = vpack.c.bf16 %v722_v33, %v720_v32  ;;  %v715_v6 = vmax.f32 %v459_v2, 0.0  ;;  %v391_v22 = vld [vmem:[%s9535_s0 + $0x540] sm:$0xff]  ;;  %v1058_v23 = vld [vmem:[%s5851_s9 + $0x618] sm:$0xff]  ;;  %v456_v33 = vld [vmem:[%s9535_s0 + $0x748] sm:$0xff] }
  0x9d   : > { %v1066_v24 = vld [vmem:[%s5851_s9 + $0x658] sm:$0xff]  ;;  %v647_v28 = vmax.f32 %v391_v22, 0.0  ;;  %v455_v35 = vld [vmem:[%s9535_s0 + $0x740] sm:$0xff]  ;;  %v1081_v61 = vld [vmem:[%s5851_s9 + $0x6d0] sm:$0xff] }
  0x9e   : > { %2356 = vmatpush2.bf16.msra.mxu0 %v827_v42  ;;  %v823_v42 = vpack.c.bf16 %v657_v31, %v655_v27  ;;  %v393_v27 = vld [vmem:[%s9535_s0 + $0x550] sm:$0xff]  ;;  %v458_v34 = vld [vmem:[%s9535_s0 + $0x758] sm:$0xff]  ;;  %v1071_v58 = vld [vmem:[%s5851_s9 + $0x680] sm:$0xff] }
  0x9f   : > { %2709 = vmatpush2.bf16.msra.mxu1 %v859_v45  ;;  %2357 = vmatprep.subr.bf16.mxu0 %v826_v5  ;;  %v855_v45 = vpack.c.bf16 %v721_v39, %v719_v38  ;;  %v822_v5 = vpack.c.bf16 %v654_v57, %v652_v56  ;;  %v649_v32 = vmax.f32 %v393_v27, 0.0  ;;  %v714_v38 = vmax.f32 %v458_v34, 0.0  ;;  %v457_v39 = vld [vmem:[%s9535_s0 + $0x750] sm:$0xff]  ;;  %v1082_v53 = vld [vmem:[%s5851_s9 + $0x6d8] sm:$0xff]  ;;  %v387_v2 = vld [vmem:[%s9535_s0 + $0x520] sm:$0xff] }
  0xa0   : > { %1714 = vmatmul.mubr.bf16.gmra.mxu0 %v1415_v36  ;;  %v1431_v36 = vpack.c.bf16 %v983_v15, %v975_v14  ;;  %v1007_v14 = vld [vmem:[%s5851_s9 + $0x480] sm:$0xff]  ;;  %2710 = vmatprep.subr.bf16.mxu1 %v858_v11  ;;  %v854_v11 = vpack.c.bf16 %v718_v1, %v716_v0  ;;  %v388_v0 = vld [vmem:[%s9535_s0 + $0x528] sm:$0xff]  ;;  %v390_v1 = vld [vmem:[%s9535_s0 + $0x538] sm:$0xff] }
  0xa1   : > { %2067 = vmatmul.mubr.bf16.gmra.mxu1 %v1417_v40  ;;  %1723 = vmatprep.mubr.bf16.mxu0 %v1424_v41  ;;  %v1433_v40 = vpack.c.bf16 %v985_v17, %v977_v16  ;;  %v1440_v41 = vpack.c.bf16 %v1000_v19, %v992_v18  ;;  %v1015_v15 = vld [vmem:[%s5851_s9 + $0x4c0] sm:$0xff]  ;;  %v1009_v16 = vld [vmem:[%s5851_s9 + $0x490] sm:$0xff]  ;;  %v1024_v18 = vld [vmem:[%s5851_s9 + $0x508] sm:$0xff] }
  0xa2   : > { %2076 = vmatprep.mubr.bf16.mxu1 %v1426_v44  ;;  %v1442_v44 = vpack.c.bf16 %v1002_v30, %v994_v20  ;;  %2358 = vmatpush2.bf16.msra.mxu0 %v825_v10  ;;  %v1017_v17 = vld [vmem:[%s5851_s9 + $0x4d0] sm:$0xff]  ;;  %v1032_v19 = vld [vmem:[%s5851_s9 + $0x548] sm:$0xff]  ;;  %v1026_v20 = vld [vmem:[%s5851_s9 + $0x518] sm:$0xff]  ;;  %v821_v10 = vpack.c.bf16 %v653_v63, %v651_v59 }
  0xa3   : > { %2711 = vmatpush2.bf16.msra.mxu1 %v857_v13  ;;  %v1034_v30 = vld [vmem:[%s5851_s9 + $0x558] sm:$0xff]  ;;  %2359 = vmatprep.subr.bf16.mxu0 %v824_v37  ;;  %v853_v13 = vpack.c.bf16 %v717_v7, %v715_v6  ;;  %v712_v37 = vmax.f32 %v456_v33, 0.0  ;;  %v1079_v59 = vld [vmem:[%s5851_s9 + $0x6c0] sm:$0xff]  ;;  %v1096_v63 = vld [vmem:[%s5851_s9 + $0x748] sm:$0xff]  ;;  %v646_v6 = vmax.f32 %v390_v1, 0.0 }
  0xa4   : > { %2712 = vmatprep.subr.bf16.mxu1 %v856_v43  ;;  %v713_v43 = vmax.f32 %v457_v39, 0.0  ;;  %v1090_v3 = vld [vmem:[%s5851_s9 + $0x718] sm:$0xff]  ;;  %v389_v7 = vld [vmem:[%s9535_s0 + $0x530] sm:$0xff]  ;;  %v1095_v27 = vld [vmem:[%s5851_s9 + $0x740] sm:$0xff] }
  0xa5   : > { %v1114_v33 = vld [vmem:[%s5851_s9 + $0x7d8] sm:$0xff]  ;;  %v1111_v39 = vld [vmem:[%s5851_s9 + $0x7c0] sm:$0xff] }
  0xa6   : > { %2360 = vmatpush2.bf16.msra.mxu0 %v823_v42  ;;  %v819_v42 = vpack.c.bf16 %v649_v32, %v647_v28  ;;  %v1089_v28 = vld [vmem:[%s5851_s9 + $0x710] sm:$0xff]  ;;  %v1106_v32 = vld [vmem:[%s5851_s9 + $0x798] sm:$0xff] }
  0xa7   : > { %2713 = vmatpush2.bf16.msra.mxu1 %v855_v45  ;;  %2361 = vmatprep.subr.bf16.mxu0 %v822_v5  ;;  %v644_v5 = vmax.f32 %v388_v0, 0.0 }
  0xa8   : > { %1724 = vmatmul.mubr.bf16.gmra.mxu0 %v1423_v4  ;;  %v1439_v4 = vpack.c.bf16 %v999_v47, %v991_v46  ;;  %v1023_v46 = vld [vmem:[%s5851_s9 + $0x500] sm:$0xff]  ;;  %2714 = vmatprep.subr.bf16.mxu1 %v854_v11 }
  0xa9   : > { %2077 = vmatmul.mubr.bf16.gmra.mxu1 %v1425_v8  ;;  %1733 = vmatprep.mubr.bf16.mxu0 %v1432_v9  ;;  %v1441_v8 = vpack.c.bf16 %v1001_v49, %v993_v48  ;;  %v1448_v9 = vpack.c.bf16 %v1016_v51, %v1008_v50  ;;  %v1031_v47 = vld [vmem:[%s5851_s9 + $0x540] sm:$0xff]  ;;  %v1025_v48 = vld [vmem:[%s5851_s9 + $0x510] sm:$0xff]  ;;  %v1040_v50 = vld [vmem:[%s5851_s9 + $0x588] sm:$0xff] }
  0xaa   : > { %2086 = vmatprep.mubr.bf16.mxu1 %v1434_v12  ;;  %v1450_v12 = vpack.c.bf16 %v1018_v62, %v1010_v52  ;;  %v1033_v49 = vld [vmem:[%s5851_s9 + $0x550] sm:$0xff]  ;;  %v1048_v51 = vld [vmem:[%s5851_s9 + $0x5c8] sm:$0xff]  ;;  %v1042_v52 = vld [vmem:[%s5851_s9 + $0x598] sm:$0xff]  ;;  %2362 = vmatpush2.bf16.msra.mxu0 %v821_v10  ;;  %v1481_v10 = vpack.c.bf16 %v1081_v61, %v1073_v60 }
  0xab   : > { %v1050_v62 = vld [vmem:[%s5851_s9 + $0x5d8] sm:$0xff]  ;;  %2715 = vmatpush2.bf16.msra.mxu1 %v853_v13  ;;  %v452_v13 = vld [vmem:[%s9535_s0 + $0x728] sm:$0xff] }
  0xb0   : > { %1734 = vmatmul.mubr.bf16.gmra.mxu0 %v1431_v36  ;;  %v1447_v36 = vpack.c.bf16 %v1015_v15, %v1007_v14  ;;  %v1039_v14 = vld [vmem:[%s5851_s9 + $0x580] sm:$0xff] }
  0xb1   : > { %2087 = vmatmul.mubr.bf16.gmra.mxu1 %v1433_v40  ;;  %1743 = vmatprep.mubr.bf16.mxu0 %v1440_v41  ;;  %v1449_v40 = vpack.c.bf16 %v1017_v17, %v1009_v16  ;;  %v1456_v41 = vpack.c.bf16 %v1032_v19, %v1024_v18  ;;  %v1047_v15 = vld [vmem:[%s5851_s9 + $0x5c0] sm:$0xff]  ;;  %v1041_v16 = vld [vmem:[%s5851_s9 + $0x590] sm:$0xff]  ;;  %v1056_v18 = vld [vmem:[%s5851_s9 + $0x608] sm:$0xff] }
  0xb2   : > { %2096 = vmatprep.mubr.bf16.mxu1 %v1442_v44  ;;  %v1458_v44 = vpack.c.bf16 %v1034_v30, %v1026_v20  ;;  %v1049_v17 = vld [vmem:[%s5851_s9 + $0x5d0] sm:$0xff]  ;;  %v1064_v19 = vld [vmem:[%s5851_s9 + $0x648] sm:$0xff]  ;;  %v1463_v29 = vpack.c.bf16 %v1047_v15, %v1039_v14  ;;  %v454_v14 = vld [vmem:[%s9535_s0 + $0x738] sm:$0xff] }
  0xb3   : > { %v392_v20 = vld [vmem:[%s9535_s0 + $0x548] sm:$0xff]  ;;  %v1465_v30 = vpack.c.bf16 %v1049_v17, %v1041_v16  ;;  %v1472_v31 = vpack.c.bf16 %v1064_v19, %v1056_v18  ;;  %v451_v15 = vld [vmem:[%s9535_s0 + $0x720] sm:$0xff]  ;;  %v818_v16 = vpack.c.bf16 %v646_v6, %v644_v5  ;;  %v708_v17 = vmax.f32 %v452_v13, 0.0  ;;  %v453_v19 = vld [vmem:[%s9535_s0 + $0x730] sm:$0xff] }
  0xb4   : > { %v648_v25 = vmax.f32 %v392_v20, 0.0  ;;  %v710_v18 = vmax.f32 %v454_v14, 0.0  ;;  %v707_v20 = vmax.f32 %v451_v15, 0.0  ;;  %v1119_v6 = vld [vmem:[%s5851_s9 + $0x800] sm:$0xff]  ;;  %v1146_v13 = vld [vmem:[%s5851_s9 + $0x8d8] sm:$0xff] }
  0xb8   : > { %1744 = vmatmul.mubr.bf16.gmra.mxu0 %v1439_v4  ;;  %v1455_v4 = vpack.c.bf16 %v1031_v47, %v1023_v46  ;;  %v1055_v46 = vld [vmem:[%s5851_s9 + $0x600] sm:$0xff] }
  0xb9   : > { %2097 = vmatmul.mubr.bf16.gmra.mxu1 %v1441_v8  ;;  %1753 = vmatprep.mubr.bf16.mxu0 %v1448_v9  ;;  %v1457_v8 = vpack.c.bf16 %v1033_v49, %v1025_v48  ;;  %v1464_v9 = vpack.c.bf16 %v1048_v51, %v1040_v50  ;;  %v1063_v47 = vld [vmem:[%s5851_s9 + $0x640] sm:$0xff]  ;;  %v1057_v48 = vld [vmem:[%s5851_s9 + $0x610] sm:$0xff]  ;;  %v1072_v50 = vld [vmem:[%s5851_s9 + $0x688] sm:$0xff] }
  0xba   : > { %2106 = vmatprep.mubr.bf16.mxu1 %v1450_v12  ;;  %v1466_v12 = vpack.c.bf16 %v1050_v62, %v1042_v52  ;;  %v1065_v49 = vld [vmem:[%s5851_s9 + $0x650] sm:$0xff]  ;;  %v1080_v51 = vld [vmem:[%s5851_s9 + $0x6c8] sm:$0xff]  ;;  %v1074_v52 = vld [vmem:[%s5851_s9 + $0x698] sm:$0xff]  ;;  %v1471_v54 = vpack.c.bf16 %v1063_v47, %v1055_v46 }
  0xbb   : > { %v1473_v55 = vpack.c.bf16 %v1065_v49, %v1057_v48  ;;  %v1480_v56 = vpack.c.bf16 %v1080_v51, %v1072_v50  ;;  %v1482_v57 = vpack.c.bf16 %v1082_v53, %v1074_v52  ;;  %v1088_v62 = vld [vmem:[%s5851_s9 + $0x708] sm:$0xff]  ;;  %v383_v46 = vld [vmem:[%s9535_s0 + $0x500] sm:$0xff]  ;;  %v1122_v47 = vld [vmem:[%s5851_s9 + $0x818] sm:$0xff] }
  0xbc   : > { %v1488_v11 = vpack.c.bf16 %v1096_v63, %v1088_v62  ;;  %v1130_v48 = vld [vmem:[%s5851_s9 + $0x858] sm:$0xff]  ;;  %v385_v51 = vld [vmem:[%s9535_s0 + $0x510] sm:$0xff]  ;;  %v639_v52 = vmax.f32 %v383_v46, 0.0  ;;  %v1184_v46 = vld [vmem:[%s5851_s9 + $0xa08] sm:$0xff] }
  0xbd   : > { %v449_v63 = vld [vmem:[%s9535_s0 + $0x710] sm:$0xff]  ;;  %v1506_v1 = vpack.c.bf16 %v1130_v48, %v1122_v47  ;;  %v1192_v47 = vld [vmem:[%s5851_s9 + $0xa48] sm:$0xff]  ;;  %v1186_v48 = vld [vmem:[%s5851_s9 + $0xa18] sm:$0xff] }
  0xc0   : > { %1754 = vmatmul.mubr.bf16.gmra.mxu0 %v1447_v36  ;;  %v820_v36 = vpack.c.bf16 %v650_v26, %v648_v25  ;;  %v1087_v26 = vld [vmem:[%s5851_s9 + $0x700] sm:$0xff] }
  0xc1   : > { %2107 = vmatmul.mubr.bf16.gmra.mxu1 %v1449_v40  ;;  %1763 = vmatprep.mubr.bf16.mxu0 %v1456_v41  ;;  %v711_v40 = vmax.f32 %v455_v35, 0.0  ;;  %v1474_v41 = vpack.c.bf16 %v1066_v24, %v1058_v23  ;;  %v709_v23 = vmax.f32 %v453_v19, 0.0  ;;  %v850_v24 = vpack.c.bf16 %v710_v18, %v708_v17  ;;  %v1135_v18 = vld [vmem:[%s5851_s9 + $0x880] sm:$0xff] }
  0xc2   : > { %2116 = vmatprep.mubr.bf16.mxu1 %v1458_v44  ;;  %2363 = vmatprep.subr.bf16.mxu0 %v820_v36  ;;  %v852_v44 = vpack.c.bf16 %v714_v38, %v712_v37  ;;  %v1487_v34 = vpack.c.bf16 %v1095_v27, %v1087_v26  ;;  %v1498_v37 = vpack.c.bf16 %v1114_v33, %v1106_v32  ;;  %v1103_v38 = vld [vmem:[%s5851_s9 + $0x780] sm:$0xff]  ;;  %v1153_v32 = vld [vmem:[%s5851_s9 + $0x910] sm:$0xff] }
  0xc3   : > { %v851_v45 = vpack.c.bf16 %v713_v43, %v711_v40  ;;  %2364 = vmatpush2.bf16.msra.mxu0 %v819_v42  ;;  %v849_v25 = vpack.c.bf16 %v709_v23, %v707_v20  ;;  %v1105_v40 = vld [vmem:[%s5851_s9 + $0x790] sm:$0xff]  ;;  %v1120_v42 = vld [vmem:[%s5851_s9 + $0x808] sm:$0xff]  ;;  %v1495_v53 = vpack.c.bf16 %v1111_v39, %v1103_v38  ;;  %v1143_v19 = vld [vmem:[%s5851_s9 + $0x8c0] sm:$0xff] }
  0xc4   : > { %2716 = vmatprep.subr.bf16.mxu1 %v852_v44  ;;  %2365 = vmatprep.subr.bf16.mxu0 %v818_v16  ;;  %v1128_v43 = vld [vmem:[%s5851_s9 + $0x848] sm:$0xff]  ;;  %v1137_v20 = vld [vmem:[%s5851_s9 + $0x890] sm:$0xff]  ;;  %v1511_v26 = vpack.c.bf16 %v1143_v19, %v1135_v18 }
  0xc5   : > { %2717 = vmatpush2.bf16.msra.mxu1 %v851_v45  ;;  %v384_v44 = vld [vmem:[%s9535_s0 + $0x508] sm:$0xff]  ;;  %v386_v45 = vld [vmem:[%s9535_s0 + $0x518] sm:$0xff]  ;;  %v1161_v33 = vld [vmem:[%s5851_s9 + $0x950] sm:$0xff] }
  0xc6   : > { %2718 = vmatprep.subr.bf16.mxu1 %v850_v24  ;;  %v640_v49 = vmax.f32 %v384_v44, 0.0  ;;  %v642_v50 = vmax.f32 %v386_v45, 0.0  ;;  %v1160_v23 = vld [vmem:[%s5851_s9 + $0x948] sm:$0xff]  ;;  %v1154_v24 = vld [vmem:[%s5851_s9 + $0x918] sm:$0xff]  ;;  %v1521_v39 = vpack.c.bf16 %v1161_v33, %v1153_v32  ;;  %v1169_v44 = vld [vmem:[%s5851_s9 + $0x990] sm:$0xff] }
  0xc7   : > { %v1177_v45 = vld [vmem:[%s5851_s9 + $0x9d0] sm:$0xff]  ;;  %v1232_v18 = vld [vmem:[%s5851_s9 + $0xb88] sm:$0xff]  ;;  %v1250_v32 = vld [vmem:[%s5851_s9 + $0xc18] sm:$0xff] }
  0xc8   : > { %1764 = vmatmul.mubr.bf16.gmra.mxu0 %v1455_v4  ;;  %v1098_v4 = vld [vmem:[%s5851_s9 + $0x758] sm:$0xff]  ;;  %v816_v60 = vpack.c.bf16 %v642_v50, %v640_v49  ;;  %v1240_v19 = vld [vmem:[%s5851_s9 + $0xbc8] sm:$0xff] }
  0xc9   : > { %2117 = vmatmul.mubr.bf16.gmra.mxu1 %v1457_v8  ;;  %1773 = vmatprep.mubr.bf16.mxu0 %v1464_v9  ;;  %v643_v8 = vmax.f32 %v387_v2, 0.0  ;;  %v1479_v9 = vpack.c.bf16 %v1079_v59, %v1071_v58  ;;  %v1490_v21 = vpack.c.bf16 %v1098_v4, %v1090_v3  ;;  %v450_v58 = vld [vmem:[%s9535_s0 + $0x718] sm:$0xff]  ;;  %v447_v59 = vld [vmem:[%s9535_s0 + $0x700] sm:$0xff]  ;;  %v705_v3 = vmax.f32 %v449_v63, 0.0 }
  0xca   : > { %2126 = vmatprep.mubr.bf16.mxu1 %v1466_v12  ;;  %v645_v12 = vmax.f32 %v389_v7, 0.0  ;;  %2719 = vmatpush2.bf16.msra.mxu1 %v849_v25  ;;  %v706_v62 = vmax.f32 %v450_v58, 0.0  ;;  %v703_v0 = vmax.f32 %v447_v59, 0.0  ;;  %v1127_v7 = vld [vmem:[%s5851_s9 + $0x840] sm:$0xff]  ;;  %v1162_v25 = vld [vmem:[%s5851_s9 + $0x958] sm:$0xff]  ;;  %v1200_v58 = vld [vmem:[%s5851_s9 + $0xa88] sm:$0xff] }
  0xcb   : > { %v1503_v14 = vpack.c.bf16 %v1127_v7, %v1119_v6  ;;  %v1194_v49 = vld [vmem:[%s5851_s9 + $0xa58] sm:$0xff]  ;;  %v1208_v59 = vld [vmem:[%s5851_s9 + $0xac8] sm:$0xff] }
  0xcc   : > { %v817_v22 = vpack.c.bf16 %v645_v12, %v643_v8  ;;  %v847_v5 = vpack.c.bf16 %v705_v3, %v703_v0  ;;  %v1121_v8 = vld [vmem:[%s5851_s9 + $0x810] sm:$0xff]  ;;  %v1138_v12 = vld [vmem:[%s5851_s9 + $0x898] sm:$0xff]  ;;  %v1544_v0 = vpack.c.bf16 %v1208_v59, %v1200_v58  ;;  %v1207_v3 = vld [vmem:[%s5851_s9 + $0xac0] sm:$0xff] }
  0xcd   : > { %v1514_v17 = vpack.c.bf16 %v1146_v13, %v1138_v12  ;;  %v1216_v6 = vld [vmem:[%s5851_s9 + $0xb08] sm:$0xff]  ;;  %v1258_v33 = vld [vmem:[%s5851_s9 + $0xc58] sm:$0xff] }
  0xce   : > { %2366 = vmatpush2.bf16.msra.mxu0 %v817_v22  ;;  %v1152_v22 = vld [vmem:[%s5851_s9 + $0x908] sm:$0xff] }
  0xcf   : > { %2367 = vmatprep.subr.bf16.mxu0 %v816_v60  ;;  %v1202_v60 = vld [vmem:[%s5851_s9 + $0xa98] sm:$0xff]  ;;  %v1224_v7 = vld [vmem:[%s5851_s9 + $0xb48] sm:$0xff] }
  0xd0   : > { %1774 = vmatmul.mubr.bf16.gmra.mxu0 %v1463_v29  ;;  %v1097_v29 = vld [vmem:[%s5851_s9 + $0x750] sm:$0xff]  ;;  %v1552_v12 = vpack.c.bf16 %v1224_v7, %v1216_v6  ;;  %v1280_v58 = vld [vmem:[%s5851_s9 + $0xd08] sm:$0xff] }
  0xd1   : > { %2127 = vmatmul.mubr.bf16.gmra.mxu1 %v1465_v30  ;;  %1783 = vmatprep.mubr.bf16.mxu0 %v1472_v31  ;;  %v1104_v30 = vld [vmem:[%s5851_s9 + $0x788] sm:$0xff]  ;;  %v1489_v35 = vpack.c.bf16 %v1097_v29, %v1089_v28  ;;  %v1520_v28 = vpack.c.bf16 %v1160_v23, %v1152_v22  ;;  %v1522_v29 = vpack.c.bf16 %v1162_v25, %v1154_v24 }
  0xd2   : > { %2136 = vmatprep.mubr.bf16.mxu1 %v1474_v41  ;;  %v1112_v31 = vld [vmem:[%s5851_s9 + $0x7c8] sm:$0xff]  ;;  %v1113_v41 = vld [vmem:[%s5851_s9 + $0x7d0] sm:$0xff]  ;;  %v1560_v24 = vpack.c.bf16 %v1240_v19, %v1232_v18 }
  0xd3   : > { %v1496_v36 = vpack.c.bf16 %v1112_v31, %v1104_v30  ;;  %v1151_v30 = vld [vmem:[%s5851_s9 + $0x900] sm:$0xff]  ;;  %v1288_v59 = vld [vmem:[%s5851_s9 + $0xd48] sm:$0xff] }
  0xd4   : > { %v1159_v31 = vld [vmem:[%s5851_s9 + $0x940] sm:$0xff]  ;;  %v1296_v18 = vld [vmem:[%s5851_s9 + $0xd88] sm:$0xff] }
  0xd5   : > { %v1519_v38 = vpack.c.bf16 %v1159_v31, %v1151_v30  ;;  %v1248_v30 = vld [vmem:[%s5851_s9 + $0xc08] sm:$0xff] }
  0xd6   : > { %v1256_v31 = vld [vmem:[%s5851_s9 + $0xc48] sm:$0xff] }
  0xd7   : > { %v1304_v19 = vld [vmem:[%s5851_s9 + $0xdc8] sm:$0xff] }
  0xd8   : > { %1784 = vmatmul.mubr.bf16.gmra.mxu0 %v1471_v54  ;;  %v1497_v54 = vpack.c.bf16 %v1113_v41, %v1105_v40 }
  0xd9   : > { %2137 = vmatmul.mubr.bf16.gmra.mxu1 %v1473_v55  ;;  %1793 = vmatprep.mubr.bf16.mxu0 %v1480_v56  ;;  %v1504_v55 = vpack.c.bf16 %v1128_v43, %v1120_v42  ;;  %v641_v56 = vmax.f32 %v385_v51, 0.0  ;;  %v1167_v42 = vld [vmem:[%s5851_s9 + $0x980] sm:$0xff]  ;;  %v1529_v51 = vpack.c.bf16 %v1177_v45, %v1169_v44  ;;  %v1266_v44 = vld [vmem:[%s5851_s9 + $0xc98] sm:$0xff] }
  0xda   : > { %2146 = vmatprep.mubr.bf16.mxu1 %v1482_v57  ;;  %v448_v57 = vld [vmem:[%s9535_s0 + $0x708] sm:$0xff]  ;;  %v1175_v43 = vld [vmem:[%s5851_s9 + $0x9c0] sm:$0xff]  ;;  %v1274_v45 = vld [vmem:[%s5851_s9 + $0xcd8] sm:$0xff] }
  0xdb   : > { %v704_v61 = vmax.f32 %v448_v57, 0.0  ;;  %v815_v2 = vpack.c.bf16 %v641_v56, %v639_v52  ;;  %v1527_v50 = vpack.c.bf16 %v1175_v43, %v1167_v42  ;;  %v1536_v52 = vpack.c.bf16 %v1192_v47, %v1184_v46  ;;  %v1185_v56 = vld [vmem:[%s5851_s9 + $0xa10] sm:$0xff]  ;;  %v1264_v42 = vld [vmem:[%s5851_s9 + $0xc88] sm:$0xff] }
  0xdc   : > { %v1193_v57 = vld [vmem:[%s5851_s9 + $0xa50] sm:$0xff]  ;;  %v1272_v43 = vld [vmem:[%s5851_s9 + $0xcc8] sm:$0xff] }
  0xdd   : > { %v848_v4 = vpack.c.bf16 %v706_v62, %v704_v61  ;;  %2368 = vmatpush2.bf16.msra.mxu0 %v815_v2  ;;  %v1210_v61 = vld [vmem:[%s5851_s9 + $0xad8] sm:$0xff]  ;;  %v1537_v63 = vpack.c.bf16 %v1193_v57, %v1185_v56  ;;  %v1199_v2 = vld [vmem:[%s5851_s9 + $0xa80] sm:$0xff]  ;;  %v1273_v57 = vld [vmem:[%s5851_s9 + $0xcd0] sm:$0xff] }
  0xdf   : > { %2720 = vmatprep.subr.bf16.mxu1 %v848_v4  ;;  %v1201_v4 = vld [vmem:[%s5851_s9 + $0xa90] sm:$0xff] }
  0xe0   : > { %1794 = vmatmul.mubr.bf16.gmra.mxu0 %v1479_v9  ;;  %v1129_v9 = vld [vmem:[%s5851_s9 + $0x850] sm:$0xff]  ;;  %2721 = vmatpush2.bf16.msra.mxu1 %v847_v5 }
  0xe1   : > { %2147 = vmatmul.mubr.bf16.gmra.mxu1 %v1481_v10  ;;  %1803 = vmatprep.mubr.bf16.mxu0 %v1488_v11  ;;  %v1136_v10 = vld [vmem:[%s5851_s9 + $0x888] sm:$0xff]  ;;  %v1505_v15 = vpack.c.bf16 %v1129_v9, %v1121_v8  ;;  %v1209_v5 = vld [vmem:[%s5851_s9 + $0xad0] sm:$0xff]  ;;  %v1218_v8 = vld [vmem:[%s5851_s9 + $0xb18] sm:$0xff] }
  0xe2   : > { %2156 = vmatprep.mubr.bf16.mxu1 %v1490_v21  ;;  %v1144_v11 = vld [vmem:[%s5851_s9 + $0x8c8] sm:$0xff]  ;;  %v1145_v21 = vld [vmem:[%s5851_s9 + $0x8d0] sm:$0xff]  ;;  %v1226_v9 = vld [vmem:[%s5851_s9 + $0xb58] sm:$0xff] }
  0xe3   : > { %v1512_v16 = vpack.c.bf16 %v1144_v11, %v1136_v10  ;;  %v1513_v27 = vpack.c.bf16 %v1145_v21, %v1137_v20  ;;  %v1543_v10 = vpack.c.bf16 %v1207_v3, %v1199_v2  ;;  %v1545_v11 = vpack.c.bf16 %v1209_v5, %v1201_v4  ;;  %v1234_v20 = vld [vmem:[%s5851_s9 + $0xb98] sm:$0xff] }
  0xe4   : > { %v1554_v13 = vpack.c.bf16 %v1226_v9, %v1218_v8  ;;  %v1242_v21 = vld [vmem:[%s5851_s9 + $0xbd8] sm:$0xff]  ;;  %v1584_v4 = vpack.c.bf16 %v1288_v59, %v1280_v58 }
  0xe5   : > { %v1562_v25 = vpack.c.bf16 %v1242_v21, %v1234_v20  ;;  %v1298_v21 = vld [vmem:[%s5851_s9 + $0xd98] sm:$0xff] }
  0xe8   : > { %1804 = vmatmul.mubr.bf16.gmra.mxu0 %v1487_v34  ;;  %v1168_v34 = vld [vmem:[%s5851_s9 + $0x988] sm:$0xff] }
  0xe9   : > { %2157 = vmatmul.mubr.bf16.gmra.mxu1 %v1489_v35  ;;  %1813 = vmatprep.mubr.bf16.mxu0 %v1496_v36  ;;  %v1176_v35 = vld [vmem:[%s5851_s9 + $0x9c8] sm:$0xff]  ;;  %v1170_v36 = vld [vmem:[%s5851_s9 + $0x998] sm:$0xff] }
  0xea   : > { %2166 = vmatprep.mubr.bf16.mxu1 %v1498_v37  ;;  %v1178_v37 = vld [vmem:[%s5851_s9 + $0x9d8] sm:$0xff]  ;;  %v1528_v40 = vpack.c.bf16 %v1176_v35, %v1168_v34 }
  0xeb   : > { %v1530_v41 = vpack.c.bf16 %v1178_v37, %v1170_v36  ;;  %v1568_v36 = vpack.c.bf16 %v1256_v31, %v1248_v30  ;;  %v1570_v37 = vpack.c.bf16 %v1258_v33, %v1250_v32 }
  0xf0   : > { %1814 = vmatmul.mubr.bf16.gmra.mxu0 %v1495_v53  ;;  %v1538_v53 = vpack.c.bf16 %v1194_v49, %v1186_v48  ;;  %v1576_v48 = vpack.c.bf16 %v1272_v43, %v1264_v42  ;;  %v1578_v49 = vpack.c.bf16 %v1274_v45, %v1266_v44  ;;  %v1312_v42 = vld [vmem:[%s5851_s9 + $0xe08] sm:$0xff]  ;;  %v1314_v45 = vld [vmem:[%s5851_s9 + $0xe18] sm:$0xff] }
  0xf1   : > { %2167 = vmatmul.mubr.bf16.gmra.mxu1 %v1497_v54  ;;  %1823 = vmatprep.mubr.bf16.mxu0 %v1504_v55  ;;  %v1183_v54 = vld [vmem:[%s5851_s9 + $0xa00] sm:$0xff]  ;;  %v1320_v43 = vld [vmem:[%s5851_s9 + $0xe48] sm:$0xff] }
  0xf2   : > { %2176 = vmatprep.mubr.bf16.mxu1 %v1506_v1  ;;  %v1191_v55 = vld [vmem:[%s5851_s9 + $0xa40] sm:$0xff]  ;;  %v1546_v1 = vpack.c.bf16 %v1210_v61, %v1202_v60  ;;  %v1282_v61 = vld [vmem:[%s5851_s9 + $0xd18] sm:$0xff] }
  0xf3   : > { %v1535_v62 = vpack.c.bf16 %v1191_v55, %v1183_v54  ;;  %v1265_v54 = vld [vmem:[%s5851_s9 + $0xc90] sm:$0xff] }
  0xf4   : > { %v1577_v3 = vpack.c.bf16 %v1273_v57, %v1265_v54 }
  0xf8   : > { %1824 = vmatmul.mubr.bf16.gmra.mxu0 %v1503_v14  ;;  %v1215_v14 = vld [vmem:[%s5851_s9 + $0xb00] sm:$0xff] }
  0xf9   : > { %2177 = vmatmul.mubr.bf16.gmra.mxu1 %v1505_v15  ;;  %1833 = vmatprep.mubr.bf16.mxu0 %v1512_v16  ;;  %v1223_v15 = vld [vmem:[%s5851_s9 + $0xb40] sm:$0xff]  ;;  %v1217_v16 = vld [vmem:[%s5851_s9 + $0xb10] sm:$0xff] }
  0xfa   : > { %2186 = vmatprep.mubr.bf16.mxu1 %v1514_v17  ;;  %v1225_v17 = vld [vmem:[%s5851_s9 + $0xb50] sm:$0xff]  ;;  %v1551_v22 = vpack.c.bf16 %v1223_v15, %v1215_v14 }
  0xfb   : > { %v1553_v23 = vpack.c.bf16 %v1225_v17, %v1217_v16  ;;  %v1281_v14 = vld [vmem:[%s5851_s9 + $0xd10] sm:$0xff] }
  0xfc   : > { %v1289_v17 = vld [vmem:[%s5851_s9 + $0xd50] sm:$0xff] }
 0x100   : > { %1834 = vmatmul.mubr.bf16.gmra.mxu0 %v1511_v26  ;;  %v1231_v26 = vld [vmem:[%s5851_s9 + $0xb80] sm:$0xff] }
 0x101   : > { %2187 = vmatmul.mubr.bf16.gmra.mxu1 %v1513_v27  ;;  %1843 = vmatprep.mubr.bf16.mxu0 %v1520_v28  ;;  %v1239_v27 = vld [vmem:[%s5851_s9 + $0xbc0] sm:$0xff]  ;;  %v1233_v28 = vld [vmem:[%s5851_s9 + $0xb90] sm:$0xff] }
 0x102   : > { %2196 = vmatprep.mubr.bf16.mxu1 %v1522_v29  ;;  %v1241_v29 = vld [vmem:[%s5851_s9 + $0xbd0] sm:$0xff]  ;;  %v1559_v34 = vpack.c.bf16 %v1239_v27, %v1231_v26  ;;  %v1585_v27 = vpack.c.bf16 %v1289_v17, %v1281_v14 }
 0x103   : > { %v1561_v35 = vpack.c.bf16 %v1241_v29, %v1233_v28  ;;  %v1592_v28 = vpack.c.bf16 %v1304_v19, %v1296_v18 }
 0x108   : > { %1844 = vmatmul.mubr.bf16.gmra.mxu0 %v1519_v38  ;;  %v1247_v38 = vld [vmem:[%s5851_s9 + $0xc00] sm:$0xff] }
 0x109   : > { %2197 = vmatmul.mubr.bf16.gmra.mxu1 %v1521_v39  ;;  %1853 = vmatprep.mubr.bf16.mxu0 %v1528_v40  ;;  %v1255_v39 = vld [vmem:[%s5851_s9 + $0xc40] sm:$0xff]  ;;  %v1249_v40 = vld [vmem:[%s5851_s9 + $0xc10] sm:$0xff] }
 0x10a   : > { %2206 = vmatprep.mubr.bf16.mxu1 %v1530_v41  ;;  %v1257_v41 = vld [vmem:[%s5851_s9 + $0xc50] sm:$0xff]  ;;  %v1567_v46 = vpack.c.bf16 %v1255_v39, %v1247_v38 }
 0x10b   : > { %v1569_v47 = vpack.c.bf16 %v1257_v41, %v1249_v40  ;;  %v1297_v38 = vld [vmem:[%s5851_s9 + $0xd90] sm:$0xff] }
 0x10c   : > { %v1305_v41 = vld [vmem:[%s5851_s9 + $0xdd0] sm:$0xff] }
 0x110   : > { %1854 = vmatmul.mubr.bf16.gmra.mxu0 %v1527_v50 }
 0x111   : > { %2207 = vmatmul.mubr.bf16.gmra.mxu1 %v1529_v51  ;;  %1863 = vmatprep.mubr.bf16.mxu0 %v1536_v52  ;;  %v1263_v52 = vld [vmem:[%s5851_s9 + $0xc80] sm:$0xff] }
 0x112   : > { %2216 = vmatprep.mubr.bf16.mxu1 %v1538_v53  ;;  %v1271_v53 = vld [vmem:[%s5851_s9 + $0xcc0] sm:$0xff] }
 0x118   : > { %1864 = vmatmul.mubr.bf16.gmra.mxu0 %v1535_v62  ;;  %v1290_v62 = vld [vmem:[%s5851_s9 + $0xd58] sm:$0xff] }
 0x119   : > { %2217 = vmatmul.mubr.bf16.gmra.mxu1 %v1537_v63  ;;  %1873 = vmatprep.mubr.bf16.mxu0 %v1544_v0  ;;  %v1586_v7 = vpack.c.bf16 %v1290_v62, %v1282_v61  ;;  %v1311_v61 = vld [vmem:[%s5851_s9 + $0xe00] sm:$0xff] }
 0x11a   : > { %2226 = vmatprep.mubr.bf16.mxu1 %v1546_v1  ;;  %v1575_v1 = vpack.c.bf16 %v1271_v53, %v1263_v52  ;;  %v1600_v52 = vpack.c.bf16 %v1320_v43, %v1312_v42  ;;  %v1319_v62 = vld [vmem:[%s5851_s9 + $0xe40] sm:$0xff] }
 0x120   : > { %1874 = vmatmul.mubr.bf16.gmra.mxu0 %v1543_v10 }
 0x121   : > { %2227 = vmatmul.mubr.bf16.gmra.mxu1 %v1545_v11  ;;  %1883 = vmatprep.mubr.bf16.mxu0 %v1552_v12  ;;  %v1279_v12 = vld [vmem:[%s5851_s9 + $0xd00] sm:$0xff] }
 0x122   : > { %2236 = vmatprep.mubr.bf16.mxu1 %v1554_v13  ;;  %v1287_v13 = vld [vmem:[%s5851_s9 + $0xd40] sm:$0xff] }
 0x128   : > { %1884 = vmatmul.mubr.bf16.gmra.mxu0 %v1551_v22  ;;  %v1306_v22 = vld [vmem:[%s5851_s9 + $0xdd8] sm:$0xff] }
 0x129   : > { %2237 = vmatmul.mubr.bf16.gmra.mxu1 %v1553_v23  ;;  %1893 = vmatprep.mubr.bf16.mxu0 %v1560_v24  ;;  %v1594_v31 = vpack.c.bf16 %v1306_v22, %v1298_v21 }
 0x12a   : > { %2246 = vmatprep.mubr.bf16.mxu1 %v1562_v25  ;;  %v1583_v25 = vpack.c.bf16 %v1287_v13, %v1279_v12  ;;  %v1599_v13 = vpack.c.bf16 %v1319_v62, %v1311_v61  ;;  %v1353_v62 = vld [vmem:[%s5851_s9 + $0xf50] sm:$0xff] }
 0x130   : > { %1894 = vmatmul.mubr.bf16.gmra.mxu0 %v1559_v34 }
 0x131   : > { %2247 = vmatmul.mubr.bf16.gmra.mxu1 %v1561_v35  ;;  %1903 = vmatprep.mubr.bf16.mxu0 %v1568_v36  ;;  %v1295_v36 = vld [vmem:[%s5851_s9 + $0xd80] sm:$0xff] }
 0x132   : > { %2256 = vmatprep.mubr.bf16.mxu1 %v1570_v37  ;;  %v1303_v37 = vld [vmem:[%s5851_s9 + $0xdc0] sm:$0xff] }
 0x138   : > { %v1665_v50 = vpop.f32.mrf.mxu0  ;;  %1904 = vmatmul.mubr.bf16.gmra.mxu0 %v1567_v46  ;;  %v1322_v46 = vld [vmem:[%s5851_s9 + $0xe58] sm:$0xff] }
 0x139   : > { %v2018_v51 = vpop.f32.mrf.mxu1  ;;  %2257 = vmatmul.mubr.bf16.gmra.mxu1 %v1569_v47  ;;  %1913 = vmatprep.mubr.bf16.mxu0 %v1576_v48 }
 0x13a   : > { %v6850_v55 = vadd.f32 %v2018_v51, %v1665_v50  ;;  %v1667_v56 = vpop.f32.mrf.mxu0  ;;  %2266 = vmatprep.mubr.bf16.mxu1 %v1578_v49  ;;  %v1591_v49 = vpack.c.bf16 %v1303_v37, %v1295_v36  ;;  %v1593_v51 = vpack.c.bf16 %v1305_v41, %v1297_v38  ;;  %v1346_v37 = vld [vmem:[%s5851_s9 + $0xf18] sm:$0xff] }
 0x13b   : > { %v2020_v60 = vpop.f32.mrf.mxu1  ;;  %v1354_v38 = vld [vmem:[%s5851_s9 + $0xf58] sm:$0xff] }
 0x13c   : > { %v6857_v63 = vadd.f32 %v2020_v60, %v1667_v56  ;;  %v1669_v0 = vpop.f32.mrf.mxu0  ;;  %v1602_v56 = vpack.c.bf16 %v1322_v46, %v1314_v45 }
 0x13d   : > { %v2022_v2 = vpop.f32.mrf.mxu1 }
 0x13e   : > { %v6859_v5 = vadd.f32 %v2022_v2, %v1669_v0  ;;  %v1671_v6 = vpop.f32.mrf.mxu0  ;;  %v1313_v0 = vld [vmem:[%s5851_s9 + $0xe10] sm:$0xff] }
 0x13f   : > { %v2024_v8 = vpop.f32.mrf.mxu1 }
 0x140   : > { %v6861_v9 = vadd.f32 %v2024_v8, %v1671_v6  ;;  %v1675_v10 = vpop.f32.mrf.mxu0  ;;  %1914 = vmatmul.mubr.bf16.gmra.mxu0 %v1575_v1  ;;  %v1336_v6 = vld [vmem:[%s5851_s9 + $0xec8] sm:$0xff]  ;;  %v1330_v8 = vld [vmem:[%s5851_s9 + $0xe98] sm:$0xff] }
 0x141   : > { %v2028_v11 = vpop.f32.mrf.mxu1  ;;  %2267 = vmatmul.mubr.bf16.gmra.mxu1 %v1577_v3  ;;  %1923 = vmatprep.mubr.bf16.mxu0 %v1584_v4  ;;  %v1321_v3 = vld [vmem:[%s5851_s9 + $0xe50] sm:$0xff]  ;;  %v1328_v4 = vld [vmem:[%s5851_s9 + $0xe88] sm:$0xff] }
 0x142   : > { %v6866_v15 = vadd.f32 %v2028_v11, %v1675_v10  ;;  %v1677_v16 = vpop.f32.mrf.mxu0  ;;  %2276 = vmatprep.mubr.bf16.mxu1 %v1586_v7  ;;  %v1338_v10 = vld [vmem:[%s5851_s9 + $0xed8] sm:$0xff]  ;;  %v1608_v17 = vpack.c.bf16 %v1336_v6, %v1328_v4 }
 0x143   : > { %v2030_v20 = vpop.f32.mrf.mxu1  ;;  %v1362_v4 = vld [vmem:[%s5851_s9 + $0xf98] sm:$0xff] }
 0x144   : > { %v6873_v23 = vadd.f32 %v2030_v20, %v1677_v16  ;;  %v1679_v24 = vpop.f32.mrf.mxu0  ;;  %v1601_v16 = vpack.c.bf16 %v1321_v3, %v1313_v0  ;;  %v1610_v20 = vpack.c.bf16 %v1338_v10, %v1330_v8  ;;  %v1360_v0 = vld [vmem:[%s5851_s9 + $0xf88] sm:$0xff]  ;;  %v1370_v6 = vld [vmem:[%s5851_s9 + $0xfd8] sm:$0xff] }
 0x145   : > { %v2032_v26 = vpop.f32.mrf.mxu1 }
 0x146   : > { %v6875_v29 = vadd.f32 %v2032_v26, %v1679_v24  ;;  %v1681_v30 = vpop.f32.mrf.mxu0  ;;  %v1327_v26 = vld [vmem:[%s5851_s9 + $0xe80] sm:$0xff] }
 0x147   : > { %v2034_v32 = vpop.f32.mrf.mxu1 }
 0x148   : > { %v6877_v33 = vadd.f32 %v2034_v32, %v1681_v30  ;;  %v1685_v34 = vpop.f32.mrf.mxu0  ;;  %1924 = vmatmul.mubr.bf16.gmra.mxu0 %v1583_v25  ;;  %v1337_v32 = vld [vmem:[%s5851_s9 + $0xed0] sm:$0xff] }
 0x149   : > { %v2038_v35 = vpop.f32.mrf.mxu1  ;;  %2277 = vmatmul.mubr.bf16.gmra.mxu1 %v1585_v27  ;;  %1933 = vmatprep.mubr.bf16.mxu0 %v1592_v28  ;;  %v1335_v27 = vld [vmem:[%s5851_s9 + $0xec0] sm:$0xff]  ;;  %v1329_v28 = vld [vmem:[%s5851_s9 + $0xe90] sm:$0xff] }
 0x14a   : > { %v6882_v39 = vadd.f32 %v2038_v35, %v1685_v34  ;;  %v1687_v40 = vpop.f32.mrf.mxu0  ;;  %2286 = vmatprep.mubr.bf16.mxu1 %v1594_v31  ;;  %v1344_v34 = vld [vmem:[%s5851_s9 + $0xf08] sm:$0xff]  ;;  %v1607_v42 = vpack.c.bf16 %v1335_v27, %v1327_v26  ;;  %v1359_v26 = vld [vmem:[%s5851_s9 + $0xf80] sm:$0xff] }
 0x14b   : > { %v2040_v44 = vpop.f32.mrf.mxu1  ;;  %v1352_v35 = vld [vmem:[%s5851_s9 + $0xf48] sm:$0xff]  ;;  %v1367_v27 = vld [vmem:[%s5851_s9 + $0xfc0] sm:$0xff] }
 0x14c   : > { %v6889_v47 = vadd.f32 %v2040_v44, %v1687_v40  ;;  %v1689_v48 = vpop.f32.mrf.mxu0  ;;  %v1609_v44 = vpack.c.bf16 %v1337_v32, %v1329_v28  ;;  %v1616_v45 = vpack.c.bf16 %v1352_v35, %v1344_v34  ;;  %v1361_v28 = vld [vmem:[%s5851_s9 + $0xf90] sm:$0xff]  ;;  %v868_v35 = vld [vmem:[%s5851_s9 + $0x28] sm:$0xff] }
 0x14d   : > { %v2042_v50 = vpop.f32.mrf.mxu1  ;;  %v1369_v34 = vld [vmem:[%s5851_s9 + $0xfd0] sm:$0xff] }
 0x14e   : > { %v6891_v53 = vadd.f32 %v2042_v50, %v1689_v48  ;;  %v1691_v54 = vpop.f32.mrf.mxu0 }
 0x14f   : > { %v2044_v57 = vpop.f32.mrf.mxu1 }
 0x150   : > { %v6893_v58 = vadd.f32 %v2044_v57, %v1691_v54  ;;  %v1695_v59 = vpop.f32.mrf.mxu0  ;;  %1934 = vmatmul.mubr.bf16.gmra.mxu0 %v1591_v49  ;;  %v1618_v49 = vpack.c.bf16 %v1354_v38, %v1346_v37  ;;  %v1351_v57 = vld [vmem:[%s5851_s9 + $0xf40] sm:$0xff]  ;;  %v870_v38 = vld [vmem:[%s5851_s9 + $0x38] sm:$0xff] }
 0x151   : > { %v2048_v60 = vpop.f32.mrf.mxu1  ;;  %2287 = vmatmul.mubr.bf16.gmra.mxu1 %v1593_v51  ;;  %1943 = vmatprep.mubr.bf16.mxu0 %v1600_v52 }
 0x152   : > { %v6898_v1 = vadd.f32 %v2048_v60, %v1695_v59  ;;  %v1697_v2 = vpop.f32.mrf.mxu0  ;;  %2296 = vmatprep.mubr.bf16.mxu1 %v1602_v56  ;;  %v1343_v56 = vld [vmem:[%s5851_s9 + $0xf00] sm:$0xff]  ;;  %v1345_v59 = vld [vmem:[%s5851_s9 + $0xf10] sm:$0xff] }
 0x153   : > { %v2050_v7 = vpop.f32.mrf.mxu1  ;;  %v1615_v10 = vpack.c.bf16 %v1351_v57, %v1343_v56 }
 0x154   : > { %v6905_v11 = vadd.f32 %v2050_v7, %v1697_v2  ;;  %v1699_v12 = vpop.f32.mrf.mxu0  ;;  %v1368_v2 = vld [vmem:[%s5851_s9 + $0xfc8] sm:$0xff] }
 0x155   : > { %v2052_v14 = vpop.f32.mrf.mxu1 }
 0x156   : > { %v6907_v18 = vadd.f32 %v2052_v14, %v1699_v12  ;;  %v1701_v19 = vpop.f32.mrf.mxu0  ;;  %v1624_v14 = vpack.c.bf16 %v1368_v2, %v1360_v0  ;;  %v875_v0 = vld [vmem:[%s5851_s9 + $0x60] sm:$0xff]  ;;  %v869_v2 = vld [vmem:[%s5851_s9 + $0x30] sm:$0xff] }
 0x157   : > { %v2054_v21 = vpop.f32.mrf.mxu1 }
 0x158   : > { %v6909_v22 = vadd.f32 %v2054_v21, %v1701_v19  ;;  %v1705_v24 = vpop.f32.mrf.mxu0  ;;  %1944 = vmatmul.mubr.bf16.gmra.mxu0 %v1599_v13  ;;  %v1617_v13 = vpack.c.bf16 %v1353_v62, %v1345_v59  ;;  %v1626_v19 = vpack.c.bf16 %v1370_v6, %v1362_v4  ;;  %v867_v62 = vld [vmem:[%s5851_s9 + $0x20] sm:$0xff]  ;;  %v877_v6 = vld [vmem:[%s5851_s9 + $0x70] sm:$0xff] }
 0x159   : > { %v2058_v25 = vpop.f32.mrf.mxu1  ;;  %2297 = vmatmul.mubr.bf16.gmra.mxu1 %v1601_v16  ;;  %1953 = vmatprep.mubr.bf16.mxu0 %v1608_v17 }
 0x15a   : > { %v6914_v30 = vadd.f32 %v2058_v25, %v1705_v24  ;;  %v1707_v31 = vpop.f32.mrf.mxu0  ;;  %2306 = vmatprep.mubr.bf16.mxu1 %v1610_v20 }
 0x15b   : > { %v2060_v36 = vpop.f32.mrf.mxu1 }
 0x15c   : > { %v6921_v40 = vadd.f32 %v2060_v36, %v1707_v31  ;;  %v1709_v41 = vpop.f32.mrf.mxu0  ;;  %v876_v36 = vld [vmem:[%s5851_s9 + $0x68] sm:$0xff] }
 0x15d   : > { %v2062_v43 = vpop.f32.mrf.mxu1 }
 0x15e   : > { %v6923_v46 = vadd.f32 %v2062_v43, %v1709_v41  ;;  %v1711_v48 = vpop.f32.mrf.mxu0  ;;  %v878_v41 = vld [vmem:[%s5851_s9 + $0x78] sm:$0xff] }
 0x15f   : > { %v2064_v50 = vpop.f32.mrf.mxu1 }
 0x160   : > { %v6925_v51 = vadd.f32 %v2064_v50, %v1711_v48  ;;  %v1715_v52 = vpop.f32.mrf.mxu0  ;;  %1954 = vmatmul.mubr.bf16.gmra.mxu0 %v1607_v42  ;;  %v1625_v48 = vpack.c.bf16 %v1369_v34, %v1361_v28 }
 0x161   : > { %v2068_v54 = vpop.f32.mrf.mxu1  ;;  %2307 = vmatmul.mubr.bf16.gmra.mxu1 %v1609_v44  ;;  %1963 = vmatprep.mubr.bf16.mxu0 %v1616_v45  ;;  %v1623_v44 = vpack.c.bf16 %v1367_v27, %v1359_v26 }
 0x162   : > { %v6930_v60 = vadd.f32 %v2068_v54, %v1715_v52  ;;  %v1717_v61 = vpop.f32.mrf.mxu0  ;;  %2316 = vmatprep.mubr.bf16.mxu1 %v1618_v49  ;;  %v1380_v49 = vpack.c.bf16 %v876_v36, %v868_v35  ;;  %v1382_v54 = vpack.c.bf16 %v878_v41, %v870_v38  ;;  %v883_v38 = vld [vmem:[%s5851_s9 + $0xa0] sm:$0xff] }
 0x163   : > { %v2070_v3 = vpop.f32.mrf.mxu1  ;;  %v891_v41 = vld [vmem:[%s5851_s9 + $0xe0] sm:$0xff] }
 0x164   : > { %v6937_v7 = vadd.f32 %v2070_v3, %v1717_v61  ;;  %v1719_v8 = vpop.f32.mrf.mxu0 }
 0x165   : > { %v2072_v12 = vpop.f32.mrf.mxu1 }
 0x166   : > { %v6939_v16 = vadd.f32 %v2072_v12, %v1719_v8  ;;  %v1721_v17 = vpop.f32.mrf.mxu0  ;;  %v884_v8 = vld [vmem:[%s5851_s9 + $0xa8] sm:$0xff] }
 0x167   : > { %v2074_v20 = vpop.f32.mrf.mxu1 }
 0x168   : > { %v6941_v21 = vadd.f32 %v2074_v20, %v1721_v17  ;;  %v1725_v24 = vpop.f32.mrf.mxu0  ;;  %1964 = vmatmul.mubr.bf16.gmra.mxu0 %v1615_v10  ;;  %v892_v10 = vld [vmem:[%s5851_s9 + $0xe8] sm:$0xff]  ;;  %v1379_v20 = vpack.c.bf16 %v875_v0, %v867_v62  ;;  %v1387_v0 = vpack.c.bf16 %v891_v41, %v883_v38  ;;  %v918_v41 = vld [vmem:[%s5851_s9 + $0x1b8] sm:$0xff] }
 0x169   : > { %v2078_v25 = vpop.f32.mrf.mxu1  ;;  %2317 = vmatmul.mubr.bf16.gmra.mxu1 %v1617_v13  ;;  %1973 = vmatprep.mubr.bf16.mxu0 %v1624_v14  ;;  %v886_v13 = vld [vmem:[%s5851_s9 + $0xb8] sm:$0xff]  ;;  %v1388_v26 = vpack.c.bf16 %v892_v10, %v884_v8 }
 0x16a   : > { %v6946_v31 = vadd.f32 %v2078_v25, %v1725_v24  ;;  %v1727_v32 = vpop.f32.mrf.mxu0  ;;  %2326 = vmatprep.mubr.bf16.mxu1 %v1626_v19  ;;  %v894_v14 = vld [vmem:[%s5851_s9 + $0xf8] sm:$0xff]  ;;  %v1381_v25 = vpack.c.bf16 %v877_v6, %v869_v2 }
 0x16b   : > { %v2080_v37 = vpop.f32.mrf.mxu1 }
 0x16c   : > { %v6953_v42 = vadd.f32 %v2080_v37, %v1727_v32  ;;  %v1729_v43 = vpop.f32.mrf.mxu0  ;;  %v1390_v32 = vpack.c.bf16 %v894_v14, %v886_v13 }
 0x16d   : > { %v2082_v45 = vpop.f32.mrf.mxu1 }
 0x16e   : > { %v6955_v50 = vadd.f32 %v2082_v45, %v1729_v43  ;;  %v1731_v52 = vpop.f32.mrf.mxu0  ;;  %v885_v43 = vld [vmem:[%s5851_s9 + $0xb0] sm:$0xff] }
 0x16f   : > { %v2084_v56 = vpop.f32.mrf.mxu1 }
 0x170   : > { %v6957_v57 = vadd.f32 %v2084_v56, %v1731_v52  ;;  %v1735_v59 = vpop.f32.mrf.mxu0  ;;  %1974 = vmatmul.mubr.bf16.gmra.mxu0 %v1623_v44  ;;  %v908_v52 = vld [vmem:[%s5851_s9 + $0x168] sm:$0xff]  ;;  %v902_v56 = vld [vmem:[%s5851_s9 + $0x138] sm:$0xff] }
 0x171   : > { %v2088_v61 = vpop.f32.mrf.mxu1  ;;  %2327 = vmatmul.mubr.bf16.gmra.mxu1 %v1625_v48  ;;  %2369 = vmatprep.mubr.bf16.mxu0 %v1380_v49  ;;  %v893_v48 = vld [vmem:[%s5851_s9 + $0xf0] sm:$0xff]  ;;  %v900_v49 = vld [vmem:[%s5851_s9 + $0x128] sm:$0xff] }
 0x172   : > { %v6962_v3 = vadd.f32 %v2088_v61, %v1735_v59  ;;  %v1737_v4 = vpop.f32.mrf.mxu0  ;;  %2722 = vmatprep.mubr.bf16.mxu1 %v1382_v54  ;;  %v910_v59 = vld [vmem:[%s5851_s9 + $0x178] sm:$0xff]  ;;  %v1396_v6 = vpack.c.bf16 %v908_v52, %v900_v49 }
 0x173   : > { %v2090_v12 = vpop.f32.mrf.mxu1 }
 0x174   : > { %v6969_v17 = vadd.f32 %v2090_v12, %v1737_v4  ;;  %v1739_v19 = vpop.f32.mrf.mxu0  ;;  %v1389_v4 = vpack.c.bf16 %v893_v48, %v885_v43  ;;  %v1398_v12 = vpack.c.bf16 %v910_v59, %v902_v56  ;;  %v926_v43 = vld [vmem:[%s5851_s9 + $0x1f8] sm:$0xff] }
 0x175   : > { %v2092_v24 = vpop.f32.mrf.mxu1 }
 0x176   : > { %v6971_v27 = vadd.f32 %v2092_v24, %v1739_v19  ;;  %v1741_v28 = vpop.f32.mrf.mxu0  ;;  %v899_v24 = vld [vmem:[%s5851_s9 + $0x120] sm:$0xff] }
 0x177   : > { %v2094_v34 = vpop.f32.mrf.mxu1 }
 0x178   : > { %v6973_v35 = vadd.f32 %v2094_v34, %v1741_v28  ;;  %v1745_v36 = vpop.f32.mrf.mxu0  ;;  %2370 = vmatmul.mubr.bf16.vlgmr.msra.gmra.mxu0 %v1379_v20  ;;  %v909_v34 = vld [vmem:[%s5851_s9 + $0x170] sm:$0xff] }
 0x179   : > { %v2098_v37 = vpop.f32.mrf.mxu1  ;;  %2723 = vmatmul.mubr.bf16.vlgmr.msra.gmra.mxu1 %v1381_v25  ;;  %2379 = vmatprep.mubr.bf16.mxu0 %v1388_v26  ;;  %v907_v25 = vld [vmem:[%s5851_s9 + $0x160] sm:$0xff]  ;;  %v901_v26 = vld [vmem:[%s5851_s9 + $0x130] sm:$0xff] }
 0x17a   : > { %v6978_v44 = vadd.f32 %v2098_v37, %v1745_v36  ;;  %v1747_v45 = vpop.f32.mrf.mxu0  ;;  %2732 = vmatprep.mubr.bf16.mxu1 %v1390_v32  ;;  %v916_v36 = vld [vmem:[%s5851_s9 + $0x1a8] sm:$0xff]  ;;  %v1395_v49 = vpack.c.bf16 %v907_v25, %v899_v24  ;;  %v925_v25 = vld [vmem:[%s5851_s9 + $0x1f0] sm:$0xff] }
 0x17b   : > { %v2100_v54 = vpop.f32.mrf.mxu1  ;;  %v924_v37 = vld [vmem:[%s5851_s9 + $0x1e8] sm:$0xff] }
 0x17c   : > { %v6985_v61 = vadd.f32 %v2100_v54, %v1747_v45  ;;  %v1749_v62 = vpop.f32.mrf.mxu0  ;;  %v1397_v54 = vpack.c.bf16 %v909_v34, %v901_v26  ;;  %v1404_v56 = vpack.c.bf16 %v924_v37, %v916_v36  ;;  %v932_v26 = vld [vmem:[%s5851_s9 + $0x228] sm:$0xff]  ;;  %v934_v36 = vld [vmem:[%s5851_s9 + $0x238] sm:$0xff] }
 0x17d   : > { %v2102_v2 = vpop.f32.mrf.mxu1  ;;  %v942_v37 = vld [vmem:[%s5851_s9 + $0x278] sm:$0xff] }
 0x17e   : > { %v6987_v8 = vadd.f32 %v2102_v2, %v1749_v62  ;;  %v1751_v10 = vpop.f32.mrf.mxu0 }
 0x17f   : > { %v2104_v13 = vpop.f32.mrf.mxu1 }
 0x180   : > { %v6989_v14 = vadd.f32 %v2104_v13, %v1751_v10  ;;  %v1755_v19 = vpop.f32.mrf.mxu0  ;;  %2380 = vmatmul.mubr.bf16.gmra.mxu0 %v1387_v0  ;;  %v1406_v0 = vpack.c.bf16 %v926_v43, %v918_v41  ;;  %v923_v13 = vld [vmem:[%s5851_s9 + $0x1e0] sm:$0xff] }
 0x181   : > { %v2108_v20 = vpop.f32.mrf.mxu1  ;;  %2733 = vmatmul.mubr.bf16.gmra.mxu1 %v1389_v4  ;;  %2389 = vmatprep.mubr.bf16.mxu0 %v1396_v6 }
 0x182   : > { %v6994_v28 = vadd.f32 %v2108_v20, %v1755_v19  ;;  %v1757_v32 = vpop.f32.mrf.mxu0  ;;  %2742 = vmatprep.mubr.bf16.mxu1 %v1398_v12  ;;  %v915_v12 = vld [vmem:[%s5851_s9 + $0x1a0] sm:$0xff]  ;;  %v917_v19 = vld [vmem:[%s5851_s9 + $0x1b0] sm:$0xff] }
 0x183   : > { %v2110_v38 = vpop.f32.mrf.mxu1  ;;  %v1403_v43 = vpack.c.bf16 %v923_v13, %v915_v12  ;;  %v931_v12 = vld [vmem:[%s5851_s9 + $0x220] sm:$0xff] }
 0x184   : > { %v7001_v45 = vadd.f32 %v2110_v38, %v1757_v32  ;;  %v1759_v48 = vpop.f32.mrf.mxu0  ;;  %v940_v32 = vld [vmem:[%s5851_s9 + $0x268] sm:$0xff]  ;;  %v939_v13 = vld [vmem:[%s5851_s9 + $0x260] sm:$0xff] }
 0x185   : > { %v2112_v52 = vpop.f32.mrf.mxu1 }
 0x186   : > { %v7003_v59 = vadd.f32 %v2112_v52, %v1759_v48  ;;  %v1761_v62 = vpop.f32.mrf.mxu0  ;;  %v1412_v52 = vpack.c.bf16 %v940_v32, %v932_v26  ;;  %v941_v26 = vld [vmem:[%s5851_s9 + $0x270] sm:$0xff]  ;;  %v948_v32 = vld [vmem:[%s5851_s9 + $0x2a8] sm:$0xff] }
 0x187   : > { %v2114_v2 = vpop.f32.mrf.mxu1 }
 0x188   : > { %v7005_v4 = vadd.f32 %v2114_v2, %v1761_v62  ;;  %v1765_v6 = vpop.f32.mrf.mxu0  ;;  %2390 = vmatmul.mubr.bf16.gmra.mxu0 %v1395_v49  ;;  %v1405_v49 = vpack.c.bf16 %v925_v25, %v917_v19  ;;  %v1414_v62 = vpack.c.bf16 %v942_v37, %v934_v36  ;;  %v933_v19 = vld [vmem:[%s5851_s9 + $0x230] sm:$0xff]  ;;  %v950_v37 = vld [vmem:[%s5851_s9 + $0x2b8] sm:$0xff] }
 0x189   : > { %v2118_v10 = vpop.f32.mrf.mxu1  ;;  %2743 = vmatmul.mubr.bf16.gmra.mxu1 %v1397_v54  ;;  %2399 = vmatprep.mubr.bf16.mxu0 %v1404_v56 }
 0x18a   : > { %v7010_v20 = vadd.f32 %v2118_v10, %v1765_v6  ;;  %v1767_v24 = vpop.f32.mrf.mxu0  ;;  %2752 = vmatprep.mubr.bf16.mxu1 %v1406_v0 }
 0x18b   : > { %v2120_v34 = vpop.f32.mrf.mxu1 }
 0x18c   : > { %9658 = vst [vmem:[#allocation5_spill] sm:$0xff] %v7010_v20  ;;  %v7017_v38 = vadd.f32 %v2120_v34, %v1767_v24  ;;  %v1769_v41 = vpop.f32.mrf.mxu0  ;;  %v956_v34 = vld [vmem:[%s5851_s9 + $0x2e8] sm:$0xff] }
 0x18d   : > { %v2122_v48 = vpop.f32.mrf.mxu1 }
 0x18e   : > { %9659 = vst [vmem:[#allocation6_spill] sm:$0xff] %v7017_v38  ;;  %v7019_v54 = vadd.f32 %v2122_v48, %v1769_v41  ;;  %v1771_v56 = vpop.f32.mrf.mxu0  ;;  %v958_v41 = vld [vmem:[%s5851_s9 + $0x2f8] sm:$0xff] }
 0x18f   : > { %v2124_v0 = vpop.f32.mrf.mxu1 }
 0x190   : > { %9660 = vst [vmem:[#allocation7_spill] sm:$0xff] %v7019_v54  ;;  %v7021_v2 = vadd.f32 %v2124_v0, %v1771_v56  ;;  %v1775_v6 = vpop.f32.mrf.mxu0  ;;  %2400 = vmatmul.mubr.bf16.gmra.mxu0 %v1403_v43  ;;  %v1413_v56 = vpack.c.bf16 %v941_v26, %v933_v19  ;;  %v1420_v0 = vpack.c.bf16 %v956_v34, %v948_v32  ;;  %v949_v19 = vld [vmem:[%s5851_s9 + $0x2b0] sm:$0xff] }
 0x191   : > { %v2128_v10 = vpop.f32.mrf.mxu1  ;;  %2753 = vmatmul.mubr.bf16.gmra.mxu1 %v1405_v49  ;;  %2409 = vmatprep.mubr.bf16.mxu0 %v1412_v52  ;;  %v1411_v49 = vpack.c.bf16 %v939_v13, %v931_v12  ;;  %v947_v12 = vld [vmem:[%s5851_s9 + $0x2a0] sm:$0xff]  ;;  %v957_v34 = vld [vmem:[%s5851_s9 + $0x2f0] sm:$0xff] }
 0x192   : > { %9661 = vst [vmem:[#allocation8_spill] sm:$0xff] %v7021_v2  ;;  %v7026_v24 = vadd.f32 %v2128_v10, %v1775_v6  ;;  %v1777_v25 = vpop.f32.mrf.mxu0  ;;  %2762 = vmatprep.mubr.bf16.mxu1 %v1414_v62  ;;  %v1422_v10 = vpack.c.bf16 %v958_v41, %v950_v37  ;;  %v955_v13 = vld [vmem:[%s5851_s9 + $0x2e0] sm:$0xff]  ;;  %v964_v37 = vld [vmem:[%s5851_s9 + $0x328] sm:$0xff] }
 0x193   : > { %v2130_v36 = vpop.f32.mrf.mxu1  ;;  %v972_v41 = vld [vmem:[%s5851_s9 + $0x368] sm:$0xff] }
 0x194   : > { %9662 = vst [vmem:[#allocation9_spill] sm:$0xff] %v7026_v24  ;;  %v7033_v48 = vadd.f32 %v2130_v36, %v1777_v25  ;;  %v1779_v43 = vpop.f32.mrf.mxu0 }
 0x195   : > { %v2132_v52 = vpop.f32.mrf.mxu1 }
 0x196   : > { %9663 = vst [vmem:[#allocation10_spill] sm:$0xff] %v7033_v48  ;;  %v7035_v6 = vadd.f32 %v2132_v52, %v1779_v43  ;;  %v1781_v62 = vpop.f32.mrf.mxu0  ;;  %v974_v52 = vld [vmem:[%s5851_s9 + $0x378] sm:$0xff] }
 0x197   : > { %v2134_v24 = vpop.f32.mrf.mxu1 }
 0x198   : > { %9664 = vst [vmem:[#allocation11_spill] sm:$0xff] %v7035_v6  ;;  %v7037_v54 = vadd.f32 %v2134_v24, %v1781_v62  ;;  %v1785_v25 = vpop.f32.mrf.mxu0  ;;  %2410 = vmatmul.mubr.bf16.gmra.mxu0 %v1411_v49  ;;  %v966_v24 = vld [vmem:[%s5851_s9 + $0x338] sm:$0xff]  ;;  %v1421_v6 = vpack.c.bf16 %v957_v34, %v949_v19  ;;  %v965_v19 = vld [vmem:[%s5851_s9 + $0x330] sm:$0xff] }
 0x199   : > { %v2138_v36 = vpop.f32.mrf.mxu1  ;;  %2763 = vmatmul.mubr.bf16.gmra.mxu1 %v1413_v56  ;;  %2419 = vmatprep.mubr.bf16.mxu0 %v1420_v0  ;;  %v1419_v56 = vpack.c.bf16 %v955_v13, %v947_v12  ;;  %v963_v12 = vld [vmem:[%s5851_s9 + $0x320] sm:$0xff] }
 0x19a   : > { %9665 = vst [vmem:[#allocation12_spill] sm:$0xff] %v7037_v54  ;;  %v7042_v26 = vadd.f32 %v2138_v36, %v1785_v25  ;;  %v1787_v32 = vpop.f32.mrf.mxu0  ;;  %2772 = vmatprep.mubr.bf16.mxu1 %v1422_v10  ;;  %v1428_v54 = vpack.c.bf16 %v972_v41, %v964_v37  ;;  %v1430_v36 = vpack.c.bf16 %v974_v52, %v966_v24  ;;  %v971_v13 = vld [vmem:[%s5851_s9 + $0x360] sm:$0xff]  ;;  %v973_v41 = vld [vmem:[%s5851_s9 + $0x370] sm:$0xff]  ;;  %v980_v24 = vld [vmem:[%s5851_s9 + $0x3a8] sm:$0xff] }
 0x19b   : > { %v2140_v43 = vpop.f32.mrf.mxu1  ;;  %v988_v52 = vld [vmem:[%s5851_s9 + $0x3e8] sm:$0xff] }
 0x19c   : > { %9666 = vst [vmem:[#allocation13_spill] sm:$0xff] %v7042_v26  ;;  %v7049_v62 = vadd.f32 %v2140_v43, %v1787_v32  ;;  %v1789_v49 = vpop.f32.mrf.mxu0 }
 0x19d   : > { %v2142_v0 = vpop.f32.mrf.mxu1 }
 0x19e   : > { %9667 = vst [vmem:[#allocation14_spill] sm:$0xff] %v7049_v62  ;;  %v7051_v25 = vadd.f32 %v2142_v0, %v1789_v49  ;;  %v1791_v10 = vpop.f32.mrf.mxu0  ;;  %v990_v0 = vld [vmem:[%s5851_s9 + $0x3f8] sm:$0xff] }
 0x19f   : > { %v2144_v26 = vpop.f32.mrf.mxu1 }
 0x1a0   : > { %9668 = vst [vmem:[#allocation15_spill] sm:$0xff] %v7051_v25  ;;  %v7053_v48 = vadd.f32 %v2144_v26, %v1791_v10  ;;  %v1795_v32 = vpop.f32.mrf.mxu0  ;;  %2420 = vmatmul.mubr.bf16.gmra.mxu0 %v1419_v56  ;;  %v982_v26 = vld [vmem:[%s5851_s9 + $0x3b8] sm:$0xff]  ;;  %v1429_v25 = vpack.c.bf16 %v973_v41, %v965_v19  ;;  %v981_v19 = vld [vmem:[%s5851_s9 + $0x3b0] sm:$0xff] }
 0x1a1   : > { %v2148_v43 = vpop.f32.mrf.mxu1  ;;  %2773 = vmatmul.mubr.bf16.gmra.mxu1 %v1421_v6  ;;  %2429 = vmatprep.mubr.bf16.mxu0 %v1428_v54  ;;  %v1427_v6 = vpack.c.bf16 %v971_v13, %v963_v12  ;;  %v979_v12 = vld [vmem:[%s5851_s9 + $0x3a0] sm:$0xff] }
 0x1a2   : > { %9669 = vst [vmem:[#allocation16_spill] sm:$0xff] %v7053_v48  ;;  %v7058_v34 = vadd.f32 %v2148_v43, %v1795_v32  ;;  %v1797_v37 = vpop.f32.mrf.mxu0  ;;  %2782 = vmatprep.mubr.bf16.mxu1 %v1430_v36  ;;  %v1436_v48 = vpack.c.bf16 %v988_v52, %v980_v24  ;;  %v1438_v43 = vpack.c.bf16 %v990_v0, %v982_v26  ;;  %v987_v13 = vld [vmem:[%s5851_s9 + $0x3e0] sm:$0xff]  ;;  %v989_v52 = vld [vmem:[%s5851_s9 + $0x3f0] sm:$0xff]  ;;  %v996_v26 = vld [vmem:[%s5851_s9 + $0x428] sm:$0xff] }
 0x1a3   : > { %v2150_v49 = vpop.f32.mrf.mxu1  ;;  %v1004_v0 = vld [vmem:[%s5851_s9 + $0x468] sm:$0xff] }
 0x1a4   : > { %9670 = vst [vmem:[#allocation17_spill] sm:$0xff] %v7058_v34  ;;  %v7065_v10 = vadd.f32 %v2150_v49, %v1797_v37  ;;  %v1799_v56 = vpop.f32.mrf.mxu0 }
 0x1a5   : > { %v2152_v54 = vpop.f32.mrf.mxu1 }
 0x1a6   : > { %9671 = vst [vmem:[#allocation18_spill] sm:$0xff] %v7065_v10  ;;  %v7067_v32 = vadd.f32 %v2152_v54, %v1799_v56  ;;  %v1801_v36 = vpop.f32.mrf.mxu0  ;;  %v1006_v54 = vld [vmem:[%s5851_s9 + $0x478] sm:$0xff] }
 0x1a7   : > { %v2154_v34 = vpop.f32.mrf.mxu1 }
 0x1a8   : > { %9672 = vst [vmem:[#allocation19_spill] sm:$0xff] %v7067_v32  ;;  %v7069_v62 = vadd.f32 %v2154_v34, %v1801_v36  ;;  %v1805_v37 = vpop.f32.mrf.mxu0  ;;  %2430 = vmatmul.mubr.bf16.gmra.mxu0 %v1427_v6  ;;  %v998_v34 = vld [vmem:[%s5851_s9 + $0x438] sm:$0xff]  ;;  %v1437_v32 = vpack.c.bf16 %v989_v52, %v981_v19  ;;  %v997_v19 = vld [vmem:[%s5851_s9 + $0x430] sm:$0xff] }
 0x1a9   : > { %v2158_v49 = vpop.f32.mrf.mxu1  ;;  %2783 = vmatmul.mubr.bf16.gmra.mxu1 %v1429_v25  ;;  %2439 = vmatprep.mubr.bf16.mxu0 %v1436_v48  ;;  %v1435_v25 = vpack.c.bf16 %v987_v13, %v979_v12  ;;  %v995_v12 = vld [vmem:[%s5851_s9 + $0x420] sm:$0xff] }
 0x1aa   : > { %9673 = vst [vmem:[#allocation20_spill] sm:$0xff] %v7069_v62  ;;  %v7074_v41 = vadd.f32 %v2158_v49, %v1805_v37  ;;  %v1807_v24 = vpop.f32.mrf.mxu0  ;;  %2792 = vmatprep.mubr.bf16.mxu1 %v1438_v43  ;;  %v1444_v62 = vpack.c.bf16 %v1004_v0, %v996_v26  ;;  %v1446_v49 = vpack.c.bf16 %v1006_v54, %v998_v34  ;;  %v1003_v13 = vld [vmem:[%s5851_s9 + $0x460] sm:$0xff]  ;;  %v1005_v0 = vld [vmem:[%s5851_s9 + $0x470] sm:$0xff]  ;;  %v1012_v34 = vld [vmem:[%s5851_s9 + $0x4a8] sm:$0xff] }
 0x1ab   : > { %v2160_v56 = vpop.f32.mrf.mxu1  ;;  %v1020_v54 = vld [vmem:[%s5851_s9 + $0x4e8] sm:$0xff] }
 0x1ac   : > { %9674 = vst [vmem:[#allocation21_spill] sm:$0xff] %v7074_v41  ;;  %v7081_v36 = vadd.f32 %v2160_v56, %v1807_v24  ;;  %v1809_v6 = vpop.f32.mrf.mxu0 }
 0x1ad   : > { %v2162_v48 = vpop.f32.mrf.mxu1 }
 0x1ae   : > { %9675 = vst [vmem:[#allocation22_spill] sm:$0xff] %v7081_v36  ;;  %v7083_v37 = vadd.f32 %v2162_v48, %v1809_v6  ;;  %v1811_v43 = vpop.f32.mrf.mxu0  ;;  %v1022_v48 = vld [vmem:[%s5851_s9 + $0x4f8] sm:$0xff] }
 0x1af   : > { %v2164_v41 = vpop.f32.mrf.mxu1 }
 0x1b0   : > { %9676 = vst [vmem:[#allocation23_spill] sm:$0xff] %v7083_v37  ;;  %v7085_v10 = vadd.f32 %v2164_v41, %v1811_v43  ;;  %v1815_v24 = vpop.f32.mrf.mxu0  ;;  %2440 = vmatmul.mubr.bf16.gmra.mxu0 %v1435_v25  ;;  %v1014_v41 = vld [vmem:[%s5851_s9 + $0x4b8] sm:$0xff]  ;;  %v1445_v37 = vpack.c.bf16 %v1005_v0, %v997_v19  ;;  %v1013_v19 = vld [vmem:[%s5851_s9 + $0x4b0] sm:$0xff] }
 0x1b1   : > { %v2168_v56 = vpop.f32.mrf.mxu1  ;;  %2793 = vmatmul.mubr.bf16.gmra.mxu1 %v1437_v32  ;;  %2449 = vmatprep.mubr.bf16.mxu0 %v1444_v62  ;;  %v1443_v32 = vpack.c.bf16 %v1003_v13, %v995_v12  ;;  %v1011_v12 = vld [vmem:[%s5851_s9 + $0x4a0] sm:$0xff] }
 0x1b2   : > { %9677 = vst [vmem:[#allocation24_spill] sm:$0xff] %v7085_v10  ;;  %v7090_v52 = vadd.f32 %v2168_v56, %v1815_v24  ;;  %v1817_v26 = vpop.f32.mrf.mxu0  ;;  %2802 = vmatprep.mubr.bf16.mxu1 %v1446_v49  ;;  %v1452_v10 = vpack.c.bf16 %v1020_v54, %v1012_v34  ;;  %v1454_v56 = vpack.c.bf16 %v1022_v48, %v1014_v41  ;;  %v1019_v13 = vld [vmem:[%s5851_s9 + $0x4e0] sm:$0xff]  ;;  %v1021_v54 = vld [vmem:[%s5851_s9 + $0x4f0] sm:$0xff]  ;;  %v1028_v41 = vld [vmem:[%s5851_s9 + $0x528] sm:$0xff] }
 0x1b3   : > { %v2170_v6 = vpop.f32.mrf.mxu1  ;;  %v1036_v48 = vld [vmem:[%s5851_s9 + $0x568] sm:$0xff] }
 0x1b4   : > { %9678 = vst [vmem:[#allocation25_spill] sm:$0xff] %v7090_v52  ;;  %v7097_v43 = vadd.f32 %v2170_v6, %v1817_v26  ;;  %v1819_v25 = vpop.f32.mrf.mxu0 }
 0x1b5   : > { %v2172_v62 = vpop.f32.mrf.mxu1 }
 0x1b6   : > { %9679 = vst [vmem:[#allocation26_spill] sm:$0xff] %v7097_v43  ;;  %v7099_v24 = vadd.f32 %v2172_v62, %v1819_v25  ;;  %v1821_v49 = vpop.f32.mrf.mxu0  ;;  %v1038_v62 = vld [vmem:[%s5851_s9 + $0x578] sm:$0xff] }
 0x1b7   : > { %v2174_v52 = vpop.f32.mrf.mxu1 }
 0x1b8   : > { %9680 = vst [vmem:[#allocation27_spill] sm:$0xff] %v7099_v24  ;;  %v7101_v36 = vadd.f32 %v2174_v52, %v1821_v49  ;;  %v1825_v26 = vpop.f32.mrf.mxu0  ;;  %2450 = vmatmul.mubr.bf16.gmra.mxu0 %v1443_v32  ;;  %v1030_v52 = vld [vmem:[%s5851_s9 + $0x538] sm:$0xff]  ;;  %v1453_v24 = vpack.c.bf16 %v1021_v54, %v1013_v19  ;;  %v1029_v19 = vld [vmem:[%s5851_s9 + $0x530] sm:$0xff] }
 0x1b9   : > { %v2178_v6 = vpop.f32.mrf.mxu1  ;;  %2803 = vmatmul.mubr.bf16.gmra.mxu1 %v1445_v37  ;;  %2459 = vmatprep.mubr.bf16.mxu0 %v1452_v10  ;;  %v1451_v37 = vpack.c.bf16 %v1019_v13, %v1011_v12  ;;  %v1027_v12 = vld [vmem:[%s5851_s9 + $0x520] sm:$0xff] }
 0x1ba   : > { %9681 = vst [vmem:[#allocation28_spill] sm:$0xff] %v7101_v36  ;;  %v7106_v0 = vadd.f32 %v2178_v6, %v1825_v26  ;;  %v1827_v34 = vpop.f32.mrf.mxu0  ;;  %2812 = vmatprep.mubr.bf16.mxu1 %v1454_v56  ;;  %v1460_v36 = vpack.c.bf16 %v1036_v48, %v1028_v41  ;;  %v1462_v6 = vpack.c.bf16 %v1038_v62, %v1030_v52  ;;  %v1035_v13 = vld [vmem:[%s5851_s9 + $0x560] sm:$0xff]  ;;  %v1037_v48 = vld [vmem:[%s5851_s9 + $0x570] sm:$0xff]  ;;  %v1044_v52 = vld [vmem:[%s5851_s9 + $0x5a8] sm:$0xff] }
 0x1bb   : > { %v2180_v25 = vpop.f32.mrf.mxu1  ;;  %v1052_v62 = vld [vmem:[%s5851_s9 + $0x5e8] sm:$0xff] }
 0x1bc   : > { %9682 = vst [vmem:[#allocation29_spill] sm:$0xff] %v7106_v0  ;;  %v7113_v49 = vadd.f32 %v2180_v25, %v1827_v34  ;;  %v1829_v32 = vpop.f32.mrf.mxu0 }
 0x1bd   : > { %v2182_v10 = vpop.f32.mrf.mxu1 }
 0x1be   : > { %9683 = vst [vmem:[#allocation30_spill] sm:$0xff] %v7113_v49  ;;  %v7115_v26 = vadd.f32 %v2182_v10, %v1829_v32  ;;  %v1831_v56 = vpop.f32.mrf.mxu0  ;;  %v1054_v10 = vld [vmem:[%s5851_s9 + $0x5f8] sm:$0xff] }
 0x1bf   : > { %v2184_v0 = vpop.f32.mrf.mxu1 }
 0x1c0   : > { %9684 = vst [vmem:[#allocation31_spill] sm:$0xff] %v7115_v26  ;;  %v7117_v43 = vadd.f32 %v2184_v0, %v1831_v56  ;;  %v1835_v34 = vpop.f32.mrf.mxu0  ;;  %2460 = vmatmul.mubr.bf16.gmra.mxu0 %v1451_v37  ;;  %v1046_v0 = vld [vmem:[%s5851_s9 + $0x5b8] sm:$0xff]  ;;  %v1461_v26 = vpack.c.bf16 %v1037_v48, %v1029_v19  ;;  %v1045_v19 = vld [vmem:[%s5851_s9 + $0x5b0] sm:$0xff] }
 0x1c1   : > { %v2188_v25 = vpop.f32.mrf.mxu1  ;;  %2813 = vmatmul.mubr.bf16.gmra.mxu1 %v1453_v24  ;;  %2469 = vmatprep.mubr.bf16.mxu0 %v1460_v36  ;;  %v1459_v24 = vpack.c.bf16 %v1035_v13, %v1027_v12  ;;  %v1043_v12 = vld [vmem:[%s5851_s9 + $0x5a0] sm:$0xff] }
 0x1c2   : > { %9685 = vst [vmem:[#allocation32_spill] sm:$0xff] %v7117_v43  ;;  %v7122_v54 = vadd.f32 %v2188_v25, %v1835_v34  ;;  %v1837_v41 = vpop.f32.mrf.mxu0  ;;  %2822 = vmatprep.mubr.bf16.mxu1 %v1462_v6  ;;  %v1468_v43 = vpack.c.bf16 %v1052_v62, %v1044_v52  ;;  %v1470_v25 = vpack.c.bf16 %v1054_v10, %v1046_v0  ;;  %v1051_v13 = vld [vmem:[%s5851_s9 + $0x5e0] sm:$0xff]  ;;  %v1053_v62 = vld [vmem:[%s5851_s9 + $0x5f0] sm:$0xff]  ;;  %v1060_v0 = vld [vmem:[%s5851_s9 + $0x628] sm:$0xff] }
 0x1c3   : > { %v2190_v32 = vpop.f32.mrf.mxu1  ;;  %v1068_v10 = vld [vmem:[%s5851_s9 + $0x668] sm:$0xff] }
 0x1c4   : > { %9686 = vst [vmem:[#allocation33_spill] sm:$0xff] %v7122_v54  ;;  %v7129_v56 = vadd.f32 %v2190_v32, %v1837_v41  ;;  %v1839_v37 = vpop.f32.mrf.mxu0 }
 0x1c5   : > { %v2192_v36 = vpop.f32.mrf.mxu1 }
 0x1c6   : > { %9687 = vst [vmem:[#allocation34_spill] sm:$0xff] %v7129_v56  ;;  %v7131_v34 = vadd.f32 %v2192_v36, %v1839_v37  ;;  %v1841_v6 = vpop.f32.mrf.mxu0  ;;  %v1070_v36 = vld [vmem:[%s5851_s9 + $0x678] sm:$0xff] }
 0x1c7   : > { %v2194_v54 = vpop.f32.mrf.mxu1 }
 0x1c8   : > { %9688 = vst [vmem:[#allocation35_spill] sm:$0xff] %v7131_v34  ;;  %v7133_v49 = vadd.f32 %v2194_v54, %v1841_v6  ;;  %v1845_v41 = vpop.f32.mrf.mxu0  ;;  %2470 = vmatmul.mubr.bf16.gmra.mxu0 %v1459_v24  ;;  %v1062_v54 = vld [vmem:[%s5851_s9 + $0x638] sm:$0xff]  ;;  %v1469_v34 = vpack.c.bf16 %v1053_v62, %v1045_v19  ;;  %v1061_v19 = vld [vmem:[%s5851_s9 + $0x630] sm:$0xff] }
 0x1c9   : > { %v2198_v32 = vpop.f32.mrf.mxu1  ;;  %2823 = vmatmul.mubr.bf16.gmra.mxu1 %v1461_v26  ;;  %2479 = vmatprep.mubr.bf16.mxu0 %v1468_v43  ;;  %v1467_v26 = vpack.c.bf16 %v1051_v13, %v1043_v12  ;;  %v1059_v12 = vld [vmem:[%s5851_s9 + $0x620] sm:$0xff] }
 0x1ca   : > { %9689 = vst [vmem:[#allocation36_spill] sm:$0xff] %v7133_v49  ;;  %v7138_v48 = vadd.f32 %v2198_v32, %v1845_v41  ;;  %v1847_v52 = vpop.f32.mrf.mxu0  ;;  %2832 = vmatprep.mubr.bf16.mxu1 %v1470_v25  ;;  %v1476_v49 = vpack.c.bf16 %v1068_v10, %v1060_v0  ;;  %v1478_v32 = vpack.c.bf16 %v1070_v36, %v1062_v54  ;;  %v1067_v13 = vld [vmem:[%s5851_s9 + $0x660] sm:$0xff]  ;;  %v1069_v10 = vld [vmem:[%s5851_s9 + $0x670] sm:$0xff]  ;;  %v1076_v54 = vld [vmem:[%s5851_s9 + $0x6a8] sm:$0xff] }
 0x1cb   : > { %v2200_v37 = vpop.f32.mrf.mxu1  ;;  %v1084_v36 = vld [vmem:[%s5851_s9 + $0x6e8] sm:$0xff] }
 0x1cc   : > { %9690 = vst [vmem:[#allocation37_spill] sm:$0xff] %v7138_v48  ;;  %v7145_v6 = vadd.f32 %v2200_v37, %v1847_v52  ;;  %v1849_v24 = vpop.f32.mrf.mxu0 }
 0x1cd   : > { %v2202_v43 = vpop.f32.mrf.mxu1 }
 0x1ce   : > { %9691 = vst [vmem:[#allocation38_spill] sm:$0xff] %v7145_v6  ;;  %v7147_v41 = vadd.f32 %v2202_v43, %v1849_v24  ;;  %v1851_v25 = vpop.f32.mrf.mxu0  ;;  %v1086_v43 = vld [vmem:[%s5851_s9 + $0x6f8] sm:$0xff] }
 0x1cf   : > { %v2204_v48 = vpop.f32.mrf.mxu1 }
 0x1d0   : > { %9692 = vst [vmem:[#allocation39_spill] sm:$0xff] %v7147_v41  ;;  %v7149_v56 = vadd.f32 %v2204_v48, %v1851_v25  ;;  %v1855_v52 = vpop.f32.mrf.mxu0  ;;  %2480 = vmatmul.mubr.bf16.gmra.mxu0 %v1467_v26  ;;  %v1078_v48 = vld [vmem:[%s5851_s9 + $0x6b8] sm:$0xff]  ;;  %v1477_v41 = vpack.c.bf16 %v1069_v10, %v1061_v19  ;;  %v1077_v19 = vld [vmem:[%s5851_s9 + $0x6b0] sm:$0xff] }
 0x1d1   : > { %v2208_v37 = vpop.f32.mrf.mxu1  ;;  %2833 = vmatmul.mubr.bf16.gmra.mxu1 %v1469_v34  ;;  %2489 = vmatprep.mubr.bf16.mxu0 %v1476_v49  ;;  %v1475_v34 = vpack.c.bf16 %v1067_v13, %v1059_v12  ;;  %v1075_v12 = vld [vmem:[%s5851_s9 + $0x6a0] sm:$0xff] }
 0x1d2   : > { %9693 = vst [vmem:[#allocation40_spill] sm:$0xff] %v7149_v56  ;;  %v7154_v62 = vadd.f32 %v2208_v37, %v1855_v52  ;;  %v1857_v0 = vpop.f32.mrf.mxu0  ;;  %2842 = vmatprep.mubr.bf16.mxu1 %v1478_v32  ;;  %v1484_v56 = vpack.c.bf16 %v1084_v36, %v1076_v54  ;;  %v1486_v37 = vpack.c.bf16 %v1086_v43, %v1078_v48  ;;  %v1083_v13 = vld [vmem:[%s5851_s9 + $0x6e0] sm:$0xff]  ;;  %v1085_v36 = vld [vmem:[%s5851_s9 + $0x6f0] sm:$0xff]  ;;  %v1092_v48 = vld [vmem:[%s5851_s9 + $0x728] sm:$0xff] }
 0x1d3   : > { %v2210_v24 = vpop.f32.mrf.mxu1  ;;  %v1100_v43 = vld [vmem:[%s5851_s9 + $0x768] sm:$0xff] }
 0x1d4   : > { %9694 = vst [vmem:[#allocation41_spill] sm:$0xff] %v7154_v62  ;;  %v7161_v25 = vadd.f32 %v2210_v24, %v1857_v0  ;;  %v1859_v26 = vpop.f32.mrf.mxu0 }
 0x1d5   : > { %v2212_v49 = vpop.f32.mrf.mxu1 }
 0x1d6   : > { %9695 = vst [vmem:[#allocation42_spill] sm:$0xff] %v7161_v25  ;;  %v7163_v52 = vadd.f32 %v2212_v49, %v1859_v26  ;;  %v1861_v32 = vpop.f32.mrf.mxu0  ;;  %v1102_v49 = vld [vmem:[%s5851_s9 + $0x778] sm:$0xff] }
 0x1d7   : > { %v2214_v62 = vpop.f32.mrf.mxu1 }
 0x1d8   : > { %9696 = vst [vmem:[#allocation43_spill] sm:$0xff] %v7163_v52  ;;  %v7165_v6 = vadd.f32 %v2214_v62, %v1861_v32  ;;  %v1865_v0 = vpop.f32.mrf.mxu0  ;;  %2490 = vmatmul.mubr.bf16.gmra.mxu0 %v1475_v34  ;;  %v1094_v62 = vld [vmem:[%s5851_s9 + $0x738] sm:$0xff]  ;;  %v1485_v52 = vpack.c.bf16 %v1085_v36, %v1077_v19  ;;  %v1093_v19 = vld [vmem:[%s5851_s9 + $0x730] sm:$0xff] }
 0x1d9   : > { %v2218_v24 = vpop.f32.mrf.mxu1  ;;  %2843 = vmatmul.mubr.bf16.gmra.mxu1 %v1477_v41  ;;  %2499 = vmatprep.mubr.bf16.mxu0 %v1484_v56  ;;  %v1483_v41 = vpack.c.bf16 %v1083_v13, %v1075_v12  ;;  %v1091_v12 = vld [vmem:[%s5851_s9 + $0x720] sm:$0xff] }
 0x1da   : > { %9697 = vst [vmem:[#allocation44_spill] sm:$0xff] %v7165_v6  ;;  %v7170_v10 = vadd.f32 %v2218_v24, %v1865_v0  ;;  %v1867_v54 = vpop.f32.mrf.mxu0  ;;  %2852 = vmatprep.mubr.bf16.mxu1 %v1486_v37  ;;  %v1492_v6 = vpack.c.bf16 %v1100_v43, %v1092_v48  ;;  %v1494_v24 = vpack.c.bf16 %v1102_v49, %v1094_v62  ;;  %v1099_v13 = vld [vmem:[%s5851_s9 + $0x760] sm:$0xff]  ;;  %v1101_v43 = vld [vmem:[%s5851_s9 + $0x770] sm:$0xff]  ;;  %v1108_v62 = vld [vmem:[%s5851_s9 + $0x7a8] sm:$0xff] }
 0x1db   : > { %v2220_v26 = vpop.f32.mrf.mxu1  ;;  %v1116_v49 = vld [vmem:[%s5851_s9 + $0x7e8] sm:$0xff] }
 0x1dc   : > { %9698 = vst [vmem:[#allocation45_spill] sm:$0xff] %v7170_v10  ;;  %v7177_v32 = vadd.f32 %v2220_v26, %v1867_v54  ;;  %v1869_v34 = vpop.f32.mrf.mxu0 }
 0x1dd   : > { %v2222_v56 = vpop.f32.mrf.mxu1 }
 0x1de   : > { %9699 = vst [vmem:[#allocation46_spill] sm:$0xff] %v7177_v32  ;;  %v7179_v0 = vadd.f32 %v2222_v56, %v1869_v34  ;;  %v1871_v37 = vpop.f32.mrf.mxu0  ;;  %v1118_v56 = vld [vmem:[%s5851_s9 + $0x7f8] sm:$0xff] }
 0x1df   : > { %v2224_v10 = vpop.f32.mrf.mxu1 }
 0x1e0   : > { %9700 = vst [vmem:[#allocation47_spill] sm:$0xff] %v7179_v0  ;;  %v7181_v25 = vadd.f32 %v2224_v10, %v1871_v37  ;;  %v1875_v54 = vpop.f32.mrf.mxu0  ;;  %2500 = vmatmul.mubr.bf16.gmra.mxu0 %v1483_v41  ;;  %v1110_v10 = vld [vmem:[%s5851_s9 + $0x7b8] sm:$0xff]  ;;  %v1493_v0 = vpack.c.bf16 %v1101_v43, %v1093_v19  ;;  %v1109_v19 = vld [vmem:[%s5851_s9 + $0x7b0] sm:$0xff] }
 0x1e1   : > { %v2228_v26 = vpop.f32.mrf.mxu1  ;;  %2853 = vmatmul.mubr.bf16.gmra.mxu1 %v1485_v52  ;;  %2509 = vmatprep.mubr.bf16.mxu0 %v1492_v6  ;;  %v1491_v52 = vpack.c.bf16 %v1099_v13, %v1091_v12  ;;  %v1107_v12 = vld [vmem:[%s5851_s9 + $0x7a0] sm:$0xff] }
 0x1e2   : > { %9701 = vst [vmem:[#allocation48_spill] sm:$0xff] %v7181_v25  ;;  %v7186_v36 = vadd.f32 %v2228_v26, %v1875_v54  ;;  %v1877_v48 = vpop.f32.mrf.mxu0  ;;  %2862 = vmatprep.mubr.bf16.mxu1 %v1494_v24  ;;  %v1500_v25 = vpack.c.bf16 %v1116_v49, %v1108_v62  ;;  %v1502_v26 = vpack.c.bf16 %v1118_v56, %v1110_v10  ;;  %v1115_v13 = vld [vmem:[%s5851_s9 + $0x7e0] sm:$0xff]  ;;  %v1117_v49 = vld [vmem:[%s5851_s9 + $0x7f0] sm:$0xff]  ;;  %v1124_v10 = vld [vmem:[%s5851_s9 + $0x828] sm:$0xff] }
 0x1e3   : > { %v2230_v34 = vpop.f32.mrf.mxu1  ;;  %v1132_v56 = vld [vmem:[%s5851_s9 + $0x868] sm:$0xff] }
 0x1e4   : > { %9702 = vst [vmem:[#allocation49_spill] sm:$0xff] %v7186_v36  ;;  %v7193_v37 = vadd.f32 %v2230_v34, %v1877_v48  ;;  %v1879_v41 = vpop.f32.mrf.mxu0 }
 0x1e5   : > { %v2232_v6 = vpop.f32.mrf.mxu1 }
 0x1e6   : > { %9703 = vst [vmem:[#allocation50_spill] sm:$0xff] %v7193_v37  ;;  %v7195_v54 = vadd.f32 %v2232_v6, %v1879_v41  ;;  %v1881_v24 = vpop.f32.mrf.mxu0  ;;  %v1134_v6 = vld [vmem:[%s5851_s9 + $0x878] sm:$0xff] }
 0x1e7   : > { %v2234_v36 = vpop.f32.mrf.mxu1 }
 0x1e8   : > { %9704 = vst [vmem:[#allocation51_spill] sm:$0xff] %v7195_v54  ;;  %v7197_v32 = vadd.f32 %v2234_v36, %v1881_v24  ;;  %v1885_v48 = vpop.f32.mrf.mxu0  ;;  %2510 = vmatmul.mubr.bf16.gmra.mxu0 %v1491_v52  ;;  %v1126_v36 = vld [vmem:[%s5851_s9 + $0x838] sm:$0xff]  ;;  %v1501_v54 = vpack.c.bf16 %v1117_v49, %v1109_v19  ;;  %v1125_v19 = vld [vmem:[%s5851_s9 + $0x830] sm:$0xff] }
 0x1e9   : > { %v2238_v34 = vpop.f32.mrf.mxu1  ;;  %2863 = vmatmul.mubr.bf16.gmra.mxu1 %v1493_v0  ;;  %2519 = vmatprep.mubr.bf16.mxu0 %v1500_v25  ;;  %v1499_v0 = vpack.c.bf16 %v1115_v13, %v1107_v12  ;;  %v1123_v12 = vld [vmem:[%s5851_s9 + $0x820] sm:$0xff] }
 0x1ea   : > { %9705 = vst [vmem:[#allocation52_spill] sm:$0xff] %v7197_v32  ;;  %v7202_v43 = vadd.f32 %v2238_v34, %v1885_v48  ;;  %v1887_v62 = vpop.f32.mrf.mxu0  ;;  %2872 = vmatprep.mubr.bf16.mxu1 %v1502_v26  ;;  %v1508_v32 = vpack.c.bf16 %v1132_v56, %v1124_v10  ;;  %v1510_v34 = vpack.c.bf16 %v1134_v6, %v1126_v36  ;;  %v1131_v13 = vld [vmem:[%s5851_s9 + $0x860] sm:$0xff]  ;;  %v1133_v56 = vld [vmem:[%s5851_s9 + $0x870] sm:$0xff]  ;;  %v1140_v36 = vld [vmem:[%s5851_s9 + $0x8a8] sm:$0xff] }
 0x1eb   : > { %v2240_v41 = vpop.f32.mrf.mxu1  ;;  %v1148_v6 = vld [vmem:[%s5851_s9 + $0x8e8] sm:$0xff] }
 0x1ec   : > { %9706 = vst [vmem:[#allocation53_spill] sm:$0xff] %v7202_v43  ;;  %v7209_v24 = vadd.f32 %v2240_v41, %v1887_v62  ;;  %v1889_v52 = vpop.f32.mrf.mxu0 }
 0x1ed   : > { %v2242_v25 = vpop.f32.mrf.mxu1 }
 0x1ee   : > { %9707 = vst [vmem:[#allocation54_spill] sm:$0xff] %v7209_v24  ;;  %v7211_v48 = vadd.f32 %v2242_v25, %v1889_v52  ;;  %v1891_v26 = vpop.f32.mrf.mxu0  ;;  %v1150_v25 = vld [vmem:[%s5851_s9 + $0x8f8] sm:$0xff] }
 0x1ef   : > { %v2244_v43 = vpop.f32.mrf.mxu1 }
 0x1f0   : > { %9708 = vst [vmem:[#allocation55_spill] sm:$0xff] %v7211_v48  ;;  %v7213_v37 = vadd.f32 %v2244_v43, %v1891_v26  ;;  %v1895_v62 = vpop.f32.mrf.mxu0  ;;  %2520 = vmatmul.mubr.bf16.gmra.mxu0 %v1499_v0  ;;  %v1142_v43 = vld [vmem:[%s5851_s9 + $0x8b8] sm:$0xff]  ;;  %v1509_v48 = vpack.c.bf16 %v1133_v56, %v1125_v19  ;;  %v1141_v19 = vld [vmem:[%s5851_s9 + $0x8b0] sm:$0xff] }
 0x1f1   : > { %v2248_v41 = vpop.f32.mrf.mxu1  ;;  %2873 = vmatmul.mubr.bf16.gmra.mxu1 %v1501_v54  ;;  %2529 = vmatprep.mubr.bf16.mxu0 %v1508_v32  ;;  %v1507_v54 = vpack.c.bf16 %v1131_v13, %v1123_v12  ;;  %v1139_v12 = vld [vmem:[%s5851_s9 + $0x8a0] sm:$0xff] }
 0x1f2   : > { %9709 = vst [vmem:[#allocation56_spill] sm:$0xff] %v7213_v37  ;;  %v7218_v49 = vadd.f32 %v2248_v41, %v1895_v62  ;;  %v1897_v10 = vpop.f32.mrf.mxu0  ;;  %2882 = vmatprep.mubr.bf16.mxu1 %v1510_v34  ;;  %v1516_v37 = vpack.c.bf16 %v1148_v6, %v1140_v36  ;;  %v1518_v41 = vpack.c.bf16 %v1150_v25, %v1142_v43  ;;  %v1147_v13 = vld [vmem:[%s5851_s9 + $0x8e0] sm:$0xff]  ;;  %v1149_v6 = vld [vmem:[%s5851_s9 + $0x8f0] sm:$0xff]  ;;  %v1156_v43 = vld [vmem:[%s5851_s9 + $0x928] sm:$0xff] }
 0x1f3   : > { %v2250_v52 = vpop.f32.mrf.mxu1  ;;  %v1164_v25 = vld [vmem:[%s5851_s9 + $0x968] sm:$0xff] }
 0x1f4   : > { %9710 = vst [vmem:[#allocation57_spill] sm:$0xff] %v7218_v49  ;;  %v7225_v26 = vadd.f32 %v2250_v52, %v1897_v10  ;;  %v1899_v0 = vpop.f32.mrf.mxu0 }
 0x1f5   : > { %v2252_v32 = vpop.f32.mrf.mxu1 }
 0x1f6   : > { %9711 = vst [vmem:[#allocation58_spill] sm:$0xff] %v7225_v26  ;;  %v7227_v62 = vadd.f32 %v2252_v32, %v1899_v0  ;;  %v1901_v34 = vpop.f32.mrf.mxu0  ;;  %v1166_v32 = vld [vmem:[%s5851_s9 + $0x978] sm:$0xff] }
 0x1f7   : > { %v2254_v49 = vpop.f32.mrf.mxu1 }
 0x1f8   : > { %9712 = vst [vmem:[#allocation59_spill] sm:$0xff] %v7227_v62  ;;  %v7229_v24 = vadd.f32 %v2254_v49, %v1901_v34  ;;  %v1905_v10 = vpop.f32.mrf.mxu0  ;;  %2530 = vmatmul.mubr.bf16.gmra.mxu0 %v1507_v54  ;;  %v1158_v49 = vld [vmem:[%s5851_s9 + $0x938] sm:$0xff]  ;;  %v1517_v62 = vpack.c.bf16 %v1149_v6, %v1141_v19  ;;  %v1157_v19 = vld [vmem:[%s5851_s9 + $0x930] sm:$0xff] }
 0x1f9   : > { %v2258_v52 = vpop.f32.mrf.mxu1  ;;  %2883 = vmatmul.mubr.bf16.gmra.mxu1 %v1509_v48  ;;  %2539 = vmatprep.mubr.bf16.mxu0 %v1516_v37  ;;  %v1515_v48 = vpack.c.bf16 %v1147_v13, %v1139_v12  ;;  %v1155_v12 = vld [vmem:[%s5851_s9 + $0x920] sm:$0xff] }
 0x1fa   : > { %9713 = vst [vmem:[#allocation60_spill] sm:$0xff] %v7229_v24  ;;  %v7234_v56 = vadd.f32 %v2258_v52, %v1905_v10  ;;  %v1907_v36 = vpop.f32.mrf.mxu0  ;;  %2892 = vmatprep.mubr.bf16.mxu1 %v1518_v41  ;;  %v1524_v24 = vpack.c.bf16 %v1164_v25, %v1156_v43  ;;  %v1526_v52 = vpack.c.bf16 %v1166_v32, %v1158_v49  ;;  %v1163_v13 = vld [vmem:[%s5851_s9 + $0x960] sm:$0xff]  ;;  %v1165_v25 = vld [vmem:[%s5851_s9 + $0x970] sm:$0xff]  ;;  %v1172_v49 = vld [vmem:[%s5851_s9 + $0x9a8] sm:$0xff] }
 0x1fb   : > { %v2260_v0 = vpop.f32.mrf.mxu1  ;;  %v1180_v32 = vld [vmem:[%s5851_s9 + $0x9e8] sm:$0xff] }
 0x1fc   : > { %9714 = vst [vmem:[#allocation61_spill] sm:$0xff] %v7234_v56  ;;  %v7241_v34 = vadd.f32 %v2260_v0, %v1907_v36  ;;  %v1909_v54 = vpop.f32.mrf.mxu0 }
 0x1fd   : > { %v2262_v37 = vpop.f32.mrf.mxu1 }
 0x1fe   : > { %9715 = vst [vmem:[#allocation62_spill] sm:$0xff] %v7241_v34  ;;  %v7243_v10 = vadd.f32 %v2262_v37, %v1909_v54  ;;  %v1911_v41 = vpop.f32.mrf.mxu0  ;;  %v1182_v37 = vld [vmem:[%s5851_s9 + $0x9f8] sm:$0xff] }
 0x1ff   : > { %v2264_v56 = vpop.f32.mrf.mxu1 }
 0x200   : > { %9716 = vst [vmem:[#allocation63_spill] sm:$0xff] %v7243_v10  ;;  %v7245_v26 = vadd.f32 %v2264_v56, %v1911_v41  ;;  %v1915_v36 = vpop.f32.mrf.mxu0  ;;  %2540 = vmatmul.mubr.bf16.gmra.mxu0 %v1515_v48  ;;  %v1174_v56 = vld [vmem:[%s5851_s9 + $0x9b8] sm:$0xff]  ;;  %v1525_v10 = vpack.c.bf16 %v1165_v25, %v1157_v19  ;;  %v1173_v19 = vld [vmem:[%s5851_s9 + $0x9b0] sm:$0xff] }
 0x201   : > { %v2268_v0 = vpop.f32.mrf.mxu1  ;;  %2893 = vmatmul.mubr.bf16.gmra.mxu1 %v1517_v62  ;;  %2549 = vmatprep.mubr.bf16.mxu0 %v1524_v24  ;;  %v1523_v62 = vpack.c.bf16 %v1163_v13, %v1155_v12  ;;  %v1171_v12 = vld [vmem:[%s5851_s9 + $0x9a0] sm:$0xff] }
 0x202   : > { %9717 = vst [vmem:[#allocation64_spill] sm:$0xff] %v7245_v26  ;;  %v7250_v6 = vadd.f32 %v2268_v0, %v1915_v36  ;;  %v1917_v43 = vpop.f32.mrf.mxu0  ;;  %2902 = vmatprep.mubr.bf16.mxu1 %v1526_v52  ;;  %v1532_v26 = vpack.c.bf16 %v1180_v32, %v1172_v49  ;;  %v1534_v0 = vpack.c.bf16 %v1182_v37, %v1174_v56  ;;  %v1179_v13 = vld [vmem:[%s5851_s9 + $0x9e0] sm:$0xff]  ;;  %v1181_v32 = vld [vmem:[%s5851_s9 + $0x9f0] sm:$0xff]  ;;  %v1188_v56 = vld [vmem:[%s5851_s9 + $0xa28] sm:$0xff] }
 0x203   : > { %v2270_v54 = vpop.f32.mrf.mxu1  ;;  %v1196_v37 = vld [vmem:[%s5851_s9 + $0xa68] sm:$0xff] }
 0x204   : > { %9718 = vst [vmem:[#allocation65_spill] sm:$0xff] %v7250_v6  ;;  %v7257_v41 = vadd.f32 %v2270_v54, %v1917_v43  ;;  %v1919_v48 = vpop.f32.mrf.mxu0 }
 0x205   : > { %v2272_v24 = vpop.f32.mrf.mxu1 }
 0x206   : > { %9719 = vst [vmem:[#allocation66_spill] sm:$0xff] %v7257_v41  ;;  %v7259_v36 = vadd.f32 %v2272_v24, %v1919_v48  ;;  %v1921_v52 = vpop.f32.mrf.mxu0  ;;  %v1198_v24 = vld [vmem:[%s5851_s9 + $0xa78] sm:$0xff] }
 0x207   : > { %v2274_v6 = vpop.f32.mrf.mxu1 }
 0x208   : > { %9720 = vst [vmem:[#allocation67_spill] sm:$0xff] %v7259_v36  ;;  %v7261_v34 = vadd.f32 %v2274_v6, %v1921_v52  ;;  %v1925_v43 = vpop.f32.mrf.mxu0  ;;  %2550 = vmatmul.mubr.bf16.gmra.mxu0 %v1523_v62  ;;  %v1190_v6 = vld [vmem:[%s5851_s9 + $0xa38] sm:$0xff]  ;;  %v1533_v36 = vpack.c.bf16 %v1181_v32, %v1173_v19  ;;  %v1189_v19 = vld [vmem:[%s5851_s9 + $0xa30] sm:$0xff] }
 0x209   : > { %v2278_v54 = vpop.f32.mrf.mxu1  ;;  %2903 = vmatmul.mubr.bf16.gmra.mxu1 %v1525_v10  ;;  %2559 = vmatprep.mubr.bf16.mxu0 %v1532_v26  ;;  %v1531_v10 = vpack.c.bf16 %v1179_v13, %v1171_v12  ;;  %v1187_v12 = vld [vmem:[%s5851_s9 + $0xa20] sm:$0xff] }
 0x20a   : > { %9721 = vst [vmem:[#allocation68_spill] sm:$0xff] %v7261_v34  ;;  %v7266_v25 = vadd.f32 %v2278_v54, %v1925_v43  ;;  %v1927_v49 = vpop.f32.mrf.mxu0  ;;  %2912 = vmatprep.mubr.bf16.mxu1 %v1534_v0  ;;  %v1540_v34 = vpack.c.bf16 %v1196_v37, %v1188_v56  ;;  %v1542_v54 = vpack.c.bf16 %v1198_v24, %v1190_v6  ;;  %v1195_v13 = vld [vmem:[%s5851_s9 + $0xa60] sm:$0xff]  ;;  %v1197_v37 = vld [vmem:[%s5851_s9 + $0xa70] sm:$0xff]  ;;  %v1204_v6 = vld [vmem:[%s5851_s9 + $0xaa8] sm:$0xff] }
 0x20b   : > { %v2280_v48 = vpop.f32.mrf.mxu1  ;;  %v1212_v24 = vld [vmem:[%s5851_s9 + $0xae8] sm:$0xff] }
 0x20c   : > { %9722 = vst [vmem:[#allocation69_spill] sm:$0xff] %v7266_v25  ;;  %v7273_v52 = vadd.f32 %v2280_v48, %v1927_v49  ;;  %v1929_v62 = vpop.f32.mrf.mxu0 }
 0x20d   : > { %v2282_v26 = vpop.f32.mrf.mxu1 }
 0x20e   : > { %9723 = vst [vmem:[#allocation70_spill] sm:$0xff] %v7273_v52  ;;  %v7275_v43 = vadd.f32 %v2282_v26, %v1929_v62  ;;  %v1931_v0 = vpop.f32.mrf.mxu0  ;;  %v1214_v26 = vld [vmem:[%s5851_s9 + $0xaf8] sm:$0xff] }
 0x20f   : > { %v2284_v25 = vpop.f32.mrf.mxu1 }
 0x210   : > { %9724 = vst [vmem:[#allocation71_spill] sm:$0xff] %v7275_v43  ;;  %v7277_v41 = vadd.f32 %v2284_v25, %v1931_v0  ;;  %v1935_v49 = vpop.f32.mrf.mxu0  ;;  %2560 = vmatmul.mubr.bf16.gmra.mxu0 %v1531_v10  ;;  %v1206_v25 = vld [vmem:[%s5851_s9 + $0xab8] sm:$0xff]  ;;  %v1541_v43 = vpack.c.bf16 %v1197_v37, %v1189_v19  ;;  %v1205_v19 = vld [vmem:[%s5851_s9 + $0xab0] sm:$0xff] }
 0x211   : > { %v2288_v48 = vpop.f32.mrf.mxu1  ;;  %2913 = vmatmul.mubr.bf16.gmra.mxu1 %v1533_v36  ;;  %2569 = vmatprep.mubr.bf16.mxu0 %v1540_v34  ;;  %v1539_v36 = vpack.c.bf16 %v1195_v13, %v1187_v12  ;;  %v1203_v12 = vld [vmem:[%s5851_s9 + $0xaa0] sm:$0xff] }
 0x212   : > { %9725 = vst [vmem:[#allocation72_spill] sm:$0xff] %v7277_v41  ;;  %v7282_v32 = vadd.f32 %v2288_v48, %v1935_v49  ;;  %v1937_v56 = vpop.f32.mrf.mxu0  ;;  %2922 = vmatprep.mubr.bf16.mxu1 %v1542_v54  ;;  %v1548_v41 = vpack.c.bf16 %v1212_v24, %v1204_v6  ;;  %v1550_v48 = vpack.c.bf16 %v1214_v26, %v1206_v25  ;;  %v1211_v13 = vld [vmem:[%s5851_s9 + $0xae0] sm:$0xff]  ;;  %v1213_v24 = vld [vmem:[%s5851_s9 + $0xaf0] sm:$0xff]  ;;  %v1220_v25 = vld [vmem:[%s5851_s9 + $0xb28] sm:$0xff] }
 0x213   : > { %v2290_v62 = vpop.f32.mrf.mxu1  ;;  %v1228_v26 = vld [vmem:[%s5851_s9 + $0xb68] sm:$0xff] }
 0x214   : > { %9726 = vst [vmem:[#allocation73_spill] sm:$0xff] %v7282_v32  ;;  %v7289_v0 = vadd.f32 %v2290_v62, %v1937_v56  ;;  %v1939_v10 = vpop.f32.mrf.mxu0 }
 0x215   : > { %v2292_v34 = vpop.f32.mrf.mxu1 }
 0x216   : > { %9727 = vst [vmem:[#allocation74_spill] sm:$0xff] %v7289_v0  ;;  %v7291_v49 = vadd.f32 %v2292_v34, %v1939_v10  ;;  %v1941_v54 = vpop.f32.mrf.mxu0  ;;  %v1230_v34 = vld [vmem:[%s5851_s9 + $0xb78] sm:$0xff] }
 0x217   : > { %v2294_v32 = vpop.f32.mrf.mxu1 }
 0x218   : > { %9728 = vst [vmem:[#allocation75_spill] sm:$0xff] %v7291_v49  ;;  %v7293_v52 = vadd.f32 %v2294_v32, %v1941_v54  ;;  %v1945_v56 = vpop.f32.mrf.mxu0  ;;  %2570 = vmatmul.mubr.bf16.gmra.mxu0 %v1539_v36  ;;  %v1222_v32 = vld [vmem:[%s5851_s9 + $0xb38] sm:$0xff]  ;;  %v1549_v49 = vpack.c.bf16 %v1213_v24, %v1205_v19  ;;  %v1221_v19 = vld [vmem:[%s5851_s9 + $0xb30] sm:$0xff] }
 0x219   : > { %v2298_v62 = vpop.f32.mrf.mxu1  ;;  %2923 = vmatmul.mubr.bf16.gmra.mxu1 %v1541_v43  ;;  %2579 = vmatprep.mubr.bf16.mxu0 %v1548_v41  ;;  %v1547_v43 = vpack.c.bf16 %v1211_v13, %v1203_v12  ;;  %v1219_v12 = vld [vmem:[%s5851_s9 + $0xb20] sm:$0xff] }
 0x21a   : > { %9729 = vst [vmem:[#allocation76_spill] sm:$0xff] %v7293_v52  ;;  %v7298_v37 = vadd.f32 %v2298_v62, %v1945_v56  ;;  %v1947_v6 = vpop.f32.mrf.mxu0  ;;  %2932 = vmatprep.mubr.bf16.mxu1 %v1550_v48  ;;  %v1556_v52 = vpack.c.bf16 %v1228_v26, %v1220_v25  ;;  %v1558_v62 = vpack.c.bf16 %v1230_v34, %v1222_v32  ;;  %v1227_v13 = vld [vmem:[%s5851_s9 + $0xb60] sm:$0xff]  ;;  %v1229_v26 = vld [vmem:[%s5851_s9 + $0xb70] sm:$0xff]  ;;  %v1236_v32 = vld [vmem:[%s5851_s9 + $0xba8] sm:$0xff] }
 0x21b   : > { %v2300_v10 = vpop.f32.mrf.mxu1  ;;  %v1244_v34 = vld [vmem:[%s5851_s9 + $0xbe8] sm:$0xff] }
 0x21c   : > { %9730 = vst [vmem:[#allocation77_spill] sm:$0xff] %v7298_v37  ;;  %v7305_v54 = vadd.f32 %v2300_v10, %v1947_v6  ;;  %v1949_v36 = vpop.f32.mrf.mxu0 }
 0x21d   : > { %v2302_v41 = vpop.f32.mrf.mxu1 }
 0x21e   : > { %9731 = vst [vmem:[#allocation78_spill] sm:$0xff] %v7305_v54  ;;  %v7307_v56 = vadd.f32 %v2302_v41, %v1949_v36  ;;  %v1951_v48 = vpop.f32.mrf.mxu0  ;;  %v1246_v41 = vld [vmem:[%s5851_s9 + $0xbf8] sm:$0xff] }
 0x21f   : > { %v2304_v37 = vpop.f32.mrf.mxu1 }
 0x220   : > { %9732 = vst [vmem:[#allocation79_spill] sm:$0xff] %v7307_v56  ;;  %v7309_v0 = vadd.f32 %v2304_v37, %v1951_v48  ;;  %v1955_v6 = vpop.f32.mrf.mxu0  ;;  %2580 = vmatmul.mubr.bf16.gmra.mxu0 %v1547_v43  ;;  %v1238_v37 = vld [vmem:[%s5851_s9 + $0xbb8] sm:$0xff]  ;;  %v1557_v56 = vpack.c.bf16 %v1229_v26, %v1221_v19  ;;  %v1237_v19 = vld [vmem:[%s5851_s9 + $0xbb0] sm:$0xff] }
 0x221   : > { %v2308_v10 = vpop.f32.mrf.mxu1  ;;  %2933 = vmatmul.mubr.bf16.gmra.mxu1 %v1549_v49  ;;  %2589 = vmatprep.mubr.bf16.mxu0 %v1556_v52  ;;  %v1555_v49 = vpack.c.bf16 %v1227_v13, %v1219_v12  ;;  %v1235_v12 = vld [vmem:[%s5851_s9 + $0xba0] sm:$0xff] }
 0x222   : > { %9733 = vst [vmem:[#allocation80_spill] sm:$0xff] %v7309_v0  ;;  %v7314_v24 = vadd.f32 %v2308_v10, %v1955_v6  ;;  %v1957_v25 = vpop.f32.mrf.mxu0  ;;  %2942 = vmatprep.mubr.bf16.mxu1 %v1558_v62  ;;  %v1564_v0 = vpack.c.bf16 %v1244_v34, %v1236_v32  ;;  %v1566_v10 = vpack.c.bf16 %v1246_v41, %v1238_v37  ;;  %v1243_v13 = vld [vmem:[%s5851_s9 + $0xbe0] sm:$0xff]  ;;  %v1245_v34 = vld [vmem:[%s5851_s9 + $0xbf0] sm:$0xff]  ;;  %v1252_v37 = vld [vmem:[%s5851_s9 + $0xc28] sm:$0xff] }
 0x223   : > { %v2310_v36 = vpop.f32.mrf.mxu1  ;;  %v1260_v41 = vld [vmem:[%s5851_s9 + $0xc68] sm:$0xff] }
 0x224   : > { %9734 = vst [vmem:[#allocation81_spill] sm:$0xff] %v7314_v24  ;;  %v7321_v48 = vadd.f32 %v2310_v36, %v1957_v25  ;;  %v1959_v43 = vpop.f32.mrf.mxu0 }
 0x225   : > { %v2312_v52 = vpop.f32.mrf.mxu1 }
 0x226   : > { %9735 = vst [vmem:[#allocation82_spill] sm:$0xff] %v7321_v48  ;;  %v7323_v6 = vadd.f32 %v2312_v52, %v1959_v43  ;;  %v1961_v62 = vpop.f32.mrf.mxu0  ;;  %v1262_v52 = vld [vmem:[%s5851_s9 + $0xc78] sm:$0xff] }
 0x227   : > { %v2314_v24 = vpop.f32.mrf.mxu1 }
 0x228   : > { %9736 = vst [vmem:[#allocation83_spill] sm:$0xff] %v7323_v6  ;;  %v7325_v54 = vadd.f32 %v2314_v24, %v1961_v62  ;;  %v1965_v25 = vpop.f32.mrf.mxu0  ;;  %2590 = vmatmul.mubr.bf16.gmra.mxu0 %v1555_v49  ;;  %v1254_v24 = vld [vmem:[%s5851_s9 + $0xc38] sm:$0xff]  ;;  %v1565_v6 = vpack.c.bf16 %v1245_v34, %v1237_v19  ;;  %v1253_v19 = vld [vmem:[%s5851_s9 + $0xc30] sm:$0xff] }
 0x229   : > { %v2318_v36 = vpop.f32.mrf.mxu1  ;;  %2943 = vmatmul.mubr.bf16.gmra.mxu1 %v1557_v56  ;;  %2599 = vmatprep.mubr.bf16.mxu0 %v1564_v0  ;;  %v1563_v56 = vpack.c.bf16 %v1243_v13, %v1235_v12  ;;  %v1251_v12 = vld [vmem:[%s5851_s9 + $0xc20] sm:$0xff] }
 0x22a   : > { %9737 = vst [vmem:[#allocation84_spill] sm:$0xff] %v7325_v54  ;;  %v7330_v26 = vadd.f32 %v2318_v36, %v1965_v25  ;;  %v1967_v32 = vpop.f32.mrf.mxu0  ;;  %2952 = vmatprep.mubr.bf16.mxu1 %v1566_v10  ;;  %v1572_v54 = vpack.c.bf16 %v1260_v41, %v1252_v37  ;;  %v1574_v36 = vpack.c.bf16 %v1262_v52, %v1254_v24  ;;  %v1259_v13 = vld [vmem:[%s5851_s9 + $0xc60] sm:$0xff]  ;;  %v1261_v41 = vld [vmem:[%s5851_s9 + $0xc70] sm:$0xff]  ;;  %v1268_v24 = vld [vmem:[%s5851_s9 + $0xca8] sm:$0xff] }
 0x22b   : > { %v2320_v43 = vpop.f32.mrf.mxu1  ;;  %v1276_v52 = vld [vmem:[%s5851_s9 + $0xce8] sm:$0xff] }
 0x22c   : > { %9738 = vst [vmem:[#allocation85_spill] sm:$0xff] %v7330_v26  ;;  %v7337_v62 = vadd.f32 %v2320_v43, %v1967_v32  ;;  %v1969_v49 = vpop.f32.mrf.mxu0 }
 0x22d   : > { %v2322_v0 = vpop.f32.mrf.mxu1 }
 0x22e   : > { %9739 = vst [vmem:[#allocation86_spill] sm:$0xff] %v7337_v62  ;;  %v7339_v25 = vadd.f32 %v2322_v0, %v1969_v49  ;;  %v1971_v10 = vpop.f32.mrf.mxu0  ;;  %v1278_v0 = vld [vmem:[%s5851_s9 + $0xcf8] sm:$0xff] }
 0x22f   : > { %v2324_v26 = vpop.f32.mrf.mxu1 }
 0x230   : > { %9740 = vst [vmem:[#allocation87_spill] sm:$0xff] %v7339_v25  ;;  %v7341_v48 = vadd.f32 %v2324_v26, %v1971_v10  ;;  %v1975_v32 = vpop.f32.mrf.mxu0  ;;  %2600 = vmatmul.mubr.bf16.gmra.mxu0 %v1563_v56  ;;  %v1270_v26 = vld [vmem:[%s5851_s9 + $0xcb8] sm:$0xff]  ;;  %v1573_v25 = vpack.c.bf16 %v1261_v41, %v1253_v19  ;;  %v1269_v19 = vld [vmem:[%s5851_s9 + $0xcb0] sm:$0xff] }
 0x231   : > { %v2328_v43 = vpop.f32.mrf.mxu1  ;;  %2953 = vmatmul.mubr.bf16.gmra.mxu1 %v1565_v6  ;;  %2609 = vmatprep.mubr.bf16.mxu0 %v1572_v54  ;;  %v1571_v6 = vpack.c.bf16 %v1259_v13, %v1251_v12  ;;  %v1267_v12 = vld [vmem:[%s5851_s9 + $0xca0] sm:$0xff] }
 0x232   : > { %9741 = vst [vmem:[#allocation88_spill] sm:$0xff] %v7341_v48  ;;  %v7346_v34 = vadd.f32 %v2328_v43, %v1975_v32  ;;  %v1977_v37 = vpop.f32.mrf.mxu0  ;;  %2962 = vmatprep.mubr.bf16.mxu1 %v1574_v36  ;;  %v1580_v48 = vpack.c.bf16 %v1276_v52, %v1268_v24  ;;  %v1582_v43 = vpack.c.bf16 %v1278_v0, %v1270_v26  ;;  %v1275_v13 = vld [vmem:[%s5851_s9 + $0xce0] sm:$0xff]  ;;  %v1277_v52 = vld [vmem:[%s5851_s9 + $0xcf0] sm:$0xff]  ;;  %v1284_v26 = vld [vmem:[%s5851_s9 + $0xd28] sm:$0xff] }
 0x233   : > { %v2330_v49 = vpop.f32.mrf.mxu1  ;;  %v1292_v0 = vld [vmem:[%s5851_s9 + $0xd68] sm:$0xff] }
 0x234   : > { %9742 = vst [vmem:[#allocation89_spill] sm:$0xff] %v7346_v34  ;;  %v7353_v10 = vadd.f32 %v2330_v49, %v1977_v37  ;;  %v1979_v56 = vpop.f32.mrf.mxu0 }
 0x235   : > { %v2332_v54 = vpop.f32.mrf.mxu1 }
 0x236   : > { %9743 = vst [vmem:[#allocation90_spill] sm:$0xff] %v7353_v10  ;;  %v7355_v32 = vadd.f32 %v2332_v54, %v1979_v56  ;;  %v1981_v36 = vpop.f32.mrf.mxu0  ;;  %v1286_v54 = vld [vmem:[%s5851_s9 + $0xd38] sm:$0xff] }
 0x237   : > { %v2334_v34 = vpop.f32.mrf.mxu1 }
 0x238   : > { %9744 = vst [vmem:[#allocation91_spill] sm:$0xff] %v7355_v32  ;;  %v7357_v62 = vadd.f32 %v2334_v34, %v1981_v36  ;;  %v2371_v37 = vpop.f32.mrf.mxu0  ;;  %2610 = vmatmul.mubr.bf16.gmra.mxu0 %v1571_v6  ;;  %v1294_v36 = vld [vmem:[%s5851_s9 + $0xd78] sm:$0xff]  ;;  %v1579_v32 = vpack.c.bf16 %v1275_v13, %v1267_v12 }
 0x239   : > { %v2724_v49 = vpop.f32.mrf.mxu1  ;;  %2963 = vmatmul.mubr.bf16.gmra.mxu1 %v1573_v25  ;;  %2619 = vmatprep.mubr.bf16.mxu0 %v1580_v48  ;;  %v2372_v41 = vadd.f32 %v2371_v37, %v6850_v55  ;;  %v1581_v55 = vpack.c.bf16 %v1277_v52, %v1269_v19  ;;  %v1588_v37 = vpack.c.bf16 %v1292_v0, %v1284_v26  ;;  %v1291_v26 = vld [vmem:[%s5851_s9 + $0xd60] sm:$0xff]  ;;  %v1285_v0 = vld [vmem:[%s5851_s9 + $0xd30] sm:$0xff] }
 0x23a   : > { %9745 = vst [vmem:[#allocation92_spill] sm:$0xff] %v7357_v62  ;;  %v2373_v24 = vpop.f32.mrf.mxu0  ;;  %2972 = vmatprep.mubr.bf16.mxu1 %v1582_v43  ;;  %v1590_v2 = vpack.c.bf16 %v1294_v36, %v1286_v54  ;;  %v1300_v54 = vld [vmem:[%s5851_s9 + $0xda8] sm:$0xff] }
 0x23b   : > { %v2374_v34 = vadd.f32 %v2373_v24, %v6857_v63  ;;  %v2726_v56 = vpop.f32.mrf.mxu1  ;;  %v7372_v43 = vadd.f32 %v2724_v49, %v2372_v41  ;;  %v1283_v41 = vld [vmem:[%s5851_s9 + $0xd20] sm:$0xff]  ;;  %v1308_v36 = vld [vmem:[%s5851_s9 + $0xde8] sm:$0xff] }
 0x23c   : > { %v2375_v6 = vpop.f32.mrf.mxu0 }
 0x23d   : > { %v7369_v25 = vadd.f32 %v2726_v56, %v2374_v34  ;;  %v2376_v48 = vadd.f32 %v2375_v6, %v6859_v5  ;;  %v2728_v62 = vpop.f32.mrf.mxu1  ;;  %9747 = vst [vmem:[#allocation94_spill] sm:$0xff] %v7372_v43  ;;  %v3300_v56 = vmul.f32 %v7372_v43, %v7372_v43 }
 0x23e   : > { %v2377_v10 = vpop.f32.mrf.mxu0 }
 0x23f   : > { %9746 = vst [vmem:[#allocation93_spill] sm:$0xff] %v7369_v25  ;;  %v2378_v63 = vadd.f32 %v2377_v10, %v6861_v9  ;;  %v2730_v24 = vpop.f32.mrf.mxu1  ;;  %v3044_v12 = vsel %vm3043_vm0, %v7369_v25, 0.0  ;;  %v3301_v13 = vmul.f32 %v7369_v25, %v7369_v25  ;;  %v7379_v5 = vadd.f32 %v2728_v62, %v2376_v48  ;;  %v1293_v62 = vld [vmem:[%s5851_s9 + $0xd70] sm:$0xff] }
 0x240   : > { %v2381_v19 = vpop.f32.mrf.mxu0  ;;  %2620 = vmatmul.mubr.bf16.gmra.mxu0 %v1579_v32  ;;  %v3045_v49 = vadd.f32 %v3044_v12, %v7372_v43 }
 0x241   : > { %v7383_v52 = vadd.f32 %v2730_v24, %v2378_v63  ;;  %v2734_v9 = vpop.f32.mrf.mxu1  ;;  %2973 = vmatmul.mubr.bf16.gmra.mxu1 %v1581_v55  ;;  %v3428_v10 = vsel %vm3043_vm0, %v3301_v13, 0.0  ;;  %2629 = vmatprep.mubr.bf16.mxu0 %v1588_v37  ;;  %v2382_v34 = vadd.f32 %v2381_v19, %v6866_v15  ;;  %v1302_v37 = vld [vmem:[%s5851_s9 + $0xdb8] sm:$0xff]  ;;  %v1587_v13 = vpack.c.bf16 %v1291_v26, %v1283_v41 }
 0x242   : > { %v2383_v32 = vpop.f32.mrf.mxu0  ;;  %3046 = vadd.xlane.f32.xlu0 %v3045_v49  ;;  %2982 = vmatprep.mubr.bf16.mxu1 %v1590_v2  ;;  %v1310_v63 = vld [vmem:[%s5851_s9 + $0xdf8] sm:$0xff]  ;;  %v3429_v12 = vadd.f32 %v3428_v10, %v3300_v56  ;;  %v3302_v15 = vmul.f32 %v7379_v5, %v7379_v5  ;;  %v1589_v19 = vpack.c.bf16 %v1293_v62, %v1285_v0 }
 0x243   : > { %v2384_v6 = vadd.f32 %v2383_v32, %v6873_v23  ;;  %v2736_v48 = vpop.f32.mrf.mxu1  ;;  %v3303_v55 = vmul.f32 %v7383_v52, %v7383_v52  ;;  %v3048_v23 = vsel %vm3043_vm0, %v7383_v52, 0.0  ;;  %v1596_v32 = vpack.c.bf16 %v1308_v36, %v1300_v54  ;;  %v1299_v54 = vld [vmem:[%s5851_s9 + $0xda0] sm:$0xff] }
 0x244   : > { %v2385_v24 = vpop.f32.mrf.mxu0  ;;  %v7406_v43 = vadd.f32 %v2734_v9, %v2382_v34  ;;  %v1598_v41 = vpack.c.bf16 %v1310_v63, %v1302_v37  ;;  %v1307_v36 = vld [vmem:[%s5851_s9 + $0xde0] sm:$0xff]  ;;  %v1309_v37 = vld [vmem:[%s5851_s9 + $0xdf0] sm:$0xff]  ;;  %v1316_v63 = vld [vmem:[%s5851_s9 + $0xe28] sm:$0xff] }
 0x245   : > { %v7401_v49 = vadd.f32 %v2736_v48, %v2384_v6  ;;  %v2738_v2 = vpop.f32.mrf.mxu1  ;;  %v3432_v25 = vsel %vm3043_vm0, %v3303_v55, 0.0  ;;  %v2386_v56 = vadd.f32 %v2385_v24, %v6875_v29  ;;  %v1301_v29 = vld [vmem:[%s5851_s9 + $0xdb0] sm:$0xff]  ;;  %v1324_v24 = vld [vmem:[%s5851_s9 + $0xe68] sm:$0xff] }
 0x246   : > { %9749 = vst [vmem:[#allocation96_spill] sm:$0xff] %v7406_v43  ;;  %v2387_v38 = vpop.f32.mrf.mxu0  ;;  %3430 = vadd.xlane.f32.xlu0 %v3429_v12  ;;  %v3433_v20 = vadd.f32 %v3432_v25, %v3302_v15  ;;  %v3049_v25 = vadd.f32 %v3048_v23, %v7379_v5  ;;  %v3304_v55 = vmul.f32 %v7406_v43, %v7406_v43  ;;  %v1326_v23 = vld [vmem:[%s5851_s9 + $0xe78] sm:$0xff] }
 0x247   : > { %9748 = vst [vmem:[#allocation95_spill] sm:$0xff] %v7401_v49  ;;  %v2388_v10 = vadd.f32 %v2387_v38, %v6877_v33  ;;  %v2740_v26 = vpop.f32.mrf.mxu1  ;;  %v3052_v0 = vsel %vm3043_vm0, %v7401_v49, 0.0  ;;  %v3305_v62 = vmul.f32 %v7401_v49, %v7401_v49 }
 0x248   : > { %v2391_v9 = vpop.f32.mrf.mxu0  ;;  %2630 = vmatmul.mubr.bf16.gmra.mxu0 %v1587_v13  ;;  %3434 = vadd.xlane.f32.xlu1 %v3433_v20  ;;  %v3053_v48 = vadd.f32 %v3052_v0, %v7406_v43 }
 0x249   : > { %v7415_v34 = vadd.f32 %v2740_v26, %v2388_v10  ;;  %v2744_v33 = vpop.f32.mrf.mxu1  ;;  %2983 = vmatmul.mubr.bf16.gmra.mxu1 %v1589_v19  ;;  %v3436_v38 = vsel %vm3043_vm0, %v3305_v62, 0.0  ;;  %2639 = vmatprep.mubr.bf16.mxu0 %v1596_v32  ;;  %v2392_v6 = vadd.f32 %v2391_v9, %v6882_v39  ;;  %v1318_v19 = vld [vmem:[%s5851_s9 + $0xe38] sm:$0xff]  ;;  %v7435_v32 = vadd.f32 %v2738_v2, %v2386_v56 }
 0x24a   : > { %v2393_v20 = vpop.f32.mrf.mxu0  ;;  %3050 = vadd.xlane.f32.xlu0 %v3049_v25  ;;  %2992 = vmatprep.mubr.bf16.mxu1 %v1598_v41  ;;  %v3437_v26 = vadd.f32 %v3436_v38, %v3304_v55  ;;  %v1595_v41 = vpack.c.bf16 %v1307_v36, %v1299_v54  ;;  %v1597_v9 = vpack.c.bf16 %v1309_v37, %v1301_v29  ;;  %v1315_v37 = vld [vmem:[%s5851_s9 + $0xe20] sm:$0xff] }
 0x24b   : > { %9750 = vst [vmem:[#allocation97_spill] sm:$0xff] %v7415_v34  ;;  %v2394_v12 = vadd.f32 %v2393_v20, %v6889_v47  ;;  %v2746_v13 = vpop.f32.mrf.mxu1  ;;  %v3056_v15 = vsel %vm3043_vm0, %v7415_v34, 0.0  ;;  %v3307_v39 = vmul.f32 %v7415_v34, %v7415_v34  ;;  %v1604_v47 = vpack.c.bf16 %v1324_v24, %v1316_v63 }
 0x24c   : > { %v2395_v10 = vpop.f32.mrf.mxu0  ;;  %3054 = vadd.xlane.f32.xlu1 %v3053_v48  ;;  %v7439_v25 = vadd.f32 %v2744_v33, %v2392_v6  ;;  %v3057_v49 = vadd.f32 %v3056_v15, %v7435_v32  ;;  %v1606_v34 = vpack.c.bf16 %v1326_v23, %v1318_v19  ;;  %v1332_v15 = vld [vmem:[%s5851_s9 + $0xea8] sm:$0xff] }
 0x24d   : > { %v7437_v0 = vadd.f32 %v2746_v13, %v2394_v12  ;;  %v2748_v62 = vpop.f32.mrf.mxu1  ;;  %v3440_v38 = vsel %vm3043_vm0, %v3307_v39, 0.0  ;;  %v2396_v54 = vadd.f32 %v2395_v10, %v6891_v53  ;;  %v1323_v53 = vld [vmem:[%s5851_s9 + $0xe60] sm:$0xff]  ;;  %v1325_v13 = vld [vmem:[%s5851_s9 + $0xe70] sm:$0xff]  ;;  %v1340_v39 = vld [vmem:[%s5851_s9 + $0xee8] sm:$0xff] }
 0x24e   : > { %v2397_v20 = vpop.f32.mrf.mxu0  ;;  %3438 = vadd.xlane.f32.xlu0 %v3437_v26 }
 0x24f   : > { %v2398_v43 = vadd.f32 %v2397_v20, %v6893_v58  ;;  %v2750_v2 = vpop.f32.mrf.mxu1  ;;  %v3060_v56 = vsel %vm3043_vm0, %v7437_v0, 0.0  ;;  %v3309_v33 = vmul.f32 %v7437_v0, %v7437_v0  ;;  %v3306_v58 = vmul.f32 %v7435_v32, %v7435_v32 }
 0x250   : > { %v2401_v36 = vpop.f32.mrf.mxu0  ;;  %2640 = vmatmul.mubr.bf16.gmra.mxu0 %v1595_v41  ;;  %3058 = vadd.xlane.f32.xlu1 %v3057_v49  ;;  %v3061_v29 = vadd.f32 %v3060_v56, %v7439_v25  ;;  %v1317_v49 = vld [vmem:[%s5851_s9 + $0xe30] sm:$0xff]  ;;  %v1342_v41 = vld [vmem:[%s5851_s9 + $0xef8] sm:$0xff] }
 0x251   : > { %v7452_v6 = vadd.f32 %v2750_v2, %v2398_v43  ;;  %v2754_v48 = vpop.f32.mrf.mxu1  ;;  %2993 = vmatmul.mubr.bf16.gmra.mxu1 %v1597_v9  ;;  %v3444_v55 = vsel %vm3043_vm0, %v3309_v33, 0.0  ;;  %2649 = vmatprep.mubr.bf16.mxu0 %v1604_v47  ;;  %v2402_v63 = vadd.f32 %v2401_v36, %v6898_v1  ;;  %v3441_v12 = vadd.f32 %v3440_v38, %v3306_v58  ;;  %v1334_v1 = vld [vmem:[%s5851_s9 + $0xeb8] sm:$0xff] }
 0x252   : > { %v2403_v24 = vpop.f32.mrf.mxu0  ;;  %3062 = vadd.xlane.f32.xlu0 %v3061_v29  ;;  %v3308_v43 = vmul.f32 %v7439_v25, %v7439_v25  ;;  %3002 = vmatprep.mubr.bf16.mxu1 %v1606_v34  ;;  %v7471_v9 = vadd.f32 %v2748_v62, %v2396_v54  ;;  %v1603_v34 = vpack.c.bf16 %v1323_v53, %v1315_v37 }
 0x253   : > { %v2404_v19 = vadd.f32 %v2403_v24, %v6905_v11  ;;  %v2756_v23 = vpop.f32.mrf.mxu1  ;;  %v3064_v10 = vsel %vm3043_vm0, %v7452_v6, 0.0  ;;  %v3311_v26 = vmul.f32 %v7452_v6, %v7452_v6  ;;  %v1605_v38 = vpack.c.bf16 %v1325_v13, %v1317_v49  ;;  %v1331_v13 = vld [vmem:[%s5851_s9 + $0xea0] sm:$0xff] }
 0x254   : > { %v2405_v47 = vpop.f32.mrf.mxu0  ;;  %3442 = vadd.xlane.f32.xlu1 %v3441_v12  ;;  %v3445_v20 = vadd.f32 %v3444_v55, %v3308_v43  ;;  %v1612_v11 = vpack.c.bf16 %v1340_v39, %v1332_v15  ;;  %v7475_v33 = vadd.f32 %v2754_v48, %v2402_v63  ;;  %v3065_v29 = vadd.f32 %v3064_v10, %v7471_v9  ;;  %v1333_v15 = vld [vmem:[%s5851_s9 + $0xeb0] sm:$0xff] }
 0x255   : > { %v7473_v2 = vadd.f32 %v2756_v23, %v2404_v19  ;;  %v2758_v56 = vpop.f32.mrf.mxu1  ;;  %v1614_v58 = vpack.c.bf16 %v1342_v41, %v1334_v1  ;;  %v3448_v55 = vsel %vm3043_vm0, %v3311_v26, 0.0  ;;  %v2406_v37 = vadd.f32 %v2405_v47, %v6907_v18  ;;  %v1339_v18 = vld [vmem:[%s5851_s9 + $0xee0] sm:$0xff]  ;;  %v1341_v26 = vld [vmem:[%s5851_s9 + $0xef0] sm:$0xff]  ;;  %v1348_v1 = vld [vmem:[%s5851_s9 + $0xf28] sm:$0xff] }
 0x256   : > { %v2407_v36 = vpop.f32.mrf.mxu0  ;;  %3446 = vadd.xlane.f32.xlu0 %v3445_v20  ;;  %v3312_v10 = vmul.f32 %v7475_v33, %v7475_v33  ;;  %v1356_v41 = vld [vmem:[%s5851_s9 + $0xf68] sm:$0xff] }
 0x257   : > { %v2408_v24 = vadd.f32 %v2407_v36, %v6909_v22  ;;  %v2760_v62 = vpop.f32.mrf.mxu1  ;;  %v3068_v54 = vsel %vm3043_vm0, %v7473_v2, 0.0  ;;  %v3313_v48 = vmul.f32 %v7473_v2, %v7473_v2  ;;  %v3310_v22 = vmul.f32 %v7471_v9, %v7471_v9 }
 0x258   : > { %v2411_v53 = vpop.f32.mrf.mxu0  ;;  %2650 = vmatmul.mubr.bf16.gmra.mxu0 %v1603_v34  ;;  %3066 = vadd.xlane.f32.xlu1 %v3065_v29  ;;  %v3069_v49 = vadd.f32 %v3068_v54, %v7475_v33  ;;  %v7507_v36 = vadd.f32 %v2758_v56, %v2406_v37 }
 0x259   : > { %v7488_v63 = vadd.f32 %v2760_v62, %v2408_v24  ;;  %v2764_v12 = vpop.f32.mrf.mxu1  ;;  %3003 = vmatmul.mubr.bf16.gmra.mxu1 %v1605_v38  ;;  %v3452_v43 = vsel %vm3043_vm0, %v3313_v48, 0.0  ;;  %2659 = vmatprep.mubr.bf16.mxu0 %v1612_v11  ;;  %v2412_v39 = vadd.f32 %v2411_v53, %v6914_v30  ;;  %v3449_v23 = vadd.f32 %v3448_v55, %v3310_v22  ;;  %v1350_v30 = vld [vmem:[%s5851_s9 + $0xf38] sm:$0xff] }
 0x25a   : > { %v2413_v19 = vpop.f32.mrf.mxu0  ;;  %3070 = vadd.xlane.f32.xlu0 %v3069_v49  ;;  %3012 = vmatprep.mubr.bf16.mxu1 %v1614_v58  ;;  %v1358_v11 = vld [vmem:[%s5851_s9 + $0xf78] sm:$0xff]  ;;  %v3453_v24 = vadd.f32 %v3452_v43, %v3312_v10  ;;  %v1611_v58 = vpack.c.bf16 %v1339_v18, %v1331_v13  ;;  %v1613_v55 = vpack.c.bf16 %v1341_v26, %v1333_v15  ;;  %v1347_v26 = vld [vmem:[%s5851_s9 + $0xf20] sm:$0xff] }
 0x25b   : > { %v2414_v47 = vadd.f32 %v2413_v19, %v6921_v40  ;;  %v2766_v20 = vpop.f32.mrf.mxu1  ;;  %v3072_v34 = vsel %vm3043_vm0, %v7488_v63, 0.0  ;;  %v3315_v38 = vmul.f32 %v7488_v63, %v7488_v63  ;;  %v1620_v40 = vpack.c.bf16 %v1356_v41, %v1348_v1  ;;  %v1349_v1 = vld [vmem:[%s5851_s9 + $0xf30] sm:$0xff] }
 0x25c   : > { %v2415_v29 = vpop.f32.mrf.mxu0  ;;  %3450 = vadd.xlane.f32.xlu1 %v3449_v23  ;;  %v7511_v48 = vadd.f32 %v2764_v12, %v2412_v39  ;;  %v3073_v49 = vadd.f32 %v3072_v34, %v7507_v36  ;;  %v1622_v22 = vpack.c.bf16 %v1358_v11, %v1350_v30  ;;  %v1364_v30 = vld [vmem:[%s5851_s9 + $0xfa8] sm:$0xff] }
 0x25d   : > { %v7509_v62 = vadd.f32 %v2766_v20, %v2414_v47  ;;  %v2768_v54 = vpop.f32.mrf.mxu1  ;;  %v3456_v43 = vsel %vm3043_vm0, %v3315_v38, 0.0  ;;  %v2416_v13 = vadd.f32 %v2415_v29, %v6923_v46  ;;  %v1355_v46 = vld [vmem:[%s5851_s9 + $0xf60] sm:$0xff]  ;;  %v1357_v38 = vld [vmem:[%s5851_s9 + $0xf70] sm:$0xff]  ;;  %v1372_v11 = vld [vmem:[%s5851_s9 + $0xfe8] sm:$0xff] }
 0x25e   : > { %v2417_v53 = vpop.f32.mrf.mxu0  ;;  %3454 = vadd.xlane.f32.xlu0 %v3453_v24  ;;  %v3316_v34 = vmul.f32 %v7511_v48, %v7511_v48 }
 0x25f   : > { %v2418_v19 = vadd.f32 %v2417_v53, %v6925_v51  ;;  %v2770_v56 = vpop.f32.mrf.mxu1  ;;  %v3076_v37 = vsel %vm3043_vm0, %v7509_v62, 0.0  ;;  %v3317_v12 = vmul.f32 %v7509_v62, %v7509_v62  ;;  %v3314_v51 = vmul.f32 %v7507_v36, %v7507_v36 }
 0x260   : > { %v2421_v18 = vpop.f32.mrf.mxu0  ;;  %2660 = vmatmul.mubr.bf16.gmra.mxu0 %v1611_v58  ;;  %3074 = vadd.xlane.f32.xlu1 %v3073_v49  ;;  %v3077_v15 = vadd.f32 %v3076_v37, %v7511_v48  ;;  %v7543_v53 = vadd.f32 %v2768_v54, %v2416_v13 }
 0x261   : > { %v7524_v39 = vadd.f32 %v2770_v56, %v2418_v19  ;;  %v2774_v23 = vpop.f32.mrf.mxu1  ;;  %3013 = vmatmul.mubr.bf16.gmra.mxu1 %v1613_v55  ;;  %v3460_v10 = vsel %vm3043_vm0, %v3317_v12, 0.0  ;;  %2669 = vmatprep.mubr.bf16.mxu0 %v1620_v40  ;;  %v2422_v41 = vadd.f32 %v2421_v18, %v6930_v60  ;;  %v3457_v20 = vadd.f32 %v3456_v43, %v3314_v51  ;;  %v1366_v60 = vld [vmem:[%s5851_s9 + $0xfb8] sm:$0xff] }
 0x262   : > { %v2423_v47 = vpop.f32.mrf.mxu0  ;;  %3078 = vadd.xlane.f32.xlu0 %v3077_v15  ;;  %3022 = vmatprep.mubr.bf16.mxu1 %v1622_v22  ;;  %v1374_v40 = vld [vmem:[%s5851_s9 + $0xff8] sm:$0xff]  ;;  %v3461_v19 = vadd.f32 %v3460_v10, %v3316_v34  ;;  %v1619_v22 = vpack.c.bf16 %v1355_v46, %v1347_v26  ;;  %v1621_v43 = vpack.c.bf16 %v1357_v38, %v1349_v1  ;;  %v1363_v38 = vld [vmem:[%s5851_s9 + $0xfa0] sm:$0xff] }
 0x263   : > { %v2424_v29 = vadd.f32 %v2423_v47, %v6937_v7  ;;  %v2776_v24 = vpop.f32.mrf.mxu1  ;;  %v3080_v58 = vsel %vm3043_vm0, %v7524_v39, 0.0  ;;  %v3319_v55 = vmul.f32 %v7524_v39, %v7524_v39  ;;  %v1628_v7 = vpack.c.bf16 %v1372_v11, %v1364_v30  ;;  %v1371_v30 = vld [vmem:[%s5851_s9 + $0xfe0] sm:$0xff] }
 0x264   : > { %v2425_v49 = vpop.f32.mrf.mxu0  ;;  %3458 = vadd.xlane.f32.xlu1 %v3457_v20  ;;  %v7547_v12 = vadd.f32 %v2774_v23, %v2422_v41  ;;  %v3081_v15 = vadd.f32 %v3080_v58, %v7543_v53  ;;  %v1630_v51 = vpack.c.bf16 %v1374_v40, %v1366_v60  ;;  %v1365_v58 = vld [vmem:[%s5851_s9 + $0xfb0] sm:$0xff] }
 0x265   : > { %v7545_v56 = vadd.f32 %v2776_v24, %v2424_v29  ;;  %v2778_v37 = vpop.f32.mrf.mxu1  ;;  %v3464_v10 = vsel %vm3043_vm0, %v3319_v55, 0.0  ;;  %v2426_v23 = vadd.f32 %v2425_v49, %v6939_v16  ;;  %v1373_v55 = vld [vmem:[%s5851_s9 + $0xff0] sm:$0xff]  ;;  %s5501_s9 = sshll.u32 %s5791_s19, 9 }
 0x266   : > { %9752 = vst [vmem:[#allocation99_spill] sm:$0xff] %v7547_v12  ;;  %v2427_v18 = vpop.f32.mrf.mxu0  ;;  %3462 = vadd.xlane.f32.xlu0 %v3461_v19  ;;  %v3320_v24 = vmul.f32 %v7547_v12, %v7547_v12  ;;  %s8048_s25 = scalar_lea.vmem %s9537_s2, %s5501_s9  ;;  %s8065_s28 = scalar_lea.vmem %s9538_s3, %s5501_s9 }
 0x267   : > { %9751 = vst [vmem:[#allocation98_spill] sm:$0xff] %v7545_v56  ;;  %v2428_v47 = vadd.f32 %v2427_v18, %v6941_v21  ;;  %v2780_v54 = vpop.f32.mrf.mxu1  ;;  %v3084_v13 = vsel %vm3043_vm0, %v7545_v56, 0.0  ;;  %v3321_v26 = vmul.f32 %v7545_v56, %v7545_v56  ;;  %v3318_v21 = vmul.f32 %v7543_v53, %v7543_v53 }
 0x268   : > { %v2431_v46 = vpop.f32.mrf.mxu0  ;;  %2670 = vmatmul.mubr.bf16.gmra.mxu0 %v1619_v22  ;;  %3082 = vadd.xlane.f32.xlu1 %v3081_v15  ;;  %v3085_v1 = vadd.f32 %v3084_v13, %v7547_v12  ;;  %v7575_v22 = vadd.f32 %v2778_v37, %v2426_v23  ;;  %v9870_v12 = vld [vmem:[#allocation52_spill] sm:$0xff] }
 0x269   : > { %v7560_v41 = vadd.f32 %v2780_v54, %v2428_v47  ;;  %v2784_v20 = vpop.f32.mrf.mxu1  ;;  %3023 = vmatmul.mubr.bf16.gmra.mxu1 %v1621_v43  ;;  %v3468_v34 = vsel %vm3043_vm0, %v3321_v26, 0.0  ;;  %2679 = vmatprep.mubr.bf16.mxu0 %v1628_v7  ;;  %v2432_v16 = vadd.f32 %v2431_v46, %v6946_v31  ;;  %v3465_v29 = vadd.f32 %v3464_v10, %v3318_v21 }
 0x26a   : > { %v2433_v11 = vpop.f32.mrf.mxu0  ;;  %3086 = vadd.xlane.f32.xlu0 %v3085_v1  ;;  %3032 = vmatprep.mubr.bf16.mxu1 %v1630_v51  ;;  %9754 = vst [vmem:[#allocation101_spill] sm:$0xff] %v7575_v22  ;;  %v3469_v43 = vadd.f32 %v3468_v34, %v3320_v24  ;;  %v1627_v7 = vpack.c.bf16 %v1371_v30, %v1363_v38 }
 0x26b   : > { %9753 = vst [vmem:[#allocation100_spill] sm:$0xff] %v7560_v41  ;;  %v2434_v60 = vadd.f32 %v2433_v11, %v6953_v42  ;;  %v2786_v40 = vpop.f32.mrf.mxu1  ;;  %v3088_v49 = vsel %vm3043_vm0, %v7560_v41, 0.0  ;;  %v3323_v19 = vmul.f32 %v7560_v41, %v7560_v41  ;;  %v1629_v51 = vpack.c.bf16 %v1373_v55, %v1365_v58 }
 0x26c   : > { %v2435_v31 = vpop.f32.mrf.mxu0  ;;  %3466 = vadd.xlane.f32.xlu1 %v3465_v29  ;;  %v7579_v47 = vadd.f32 %v2784_v20, %v2432_v16  ;;  %v3089_v54 = vadd.f32 %v3088_v49, %v7575_v22  ;;  %v3322_v20 = vmul.f32 %v7575_v22, %v7575_v22 }
 0x26d   : > { %v7577_v18 = vadd.f32 %v2786_v40, %v2434_v60  ;;  %v2788_v15 = vpop.f32.mrf.mxu1  ;;  %v3472_v26 = vsel %vm3043_vm0, %v3323_v19, 0.0  ;;  %v2436_v46 = vadd.f32 %v2435_v31, %v6955_v50 }
 0x26e   : > { %9756 = vst [vmem:[#allocation103_spill] sm:$0xff] %v7579_v47  ;;  %v2437_v42 = vpop.f32.mrf.mxu0  ;;  %3470 = vadd.xlane.f32.xlu0 %v3469_v43  ;;  %v3473_v11 = vadd.f32 %v3472_v26, %v3322_v20  ;;  %v3324_v50 = vmul.f32 %v7579_v47, %v7579_v47 }
 0x26f   : > { %9755 = vst [vmem:[#allocation102_spill] sm:$0xff] %v7577_v18  ;;  %v2438_v13 = vadd.f32 %v2437_v42, %v6957_v57  ;;  %v2790_v10 = vpop.f32.mrf.mxu1  ;;  %v3092_v37 = vsel %vm3043_vm0, %v7577_v18, 0.0  ;;  %v3325_v23 = vmul.f32 %v7577_v18, %v7577_v18  ;;  %v7603_v60 = vadd.f32 %v2788_v15, %v2436_v46 }
 0x270   : > { %v2441_v1 = vpop.f32.mrf.mxu0  ;;  %2680 = vmatmul.mubr.bf16.gmra.mxu0 %v1627_v7  ;;  %3090 = vadd.xlane.f32.xlu1 %v3089_v54  ;;  %v3093_v21 = vadd.f32 %v3092_v37, %v7579_v47 }
 0x271   : > { %v7592_v57 = vadd.f32 %v2790_v10, %v2438_v13  ;;  %v2794_v34 = vpop.f32.mrf.mxu1  ;;  %3033 = vmatmul.mubr.bf16.gmra.mxu1 %v1629_v51  ;;  %v3476_v38 = vsel %vm3043_vm0, %v3325_v23, 0.0  ;;  %v2442_v30 = vadd.f32 %v2441_v1, %v6962_v3  ;;  %9758 = vst [vmem:[#allocation105_spill] sm:$0xff] %v7603_v60  ;;  %v3326_v26 = vmul.f32 %v7603_v60, %v7603_v60 }
 0x272   : > { %v2443_v16 = vpop.f32.mrf.mxu0  ;;  %3094 = vadd.xlane.f32.xlu0 %v3093_v21  ;;  %v3477_v3 = vadd.f32 %v3476_v38, %v3324_v50 }
 0x273   : > { %9757 = vst [vmem:[#allocation104_spill] sm:$0xff] %v7592_v57  ;;  %v2444_v29 = vadd.f32 %v2443_v16, %v6969_v17  ;;  %v2796_v24 = vpop.f32.mrf.mxu1  ;;  %v3096_v58 = vsel %vm3043_vm0, %v7592_v57, 0.0  ;;  %v3327_v55 = vmul.f32 %v7592_v57, %v7592_v57  ;;  %v7607_v31 = vadd.f32 %v2794_v34, %v2442_v30 }
 0x274   : > { %v2445_v40 = vpop.f32.mrf.mxu0  ;;  %3474 = vadd.xlane.f32.xlu1 %v3473_v11  ;;  %v3097_v17 = vadd.f32 %v3096_v58, %v7603_v60  ;;  %v5746_v58 = vmov 0  }
 0x275   : > { %v7605_v49 = vadd.f32 %v2796_v24, %v2444_v29  ;;  %v2798_v19 = vpop.f32.mrf.mxu1  ;;  %9760 = vst [vmem:[#allocation107_spill] sm:$0xff] %v7607_v31  ;;  %v3480_v15 = vsel %vm3043_vm0, %v3327_v55, 0.0  ;;  %v2446_v13 = vadd.f32 %v2445_v40, %v6971_v27  ;;  %v3328_v27 = vmul.f32 %v7607_v31, %v7607_v31  ;;  %5549 = vset.pattern.permute.xlu0 %v5746_v58 }
 0x276   : > { %v2447_v43 = vpop.f32.mrf.mxu0  ;;  %3478 = vadd.xlane.f32.xlu0 %v3477_v3  ;;  %v3481_v20 = vadd.f32 %v3480_v15, %v3326_v26  ;;  %5550 = vset.pattern.permute.xlu1 %v5746_v58 }
 0x277   : > { %9759 = vst [vmem:[#allocation106_spill] sm:$0xff] %v7605_v49  ;;  %v2448_v7 = vadd.f32 %v2447_v43, %v6973_v35  ;;  %v2800_v51 = vpop.f32.mrf.mxu1  ;;  %v3100_v42 = vsel %vm3043_vm0, %v7605_v49, 0.0  ;;  %v3329_v54 = vmul.f32 %v7605_v49, %v7605_v49  ;;  %v7631_v11 = vadd.f32 %v2798_v19, %v2446_v13 }
 0x278   : > { %v2451_v10 = vpop.f32.mrf.mxu0  ;;  %3098 = vadd.xlane.f32.xlu1 %v3097_v17  ;;  %v3101_v37 = vadd.f32 %v3100_v42, %v7607_v31  ;;  %v9863_v31 = vld [vmem:[#allocation49_spill] sm:$0xff] }
 0x279   : > { %v7620_v23 = vadd.f32 %v2800_v51, %v2448_v7  ;;  %v2804_v35 = vpop.f32.mrf.mxu1  ;;  %v3484_v46 = vsel %vm3043_vm0, %v3329_v54, 0.0  ;;  %v2452_v1 = vadd.f32 %v2451_v10, %v6978_v44  ;;  %9762 = vst [vmem:[#allocation109_spill] sm:$0xff] %v7631_v11  ;;  %v3330_v54 = vmul.f32 %v7631_v11, %v7631_v11 }
 0x27a   : > { %v2453_v21 = vpop.f32.mrf.mxu0  ;;  %3102 = vadd.xlane.f32.xlu0 %v3101_v37  ;;  %v3485_v44 = vadd.f32 %v3484_v46, %v3328_v27 }
 0x27b   : > { %9761 = vst [vmem:[#allocation108_spill] sm:$0xff] %v7620_v23  ;;  %v2454_v34 = vadd.f32 %v2453_v21, %v6985_v61  ;;  %v2806_v38 = vpop.f32.mrf.mxu1  ;;  %v3104_v30 = vsel %vm3043_vm0, %v7620_v23, 0.0  ;;  %v3331_v16 = vmul.f32 %v7620_v23, %v7620_v23  ;;  %v7635_v55 = vadd.f32 %v2804_v35, %v2452_v1 }
 0x27c   : > { %v2455_v50 = vpop.f32.mrf.mxu0  ;;  %3482 = vadd.xlane.f32.xlu1 %v3481_v20  ;;  %v3105_v40 = vadd.f32 %v3104_v30, %v7631_v11 }
 0x27d   : > { %v7633_v29 = vadd.f32 %v2806_v38, %v2454_v34  ;;  %v2808_v24 = vpop.f32.mrf.mxu1  ;;  %9764 = vst [vmem:[#allocation111_spill] sm:$0xff] %v7635_v55  ;;  %v3488_v17 = vsel %vm3043_vm0, %v3331_v16, 0.0  ;;  %v2456_v51 = vadd.f32 %v2455_v50, %v6987_v8  ;;  %v3332_v8 = vmul.f32 %v7635_v55, %v7635_v55 }
 0x27e   : > { %v2457_v61 = vpop.f32.mrf.mxu0  ;;  %3486 = vadd.xlane.f32.xlu0 %v3485_v44  ;;  %v3489_v35 = vadd.f32 %v3488_v17, %v3330_v54 }
 0x27f   : > { %9763 = vst [vmem:[#allocation110_spill] sm:$0xff] %v7633_v29  ;;  %v2458_v3 = vadd.f32 %v2457_v61, %v6989_v14  ;;  %v2810_v43 = vpop.f32.mrf.mxu1  ;;  %v3108_v19 = vsel %vm3043_vm0, %v7633_v29, 0.0  ;;  %v3333_v7 = vmul.f32 %v7633_v29, %v7633_v29  ;;  %v7659_v27 = vadd.f32 %v2808_v24, %v2456_v51 }
 0x280   : > { %v2461_v42 = vpop.f32.mrf.mxu0  ;;  %3106 = vadd.xlane.f32.xlu1 %v3105_v40  ;;  %v3109_v15 = vadd.f32 %v3108_v19, %v7635_v55 }
 0x281   : > { %v7648_v13 = vadd.f32 %v2810_v43, %v2458_v3  ;;  %v2814_v14 = vpop.f32.mrf.mxu1  ;;  %v3492_v10 = vsel %vm3043_vm0, %v3333_v7, 0.0  ;;  %v2462_v37 = vadd.f32 %v2461_v42, %v6994_v28  ;;  %9766 = vst [vmem:[#allocation113_spill] sm:$0xff] %v7659_v27  ;;  %v3334_v17 = vmul.f32 %v7659_v27, %v7659_v27  ;;  %v9770_v42 = vld [vmem:[#allocation5_spill] sm:$0xff] }
 0x282   : > { %v2463_v26 = vpop.f32.mrf.mxu0  ;;  %3110 = vadd.xlane.f32.xlu0 %v3109_v15  ;;  %v3493_v28 = vadd.f32 %v3492_v10, %v3332_v8  ;;  %v9771_v10 = vld [vmem:[#allocation6_spill] sm:$0xff] }
 0x283   : > { %9765 = vst [vmem:[#allocation112_spill] sm:$0xff] %v7648_v13  ;;  %v2464_v46 = vadd.f32 %v2463_v26, %v7001_v45  ;;  %v2816_v1 = vpop.f32.mrf.mxu1  ;;  %v3112_v21 = vsel %vm3043_vm0, %v7648_v13, 0.0  ;;  %v3335_v20 = vmul.f32 %v7648_v13, %v7648_v13  ;;  %v7663_v16 = vadd.f32 %v2814_v14, %v2462_v37 }
 0x284   : > { %v2465_v34 = vpop.f32.mrf.mxu0  ;;  %3490 = vadd.xlane.f32.xlu1 %v3489_v35  ;;  %v3113_v45 = vadd.f32 %v3112_v21, %v7659_v27 }
 0x285   : > { %v7661_v38 = vadd.f32 %v2816_v1, %v2464_v46  ;;  %v2818_v30 = vpop.f32.mrf.mxu1  ;;  %9768 = vst [vmem:[#allocation115_spill] sm:$0xff] %v7663_v16  ;;  %v3496_v24 = vsel %vm3043_vm0, %v3335_v20, 0.0  ;;  %v2466_v3 = vadd.f32 %v2465_v34, %v7003_v59  ;;  %v3336_v59 = vmul.f32 %v7663_v16, %v7663_v16 }
 0x286   : > { %v2467_v50 = vpop.f32.mrf.mxu0  ;;  %3494 = vadd.xlane.f32.xlu0 %v3493_v28  ;;  %v3497_v14 = vadd.f32 %v3496_v24, %v3334_v17 }
 0x287   : > { %9767 = vst [vmem:[#allocation114_spill] sm:$0xff] %v7661_v38  ;;  %v2468_v44 = vadd.f32 %v2467_v50, %v7005_v4  ;;  %v2820_v58 = vpop.f32.mrf.mxu1  ;;  %v3116_v61 = vsel %vm3043_vm0, %v7661_v38, 0.0  ;;  %v3337_v40 = vmul.f32 %v7661_v38, %v7661_v38  ;;  %v7687_v46 = vadd.f32 %v2818_v30, %v2466_v3  ;;  %v9776_v3 = vld [vmem:[#allocation7_spill] sm:$0xff] }
 0x288   : > { %v2471_v43 = vpop.f32.mrf.mxu0  ;;  %3114 = vadd.xlane.f32.xlu1 %v3113_v45  ;;  %v3117_v19 = vadd.f32 %v3116_v61, %v7663_v16 }
 0x289   : > { %v7676_v7 = vadd.f32 %v2820_v58, %v2468_v44  ;;  %v2824_v4 = vpop.f32.mrf.mxu1  ;;  %v3500_v51 = vsel %vm3043_vm0, %v3337_v40, 0.0  ;;  %v2472_v15 = vadd.f32 %v2471_v43, %v9770_v42  ;;  %9772 = vst [vmem:[#allocation5_spill] sm:$0xff] %v7687_v46  ;;  %v9775_v44 = vld [vmem:[#allocation8_spill] sm:$0xff] }
 0x28a   : > { %v2473_v54 = vpop.f32.mrf.mxu0  ;;  %3118 = vadd.xlane.f32.xlu0 %v3117_v19  ;;  %v3501_v21 = vadd.f32 %v3500_v51, %v3336_v59 }
 0x28b   : > { %9769 = vst [vmem:[#allocation116_spill] sm:$0xff] %v7676_v7  ;;  %v2474_v37 = vadd.f32 %v2473_v54, %v9771_v10  ;;  %v2826_v26 = vpop.f32.mrf.mxu1  ;;  %v3120_v35 = vsel %vm3043_vm0, %v7676_v7, 0.0  ;;  %v3339_v8 = vmul.f32 %v7676_v7, %v7676_v7  ;;  %v7691_v28 = vadd.f32 %v2824_v4, %v2472_v15  ;;  %v9778_v54 = vld [vmem:[#allocation9_spill] sm:$0xff] }
 0x28c   : > { %v2475_v1 = vpop.f32.mrf.mxu0  ;;  %3498 = vadd.xlane.f32.xlu1 %v3497_v14  ;;  %v3121_v45 = vadd.f32 %v3120_v35, %v7687_v46  ;;  %v3338_v4 = vmul.f32 %v7687_v46, %v7687_v46 }
 0x28d   : > { %v7689_v20 = vadd.f32 %v2826_v26, %v2474_v37  ;;  %v2828_v34 = vpop.f32.mrf.mxu1  ;;  %9774 = vst [vmem:[#allocation117_spill] sm:$0xff] %v7691_v28  ;;  %v3504_v30 = vsel %vm3043_vm0, %v3339_v8, 0.0  ;;  %v2476_v43 = vadd.f32 %v2475_v1, %v9776_v3  ;;  %v3340_v37 = vmul.f32 %v7691_v28, %v7691_v28  ;;  %v9779_v26 = vld [vmem:[#allocation10_spill] sm:$0xff]  ;;  %v9783_v3 = vld [vmem:[#allocation12_spill] sm:$0xff] }
 0x28e   : > { %v2477_v50 = vpop.f32.mrf.mxu0  ;;  %3502 = vadd.xlane.f32.xlu0 %v3501_v21  ;;  %v3505_v10 = vadd.f32 %v3504_v30, %v3338_v4 }
 0x28f   : > { %9773 = vst [vmem:[#allocation6_spill] sm:$0xff] %v7689_v20  ;;  %v2478_v58 = vadd.f32 %v2477_v50, %v9775_v44  ;;  %v2830_v61 = vpop.f32.mrf.mxu1  ;;  %v3124_v24 = vsel %vm3043_vm0, %v7689_v20, 0.0  ;;  %v3341_v40 = vmul.f32 %v7689_v20, %v7689_v20  ;;  %v7715_v50 = vadd.f32 %v2828_v34, %v2476_v43 }
 0x290   : > { %v2481_v19 = vpop.f32.mrf.mxu0  ;;  %3122 = vadd.xlane.f32.xlu1 %v3121_v45  ;;  %v3125_v17 = vadd.f32 %v3124_v24, %v7691_v28 }
 0x291   : > { %v7704_v51 = vadd.f32 %v2830_v61, %v2478_v58  ;;  %v2834_v42 = vpop.f32.mrf.mxu1  ;;  %v3508_v15 = vsel %vm3043_vm0, %v3341_v40, 0.0  ;;  %v2482_v14 = vadd.f32 %v2481_v19, %v9778_v54  ;;  %9780 = vst [vmem:[#allocation7_spill] sm:$0xff] %v7715_v50 }
 0x292   : > { %v2483_v59 = vpop.f32.mrf.mxu0  ;;  %3126 = vadd.xlane.f32.xlu0 %v3125_v17  ;;  %v3509_v44 = vadd.f32 %v3508_v15, %v3340_v37  ;;  %v9784_v15 = vld [vmem:[#allocation11_spill] sm:$0xff] }
 0x293   : > { %9777 = vst [vmem:[#allocation8_spill] sm:$0xff] %v7704_v51  ;;  %v2484_v35 = vadd.f32 %v2483_v59, %v9779_v26  ;;  %v2836_v8 = vpop.f32.mrf.mxu1  ;;  %v3128_v1 = vsel %vm3043_vm0, %v7704_v51, 0.0  ;;  %v3343_v21 = vmul.f32 %v7704_v51, %v7704_v51  ;;  %v7719_v24 = vadd.f32 %v2834_v42, %v2482_v14 }
 0x294   : > { %v2485_v45 = vpop.f32.mrf.mxu0  ;;  %3506 = vadd.xlane.f32.xlu1 %v3505_v10  ;;  %v3129_v40 = vadd.f32 %v3128_v1, %v7715_v50  ;;  %v3342_v14 = vmul.f32 %v7715_v50, %v7715_v50 }
 0x295   : > { %v7717_v58 = vadd.f32 %v2836_v8, %v2484_v35  ;;  %v2838_v61 = vpop.f32.mrf.mxu1  ;;  %9782 = vst [vmem:[#allocation10_spill] sm:$0xff] %v7719_v24  ;;  %v3512_v34 = vsel %vm3043_vm0, %v3343_v21, 0.0  ;;  %v2486_v54 = vadd.f32 %v2485_v45, %v9784_v15  ;;  %v9786_v35 = vld [vmem:[#allocation13_spill] sm:$0xff]  ;;  %v3344_v45 = vmul.f32 %v7719_v24, %v7719_v24 }
 0x296   : > { %v2487_v30 = vpop.f32.mrf.mxu0  ;;  %3510 = vadd.xlane.f32.xlu0 %v3509_v44  ;;  %v3513_v21 = vadd.f32 %v3512_v34, %v3342_v14  ;;  %v9787_v44 = vld [vmem:[#allocation14_spill] sm:$0xff] }
 0x297   : > { %9781 = vst [vmem:[#allocation9_spill] sm:$0xff] %v7717_v58  ;;  %v2488_v19 = vadd.f32 %v2487_v30, %v9783_v3  ;;  %v2840_v17 = vpop.f32.mrf.mxu1  ;;  %v3132_v4 = vsel %vm3043_vm0, %v7717_v58, 0.0  ;;  %v3345_v43 = vmul.f32 %v7717_v58, %v7717_v58 }
 0x298   : > { %v2491_v59 = vpop.f32.mrf.mxu0  ;;  %3130 = vadd.xlane.f32.xlu1 %v3129_v40  ;;  %v3133_v42 = vadd.f32 %v3132_v4, %v7719_v24 }
 0x299   : > { %v7732_v10 = vadd.f32 %v2840_v17, %v2488_v19  ;;  %v2844_v37 = vpop.f32.mrf.mxu1  ;;  %v3516_v26 = vsel %vm3043_vm0, %v3345_v43, 0.0  ;;  %v2492_v8 = vadd.f32 %v2491_v59, %v9786_v35  ;;  %v7743_v17 = vadd.f32 %v2838_v61, %v2486_v54  ;;  %v9791_v35 = vld [vmem:[#allocation16_spill] sm:$0xff] }
 0x29a   : > { %v2493_v1 = vpop.f32.mrf.mxu0  ;;  %3134 = vadd.xlane.f32.xlu0 %v3133_v42  ;;  %v3517_v43 = vadd.f32 %v3516_v26, %v3344_v45  ;;  %v9792_v26 = vld [vmem:[#allocation15_spill] sm:$0xff] }
 0x29b   : > { %9785 = vst [vmem:[#allocation12_spill] sm:$0xff] %v7732_v10  ;;  %v2494_v30 = vadd.f32 %v2493_v1, %v9787_v44  ;;  %v2846_v40 = vpop.f32.mrf.mxu1  ;;  %v3136_v3 = vsel %vm3043_vm0, %v7732_v10, 0.0  ;;  %v3347_v19 = vmul.f32 %v7732_v10, %v7732_v10  ;;  %9788 = vst [vmem:[#allocation11_spill] sm:$0xff] %v7743_v17  ;;  %v7747_v59 = vadd.f32 %v2844_v37, %v2492_v8 }
 0x29c   : > { %v2495_v4 = vpop.f32.mrf.mxu0  ;;  %3514 = vadd.xlane.f32.xlu1 %v3513_v21  ;;  %v3137_v14 = vadd.f32 %v3136_v3, %v7743_v17  ;;  %v3346_v8 = vmul.f32 %v7743_v17, %v7743_v17 }
 0x29d   : > { %v7745_v15 = vadd.f32 %v2846_v40, %v2494_v30  ;;  %v2848_v34 = vpop.f32.mrf.mxu1  ;;  %9790 = vst [vmem:[#allocation14_spill] sm:$0xff] %v7747_v59  ;;  %v3520_v61 = vsel %vm3043_vm0, %v3347_v19, 0.0  ;;  %v2496_v21 = vadd.f32 %v2495_v4, %v9792_v26  ;;  %v3348_v4 = vmul.f32 %v7747_v59, %v7747_v59  ;;  %v9795_v26 = vld [vmem:[#allocation18_spill] sm:$0xff] }
 0x29e   : > { %v2497_v42 = vpop.f32.mrf.mxu0  ;;  %3518 = vadd.xlane.f32.xlu0 %v3517_v43  ;;  %v9794_v43 = vld [vmem:[#allocation17_spill] sm:$0xff] }
 0x29f   : > { %9789 = vst [vmem:[#allocation13_spill] sm:$0xff] %v7745_v15  ;;  %v2498_v1 = vadd.f32 %v2497_v42, %v9791_v35  ;;  %v2850_v44 = vpop.f32.mrf.mxu1  ;;  %v3140_v58 = vsel %vm3043_vm0, %v7745_v15, 0.0  ;;  %v3349_v54 = vmul.f32 %v7745_v15, %v7745_v15  ;;  %v3521_v35 = vadd.f32 %v3520_v61, %v3346_v8 }
 0x2a0   : > { %v2501_v45 = vpop.f32.mrf.mxu0  ;;  %3138 = vadd.xlane.f32.xlu1 %v3137_v14  ;;  %v3141_v37 = vadd.f32 %v3140_v58, %v7747_v59 }
 0x2a1   : > { %v7760_v30 = vadd.f32 %v2850_v44, %v2498_v1  ;;  %v2854_v40 = vpop.f32.mrf.mxu1  ;;  %v3524_v3 = vsel %vm3043_vm0, %v3349_v54, 0.0  ;;  %v2502_v42 = vadd.f32 %v2501_v45, %v9794_v43  ;;  %v7771_v44 = vadd.f32 %v2848_v34, %v2496_v21 }
 0x2a2   : > { %v2503_v19 = vpop.f32.mrf.mxu0  ;;  %3142 = vadd.xlane.f32.xlu0 %v3141_v37  ;;  %v3525_v45 = vadd.f32 %v3524_v3, %v3348_v4 }
 0x2a3   : > { %9793 = vst [vmem:[#allocation16_spill] sm:$0xff] %v7760_v30  ;;  %v2504_v14 = vadd.f32 %v2503_v19, %v9795_v26  ;;  %v2856_v15 = vpop.f32.mrf.mxu1  ;;  %v3144_v58 = vsel %vm3043_vm0, %v7760_v30, 0.0  ;;  %v3351_v1 = vmul.f32 %v7760_v30, %v7760_v30  ;;  %9796 = vst [vmem:[#allocation15_spill] sm:$0xff] %v7771_v44  ;;  %v7775_v37 = vadd.f32 %v2854_v40, %v2502_v42  ;;  %v9799_v26 = vld [vmem:[#allocation20_spill] sm:$0xff] }
 0x2a4   : > { %v2505_v54 = vpop.f32.mrf.mxu0  ;;  %3522 = vadd.xlane.f32.xlu1 %v3521_v35  ;;  %v3145_v19 = vadd.f32 %v3144_v58, %v7771_v44  ;;  %v3350_v42 = vmul.f32 %v7771_v44, %v7771_v44 }
 0x2a5   : > { %v7773_v43 = vadd.f32 %v2856_v15, %v2504_v14  ;;  %v2858_v61 = vpop.f32.mrf.mxu1  ;;  %9798 = vst [vmem:[#allocation18_spill] sm:$0xff] %v7775_v37  ;;  %v3528_v34 = vsel %vm3043_vm0, %v3351_v1, 0.0  ;;  %v9800_v15 = vld [vmem:[#allocation19_spill] sm:$0xff] }
 0x2a6   : > { %v2507_v8 = vpop.f32.mrf.mxu0  ;;  %3526 = vadd.xlane.f32.xlu0 %v3525_v45  ;;  %v2506_v3 = vadd.f32 %v2505_v54, %v9800_v15  ;;  %v9802_v45 = vld [vmem:[#allocation21_spill] sm:$0xff]  ;;  %v3352_v54 = vmul.f32 %v7775_v37, %v7775_v37  ;;  %v9803_v15 = vld [vmem:[#allocation22_spill] sm:$0xff] }
 0x2a7   : > { %9797 = vst [vmem:[#allocation17_spill] sm:$0xff] %v7773_v43  ;;  %v2508_v59 = vadd.f32 %v2507_v8, %v9799_v26  ;;  %v2860_v24 = vpop.f32.mrf.mxu1  ;;  %v3148_v30 = vsel %vm3043_vm0, %v7773_v43, 0.0  ;;  %v3353_v21 = vmul.f32 %v7773_v43, %v7773_v43  ;;  %v3529_v26 = vadd.f32 %v3528_v34, %v3350_v42 }
 0x2a8   : > { %v2511_v35 = vpop.f32.mrf.mxu0  ;;  %3146 = vadd.xlane.f32.xlu1 %v3145_v19  ;;  %v3149_v40 = vadd.f32 %v3148_v30, %v7775_v37 }
 0x2a9   : > { %v7788_v4 = vadd.f32 %v2860_v24, %v2508_v59  ;;  %v2864_v14 = vpop.f32.mrf.mxu1  ;;  %v3532_v58 = vsel %vm3043_vm0, %v3353_v21, 0.0  ;;  %v2512_v8 = vadd.f32 %v2511_v35, %v9802_v45  ;;  %v7799_v59 = vadd.f32 %v2858_v61, %v2506_v3 }
 0x2aa   : > { %v2513_v1 = vpop.f32.mrf.mxu0  ;;  %3150 = vadd.xlane.f32.xlu0 %v3149_v40  ;;  %v3533_v35 = vadd.f32 %v3532_v58, %v3352_v54 }
 0x2ab   : > { %9801 = vst [vmem:[#allocation20_spill] sm:$0xff] %v7788_v4  ;;  %v2514_v19 = vadd.f32 %v2513_v1, %v9803_v15  ;;  %v2866_v43 = vpop.f32.mrf.mxu1  ;;  %v3152_v30 = vsel %vm3043_vm0, %v7788_v4, 0.0  ;;  %v3355_v24 = vmul.f32 %v7788_v4, %v7788_v4  ;;  %9804 = vst [vmem:[#allocation19_spill] sm:$0xff] %v7799_v59  ;;  %v7803_v40 = vadd.f32 %v2864_v14, %v2512_v8  ;;  %v9807_v15 = vld [vmem:[#allocation24_spill] sm:$0xff] }
 0x2ac   : > { %v2515_v21 = vpop.f32.mrf.mxu0  ;;  %3530 = vadd.xlane.f32.xlu1 %v3529_v26  ;;  %v3153_v1 = vadd.f32 %v3152_v30, %v7799_v59  ;;  %v3354_v8 = vmul.f32 %v7799_v59, %v7799_v59 }
 0x2ad   : > { %v7801_v45 = vadd.f32 %v2866_v43, %v2514_v19  ;;  %v2868_v34 = vpop.f32.mrf.mxu1  ;;  %9806 = vst [vmem:[#allocation22_spill] sm:$0xff] %v7803_v40  ;;  %v3536_v61 = vsel %vm3043_vm0, %v3355_v24, 0.0  ;;  %v9808_v43 = vld [vmem:[#allocation23_spill] sm:$0xff] }
 0x2ae   : > { %v2517_v42 = vpop.f32.mrf.mxu0  ;;  %3534 = vadd.xlane.f32.xlu0 %v3533_v35  ;;  %v2516_v58 = vadd.f32 %v2515_v21, %v9808_v43  ;;  %v9810_v35 = vld [vmem:[#allocation25_spill] sm:$0xff]  ;;  %v3356_v21 = vmul.f32 %v7803_v40, %v7803_v40  ;;  %v9811_v43 = vld [vmem:[#allocation26_spill] sm:$0xff] }
 0x2af   : > { %9805 = vst [vmem:[#allocation21_spill] sm:$0xff] %v7801_v45  ;;  %v2518_v37 = vadd.f32 %v2517_v42, %v9807_v15  ;;  %v2870_v44 = vpop.f32.mrf.mxu1  ;;  %v3156_v4 = vsel %vm3043_vm0, %v7801_v45, 0.0  ;;  %v3357_v3 = vmul.f32 %v7801_v45, %v7801_v45  ;;  %v3537_v15 = vadd.f32 %v3536_v61, %v3354_v8 }
 0x2b0   : > { %v2521_v26 = vpop.f32.mrf.mxu0  ;;  %3154 = vadd.xlane.f32.xlu1 %v3153_v1  ;;  %v3157_v14 = vadd.f32 %v3156_v4, %v7803_v40 }
 0x2b1   : > { %v7816_v54 = vadd.f32 %v2870_v44, %v2518_v37  ;;  %v2874_v19 = vpop.f32.mrf.mxu1  ;;  %v3540_v30 = vsel %vm3043_vm0, %v3357_v3, 0.0  ;;  %v2522_v42 = vadd.f32 %v2521_v26, %v9810_v35  ;;  %v7827_v37 = vadd.f32 %v2868_v34, %v2516_v58 }
 0x2b2   : > { %v2523_v24 = vpop.f32.mrf.mxu0  ;;  %3158 = vadd.xlane.f32.xlu0 %v3157_v14  ;;  %v3541_v26 = vadd.f32 %v3540_v30, %v3356_v21 }
 0x2b3   : > { %9809 = vst [vmem:[#allocation24_spill] sm:$0xff] %v7816_v54  ;;  %v2524_v1 = vadd.f32 %v2523_v24, %v9811_v43  ;;  %v2876_v45 = vpop.f32.mrf.mxu1  ;;  %v3160_v4 = vsel %vm3043_vm0, %v7816_v54, 0.0  ;;  %v3359_v44 = vmul.f32 %v7816_v54, %v7816_v54  ;;  %9812 = vst [vmem:[#allocation23_spill] sm:$0xff] %v7827_v37  ;;  %v7831_v14 = vadd.f32 %v2874_v19, %v2522_v42  ;;  %v9815_v43 = vld [vmem:[#allocation28_spill] sm:$0xff] }
 0x2b4   : > { %v2525_v3 = vpop.f32.mrf.mxu0  ;;  %3538 = vadd.xlane.f32.xlu1 %v3537_v15  ;;  %v3161_v24 = vadd.f32 %v3160_v4, %v7827_v37  ;;  %v3358_v42 = vmul.f32 %v7827_v37, %v7827_v37 }
 0x2b5   : > { %v7829_v35 = vadd.f32 %v2876_v45, %v2524_v1  ;;  %v2878_v61 = vpop.f32.mrf.mxu1  ;;  %9814 = vst [vmem:[#allocation26_spill] sm:$0xff] %v7831_v14  ;;  %v3544_v34 = vsel %vm3043_vm0, %v3359_v44, 0.0  ;;  %v9816_v45 = vld [vmem:[#allocation27_spill] sm:$0xff] }
 0x2b6   : > { %v2527_v8 = vpop.f32.mrf.mxu0  ;;  %3542 = vadd.xlane.f32.xlu0 %v3541_v26  ;;  %v2526_v30 = vadd.f32 %v2525_v3, %v9816_v45  ;;  %v9818_v26 = vld [vmem:[#allocation29_spill] sm:$0xff]  ;;  %v3360_v3 = vmul.f32 %v7831_v14, %v7831_v14  ;;  %v9819_v45 = vld [vmem:[#allocation30_spill] sm:$0xff] }
 0x2b7   : > { %9813 = vst [vmem:[#allocation25_spill] sm:$0xff] %v7829_v35  ;;  %v2528_v40 = vadd.f32 %v2527_v8, %v9815_v43  ;;  %v2880_v59 = vpop.f32.mrf.mxu1  ;;  %v3164_v54 = vsel %vm3043_vm0, %v7829_v35, 0.0  ;;  %v3361_v58 = vmul.f32 %v7829_v35, %v7829_v35  ;;  %v3545_v43 = vadd.f32 %v3544_v34, %v3358_v42 }
 0x2b8   : > { %v2531_v15 = vpop.f32.mrf.mxu0  ;;  %3162 = vadd.xlane.f32.xlu1 %v3161_v24  ;;  %v3165_v19 = vadd.f32 %v3164_v54, %v7831_v14 }
 0x2b9   : > { %v7844_v21 = vadd.f32 %v2880_v59, %v2528_v40  ;;  %v2884_v1 = vpop.f32.mrf.mxu1  ;;  %v3548_v4 = vsel %vm3043_vm0, %v3361_v58, 0.0  ;;  %v2532_v8 = vadd.f32 %v2531_v15, %v9818_v26  ;;  %v7855_v40 = vadd.f32 %v2878_v61, %v2526_v30 }
 0x2ba   : > { %v2533_v44 = vpop.f32.mrf.mxu0  ;;  %3166 = vadd.xlane.f32.xlu0 %v3165_v19  ;;  %v3549_v15 = vadd.f32 %v3548_v4, %v3360_v3 }
 0x2bb   : > { %9817 = vst [vmem:[#allocation28_spill] sm:$0xff] %v7844_v21  ;;  %v2534_v24 = vadd.f32 %v2533_v44, %v9819_v45  ;;  %v2886_v35 = vpop.f32.mrf.mxu1  ;;  %v3168_v54 = vsel %vm3043_vm0, %v7844_v21, 0.0  ;;  %v3363_v59 = vmul.f32 %v7844_v21, %v7844_v21  ;;  %9820 = vst [vmem:[#allocation27_spill] sm:$0xff] %v7855_v40  ;;  %v7859_v19 = vadd.f32 %v2884_v1, %v2532_v8  ;;  %v9823_v45 = vld [vmem:[#allocation32_spill] sm:$0xff] }
 0x2bc   : > { %v2535_v58 = vpop.f32.mrf.mxu0  ;;  %3546 = vadd.xlane.f32.xlu1 %v3545_v43  ;;  %v3169_v44 = vadd.f32 %v3168_v54, %v7855_v40  ;;  %v3362_v8 = vmul.f32 %v7855_v40, %v7855_v40 }
 0x2bd   : > { %v7857_v26 = vadd.f32 %v2886_v35, %v2534_v24  ;;  %v2888_v34 = vpop.f32.mrf.mxu1  ;;  %9822 = vst [vmem:[#allocation30_spill] sm:$0xff] %v7859_v19  ;;  %v3552_v61 = vsel %vm3043_vm0, %v3363_v59, 0.0  ;;  %v9824_v35 = vld [vmem:[#allocation31_spill] sm:$0xff] }
 0x2be   : > { %v2537_v42 = vpop.f32.mrf.mxu0  ;;  %3550 = vadd.xlane.f32.xlu0 %v3549_v15  ;;  %v2536_v4 = vadd.f32 %v2535_v58, %v9824_v35  ;;  %v9826_v15 = vld [vmem:[#allocation33_spill] sm:$0xff]  ;;  %v3364_v58 = vmul.f32 %v7859_v19, %v7859_v19  ;;  %v9827_v35 = vld [vmem:[#allocation34_spill] sm:$0xff] }
 0x2bf   : > { %9821 = vst [vmem:[#allocation29_spill] sm:$0xff] %v7857_v26  ;;  %v2538_v14 = vadd.f32 %v2537_v42, %v9823_v45  ;;  %v2890_v37 = vpop.f32.mrf.mxu1  ;;  %v3172_v21 = vsel %vm3043_vm0, %v7857_v26, 0.0  ;;  %v3365_v30 = vmul.f32 %v7857_v26, %v7857_v26  ;;  %v3553_v45 = vadd.f32 %v3552_v61, %v3362_v8 }
 0x2c0   : > { %v2541_v43 = vpop.f32.mrf.mxu0  ;;  %3170 = vadd.xlane.f32.xlu1 %v3169_v44  ;;  %v3173_v1 = vadd.f32 %v3172_v21, %v7859_v19 }
 0x2c1   : > { %v7872_v3 = vadd.f32 %v2890_v37, %v2538_v14  ;;  %v2894_v24 = vpop.f32.mrf.mxu1  ;;  %v3556_v54 = vsel %vm3043_vm0, %v3365_v30, 0.0  ;;  %v2542_v42 = vadd.f32 %v2541_v43, %v9826_v15  ;;  %v7883_v14 = vadd.f32 %v2888_v34, %v2536_v4 }
 0x2c2   : > { %v2543_v59 = vpop.f32.mrf.mxu0  ;;  %3174 = vadd.xlane.f32.xlu0 %v3173_v1  ;;  %v3557_v43 = vadd.f32 %v3556_v54, %v3364_v58 }
 0x2c3   : > { %9825 = vst [vmem:[#allocation32_spill] sm:$0xff] %v7872_v3  ;;  %v2544_v44 = vadd.f32 %v2543_v59, %v9827_v35  ;;  %v2896_v26 = vpop.f32.mrf.mxu1  ;;  %v3176_v21 = vsel %vm3043_vm0, %v7872_v3, 0.0  ;;  %v3367_v37 = vmul.f32 %v7872_v3, %v7872_v3  ;;  %9828 = vst [vmem:[#allocation31_spill] sm:$0xff] %v7883_v14  ;;  %v7887_v1 = vadd.f32 %v2894_v24, %v2542_v42  ;;  %v9831_v35 = vld [vmem:[#allocation36_spill] sm:$0xff] }
 0x2c4   : > { %v2545_v30 = vpop.f32.mrf.mxu0  ;;  %3554 = vadd.xlane.f32.xlu1 %v3553_v45  ;;  %v3177_v59 = vadd.f32 %v3176_v21, %v7883_v14  ;;  %v3366_v42 = vmul.f32 %v7883_v14, %v7883_v14 }
 0x2c5   : > { %v7885_v15 = vadd.f32 %v2896_v26, %v2544_v44  ;;  %v2898_v61 = vpop.f32.mrf.mxu1  ;;  %9830 = vst [vmem:[#allocation34_spill] sm:$0xff] %v7887_v1  ;;  %v3560_v34 = vsel %vm3043_vm0, %v3367_v37, 0.0  ;;  %v9832_v26 = vld [vmem:[#allocation35_spill] sm:$0xff] }
 0x2c6   : > { %v2547_v8 = vpop.f32.mrf.mxu0  ;;  %3558 = vadd.xlane.f32.xlu0 %v3557_v43  ;;  %v2546_v54 = vadd.f32 %v2545_v30, %v9832_v26  ;;  %v9834_v43 = vld [vmem:[#allocation37_spill] sm:$0xff]  ;;  %v3368_v30 = vmul.f32 %v7887_v1, %v7887_v1  ;;  %v9835_v26 = vld [vmem:[#allocation38_spill] sm:$0xff] }
 0x2c7   : > { %9829 = vst [vmem:[#allocation33_spill] sm:$0xff] %v7885_v15  ;;  %v2548_v19 = vadd.f32 %v2547_v8, %v9831_v35  ;;  %v2900_v40 = vpop.f32.mrf.mxu1  ;;  %v3180_v3 = vsel %vm3043_vm0, %v7885_v15, 0.0  ;;  %v3369_v4 = vmul.f32 %v7885_v15, %v7885_v15  ;;  %v3561_v35 = vadd.f32 %v3560_v34, %v3366_v42 }
 0x2c8   : > { %v2551_v45 = vpop.f32.mrf.mxu0  ;;  %3178 = vadd.xlane.f32.xlu1 %v3177_v59  ;;  %v3181_v24 = vadd.f32 %v3180_v3, %v7887_v1 }
 0x2c9   : > { %v7900_v58 = vadd.f32 %v2900_v40, %v2548_v19  ;;  %v2904_v44 = vpop.f32.mrf.mxu1  ;;  %v3564_v21 = vsel %vm3043_vm0, %v3369_v4, 0.0  ;;  %v2552_v8 = vadd.f32 %v2551_v45, %v9834_v43  ;;  %v7911_v19 = vadd.f32 %v2898_v61, %v2546_v54 }
 0x2ca   : > { %v2553_v37 = vpop.f32.mrf.mxu0  ;;  %3182 = vadd.xlane.f32.xlu0 %v3181_v24  ;;  %v3565_v45 = vadd.f32 %v3564_v21, %v3368_v30  ;;  %v9840_v21 = vld [vmem:[#allocation39_spill] sm:$0xff] }
 0x2cb   : > { %9833 = vst [vmem:[#allocation36_spill] sm:$0xff] %v7900_v58  ;;  %v2554_v59 = vadd.f32 %v2553_v37, %v9835_v26  ;;  %v2906_v15 = vpop.f32.mrf.mxu1  ;;  %v3047_v3 = vpop.xlane.xlu0 %3046  ;;  %v3184_v14 = vsel %vm3043_vm0, %v7900_v58, 0.0  ;;  %v3371_v40 = vmul.f32 %v7900_v58, %v7900_v58  ;;  %9836 = vst [vmem:[#allocation35_spill] sm:$0xff] %v7911_v19  ;;  %v7915_v42 = vadd.f32 %v2904_v44, %v2552_v8  ;;  %v9839_v26 = vld [vmem:[#allocation40_spill] sm:$0xff] }
 0x2cc   : > { %v2555_v4 = vpop.f32.mrf.mxu0  ;;  %3562 = vadd.xlane.f32.xlu1 %v3561_v35  ;;  %v3185_v37 = vadd.f32 %v3184_v14, %v7911_v19  ;;  %v3370_v14 = vmul.f32 %v7911_v19, %v7911_v19 }
 0x2cd   : > { %v7913_v24 = vadd.f32 %v2906_v15, %v2554_v59  ;;  %v2908_v34 = vpop.f32.mrf.mxu1  ;;  %9838 = vst [vmem:[#allocation38_spill] sm:$0xff] %v7915_v42  ;;  %v3568_v54 = vsel %vm3043_vm0, %v3371_v40, 0.0  ;;  %v2556_v35 = vadd.f32 %v2555_v4, %v9840_v21  ;;  %v9842_v40 = vld [vmem:[#allocation41_spill] sm:$0xff]  ;;  %v3372_v4 = vmul.f32 %v7915_v42, %v7915_v42 }
 0x2ce   : > { %v2557_v43 = vpop.f32.mrf.mxu0  ;;  %3566 = vadd.xlane.f32.xlu0 %v3565_v45 }
 0x2cf   : > { %9837 = vst [vmem:[#allocation37_spill] sm:$0xff] %v7913_v24  ;;  %v2558_v1 = vadd.f32 %v2557_v43, %v9839_v26  ;;  %v2910_v10 = vpop.f32.mrf.mxu1  ;;  %v3431_v17 = vpop.xlane.xlu0 %3430  ;;  %v3188_v61 = vsel %vm3043_vm0, %v7913_v24, 0.0  ;;  %v3373_v15 = vmul.f32 %v7913_v24, %v7913_v24  ;;  %v3569_v24 = vadd.f32 %v3568_v54, %v3370_v14 }
 0x2d0   : > { %v2561_v44 = vpop.f32.mrf.mxu0  ;;  %3186 = vadd.xlane.f32.xlu1 %v3185_v37  ;;  %v3189_v8 = vadd.f32 %v3188_v61, %v7915_v42  ;;  %v9843_v37 = vld [vmem:[#allocation42_spill] sm:$0xff]  ;;  %v7941_v19 = vadd.f32 %v2908_v34, %v2556_v35  ;;  %v9847_v42 = vld [vmem:[#allocation44_spill] sm:$0xff] }
 0x2d1   : > { %v7928_v30 = vadd.f32 %v2910_v10, %v2558_v1  ;;  %v2914_v59 = vpop.f32.mrf.mxu1  ;;  %v7930_v45 = vpop.xlane.xlu1 %3434  ;;  %v3572_v43 = vsel %vm3043_vm0, %v3373_v15, 0.0  ;;  %v2562_v26 = vadd.f32 %v2561_v44, %v9842_v40 }
 0x2d2   : > { %v2563_v58 = vpop.f32.mrf.mxu0  ;;  %3190 = vadd.xlane.f32.xlu0 %v3189_v8  ;;  %9844 = vst [vmem:[#allocation39_spill] sm:$0xff] %v7941_v19  ;;  %v3573_v44 = vadd.f32 %v3572_v43, %v3372_v4  ;;  %v7958_v43 = vmul.f32 0.0051020407, %v3047_v3 }
 0x2d3   : > { %9841 = vst [vmem:[#allocation40_spill] sm:$0xff] %v7928_v30  ;;  %v2564_v61 = vadd.f32 %v2563_v58, %v9843_v37  ;;  %v2916_v21 = vpop.f32.mrf.mxu1  ;;  %v3051_v51 = vpop.xlane.xlu0 %3050  ;;  %v3192_v10 = vsel %vm3043_vm0, %v7928_v30, 0.0  ;;  %v3375_v1 = vmul.f32 %v7928_v30, %v7928_v30  ;;  %v7947_v40 = vadd.f32 %v2914_v59, %v2562_v26  ;;  %v9848_v59 = vld [vmem:[#allocation43_spill] sm:$0xff] }
 0x2d4   : > { %v2565_v15 = vpop.f32.mrf.mxu0  ;;  %3570 = vadd.xlane.f32.xlu1 %v3569_v24  ;;  %v3193_v37 = vadd.f32 %v3192_v10, %v7941_v19 }
 0x2d5   : > { %v7943_v8 = vadd.f32 %v2916_v21, %v2564_v61  ;;  %v2918_v54 = vpop.f32.mrf.mxu1  ;;  %v7945_v14 = vpop.xlane.xlu1 %3054  ;;  %9846 = vst [vmem:[#allocation42_spill] sm:$0xff] %v7947_v40  ;;  %v3576_v34 = vsel %vm3043_vm0, %v3375_v1, 0.0  ;;  %v2566_v26 = vadd.f32 %v2565_v15, %v9848_v59  ;;  %v9851_v59 = vld [vmem:[#allocation46_spill] sm:$0xff] }
 0x2d6   : > { %v2567_v58 = vpop.f32.mrf.mxu0  ;;  %3574 = vadd.xlane.f32.xlu0 %v3573_v44 }
 0x2d7   : > { %9845 = vst [vmem:[#allocation41_spill] sm:$0xff] %v7943_v8  ;;  %v2568_v50 = vadd.f32 %v2567_v58, %v9847_v42  ;;  %v2920_v20 = vpop.f32.mrf.mxu1  ;;  %v7951_v30 = vpop.xlane.xlu0 %3438  ;;  %v3196_v24 = vsel %vm3043_vm0, %v7943_v8, 0.0  ;;  %v3377_v35 = vmul.f32 %v7943_v8, %v7943_v8  ;;  %v3374_v42 = vmul.f32 %v7941_v19, %v7941_v19  ;;  %v9850_v8 = vld [vmem:[#allocation45_spill] sm:$0xff] }
 0x2d8   : > { %v2571_v4 = vpop.f32.mrf.mxu0  ;;  %3194 = vadd.xlane.f32.xlu1 %v3193_v37  ;;  %v3197_v61 = vadd.f32 %v3196_v24, %v7947_v40  ;;  %v3748_v58 = vmul.f32 0.0051020407, %v3431_v17  ;;  %v3376_v37 = vmul.f32 %v7947_v40, %v7947_v40  ;;  %v7972_v24 = vmul.f32 0.0051020407, %v3051_v51 }
 0x2d9   : > { %v7964_v21 = vadd.f32 %v2920_v20, %v2568_v50  ;;  %v2924_v10 = vpop.f32.mrf.mxu1  ;;  %v7966_v44 = vpop.xlane.xlu1 %3058  ;;  %v3580_v1 = vsel %vm3043_vm0, %v3377_v35, 0.0  ;;  %v2572_v3 = vadd.f32 %v2571_v4, %v9850_v8  ;;  %v3577_v15 = vadd.f32 %v3576_v34, %v3374_v42 }
 0x2da   : > { %v2573_v28 = vpop.f32.mrf.mxu0  ;;  %3198 = vadd.xlane.f32.xlu0 %v3197_v61  ;;  %v3812_v8 = vmul.f32 %v7958_v43, %v7958_v43  ;;  %v7983_v34 = vadd.f32 %v2918_v54, %v2566_v26  ;;  %v3581_v51 = vadd.f32 %v3580_v1, %v3376_v37  ;;  %v3813_v46 = vmul.f32 %v7972_v24, %v7972_v24  ;;  %v9855_v54 = vld [vmem:[#allocation48_spill] sm:$0xff] }
 0x2db   : > { %9849 = vst [vmem:[#allocation44_spill] sm:$0xff] %v7964_v21  ;;  %v2574_v19 = vadd.f32 %v2573_v28, %v9851_v59  ;;  %v2926_v20 = vpop.f32.mrf.mxu1  ;;  %v7975_v50 = vpop.xlane.xlu0 %3062  ;;  %v3200_v7 = vsel %vm3043_vm0, %v7964_v21, 0.0  ;;  %v3379_v17 = vmul.f32 %v7964_v21, %v7964_v21  ;;  %v7989_v59 = vadd.f32 %v2924_v10, %v2572_v3 }
 0x2dc   : > { %9852 = vst [vmem:[#allocation43_spill] sm:$0xff] %v7983_v34  ;;  %v2575_v35 = vpop.f32.mrf.mxu0  ;;  %3578 = vadd.xlane.f32.xlu1 %v3577_v15  ;;  %v3876_v42 = vsub.f32 %v3748_v58, %v3812_v8  ;;  %v3201_v21 = vadd.f32 %v3200_v7, %v7983_v34  ;;  %v9856_v15 = vld [vmem:[#allocation47_spill] sm:$0xff]  ;;  %v3378_v7 = vmul.f32 %v7983_v34, %v7983_v34 }
 0x2dd   : > { %v7985_v4 = vadd.f32 %v2926_v20, %v2574_v19  ;;  %v2928_v28 = vpop.f32.mrf.mxu1  ;;  %v7987_v61 = vpop.xlane.xlu1 %3442  ;;  %9854 = vst [vmem:[#allocation46_spill] sm:$0xff] %v7989_v59  ;;  %v3584_v1 = vsel %vm3043_vm0, %v3379_v17, 0.0  ;;  %v2576_v58 = vadd.f32 %v2575_v35, %v9856_v15  ;;  %v3944_v34 = vld [vmem:[%s8048_s25 + $0x10] sm:$0xff] }
 0x2de   : > { %v2577_v40 = vpop.f32.mrf.mxu0  ;;  %3582 = vadd.xlane.f32.xlu0 %v3581_v51  ;;  %v4071_v51 = vadd.f32 1e-05, %v3876_v42  ;;  %v3585_v17 = vadd.f32 %v3584_v1, %v3378_v7  ;;  %v3750_v7 = vmul.f32 0.0051020407, %v7951_v30 }
 0x2df   : > { %9853 = vst [vmem:[#allocation45_spill] sm:$0xff] %v7985_v4  ;;  %v2578_v26 = vadd.f32 %v2577_v40, %v9855_v54  ;;  %v7995_v38 = vpop.xlane.xlu0 %3446  ;;  %v3204_v19 = vsel %vm3043_vm0, %v7985_v4, 0.0  ;;  %v2930_v10 = vpop.f32.mrf.mxu1  ;;  %v3381_v37 = vmul.f32 %v7985_v4, %v7985_v4  ;;  %v3749_v40 = vmul.f32 0.0051020407, %v7930_v45 }
 0x2e0   : > { %3202 = vadd.xlane.f32.xlu1 %v3201_v21  ;;  %v3205_v3 = vadd.f32 %v3204_v19, %v7989_v59  ;;  %v3380_v21 = vmul.f32 %v7989_v59, %v7989_v59  ;;  %v8015_v19 = vmul.f32 0.0051020407, %v7945_v14  ;;  %5551 = vrsqrt.f32 %v4071_v51  ;;  %v4007_v59 = vld [vmem:[%s8065_s28] sm:$0xff] }
 0x2e1   : > { %v8007_v20 = vadd.f32 %v2930_v10, %v2578_v26  ;;  %v8009_v8 = vpop.xlane.xlu1 %3066  ;;  %v3588_v35 = vsel %vm3043_vm0, %v3381_v37, 0.0  ;;  %v3877_v54 = vsub.f32 %v3749_v40, %v3813_v46  ;;  %v8021_v26 = vadd.f32 %v2928_v28, %v2576_v58  ;;  %v2934_v29 = vpop.f32.mrf.mxu1 }
 0x2e2   : > { %3206 = vadd.xlane.f32.xlu0 %v3205_v3  ;;  %v3589_v42 = vadd.f32 %v3588_v35, %v3380_v21  ;;  %v3814_v3 = vmul.f32 %v8015_v19, %v8015_v19 }
 0x2e3   : > { %9857 = vst [vmem:[#allocation48_spill] sm:$0xff] %v8007_v20  ;;  %v8017_v15 = vpop.xlane.xlu0 %3070  ;;  %v3208_v45 = vsel %vm3043_vm0, %v8007_v20, 0.0  ;;  %9858 = vst [vmem:[#allocation47_spill] sm:$0xff] %v8021_v26  ;;  %v3383_v1 = vmul.f32 %v8007_v20, %v8007_v20  ;;  %v4072_v14 = vadd.f32 1e-05, %v3877_v54  ;;  %v3382_v37 = vmul.f32 %v8021_v26, %v8021_v26  ;;  %v2936_v11 = vpop.f32.mrf.mxu1 }
 0x2e4   : > { %3586 = vadd.xlane.f32.xlu1 %v3585_v17  ;;  %v3209_v46 = vadd.f32 %v3208_v45, %v8021_v26  ;;  %v3878_v17 = vsub.f32 %v3750_v7, %v3814_v3 }
 0x2e5   : > { %v8023_v10 = vpop.xlane.xlu1 %3450  ;;  %v3592_v58 = vsel %vm3043_vm0, %v3383_v1, 0.0  ;;  %5553 = vrsqrt.f32 %v4072_v14  ;;  %v2938_v56 = vpop.f32.mrf.mxu1 }
 0x2e6   : > { %3590 = vadd.xlane.f32.xlu0 %v3589_v42  ;;  %v3593_v51 = vadd.f32 %v3592_v58, %v3382_v37  ;;  %v4073_v30 = vadd.f32 1e-05, %v3878_v17  ;;  %v3943_v37 = vld [vmem:[%s8048_s25 + $0x8] sm:$0xff] }
 0x2e7   : > { %v8031_v28 = vpop.xlane.xlu0 %3454 }
 0x2e8   : > { %3210 = vadd.xlane.f32.xlu1 %v3209_v46  ;;  %5555 = vrsqrt.f32 %v4073_v30  ;;  %v3942_v46 = vld [vmem:[%s8048_s25] sm:$0xff] }
 0x2e9   : > { %v8036_v40 = vpop.xlane.xlu1 %3074 }
 0x2eb   : > { %v8038_v21 = vpop.xlane.xlu0 %3078 }
 0x2ec   : > { %3594 = vadd.xlane.f32.xlu1 %v3593_v51 }
 0x2ed   : > { %v8040_v35 = vpop.xlane.xlu1 %3458  ;;  %v5552_v42 = vpop.eup %5551 }
 0x2ee   : > { %v4199_v7 = vmul.f32 %v5552_v42, %v3942_v46 }
 0x2ef   : > { %v8043_v54 = vpop.xlane.xlu0 %3462 }
 0x2f0   : > { %v4263_v4 = vmul.f32 %v4199_v7, %v7958_v43  ;;  %v2581_v43 = vpop.f32.mrf.mxu0 }
 0x2f1   : > { %v8050_v45 = vpop.xlane.xlu1 %3082  ;;  %v2582_v57 = vadd.f32 %v2581_v43, %v9863_v31 }
 0x2f2   : > { %v5554_v58 = vpop.eup %5553  ;;  %v4327_v46 = vsub.f32 %v4007_v59, %v4263_v4  ;;  %v2583_v4 = vpop.f32.mrf.mxu0 }
 0x2f3   : > { %v8052_v1 = vpop.xlane.xlu0 %3086  ;;  %v8067_v17 = vmul.f32 %v5554_v58, %v3943_v37 }
 0x2f4   : > { %v2585_v18 = vpop.f32.mrf.mxu0 }
 0x2f5   : > { %v8055_v14 = vpop.xlane.xlu1 %3466  ;;  %v5556_v26 = vpop.eup %5555 }
 0x2f6   : > { %v8083_v37 = vmul.f32 %v5556_v26, %v3944_v34 }
 0x2f7   : > { %v8057_v3 = vpop.xlane.xlu0 %3470 }
 0x2f9   : > { %v8060_v51 = vpop.xlane.xlu1 %3090 }
 0x2fb   : > { %v8069_v30 = vpop.xlane.xlu0 %3094 }
 0x2fc   : > { %4393 = vperm.xlu0 %5549, %v4199_v7  }
 0x2fd   : > { %v8073_v20 = vpop.xlane.xlu1 %3474  ;;  %4398 = vperm.xlu1 %5550, %v8067_v17  }
 0x2ff   : > { %v8076_v42 = vpop.xlane.xlu0 %3478 }
 0x301   : > { %v8079_v16 = vpop.xlane.xlu1 %3098  ;;  %4841 = vperm.xlu1 %5550, %v4327_v46   ;;  %v9859_v46 = vld [vmem:[#allocation50_spill] sm:$0xff] }
 0x302   : > { %v2584_v23 = vadd.f32 %v2583_v4, %v9859_v46  ;;  %v8112_v46 = vadd.f32 %v2934_v29, %v2582_v57  ;;  %v2940_v57 = vpop.f32.mrf.mxu1 }
 0x303   : > { %v8081_v58 = vpop.xlane.xlu0 %3102 }
 0x304   : > { %v8101_v49 = vadd.f32 %v2936_v11, %v2584_v23  ;;  %9866 = vst [vmem:[#allocation121_spill] sm:$0xff] %v8112_v46  ;;  %v2587_v23 = vpop.f32.mrf.mxu0 }
 0x305   : > { %v8085_v13 = vpop.xlane.xlu1 %3482  ;;  %4403 = vperm.xlu1 %5550, %v8083_v37  }
 0x306   : > { %9862 = vst [vmem:[#allocation119_spill] sm:$0xff] %v8101_v49  ;;  %v3212_v41 = vsel %vm3043_vm0, %v8101_v49, 0.0  ;;  %v3385_v4 = vmul.f32 %v8101_v49, %v8101_v49  ;;  %v2588_v49 = vadd.f32 %v2587_v23, %v9870_v12 }
 0x307   : > { %v8088_v7 = vpop.xlane.xlu0 %3486  ;;  %v3213_v31 = vadd.f32 %v3212_v41, %v8112_v46  ;;  %v3751_v41 = vmul.f32 0.0051020407, %v7987_v61 }
 0x308   : > { %v3596_v43 = vsel %vm3043_vm0, %v3385_v4, 0.0  ;;  %v8133_v4 = vadd.f32 %v2940_v57, %v2588_v49 }
 0x309   : > { %v8090_v27 = vpop.xlane.xlu1 %3106 }
 0x30a   : > { %9871 = vst [vmem:[#allocation52_spill] sm:$0xff] %v8133_v4 }
 0x30b   : > { %v8092_v59 = vpop.xlane.xlu0 %3110 }
 0x30d   : > { %v8094_v55 = vpop.xlane.xlu1 %3490 }
 0x30f   : > { %v8097_v34 = vpop.xlane.xlu0 %3494 }
 0x310   : > { %9860 = vst [vmem:[#allocation50_spill] sm:$0xff] %v8097_v34 }
 0x311   : > { %v8099_v26 = vpop.xlane.xlu1 %3114 }
 0x312   : > { %9861 = vst [vmem:[#allocation118_spill] sm:$0xff] %v8099_v26  ;;  %v8128_v26 = vmul.f32 0.0051020407, %v7966_v44  ;;  %v3216_v44 = vsel %vm3043_vm0, %v8133_v4, 0.0 }
 0x313   : > { %v8104_v60 = vpop.xlane.xlu0 %3118 }
 0x314   : > { %9864 = vst [vmem:[#allocation49_spill] sm:$0xff] %v8104_v60  ;;  %v3815_v12 = vmul.f32 %v8128_v26, %v8128_v26 }
 0x315   : > { %v8106_v47 = vpop.xlane.xlu1 %3498 }
 0x316   : > { %9865 = vst [vmem:[#allocation120_spill] sm:$0xff] %v8106_v47  ;;  %v3384_v47 = vmul.f32 %v8112_v46, %v8112_v46 }
 0x317   : > { %v8114_v22 = vpop.xlane.xlu0 %3502 }
 0x318   : > { %9867 = vst [vmem:[#allocation122_spill] sm:$0xff] %v8114_v22  ;;  %v3597_v22 = vadd.f32 %v3596_v43, %v3384_v47  ;;  %v3879_v47 = vsub.f32 %v3751_v41, %v3815_v12  ;;  %v3752_v41 = vmul.f32 0.0051020407, %v7995_v38  ;;  %v4264_v38 = vmul.f32 %v8067_v17, %v7972_v24  ;;  %v3945_v24 = vld [vmem:[%s8048_s25 + $0x18] sm:$0xff] }
 0x319   : > { %v8116_v11 = vpop.xlane.xlu1 %3122 }
 0x31a   : > { %9868 = vst [vmem:[#allocation123_spill] sm:$0xff] %v8116_v11 }
 0x31b   : > { %3214 = vadd.xlane.f32.xlu0 %v3213_v31  ;;  %v8120_v60 = vpop.xlane.xlu0 %3126  ;;  %v9872_v31 = vld [vmem:[#allocation51_spill] sm:$0xff] }
 0x31c   : > { %9869 = vst [vmem:[#allocation124_spill] sm:$0xff] %v8120_v60  ;;  %v2586_v60 = vadd.f32 %v2585_v18, %v9872_v31  ;;  %v8151_v18 = vmul.f32 0.0051020407, %v7975_v50  ;;  %v4074_v31 = vadd.f32 1e-05, %v3879_v47 }
 0x31d   : > { %v8125_v29 = vpop.xlane.xlu1 %3506 }
 0x31e   : > { %v8146_v43 = vadd.f32 %v2938_v56, %v2586_v60  ;;  %v3816_v60 = vmul.f32 %v8151_v18, %v8151_v18  ;;  %5557 = vrsqrt.f32 %v4074_v31 }
 0x31f   : > { %3598 = vadd.xlane.f32.xlu0 %v3597_v22  ;;  %v8130_v11 = vpop.xlane.xlu0 %3510  ;;  %v3387_v22 = vmul.f32 %v8133_v4, %v8133_v4 }
 0x320   : > { %9874 = vst [vmem:[#allocation125_spill] sm:$0xff] %v8146_v43  ;;  %v3217_v57 = vadd.f32 %v3216_v44, %v8146_v43  ;;  %v3386_v56 = vmul.f32 %v8146_v43, %v8146_v43  ;;  %v3880_v44 = vsub.f32 %v3752_v41, %v3816_v60  ;;  %v4008_v43 = vld [vmem:[%s8065_s28 + $0x8] sm:$0xff]  ;;  %v4265_v60 = vmul.f32 %v8083_v37, %v8015_v19 }
 0x321   : > { %v8136_v34 = vpop.xlane.xlu1 %3130  ;;  %v3600_v12 = vsel %vm3043_vm0, %v3387_v22, 0.0  ;;  %v9891_v37 = vld [vmem:[#allocation54_spill] sm:$0xff] }
 0x322   : > { %v3601_v4 = vadd.f32 %v3600_v12, %v3386_v56 }
 0x323   : > { %v8140_v23 = vpop.xlane.xlu0 %3134 }
 0x324   : > { %9873 = vst [vmem:[#allocation51_spill] sm:$0xff] %v8140_v23 }
 0x325   : > { %v8148_v49 = vpop.xlane.xlu1 %3514 }
 0x327   : > { %v8153_v61 = vpop.xlane.xlu0 %3518 }
 0x328   : > { %9875 = vst [vmem:[#allocation126_spill] sm:$0xff] %v8153_v61 }
 0x329   : > { %v8158_v46 = vpop.xlane.xlu1 %3138  ;;  %3218 = vadd.xlane.f32.xlu1 %v3217_v57  ;;  %v4075_v57 = vadd.f32 1e-05, %v3880_v44 }
 0x32a   : > { %9876 = vst [vmem:[#allocation127_spill] sm:$0xff] %v8158_v46 }
 0x32b   : > { %v8164_v50 = vpop.xlane.xlu0 %3142  ;;  %5559 = vrsqrt.f32 %v4075_v57 }
 0x32c   : > { %9877 = vst [vmem:[#allocation128_spill] sm:$0xff] %v8164_v50  ;;  %v4328_v50 = vsub.f32 %v4008_v43, %v4264_v38  ;;  %v4009_v43 = vld [vmem:[%s8065_s28 + $0x10] sm:$0xff]  ;;  %v2591_v38 = vpop.f32.mrf.mxu0 }
 0x32d   : > { %v8166_v47 = vpop.xlane.xlu1 %3522  ;;  %3602 = vadd.xlane.f32.xlu1 %v3601_v4  ;;  %v5558_v4 = vpop.eup %5557  ;;  %v4329_v57 = vsub.f32 %v4009_v43, %v4265_v60 }
 0x32e   : > { %9878 = vst [vmem:[#allocation129_spill] sm:$0xff] %v8166_v47  ;;  %v8186_v56 = vmul.f32 %v5558_v4, %v3945_v24  ;;  %v2593_v4 = vpop.f32.mrf.mxu0  ;;  %v2944_v24 = vpop.f32.mrf.mxu1 }
 0x32f   : > { %v8170_v22 = vpop.xlane.xlu0 %3526 }
 0x330   : > { %9879 = vst [vmem:[#allocation130_spill] sm:$0xff] %v8170_v22  ;;  %v3946_v22 = vld [vmem:[%s8048_s25 + $0x20] sm:$0xff]  ;;  %v2946_v60 = vpop.f32.mrf.mxu1 }
 0x331   : > { %v8173_v46 = vpop.xlane.xlu1 %3146 }
 0x332   : > { %9880 = vst [vmem:[#allocation131_spill] sm:$0xff] %v8173_v46 }
 0x333   : > { %v8175_v61 = vpop.xlane.xlu0 %3150 }
 0x334   : > { %9881 = vst [vmem:[#allocation132_spill] sm:$0xff] %v8175_v61 }
 0x335   : > { %v8177_v31 = vpop.xlane.xlu1 %3530  ;;  %4846 = vperm.xlu0 %5549, %v4328_v50  }
 0x336   : > { %9882 = vst [vmem:[#allocation133_spill] sm:$0xff] %v8177_v31 }
 0x337   : > { %v8179_v41 = vpop.xlane.xlu0 %3534 }
 0x338   : > { %9883 = vst [vmem:[#allocation134_spill] sm:$0xff] %v8179_v41  ;;  %v5560_v41 = vpop.eup %5559 }
 0x339   : > { %v8181_v12 = vpop.xlane.xlu1 %3154 }
 0x33a   : > { %9884 = vst [vmem:[#allocation135_spill] sm:$0xff] %v8181_v12  ;;  %v8201_v12 = vmul.f32 %v5560_v41, %v3946_v22 }
 0x33b   : > { %v8184_v17 = vpop.xlane.xlu0 %3158 }
 0x33c   : > { %9885 = vst [vmem:[#allocation136_spill] sm:$0xff] %v8184_v17 }
 0x33d   : > { %v8190_v44 = vpop.xlane.xlu1 %3538 }
 0x33e   : > { %9886 = vst [vmem:[#allocation137_spill] sm:$0xff] %v8190_v44  ;;  %4408 = vperm.xlu1 %5550, %v8186_v56   ;;  %v2594_v44 = vadd.f32 %v2593_v4, %v9891_v37 }
 0x33f   : > { %v8194_v50 = vpop.xlane.xlu0 %3542 }
 0x340   : > { %9887 = vst [vmem:[#allocation138_spill] sm:$0xff] %v8194_v50 }
 0x341   : > { %v8196_v61 = vpop.xlane.xlu1 %3162 }
 0x342   : > { %9888 = vst [vmem:[#allocation139_spill] sm:$0xff] %v8196_v61  ;;  %4851 = vperm.xlu1 %5550, %v4329_v57   ;;  %v8211_v61 = vadd.f32 %v2946_v60, %v2594_v44 }
 0x343   : > { %v8199_v17 = vpop.xlane.xlu0 %3166 }
 0x344   : > { %9889 = vst [vmem:[#allocation140_spill] sm:$0xff] %v8199_v17  ;;  %9894 = vst [vmem:[#allocation143_spill] sm:$0xff] %v8211_v61  ;;  %v9896_v17 = vld [vmem:[#allocation53_spill] sm:$0xff]  ;;  %v3220_v41 = vsel %vm3043_vm0, %v8211_v61, 0.0  ;;  %v3389_v4 = vmul.f32 %v8211_v61, %v8211_v61  ;;  %v2948_v61 = vpop.f32.mrf.mxu1 }
 0x345   : > { %v8203_v19 = vpop.xlane.xlu1 %3546  ;;  %v2592_v31 = vadd.f32 %v2591_v38, %v9896_v17 }
 0x346   : > { %9890 = vst [vmem:[#allocation141_spill] sm:$0xff] %v8203_v19  ;;  %4413 = vperm.xlu1 %5550, %v8201_v12   ;;  %v3604_v17 = vsel %vm3043_vm0, %v3389_v4, 0.0  ;;  %v3948_v19 = vld [vmem:[%s8048_s25 + $0x30] sm:$0xff] }
 0x347   : > { %v8207_v50 = vpop.xlane.xlu0 %3550  ;;  %v8224_v37 = vadd.f32 %v2944_v24, %v2592_v31 }
 0x348   : > { %9892 = vst [vmem:[#allocation54_spill] sm:$0xff] %v8207_v50 }
 0x349   : > { %v8209_v43 = vpop.xlane.xlu1 %3170  ;;  %9899 = vst [vmem:[#allocation146_spill] sm:$0xff] %v8224_v37  ;;  %v3221_v44 = vadd.f32 %v3220_v41, %v8224_v37  ;;  %v3388_v38 = vmul.f32 %v8224_v37, %v8224_v37  ;;  %v8246_v37 = vmul.f32 0.0051020407, %v8009_v8 }
 0x34a   : > { %9893 = vst [vmem:[#allocation142_spill] sm:$0xff] %v8209_v43 }
 0x34b   : > { %v8213_v57 = vpop.xlane.xlu0 %3174 }
 0x34c   : > { %9895 = vst [vmem:[#allocation144_spill] sm:$0xff] %v8213_v57  ;;  %v2595_v57 = vpop.f32.mrf.mxu0 }
 0x34d   : > { %v8216_v46 = vpop.xlane.xlu1 %3554 }
 0x34e   : > { %9897 = vst [vmem:[#allocation53_spill] sm:$0xff] %v8216_v46  ;;  %v3605_v46 = vadd.f32 %v3604_v17, %v3388_v38  ;;  %v2597_v24 = vpop.f32.mrf.mxu0  ;;  %v3753_v17 = vmul.f32 0.0051020407, %v8023_v10 }
 0x34f   : > { %v8218_v22 = vpop.xlane.xlu0 %3558 }
 0x350   : > { %9898 = vst [vmem:[#allocation145_spill] sm:$0xff] %v8218_v22 }
 0x351   : > { %v8226_v50 = vpop.xlane.xlu1 %3178 }
 0x352   : > { %9900 = vst [vmem:[#allocation147_spill] sm:$0xff] %v8226_v50 }
 0x353   : > { %v8229_v60 = vpop.xlane.xlu0 %3182 }
 0x354   : > { %9901 = vst [vmem:[#allocation148_spill] sm:$0xff] %v8229_v60  ;;  %3222 = vadd.xlane.f32.xlu0 %v3221_v44  ;;  %v9906_v60 = vld [vmem:[#allocation56_spill] sm:$0xff]  ;;  %v2950_v44 = vpop.f32.mrf.mxu1 }
 0x355   : > { %v8234_v22 = vpop.xlane.xlu1 %3562  ;;  %v2598_v50 = vadd.f32 %v2597_v24, %v9906_v60  ;;  %v3817_v60 = vmul.f32 %v8246_v37, %v8246_v37 }
 0x356   : > { %9902 = vst [vmem:[#allocation149_spill] sm:$0xff] %v8234_v22 }
 0x357   : > { %v8236_v43 = vpop.xlane.xlu0 %3566  ;;  %v8251_v38 = vadd.f32 %v2950_v44, %v2598_v50  ;;  %v8269_v44 = vmul.f32 0.0051020407, %v8017_v15 }
 0x358   : > { %9903 = vst [vmem:[#allocation150_spill] sm:$0xff] %v8236_v43  ;;  %3606 = vadd.xlane.f32.xlu0 %v3605_v46  ;;  %v9911_v43 = vld [vmem:[#allocation55_spill] sm:$0xff] }
 0x359   : > { %v8238_v31 = vpop.xlane.xlu1 %3186  ;;  %9909 = vst [vmem:[#allocation154_spill] sm:$0xff] %v8251_v38  ;;  %v3391_v8 = vmul.f32 %v8251_v38, %v8251_v38  ;;  %v3224_v10 = vsel %vm3043_vm0, %v8251_v38, 0.0 }
 0x35a   : > { %9904 = vst [vmem:[#allocation151_spill] sm:$0xff] %v8238_v31  ;;  %v2596_v31 = vadd.f32 %v2595_v57, %v9911_v43  ;;  %v4266_v57 = vmul.f32 %v8186_v56, %v8128_v26 }
 0x35b   : > { %v8240_v41 = vpop.xlane.xlu0 %3190 }
 0x35c   : > { %9905 = vst [vmem:[#allocation152_spill] sm:$0xff] %v8240_v41  ;;  %v3881_v41 = vsub.f32 %v3753_v17, %v3817_v60  ;;  %v8266_v50 = vadd.f32 %v2948_v61, %v2596_v31  ;;  %v3754_v17 = vmul.f32 0.0051020407, %v8031_v28  ;;  %v3608_v61 = vsel %vm3043_vm0, %v3391_v8, 0.0 }
 0x35d   : > { %v8243_v4 = vpop.xlane.xlu1 %3570  ;;  %v3818_v31 = vmul.f32 %v8269_v44, %v8269_v44 }
 0x35e   : > { %9907 = vst [vmem:[#allocation56_spill] sm:$0xff] %v8243_v4  ;;  %9914 = vst [vmem:[#allocation157_spill] sm:$0xff] %v8266_v50  ;;  %v3225_v43 = vadd.f32 %v3224_v10, %v8266_v50  ;;  %v3390_v15 = vmul.f32 %v8266_v50, %v8266_v50 }
 0x35f   : > { %v8248_v22 = vpop.xlane.xlu0 %3574  ;;  %v3882_v56 = vsub.f32 %v3754_v17, %v3818_v31  ;;  %v9922_v31 = vld [vmem:[#allocation94_spill] sm:$0xff] }
 0x360   : > { %9908 = vst [vmem:[#allocation153_spill] sm:$0xff] %v8248_v22  ;;  %v3609_v26 = vadd.f32 %v3608_v61, %v3390_v15  ;;  %v3947_v61 = vld [vmem:[%s8048_s25 + $0x28] sm:$0xff]  ;;  %v2954_v15 = vpop.f32.mrf.mxu1 }
 0x361   : > { %v8253_v46 = vpop.xlane.xlu1 %3194  ;;  %v4077_v8 = vadd.f32 1e-05, %v3882_v56 }
 0x362   : > { %9910 = vst [vmem:[#allocation155_spill] sm:$0xff] %v8253_v46 }
 0x363   : > { %v8258_v24 = vpop.xlane.xlu0 %3198 }
 0x364   : > { %9912 = vst [vmem:[#allocation55_spill] sm:$0xff] %v8258_v24  ;;  %v4076_v24 = vadd.f32 1e-05, %v3881_v41 }
 0x365   : > { %v8262_v4 = vpop.xlane.xlu1 %3578 }
 0x366   : > { %9913 = vst [vmem:[#allocation156_spill] sm:$0xff] %v8262_v4  ;;  %v4010_v4 = vld [vmem:[%s8065_s28 + $0x18] sm:$0xff]  ;;  %5561 = vrsqrt.f32 %v4076_v24 }
 0x367   : > { %v8275_v60 = vpop.xlane.xlu0 %3582  ;;  %v4330_v10 = vsub.f32 %v4010_v4, %v4266_v57  ;;  %5563 = vrsqrt.f32 %v4077_v8  ;;  %v2601_v4 = vpop.f32.mrf.mxu0 }
 0x368   : > { %9915 = vst [vmem:[#allocation158_spill] sm:$0xff] %v8275_v60  ;;  %v4267_v60 = vmul.f32 %v8201_v12, %v8151_v18 }
 0x369   : > { %v8277_v22 = vpop.xlane.xlu1 %3202  ;;  %v2603_v8 = vpop.f32.mrf.mxu0 }
 0x36a   : > { %9916 = vst [vmem:[#allocation159_spill] sm:$0xff] %v8277_v22  ;;  %3226 = vadd.xlane.f32.xlu1 %v3225_v43 }
 0x36b   : > { %v8287_v41 = vpop.xlane.xlu0 %3206 }
 0x36c   : > { %9918 = vst [vmem:[#allocation161_spill] sm:$0xff] %v8287_v41 }
 0x36d   : > { %v8285_v28 = vpop.xlane.xlu1 %3586 }
 0x36e   : > { %9917 = vst [vmem:[#allocation160_spill] sm:$0xff] %v8285_v28  ;;  %4856 = vperm.xlu0 %5549, %v4330_v10   ;;  %3610 = vadd.xlane.f32.xlu1 %v3609_v26  ;;  %v9923_v26 = vld [vmem:[#allocation93_spill] sm:$0xff] }
 0x36f   : > { %v8292_v43 = vpop.xlane.xlu0 %3590  ;;  %v4011_v28 = vld [vmem:[%s8065_s28 + $0x20] sm:$0xff] }
 0x370   : > { %9920 = vst [vmem:[#allocation163_spill] sm:$0xff] %v8292_v43  ;;  %v4331_v22 = vsub.f32 %v4011_v28, %v4267_v60 }
 0x371   : > { %v8290_v38 = vpop.xlane.xlu1 %3210 }
 0x372   : > { %9919 = vst [vmem:[#allocation162_spill] sm:$0xff] %v8290_v38 }
 0x373   : > { %v5562_v17 = vpop.eup %5561 }
 0x374   : > { %v4204_v41 = vmul.f32 %v5562_v17, %v3947_v61  ;;  %v5564_v46 = vpop.eup %5563  ;;  %v9926_v17 = vld [vmem:[#allocation57_spill] sm:$0xff] }
 0x375   : > { %v8294_v50 = vpop.xlane.xlu1 %3594  ;;  %v2602_v61 = vadd.f32 %v2601_v4, %v9926_v17  ;;  %v8317_v23 = vmul.f32 %v5564_v46, %v3948_v19  ;;  %v2605_v46 = vpop.f32.mrf.mxu0  ;;  %v9928_v4 = vld [vmem:[#allocation60_spill] sm:$0xff]  ;;  %v9930_v17 = vld [vmem:[#allocation59_spill] sm:$0xff] }
 0x376   : > { %9921 = vst [vmem:[#allocation164_spill] sm:$0xff] %v8294_v50 }
 0x377   : > { %v4394_v24 = vpop.permute.xlu0 %4393  ;;  %v2607_v28 = vpop.f32.mrf.mxu0 }
 0x378   : > { %v4711_v10 = vmul.f32 %v4394_v24, %v9922_v31  ;;  %v4712_v56 = vmul.f32 %v4394_v24, %v9923_v26  ;;  %v9924_v31 = vld [vmem:[#allocation58_spill] sm:$0xff]  ;;  %v2956_v26 = vpop.f32.mrf.mxu1 }
 0x379   : > { %v8296_v57 = vpop.permute.xlu1 %4398  ;;  %v2604_v24 = vadd.f32 %v2603_v8, %v9924_v31  ;;  %v4268_v8 = vmul.f32 %v4204_v41, %v8246_v37  ;;  %v3755_v31 = vmul.f32 0.0051020407, %v8040_v35  ;;  %v8351_v35 = vmul.f32 0.0051020407, %v8038_v21 }
 0x37b   : > { %v8314_v47 = vadd.f32 %v2956_v26, %v2604_v24  ;;  %v4012_v26 = vld [vmem:[%s8065_s28 + $0x28] sm:$0xff] }
 0x37d   : > { %v4842_v43 = vpop.permute.xlu1 %4841  ;;  %9925 = vst [vmem:[#allocation94_spill] sm:$0xff] %v8314_v47  ;;  %v3393_v18 = vmul.f32 %v8314_v47, %v8314_v47  ;;  %v3228_v12 = vsel %vm3043_vm0, %v8314_v47, 0.0  ;;  %v4013_v47 = vld [vmem:[%s8065_s28 + $0x30] sm:$0xff] }
 0x37e   : > { %v5159_v50 = vadd.f32 %v4842_v43, %v4711_v10  ;;  %v5160_v38 = vadd.f32 %v4842_v43, %v4712_v56  ;;  %v2958_v43 = vpop.f32.mrf.mxu1  ;;  %v2608_v10 = vadd.f32 %v2607_v28, %v9928_v4 }
 0x37f   : > { %4418 = vperm.xlu1 %5550, %v4204_v41  }
 0x380   : > { %5287 = vst [vmem:[%s8304_s11] sm:$0xff] %v5159_v50  ;;  %5288 = vst.msk [vmem:[%s8304_s11 + $0x8] sm:$0xff] %vm3043_vm0, %v5160_v38  ;;  %v8324_v38 = vadd.f32 %v2954_v15, %v2602_v61  ;;  %v2960_v56 = vpop.f32.mrf.mxu1  ;;  %v8332_v15 = vmul.f32 0.0051020407, %v8036_v40  ;;  %v2606_v61 = vadd.f32 %v2605_v46, %v9930_v17  ;;  %v3756_v46 = vmul.f32 0.0051020407, %v8043_v54 }
 0x381   : > { %v8336_v24 = vadd.f32 %v2960_v56, %v2608_v10  ;;  %v4713_v54 = vmul.f32 %v8296_v57, %v7379_v5 }
 0x382   : > { %9927 = vst [vmem:[#allocation93_spill] sm:$0xff] %v8324_v38  ;;  %v3229_v50 = vadd.f32 %v3228_v12, %v8324_v38  ;;  %v3392_v60 = vmul.f32 %v8324_v38, %v8324_v38  ;;  %v4332_v12 = vsub.f32 %v4012_v26, %v4268_v8  ;;  %v8348_v37 = vadd.f32 %v2958_v43, %v2606_v61  ;;  %v4404_v8 = vpop.permute.xlu1 %4403 }
 0x383   : > { %4861 = vperm.xlu1 %5550, %v4331_v22   ;;  %v3612_v22 = vsel %vm3043_vm0, %v3393_v18, 0.0  ;;  %9929 = vst [vmem:[#allocation58_spill] sm:$0xff] %v8336_v24  ;;  %v3819_v18 = vmul.f32 %v8332_v15, %v8332_v15  ;;  %v3232_v40 = vsel %vm3043_vm0, %v8336_v24, 0.0  ;;  %v3820_v43 = vmul.f32 %v8351_v35, %v8351_v35 }
 0x384   : > { %v3613_v19 = vadd.f32 %v3612_v22, %v3392_v60  ;;  %v3395_v22 = vmul.f32 %v8336_v24, %v8336_v24  ;;  %9931 = vst [vmem:[#allocation57_spill] sm:$0xff] %v8348_v37  ;;  %v3233_v41 = vadd.f32 %v3232_v40, %v8348_v37  ;;  %v3394_v4 = vmul.f32 %v8348_v37, %v8348_v37  ;;  %v10036_v37 = vld [vmem:[#allocation128_spill] sm:$0xff] }
 0x385   : > { %v3884_v56 = vsub.f32 %v3756_v46, %v3820_v43  ;;  %v9934_v43 = vld [vmem:[#allocation96_spill] sm:$0xff] }
 0x386   : > { %v3616_v28 = vsel %vm3043_vm0, %v3395_v22, 0.0  ;;  %v2964_v22 = vpop.f32.mrf.mxu1 }
 0x387   : > { %4423 = vperm.xlu1 %5550, %v8317_v23   ;;  %v3617_v21 = vadd.f32 %v3616_v28, %v3394_v4  ;;  %v3949_v28 = vld [vmem:[%s8048_s25 + $0x38] sm:$0xff] }
 0x38d   : > { %3230 = vadd.xlane.f32.xlu0 %v3229_v50  ;;  %v3883_v50 = vsub.f32 %v3755_v31, %v3819_v18  ;;  %v4714_v31 = vmul.f32 %v8296_v57, %v7383_v52  ;;  %v4079_v18 = vadd.f32 1e-05, %v3884_v56  ;;  %v2966_v57 = vpop.f32.mrf.mxu1  ;;  %v9935_v56 = vld [vmem:[#allocation95_spill] sm:$0xff] }
 0x391   : > { %3614 = vadd.xlane.f32.xlu0 %v3613_v19  ;;  %v4078_v19 = vadd.f32 1e-05, %v3883_v50 }
 0x393   : > { %5565 = vrsqrt.f32 %v4078_v19 }
 0x394   : > { %5567 = vrsqrt.f32 %v4079_v18  ;;  %v4269_v18 = vmul.f32 %v8317_v23, %v8269_v44  ;;  %v8394_v23 = vmul.f32 0.0051020407, %v8050_v45 }
 0x3a0   : > { %v5566_v46 = vpop.eup %5565 }
 0x3a4   : > { %v8344_v60 = vpop.xlane.xlu0 %3214 }
 0x3a7   : > { %4866 = vperm.xlu0 %5549, %v4332_v12   ;;  %v2611_v12 = vpop.f32.mrf.mxu0 }
 0x3a8   : > { %v8360_v10 = vpop.xlane.xlu0 %3598 }
 0x3a9   : > { %v2613_v40 = vpop.f32.mrf.mxu0 }
 0x3ab   : > { %3234 = vadd.xlane.f32.xlu1 %v3233_v41  ;;  %v9932_v41 = vld [vmem:[#allocation62_spill] sm:$0xff] }
 0x3ac   : > { %v2614_v52 = vadd.f32 %v2613_v40, %v9932_v41 }
 0x3ae   : > { %v8375_v4 = vadd.f32 %v2966_v57, %v2614_v52 }
 0x3af   : > { %3618 = vadd.xlane.f32.xlu1 %v3617_v21  ;;  %v4715_v21 = vmul.f32 %v4404_v8, %v9934_v43 }
 0x3b0   : > { %v4847_v26 = vpop.permute.xlu0 %4846  ;;  %9933 = vst [vmem:[#allocation60_spill] sm:$0xff] %v8375_v4  ;;  %v3397_v52 = vmul.f32 %v8375_v4, %v8375_v4 }
 0x3b1   : > { %v5161_v17 = vadd.f32 %v4847_v26, %v4713_v54  ;;  %v5162_v61 = vadd.f32 %v4847_v26, %v4714_v31  ;;  %v4716_v54 = vmul.f32 %v4404_v8, %v9935_v56  ;;  %v9936_v31 = vld [vmem:[#allocation61_spill] sm:$0xff]  ;;  %v3236_v8 = vsel %vm3043_vm0, %v8375_v4, 0.0 }
 0x3b2   : > { %v8366_v50 = vpop.xlane.xlu1 %3218  ;;  %v2612_v26 = vadd.f32 %v2611_v12, %v9936_v31  ;;  %v4333_v12 = vsub.f32 %v4013_v47, %v4269_v18  ;;  %v3620_v43 = vsel %vm3043_vm0, %v3397_v52, 0.0  ;;  %v3821_v47 = vmul.f32 %v8394_v23, %v8394_v23  ;;  %v4014_v18 = vld [vmem:[%s8065_s28 + $0x38] sm:$0xff] }
 0x3b3   : > { %5289 = vst [vmem:[%s8304_s11 + $0x10] sm:$0xff] %v5161_v17  ;;  %5290 = vst.msk [vmem:[%s8304_s11 + $0x18] sm:$0xff] %vm3043_vm0, %v5162_v61  ;;  %v4206_v61 = vmul.f32 %v5566_v46, %v3949_v28  ;;  %v5568_v46 = vpop.eup %5567  ;;  %v3950_v28 = vld [vmem:[%s8048_s25 + $0x40] sm:$0xff] }
 0x3b4   : > { %v8390_v57 = vadd.f32 %v2964_v22, %v2612_v26  ;;  %v4207_v22 = vmul.f32 %v5568_v46, %v3950_v28  ;;  %v2615_v26 = vpop.f32.mrf.mxu0  ;;  %v3951_v28 = vld [vmem:[%s8048_s25 + $0x48] sm:$0xff] }
 0x3b6   : > { %v8371_v5 = vpop.xlane.xlu1 %3602  ;;  %9937 = vst [vmem:[#allocation59_spill] sm:$0xff] %v8390_v57  ;;  %v3237_v44 = vadd.f32 %v3236_v8, %v8390_v57  ;;  %v3396_v56 = vmul.f32 %v8390_v57, %v8390_v57  ;;  %v9938_v8 = vld [vmem:[#allocation64_spill] sm:$0xff] }
 0x3b8   : > { %v3621_v45 = vadd.f32 %v3620_v43, %v3396_v56  ;;  %v9940_v56 = vld [vmem:[#allocation63_spill] sm:$0xff] }
 0x3ba   : > { %v4409_v19 = vpop.permute.xlu1 %4408 }
 0x3be   : > { %v4852_v17 = vpop.permute.xlu1 %4851 }
 0x3bf   : > { %v5163_v40 = vadd.f32 %v4852_v17, %v4715_v21  ;;  %v5164_v41 = vadd.f32 %v4852_v17, %v4716_v54  ;;  %v3757_v21 = vmul.f32 0.0051020407, %v8055_v14  ;;  %v4270_v17 = vmul.f32 %v4206_v61, %v8332_v15  ;;  %v2617_v14 = vpop.f32.mrf.mxu0 }
 0x3c0   : > { %4428 = vperm.xlu1 %5550, %v4206_v61   ;;  %v8416_v15 = vmul.f32 0.0051020407, %v8052_v1 }
 0x3c1   : > { %5291 = vst [vmem:[%s8304_s11 + $0x20] sm:$0xff] %v5163_v40  ;;  %5292 = vst.msk [vmem:[%s8304_s11 + $0x28] sm:$0xff] %vm3043_vm0, %v5164_v41  ;;  %v3885_v54 = vsub.f32 %v3757_v21, %v3821_v47  ;;  %v2968_v40 = vpop.f32.mrf.mxu1  ;;  %v4334_v41 = vsub.f32 %v4014_v18, %v4270_v17  ;;  %v2616_v47 = vadd.f32 %v2615_v26, %v9940_v56  ;;  %v9942_v18 = vld [vmem:[#allocation97_spill] sm:$0xff] }
 0x3c2   : > { %v4717_v26 = vmul.f32 %v4409_v19, %v7435_v32  ;;  %v3822_v1 = vmul.f32 %v8416_v15, %v8416_v15  ;;  %v4414_v56 = vpop.permute.xlu1 %4413 }
 0x3c3   : > { %v4080_v31 = vadd.f32 1e-05, %v3885_v54  ;;  %v8425_v17 = vadd.f32 %v2968_v40, %v2616_v47  ;;  %v2621_v40 = vpop.f32.mrf.mxu0 }
 0x3c4   : > { %4871 = vperm.xlu1 %5550, %v4333_v12   ;;  %v2618_v12 = vadd.f32 %v2617_v14, %v9938_v8  ;;  %v4718_v14 = vmul.f32 %v4409_v19, %v9942_v18 }
 0x3c5   : > { %5569 = vrsqrt.f32 %v4080_v31  ;;  %9941 = vst [vmem:[#allocation96_spill] sm:$0xff] %v8425_v17 }
 0x3c6   : > { %3238 = vadd.xlane.f32.xlu0 %v3237_v44  ;;  %v2970_v44 = vpop.f32.mrf.mxu1 }
 0x3c7   : > { %v8411_v21 = vadd.f32 %v2970_v44, %v2618_v12  ;;  %v3398_v44 = vmul.f32 %v8425_v17, %v8425_v17 }
 0x3c8   : > { %4433 = vperm.xlu1 %5550, %v4207_v22   ;;  %v2974_v47 = vpop.f32.mrf.mxu1 }
 0x3c9   : > { %9939 = vst [vmem:[#allocation62_spill] sm:$0xff] %v8411_v21  ;;  %v3399_v54 = vmul.f32 %v8411_v21, %v8411_v21  ;;  %v3240_v31 = vsel %vm3043_vm0, %v8411_v21, 0.0 }
 0x3ca   : > { %3622 = vadd.xlane.f32.xlu0 %v3621_v45  ;;  %v3758_v45 = vmul.f32 0.0051020407, %v8057_v3  ;;  %v3241_v3 = vadd.f32 %v3240_v31, %v8425_v17  ;;  %v2976_v18 = vpop.f32.mrf.mxu1  ;;  %v10035_v17 = vld [vmem:[#allocation112_spill] sm:$0xff] }
 0x3cc   : > { %v3886_v12 = vsub.f32 %v3758_v45, %v3822_v1  ;;  %v9943_v45 = vld [vmem:[#allocation66_spill] sm:$0xff] }
 0x3ce   : > { %v4081_v19 = vadd.f32 1e-05, %v3886_v12  ;;  %v4015_v12 = vld [vmem:[%s8065_s28 + $0x40] sm:$0xff] }
 0x3d0   : > { %5571 = vrsqrt.f32 %v4081_v19 }
 0x3d2   : > { %v5570_v52 = vpop.eup %5569 }
 0x3d3   : > { %v8409_v43 = vmul.f32 %v5570_v52, %v3951_v28  ;;  %v3624_v28 = vsel %vm3043_vm0, %v3399_v54, 0.0 }
 0x3d4   : > { %v3625_v32 = vadd.f32 %v3624_v28, %v3398_v44  ;;  %v4719_v44 = vmul.f32 %v4414_v56, %v7439_v25  ;;  %v3759_v25 = vmul.f32 0.0051020407, %v8073_v20 }
 0x3dd   : > { %v8406_v46 = vpop.xlane.xlu0 %3222 }
 0x3e0   : > { %4876 = vperm.xlu0 %5549, %v4334_v41  }
 0x3e1   : > { %v8418_v61 = vpop.xlane.xlu0 %3606 }
 0x3e4   : > { %4438 = vperm.xlu0 %5549, %v8409_v43  }
 0x3e9   : > { %v4857_v41 = vpop.permute.xlu0 %4856 }
 0x3ea   : > { %v5165_v52 = vadd.f32 %v4857_v41, %v4717_v26  ;;  %v5166_v8 = vadd.f32 %v4857_v41, %v4718_v14  ;;  %v2623_v26 = vpop.f32.mrf.mxu0  ;;  %v9945_v41 = vld [vmem:[#allocation65_spill] sm:$0xff] }
 0x3eb   : > { %v2624_v54 = vadd.f32 %v2623_v26, %v9943_v45 }
 0x3ec   : > { %5293 = vst [vmem:[%s8304_s11 + $0x30] sm:$0xff] %v5165_v52  ;;  %5294 = vst.msk [vmem:[%s8304_s11 + $0x38] sm:$0xff] %vm3043_vm0, %v5166_v8  ;;  %3242 = vadd.xlane.f32.xlu1 %v3241_v3  ;;  %v2622_v52 = vadd.f32 %v2621_v40, %v9945_v41  ;;  %v4271_v3 = vmul.f32 %v4207_v22, %v8351_v35  ;;  %v3952_v22 = vld [vmem:[%s8048_s25 + $0x50] sm:$0xff]  ;;  %v8458_v41 = vmul.f32 0.0051020407, %v8060_v51 }
 0x3ed   : > { %v8443_v1 = vadd.f32 %v2976_v18, %v2624_v54  ;;  %v5572_v54 = vpop.eup %5571 }
 0x3ee   : > { %v8454_v26 = vadd.f32 %v2974_v47, %v2622_v52  ;;  %v4335_v40 = vsub.f32 %v4015_v12, %v4271_v3  ;;  %v4209_v47 = vmul.f32 %v5572_v54, %v3952_v22  ;;  %v3823_v51 = vmul.f32 %v8458_v41, %v8458_v41  ;;  %v9947_v54 = vld [vmem:[#allocation68_spill] sm:$0xff] }
 0x3ef   : > { %9944 = vst [vmem:[#allocation95_spill] sm:$0xff] %v8443_v1  ;;  %v3401_v28 = vmul.f32 %v8443_v1, %v8443_v1  ;;  %v3244_v19 = vsel %vm3043_vm0, %v8443_v1, 0.0  ;;  %v9980_v1 = vld [vmem:[#allocation79_spill] sm:$0xff] }
 0x3f0   : > { %3626 = vadd.xlane.f32.xlu1 %v3625_v32  ;;  %v4720_v32 = vmul.f32 %v4414_v56, %v7437_v0  ;;  %9946 = vst [vmem:[#allocation61_spill] sm:$0xff] %v8454_v26  ;;  %v3245_v4 = vadd.f32 %v3244_v19, %v8454_v26  ;;  %v3400_v56 = vmul.f32 %v8454_v26, %v8454_v26 }
 0x3f1   : > { %v3628_v0 = vsel %vm3043_vm0, %v3401_v28, 0.0  ;;  %v3887_v3 = vsub.f32 %v3759_v25, %v3823_v51  ;;  %v4272_v28 = vmul.f32 %v8409_v43, %v8394_v23  ;;  %v9949_v23 = vld [vmem:[#allocation67_spill] sm:$0xff] }
 0x3f2   : > { %v3629_v52 = vadd.f32 %v3628_v0, %v3400_v56 }
 0x3f3   : > { %v8438_v31 = vpop.xlane.xlu1 %3226  ;;  %v4082_v12 = vadd.f32 1e-05, %v3887_v3  ;;  %v8488_v3 = vmul.f32 0.0051020407, %v8069_v30 }
 0x3f5   : > { %5573 = vrsqrt.f32 %v4082_v12 }
 0x3f7   : > { %v8441_v14 = vpop.xlane.xlu1 %3610 }
 0x3fb   : > { %v4419_v8 = vpop.permute.xlu1 %4418 }
 0x3fc   : > { %v4721_v51 = vmul.f32 %v4419_v8, %v7471_v9 }
 0x3ff   : > { %v4862_v45 = vpop.permute.xlu1 %4861 }
 0x400   : > { %v5167_v18 = vadd.f32 %v4862_v45, %v4719_v44  ;;  %v5168_v35 = vadd.f32 %v4862_v45, %v4720_v32  ;;  %v2625_v44 = vpop.f32.mrf.mxu0  ;;  %v4016_v32 = vld [vmem:[%s8065_s28 + $0x48] sm:$0xff] }
 0x401   : > { %4881 = vperm.xlu1 %5550, %v4335_v40   ;;  %v4336_v45 = vsub.f32 %v4016_v32, %v4272_v28  ;;  %v2626_v43 = vadd.f32 %v2625_v44, %v9949_v23 }
 0x402   : > { %5295 = vst [vmem:[%s8304_s11 + $0x40] sm:$0xff] %v5167_v18  ;;  %5296 = vst.msk [vmem:[%s8304_s11 + $0x48] sm:$0xff] %vm3043_vm0, %v5168_v35  ;;  %v2627_v19 = vpop.f32.mrf.mxu0  ;;  %v5574_v40 = vpop.eup %5573  ;;  %v3953_v35 = vld [vmem:[%s8048_s25 + $0x58] sm:$0xff] }
 0x403   : > { %3246 = vadd.xlane.f32.xlu0 %v3245_v4  ;;  %v2978_v4 = vpop.f32.mrf.mxu1  ;;  %v2628_v18 = vadd.f32 %v2627_v19, %v9947_v54  ;;  %v8479_v25 = vmul.f32 %v5574_v40, %v3953_v35  ;;  %v3760_v19 = vmul.f32 0.0051020407, %v8076_v42  ;;  %v4424_v23 = vpop.permute.xlu1 %4423 }
 0x404   : > { %v8495_v40 = vadd.f32 %v2978_v4, %v2626_v43  ;;  %v2631_v4 = vpop.f32.mrf.mxu0  ;;  %v9951_v43 = vld [vmem:[#allocation70_spill] sm:$0xff] }
 0x405   : > { %4443 = vperm.xlu1 %5550, %v4209_v47   ;;  %v2980_v22 = vpop.f32.mrf.mxu1 }
 0x406   : > { %v8481_v56 = vadd.f32 %v2980_v22, %v2628_v18  ;;  %9950 = vst [vmem:[#allocation63_spill] sm:$0xff] %v8495_v40  ;;  %v3402_v42 = vmul.f32 %v8495_v40, %v8495_v40  ;;  %v2633_v22 = vpop.f32.mrf.mxu0 }
 0x407   : > { %3630 = vadd.xlane.f32.xlu0 %v3629_v52  ;;  %v4722_v52 = vmul.f32 %v4419_v8, %v7452_v6  ;;  %v3824_v6 = vmul.f32 %v8488_v3, %v8488_v3  ;;  %v2984_v35 = vpop.f32.mrf.mxu1 }
 0x408   : > { %9948 = vst [vmem:[#allocation64_spill] sm:$0xff] %v8481_v56  ;;  %v3248_v44 = vsel %vm3043_vm0, %v8481_v56, 0.0 }
 0x409   : > { %v3249_v9 = vadd.f32 %v3248_v44, %v8495_v40  ;;  %v3888_v30 = vsub.f32 %v3760_v19, %v3824_v6  ;;  %v4273_v44 = vmul.f32 %v4209_v47, %v8416_v15  ;;  %v4017_v6 = vld [vmem:[%s8065_s28 + $0x50] sm:$0xff]  ;;  %v4723_v47 = vmul.f32 %v4424_v23, %v7475_v33 }
 0x40b   : > { %v4083_v18 = vadd.f32 1e-05, %v3888_v30 }
 0x40d   : > { %5575 = vrsqrt.f32 %v4083_v18 }
 0x416   : > { %v8472_v20 = vpop.xlane.xlu0 %3230 }
 0x41a   : > { %v8477_v0 = vpop.xlane.xlu0 %3614  ;;  %v5576_v18 = vpop.eup %5575 }
 0x41d   : > { %4886 = vperm.xlu0 %5549, %v4336_v45   ;;  %v3403_v45 = vmul.f32 %v8481_v56, %v8481_v56 }
 0x41f   : > { %v3632_v8 = vsel %vm3043_vm0, %v3403_v45, 0.0 }
 0x420   : > { %v3633_v54 = vadd.f32 %v3632_v8, %v3402_v42 }
 0x421   : > { %4448 = vperm.xlu0 %5549, %v8479_v25  }
 0x422   : > { %v4867_v12 = vpop.permute.xlu0 %4866 }
 0x423   : > { %v5169_v28 = vadd.f32 %v4867_v12, %v4721_v51  ;;  %v5170_v32 = vadd.f32 %v4867_v12, %v4722_v52  ;;  %v2634_v51 = vadd.f32 %v2633_v22, %v9951_v43  ;;  %v2986_v52 = vpop.f32.mrf.mxu1  ;;  %v3954_v22 = vld [vmem:[%s8048_s25 + $0x60] sm:$0xff]  ;;  %v8524_v43 = vmul.f32 0.0051020407, %v8079_v16 }
 0x424   : > { %v4211_v16 = vmul.f32 %v5576_v18, %v3954_v22 }
 0x425   : > { %5297 = vst [vmem:[%s8304_s11 + $0x50] sm:$0xff] %v5169_v28  ;;  %5298 = vst.msk [vmem:[%s8304_s11 + $0x58] sm:$0xff] %vm3043_vm0, %v5170_v32  ;;  %v8509_v28 = vadd.f32 %v2986_v52, %v2634_v51  ;;  %v9953_v32 = vld [vmem:[#allocation69_spill] sm:$0xff]  ;;  %v2988_v22 = vpop.f32.mrf.mxu1 }
 0x426   : > { %v2632_v19 = vadd.f32 %v2631_v4, %v9953_v32  ;;  %v4724_v4 = vmul.f32 %v4424_v23, %v7473_v2 }
 0x427   : > { %9952 = vst [vmem:[#allocation97_spill] sm:$0xff] %v8509_v28  ;;  %v3252_v30 = vsel %vm3043_vm0, %v8509_v28, 0.0 }
 0x428   : > { %v8520_v8 = vadd.f32 %v2984_v35, %v2632_v19  ;;  %v3761_v35 = vmul.f32 0.0051020407, %v8085_v13 }
 0x429   : > { %3250 = vadd.xlane.f32.xlu1 %v3249_v9  ;;  %v3405_v9 = vmul.f32 %v8509_v28, %v8509_v28 }
 0x42a   : > { %9954 = vst [vmem:[#allocation66_spill] sm:$0xff] %v8520_v8  ;;  %v3253_v15 = vadd.f32 %v3252_v30, %v8520_v8  ;;  %v3404_v52 = vmul.f32 %v8520_v8, %v8520_v8  ;;  %v4274_v30 = vmul.f32 %v8479_v25, %v8458_v41 }
 0x42b   : > { %v3636_v51 = vsel %vm3043_vm0, %v3405_v9, 0.0  ;;  %v2635_v9 = vpop.f32.mrf.mxu0 }
 0x42c   : > { %v3637_v33 = vadd.f32 %v3636_v51, %v3404_v52  ;;  %v9955_v51 = vld [vmem:[#allocation72_spill] sm:$0xff]  ;;  %v3955_v52 = vld [vmem:[%s8048_s25 + $0x68] sm:$0xff] }
 0x42d   : > { %3634 = vadd.xlane.f32.xlu1 %v3633_v54  ;;  %v4337_v54 = vsub.f32 %v4017_v6, %v4273_v44  ;;  %v3825_v6 = vmul.f32 %v8524_v43, %v8524_v43  ;;  %v2637_v18 = vpop.f32.mrf.mxu0 }
 0x42f   : > { %v3889_v2 = vsub.f32 %v3761_v35, %v3825_v6  ;;  %v2638_v35 = vadd.f32 %v2637_v18, %v9955_v51 }
 0x431   : > { %v4084_v13 = vadd.f32 1e-05, %v3889_v2 }
 0x433   : > { %5577 = vrsqrt.f32 %v4084_v13  ;;  %v9957_v13 = vld [vmem:[#allocation71_spill] sm:$0xff] }
 0x434   : > { %v8507_v12 = vpop.xlane.xlu1 %3234  ;;  %v2636_v28 = vadd.f32 %v2635_v9, %v9957_v13 }
 0x438   : > { %v8512_v45 = vpop.xlane.xlu1 %3618 }
 0x43c   : > { %v4429_v42 = vpop.permute.xlu1 %4428 }
 0x43e   : > { %4891 = vperm.xlu1 %5550, %v4337_v54   ;;  %v4018_v54 = vld [vmem:[%s8065_s28 + $0x58] sm:$0xff] }
 0x440   : > { %v4872_v32 = vpop.permute.xlu1 %4871  ;;  %3254 = vadd.xlane.f32.xlu0 %v3253_v15 }
 0x441   : > { %v5171_v19 = vadd.f32 %v4872_v32, %v4723_v47  ;;  %v5172_v44 = vadd.f32 %v4872_v32, %v4724_v4  ;;  %v4338_v47 = vsub.f32 %v4018_v54, %v4274_v30  ;;  %v5578_v4 = vpop.eup %5577  ;;  %v2990_v32 = vpop.f32.mrf.mxu1  ;;  %v8559_v30 = vmul.f32 0.0051020407, %v8081_v58 }
 0x442   : > { %4453 = vperm.xlu1 %5550, %v4211_v16   ;;  %v8551_v2 = vadd.f32 %v2990_v32, %v2638_v35  ;;  %v8566_v54 = vadd.f32 %v2988_v22, %v2636_v28  ;;  %v2641_v35 = vpop.f32.mrf.mxu0 }
 0x443   : > { %5299 = vst [vmem:[%s8304_s11 + $0x60] sm:$0xff] %v5171_v19  ;;  %5300 = vst.msk [vmem:[%s8304_s11 + $0x68] sm:$0xff] %vm3043_vm0, %v5172_v44  ;;  %v4725_v19 = vmul.f32 %v4429_v42, %v7507_v36  ;;  %v4726_v44 = vmul.f32 %v4429_v42, %v7488_v63  ;;  %v3762_v63 = vmul.f32 0.0051020407, %v8088_v7  ;;  %v3826_v9 = vmul.f32 %v8559_v30, %v8559_v30  ;;  %v2994_v22 = vpop.f32.mrf.mxu1 }
 0x444   : > { %3638 = vadd.xlane.f32.xlu0 %v3637_v33  ;;  %v8549_v33 = vmul.f32 %v5578_v4, %v3955_v52  ;;  %9956 = vst [vmem:[#allocation65_spill] sm:$0xff] %v8551_v2  ;;  %v3407_v36 = vmul.f32 %v8551_v2, %v8551_v2  ;;  %v3256_v42 = vsel %vm3043_vm0, %v8551_v2, 0.0  ;;  %9958 = vst [vmem:[#allocation68_spill] sm:$0xff] %v8566_v54  ;;  %v2643_v28 = vpop.f32.mrf.mxu0  ;;  %v9959_v52 = vld [vmem:[#allocation74_spill] sm:$0xff] }
 0x445   : > { %v3257_v18 = vadd.f32 %v3256_v42, %v8566_v54  ;;  %v3406_v58 = vmul.f32 %v8566_v54, %v8566_v54  ;;  %v2644_v32 = vadd.f32 %v2643_v28, %v9959_v52 }
 0x446   : > { %v3640_v4 = vsel %vm3043_vm0, %v3407_v36, 0.0  ;;  %v4019_v36 = vld [vmem:[%s8065_s28 + $0x60] sm:$0xff] }
 0x447   : > { %v3641_v7 = vadd.f32 %v3640_v4, %v3406_v58 }
 0x44f   : > { %v8538_v23 = vpop.xlane.xlu0 %3238 }
 0x453   : > { %v8543_v15 = vpop.xlane.xlu0 %3622 }
 0x45a   : > { %4896 = vperm.xlu0 %5549, %v4338_v47   ;;  %v3890_v47 = vsub.f32 %v3762_v63, %v3826_v9  ;;  %v4275_v63 = vmul.f32 %v4211_v16, %v8488_v3 }
 0x45b   : > { %v4877_v6 = vpop.permute.xlu0 %4876 }
 0x45c   : > { %v5173_v41 = vadd.f32 %v4877_v6, %v4725_v19  ;;  %v5174_v25 = vadd.f32 %v4877_v6, %v4726_v44  ;;  %v4085_v51 = vadd.f32 1e-05, %v3890_v47  ;;  %v2996_v19 = vpop.f32.mrf.mxu1  ;;  %v4434_v44 = vpop.permute.xlu1 %4433  ;;  %v4339_v4 = vsub.f32 %v4019_v36, %v4275_v63 }
 0x45d   : > { %v8575_v6 = vadd.f32 %v2996_v19, %v2644_v32  ;;  %v4727_v16 = vmul.f32 %v4434_v44, %v7511_v48  ;;  %v2645_v36 = vpop.f32.mrf.mxu0 }
 0x45e   : > { %5301 = vst [vmem:[%s8304_s11 + $0x70] sm:$0xff] %v5173_v41  ;;  %5302 = vst.msk [vmem:[%s8304_s11 + $0x78] sm:$0xff] %vm3043_vm0, %v5174_v25  ;;  %4458 = vperm.xlu0 %5549, %v8549_v33   ;;  %5579 = vrsqrt.f32 %v4085_v51  ;;  %v9961_v41 = vld [vmem:[#allocation73_spill] sm:$0xff]  ;;  %v8592_v51 = vmul.f32 0.0051020407, %v8090_v27 }
 0x45f   : > { %9960 = vst [vmem:[#allocation67_spill] sm:$0xff] %v8575_v6  ;;  %v2642_v25 = vadd.f32 %v2641_v35, %v9961_v41  ;;  %v3409_v42 = vmul.f32 %v8575_v6, %v8575_v6  ;;  %v3260_v9 = vsel %vm3043_vm0, %v8575_v6, 0.0  ;;  %v4728_v35 = vmul.f32 %v4434_v44, %v7509_v62  ;;  %v4439_v44 = vpop.permute.xlu0 %4438 }
 0x461   : > { %v3644_v28 = vsel %vm3043_vm0, %v3409_v42, 0.0  ;;  %v4276_v42 = vmul.f32 %v8549_v33, %v8524_v43 }
 0x466   : > { %3258 = vadd.xlane.f32.xlu1 %v3257_v18  ;;  %v8586_v18 = vadd.f32 %v2994_v22, %v2642_v25  ;;  %v3763_v22 = vmul.f32 0.0051020407, %v8094_v55  ;;  %v3827_v25 = vmul.f32 %v8592_v51, %v8592_v51 }
 0x468   : > { %9962 = vst [vmem:[#allocation70_spill] sm:$0xff] %v8586_v18  ;;  %v3261_v3 = vadd.f32 %v3260_v9, %v8586_v18  ;;  %v3408_v52 = vmul.f32 %v8586_v18, %v8586_v18  ;;  %v3891_v62 = vsub.f32 %v3763_v22, %v3827_v25  ;;  %v4020_v9 = vld [vmem:[%s8065_s28 + $0x68] sm:$0xff]  ;;  %v3957_v22 = vld [vmem:[%s8048_s25 + $0x78] sm:$0xff] }
 0x46a   : > { %3642 = vadd.xlane.f32.xlu1 %v3641_v7  ;;  %v3956_v7 = vld [vmem:[%s8048_s25 + $0x70] sm:$0xff]  ;;  %v3645_v48 = vadd.f32 %v3644_v28, %v3408_v52  ;;  %v4086_v55 = vadd.f32 1e-05, %v3891_v62 }
 0x46b   : > { %v5580_v58 = vpop.eup %5579  ;;  %v9965_v62 = vld [vmem:[#allocation75_spill] sm:$0xff] }
 0x46c   : > { %v4213_v27 = vmul.f32 %v5580_v58, %v3956_v7  ;;  %5581 = vrsqrt.f32 %v4086_v55  ;;  %v2998_v58 = vpop.f32.mrf.mxu1  ;;  %v2646_v55 = vadd.f32 %v2645_v36, %v9965_v62 }
 0x46e   : > { %v3000_v52 = vpop.f32.mrf.mxu1 }
 0x475   : > { %v8578_v13 = vpop.xlane.xlu1 %3242 }
 0x479   : > { %v8588_v47 = vpop.xlane.xlu1 %3626 }
 0x47b   : > { %4901 = vperm.xlu1 %5550, %v4339_v4   ;;  %v2647_v4 = vpop.f32.mrf.mxu0 }
 0x47d   : > { %v4882_v32 = vpop.permute.xlu1 %4881  ;;  %3262 = vadd.xlane.f32.xlu0 %v3261_v3  ;;  %v4340_v3 = vsub.f32 %v4020_v9, %v4276_v42  ;;  %v8627_v42 = vmul.f32 0.0051020407, %v8092_v59 }
 0x47e   : > { %v5175_v19 = vadd.f32 %v4882_v32, %v4727_v16  ;;  %v5176_v41 = vadd.f32 %v4882_v32, %v4728_v35  ;;  %v5582_v16 = vpop.eup %5581  ;;  %v9963_v35 = vld [vmem:[#allocation76_spill] sm:$0xff]  ;;  %v4729_v32 = vmul.f32 %v4439_v44, %v7543_v53  ;;  %v9966_v53 = vld [vmem:[#allocation50_spill] sm:$0xff] }
 0x47f   : > { %4463 = vperm.xlu1 %5550, %v4213_v27   ;;  %v2648_v28 = vadd.f32 %v2647_v4, %v9963_v35  ;;  %v8617_v25 = vmul.f32 %v5582_v16, %v3957_v22  ;;  %v8634_v4 = vadd.f32 %v2998_v58, %v2646_v55  ;;  %v3828_v36 = vmul.f32 %v8627_v42, %v8627_v42  ;;  %v9970_v55 = vld [vmem:[#allocation77_spill] sm:$0xff] }
 0x480   : > { %5303 = vst [vmem:[%s8304_s11 + $0x80] sm:$0xff] %v5175_v19  ;;  %5304 = vst.msk [vmem:[%s8304_s11 + $0x88] sm:$0xff] %vm3043_vm0, %v5176_v41  ;;  %v4730_v19 = vmul.f32 %v4439_v44, %v7524_v39  ;;  %v3764_v39 = vmul.f32 0.0051020407, %v9966_v53 }
 0x481   : > { %3646 = vadd.xlane.f32.xlu0 %v3645_v48  ;;  %v8619_v48 = vadd.f32 %v3000_v52, %v2648_v28  ;;  %9967 = vst [vmem:[#allocation72_spill] sm:$0xff] %v8634_v4  ;;  %v3410_v59 = vmul.f32 %v8634_v4, %v8634_v4  ;;  %v2651_v52 = vpop.f32.mrf.mxu0 }
 0x482   : > { %v3892_v16 = vsub.f32 %v3764_v39, %v3828_v36  ;;  %v2652_v53 = vadd.f32 %v2651_v52, %v9970_v55  ;;  %v9975_v55 = vld [vmem:[#allocation120_spill] sm:$0xff] }
 0x483   : > { %9964 = vst [vmem:[#allocation69_spill] sm:$0xff] %v8619_v48  ;;  %v3411_v44 = vmul.f32 %v8619_v48, %v8619_v48  ;;  %v3264_v9 = vsel %vm3043_vm0, %v8619_v48, 0.0  ;;  %v2653_v58 = vpop.f32.mrf.mxu0  ;;  %v9997_v48 = vld [vmem:[#allocation83_spill] sm:$0xff] }
 0x484   : > { %v4087_v22 = vadd.f32 1e-05, %v3892_v16 }
 0x485   : > { %v3648_v35 = vsel %vm3043_vm0, %v3411_v44, 0.0  ;;  %v4277_v44 = vmul.f32 %v4213_v27, %v8559_v30  ;;  %v9973_v27 = vld [vmem:[#allocation99_spill] sm:$0xff] }
 0x486   : > { %v3649_v28 = vadd.f32 %v3648_v35, %v3410_v59  ;;  %5583 = vrsqrt.f32 %v4087_v22  ;;  %v3958_v22 = vld [vmem:[%s8048_s25 + $0x80] sm:$0xff] }
 0x48c   : > { %v8606_v63 = vpop.xlane.xlu0 %3246 }
 0x490   : > { %v8611_v7 = vpop.xlane.xlu0 %3630 }
 0x497   : > { %4906 = vperm.xlu0 %5549, %v4340_v3   ;;  %v3265_v3 = vadd.f32 %v3264_v9, %v8634_v4  ;;  %v4021_v9 = vld [vmem:[%s8065_s28 + $0x70] sm:$0xff] }
 0x498   : > { %v4887_v41 = vpop.permute.xlu0 %4886  ;;  %v4341_v59 = vsub.f32 %v4021_v9, %v4277_v44 }
 0x499   : > { %v5177_v43 = vadd.f32 %v4887_v41, %v4729_v32  ;;  %v5178_v33 = vadd.f32 %v4887_v41, %v4730_v19  ;;  %v3004_v32 = vpop.f32.mrf.mxu1  ;;  %v9968_v19 = vld [vmem:[#allocation78_spill] sm:$0xff] }
 0x49a   : > { %v2654_v41 = vadd.f32 %v2653_v58, %v9968_v19  ;;  %v8654_v16 = vadd.f32 %v3004_v32, %v2652_v53  ;;  %v9972_v58 = vld [vmem:[#allocation118_spill] sm:$0xff]  ;;  %v3765_v53 = vmul.f32 0.0051020407, %v9975_v55 }
 0x49b   : > { %5305 = vst [vmem:[%s8304_s11 + $0x90] sm:$0xff] %v5177_v43  ;;  %5306 = vst.msk [vmem:[%s8304_s11 + $0x98] sm:$0xff] %vm3043_vm0, %v5178_v33  ;;  %4468 = vperm.xlu0 %5549, %v8617_v25   ;;  %v3006_v43 = vpop.f32.mrf.mxu1  ;;  %v4444_v33 = vpop.permute.xlu1 %4443  ;;  %v8660_v52 = vmul.f32 0.0051020407, %v9972_v58 }
 0x49c   : > { %v8643_v62 = vadd.f32 %v3006_v43, %v2654_v41  ;;  %9971 = vst [vmem:[#allocation74_spill] sm:$0xff] %v8654_v16  ;;  %v4731_v19 = vmul.f32 %v4444_v33, %v9973_v27  ;;  %v9974_v41 = vld [vmem:[#allocation98_spill] sm:$0xff]  ;;  %v3412_v44 = vmul.f32 %v8654_v16, %v8654_v16 }
 0x49d   : > { %v4732_v43 = vmul.f32 %v4444_v33, %v9974_v41  ;;  %v4449_v41 = vpop.permute.xlu0 %4448 }
 0x49e   : > { %9969 = vst [vmem:[#allocation71_spill] sm:$0xff] %v8643_v62  ;;  %v3413_v36 = vmul.f32 %v8643_v62, %v8643_v62 }
 0x4a0   : > { %v3652_v32 = vsel %vm3043_vm0, %v3413_v36, 0.0 }
 0x4a1   : > { %v3653_v27 = vadd.f32 %v3652_v32, %v3412_v44 }
 0x4a3   : > { %3266 = vadd.xlane.f32.xlu1 %v3265_v3  ;;  %v3268_v3 = vsel %vm3043_vm0, %v8643_v62, 0.0 }
 0x4a4   : > { %v3269_v30 = vadd.f32 %v3268_v3, %v8654_v16  ;;  %v3829_v3 = vmul.f32 %v8660_v52, %v8660_v52 }
 0x4a6   : > { %v3893_v33 = vsub.f32 %v3765_v53, %v3829_v3  ;;  %v9976_v53 = vld [vmem:[#allocation80_spill] sm:$0xff] }
 0x4a7   : > { %3650 = vadd.xlane.f32.xlu1 %v3649_v28  ;;  %v5584_v28 = vpop.eup %5583 }
 0x4a8   : > { %v4215_v58 = vmul.f32 %v5584_v28, %v3958_v22  ;;  %v4088_v36 = vadd.f32 1e-05, %v3893_v33  ;;  %v2655_v28 = vpop.f32.mrf.mxu0  ;;  %v4278_v22 = vmul.f32 %v8617_v25, %v8592_v51 }
 0x4a9   : > { %v2656_v26 = vadd.f32 %v2655_v28, %v9980_v1 }
 0x4aa   : > { %5585 = vrsqrt.f32 %v4088_v36  ;;  %v9978_v36 = vld [vmem:[#allocation100_spill] sm:$0xff] }
 0x4ab   : > { %v4734_v16 = vmul.f32 %v4449_v41, %v9978_v36 }
 0x4b2   : > { %v8646_v39 = vpop.xlane.xlu1 %3250 }
 0x4b6   : > { %v8656_v35 = vpop.xlane.xlu1 %3634 }
 0x4b7   : > { %v5586_v44 = vpop.eup %5585 }
 0x4b8   : > { %4911 = vperm.xlu1 %5550, %v4341_v59  }
 0x4ba   : > { %v4892_v9 = vpop.permute.xlu1 %4891  ;;  %3270 = vadd.xlane.f32.xlu0 %v3269_v30  ;;  %v4022_v30 = vld [vmem:[%s8065_s28 + $0x78] sm:$0xff] }
 0x4bb   : > { %v5179_v62 = vadd.f32 %v4892_v9, %v4731_v19  ;;  %v5180_v59 = vadd.f32 %v4892_v9, %v4732_v43  ;;  %v2657_v19 = vpop.f32.mrf.mxu0  ;;  %v3008_v43 = vpop.f32.mrf.mxu1 }
 0x4bc   : > { %4473 = vperm.xlu1 %5550, %v4215_v58   ;;  %v2658_v9 = vadd.f32 %v2657_v19, %v9976_v53  ;;  %v9982_v19 = vld [vmem:[#allocation122_spill] sm:$0xff] }
 0x4bd   : > { %5307 = vst [vmem:[%s8304_s11 + $0xa0] sm:$0xff] %v5179_v62  ;;  %5308 = vst.msk [vmem:[%s8304_s11 + $0xa8] sm:$0xff] %vm3043_vm0, %v5180_v59  ;;  %v4342_v62 = vsub.f32 %v4022_v30, %v4278_v22  ;;  %v3959_v59 = vld [vmem:[%s8048_s25 + $0x88] sm:$0xff]  ;;  %v3010_v3 = vpop.f32.mrf.mxu1  ;;  %v9981_v22 = vld [vmem:[#allocation49_spill] sm:$0xff] }
 0x4be   : > { %3654 = vadd.xlane.f32.xlu0 %v3653_v27  ;;  %v9977_v27 = vld [vmem:[#allocation101_spill] sm:$0xff]  ;;  %v8685_v18 = vmul.f32 %v5586_v44, %v3959_v59  ;;  %v8687_v8 = vadd.f32 %v3010_v3, %v2658_v9  ;;  %v8695_v30 = vmul.f32 0.0051020407, %v9981_v22 }
 0x4bf   : > { %v4733_v33 = vmul.f32 %v4449_v41, %v9977_v27  ;;  %v3766_v41 = vmul.f32 0.0051020407, %v9982_v19  ;;  %v2661_v27 = vpop.f32.mrf.mxu0  ;;  %v9986_v19 = vld [vmem:[#allocation81_spill] sm:$0xff] }
 0x4c0   : > { %9979 = vst [vmem:[#allocation73_spill] sm:$0xff] %v8687_v8  ;;  %v3830_v1 = vmul.f32 %v8695_v30, %v8695_v30 }
 0x4c2   : > { %v3894_v44 = vsub.f32 %v3766_v41, %v3830_v1  ;;  %v2662_v41 = vadd.f32 %v2661_v27, %v9986_v19  ;;  %v4023_v1 = vld [vmem:[%s8065_s28 + $0x80] sm:$0xff] }
 0x4c4   : > { %v4089_v3 = vadd.f32 1e-05, %v3894_v44 }
 0x4c6   : > { %5587 = vrsqrt.f32 %v4089_v3 }
 0x4c9   : > { %v8674_v55 = vpop.xlane.xlu0 %3254 }
 0x4cd   : > { %v8679_v32 = vpop.xlane.xlu0 %3638 }
 0x4d3   : > { %v5588_v3 = vpop.eup %5587 }
 0x4d4   : > { %4916 = vperm.xlu0 %5549, %v4342_v62   ;;  %v3415_v62 = vmul.f32 %v8687_v8, %v8687_v8 }
 0x4d5   : > { %v4897_v6 = vpop.permute.xlu0 %4896 }
 0x4d6   : > { %v5181_v51 = vadd.f32 %v4897_v6, %v4733_v33  ;;  %v5182_v25 = vadd.f32 %v4897_v6, %v4734_v16  ;;  %v3272_v6 = vsel %vm3043_vm0, %v8687_v8, 0.0  ;;  %v8702_v16 = vadd.f32 %v3008_v43, %v2656_v26  ;;  %v2663_v26 = vpop.f32.mrf.mxu0  ;;  %v3014_v43 = vpop.f32.mrf.mxu1  ;;  %v9984_v33 = vld [vmem:[#allocation82_spill] sm:$0xff] }
 0x4d7   : > { %v3656_v53 = vsel %vm3043_vm0, %v3415_v62, 0.0  ;;  %v2664_v36 = vadd.f32 %v2663_v26, %v9984_v33  ;;  %v3960_v26 = vld [vmem:[%s8048_s25 + $0x90] sm:$0xff] }
 0x4d8   : > { %5309 = vst [vmem:[%s8304_s11 + $0xb0] sm:$0xff] %v5181_v51  ;;  %5310 = vst.msk [vmem:[%s8304_s11 + $0xb8] sm:$0xff] %vm3043_vm0, %v5182_v25  ;;  %4478 = vperm.xlu0 %5549, %v8685_v18   ;;  %v3273_v28 = vadd.f32 %v3272_v6, %v8702_v16  ;;  %v3414_v9 = vmul.f32 %v8702_v16, %v8702_v16  ;;  %v3016_v51 = vpop.f32.mrf.mxu1  ;;  %v4454_v25 = vpop.permute.xlu1 %4453  ;;  %v4279_v6 = vmul.f32 %v4215_v58, %v8627_v42  ;;  %v9988_v33 = vld [vmem:[#allocation123_spill] sm:$0xff] }
 0x4d9   : > { %9983 = vst [vmem:[#allocation76_spill] sm:$0xff] %v8702_v16  ;;  %v8711_v22 = vadd.f32 %v3016_v51, %v2664_v36  ;;  %v8728_v27 = vmul.f32 0.0051020407, %v9988_v33  ;;  %v9989_v58 = vld [vmem:[#allocation103_spill] sm:$0xff]  ;;  %v9990_v51 = vld [vmem:[#allocation102_spill] sm:$0xff]  ;;  %v4217_v33 = vmul.f32 %v5588_v3, %v3960_v26  ;;  %v2665_v3 = vpop.f32.mrf.mxu0  ;;  %v4280_v26 = vmul.f32 %v8685_v18, %v8660_v52 }
 0x4da   : > { %v3657_v59 = vadd.f32 %v3656_v53, %v3414_v9  ;;  %v8722_v53 = vadd.f32 %v3014_v43, %v2662_v41  ;;  %v4735_v36 = vmul.f32 %v4454_v25, %v9989_v58  ;;  %v4736_v19 = vmul.f32 %v4454_v25, %v9990_v51 }
 0x4db   : > { %9985 = vst [vmem:[#allocation75_spill] sm:$0xff] %v8711_v22  ;;  %v3276_v44 = vsel %vm3043_vm0, %v8711_v22, 0.0  ;;  %v3767_v41 = vmul.f32 0.0051020407, %v8125_v29  ;;  %v2666_v4 = vadd.f32 %v2665_v3, %v9997_v48 }
 0x4dc   : > { %9987 = vst [vmem:[#allocation50_spill] sm:$0xff] %v8722_v53  ;;  %v3277_v42 = vadd.f32 %v3276_v44, %v8722_v53  ;;  %v3831_v44 = vmul.f32 %v8728_v27, %v8728_v27 }
 0x4de   : > { %v3895_v25 = vsub.f32 %v3767_v41, %v3831_v44  ;;  %v9993_v41 = vld [vmem:[#allocation84_spill] sm:$0xff] }
 0x4e0   : > { %3274 = vadd.xlane.f32.xlu1 %v3273_v28  ;;  %v3417_v28 = vmul.f32 %v8711_v22, %v8711_v22  ;;  %v4090_v29 = vadd.f32 1e-05, %v3895_v25 }
 0x4e2   : > { %v3660_v43 = vsel %vm3043_vm0, %v3417_v28, 0.0  ;;  %5589 = vrsqrt.f32 %v4090_v29  ;;  %v4459_v28 = vpop.permute.xlu0 %4458  ;;  %v9995_v29 = vld [vmem:[#allocation104_spill] sm:$0xff] }
 0x4e4   : > { %3658 = vadd.xlane.f32.xlu1 %v3657_v59  ;;  %v4343_v59 = vsub.f32 %v4023_v1, %v4279_v6  ;;  %v3416_v6 = vmul.f32 %v8722_v53, %v8722_v53  ;;  %v4738_v53 = vmul.f32 %v4459_v28, %v9995_v29 }
 0x4e6   : > { %v3661_v58 = vadd.f32 %v3660_v43, %v3416_v6 }
 0x4ef   : > { %v8714_v62 = vpop.xlane.xlu1 %3258  ;;  %v5590_v6 = vpop.eup %5589 }
 0x4f3   : > { %v8724_v9 = vpop.xlane.xlu1 %3642 }
 0x4f5   : > { %4921 = vperm.xlu1 %5550, %v4343_v59  }
 0x4f7   : > { %v4902_v1 = vpop.permute.xlu1 %4901  ;;  %3278 = vadd.xlane.f32.xlu0 %v3277_v42  ;;  %v4024_v42 = vld [vmem:[%s8065_s28 + $0x88] sm:$0xff] }
 0x4f8   : > { %v5183_v22 = vadd.f32 %v4902_v1, %v4735_v36  ;;  %v5184_v59 = vadd.f32 %v4902_v1, %v4736_v19  ;;  %v2667_v36 = vpop.f32.mrf.mxu0  ;;  %v3018_v19 = vpop.f32.mrf.mxu1 }
 0x4f9   : > { %4483 = vperm.xlu1 %5550, %v4217_v33   ;;  %v2668_v1 = vadd.f32 %v2667_v36, %v9993_v41 }
 0x4fa   : > { %5311 = vst [vmem:[%s8304_s11 + $0xc0] sm:$0xff] %v5183_v22  ;;  %5312 = vst.msk [vmem:[%s8304_s11 + $0xc8] sm:$0xff] %vm3043_vm0, %v5184_v59  ;;  %v4344_v22 = vsub.f32 %v4024_v42, %v4280_v26  ;;  %v3961_v59 = vld [vmem:[%s8048_s25 + $0x98] sm:$0xff]  ;;  %v3020_v44 = vpop.f32.mrf.mxu1 }
 0x4fb   : > { %3662 = vadd.xlane.f32.xlu0 %v3661_v58  ;;  %v9994_v58 = vld [vmem:[#allocation105_spill] sm:$0xff]  ;;  %v8753_v16 = vmul.f32 %v5590_v6, %v3961_v59  ;;  %v8755_v57 = vadd.f32 %v3020_v44, %v2668_v1  ;;  %v9998_v26 = vld [vmem:[#allocation124_spill] sm:$0xff]  ;;  %v2671_v59 = vpop.f32.mrf.mxu0  ;;  %v10000_v44 = vld [vmem:[#allocation86_spill] sm:$0xff]  ;;  %v4464_v29 = vpop.permute.xlu1 %4463 }
 0x4fc   : > { %v4737_v25 = vmul.f32 %v4459_v28, %v9994_v58  ;;  %v8763_v42 = vmul.f32 0.0051020407, %v9998_v26  ;;  %v3768_v28 = vmul.f32 0.0051020407, %v8130_v11 }
 0x4fd   : > { %9996 = vst [vmem:[#allocation118_spill] sm:$0xff] %v8755_v57  ;;  %v3419_v36 = vmul.f32 %v8755_v57, %v8755_v57 }
 0x4fe   : > { %v3832_v48 = vmul.f32 %v8763_v42, %v8763_v42 }
 0x4ff   : > { %v3664_v6 = vsel %vm3043_vm0, %v3419_v36, 0.0  ;;  %v4281_v36 = vmul.f32 %v4217_v33, %v8695_v30  ;;  %v10004_v33 = vld [vmem:[#allocation107_spill] sm:$0xff] }
 0x506   : > { %v8742_v51 = vpop.xlane.xlu0 %3262 }
 0x507   : > { %9991 = vst [vmem:[#allocation78_spill] sm:$0xff] %v8742_v51 }
 0x50a   : > { %v8747_v43 = vpop.xlane.xlu0 %3646 }
 0x50b   : > { %9992 = vst [vmem:[#allocation77_spill] sm:$0xff] %v8747_v43  ;;  %v10060_v43 = vld [vmem:[#allocation148_spill] sm:$0xff] }
 0x511   : > { %4926 = vperm.xlu0 %5549, %v4344_v22   ;;  %v3896_v22 = vsub.f32 %v3768_v28, %v3832_v48 }
 0x512   : > { %v4907_v8 = vpop.permute.xlu0 %4906 }
 0x513   : > { %v5185_v18 = vadd.f32 %v4907_v8, %v4737_v25  ;;  %v5186_v52 = vadd.f32 %v4907_v8, %v4738_v53  ;;  %v3280_v8 = vsel %vm3043_vm0, %v8755_v57, 0.0  ;;  %v8770_v53 = vadd.f32 %v3018_v19, %v2666_v4  ;;  %v2673_v4 = vpop.f32.mrf.mxu0  ;;  %v3024_v19 = vpop.f32.mrf.mxu1 }
 0x514   : > { %v4091_v1 = vadd.f32 1e-05, %v3896_v22  ;;  %v2674_v58 = vadd.f32 %v2673_v4, %v10000_v44  ;;  %v4739_v4 = vmul.f32 %v4464_v29, %v10004_v33  ;;  %v10005_v44 = vld [vmem:[#allocation106_spill] sm:$0xff] }
 0x515   : > { %5313 = vst [vmem:[%s8304_s11 + $0xd0] sm:$0xff] %v5185_v18  ;;  %5314 = vst.msk [vmem:[%s8304_s11 + $0xd8] sm:$0xff] %vm3043_vm0, %v5186_v52  ;;  %4488 = vperm.xlu0 %5549, %v8753_v16   ;;  %v3281_v3 = vadd.f32 %v3280_v8, %v8770_v53  ;;  %v3418_v41 = vmul.f32 %v8770_v53, %v8770_v53  ;;  %v3026_v25 = vpop.f32.mrf.mxu1  ;;  %v10002_v52 = vld [vmem:[#allocation85_spill] sm:$0xff]  ;;  %v4025_v8 = vld [vmem:[%s8065_s28 + $0x90] sm:$0xff] }
 0x516   : > { %9999 = vst [vmem:[#allocation99_spill] sm:$0xff] %v8770_v53  ;;  %5591 = vrsqrt.f32 %v4091_v1  ;;  %v8779_v18 = vadd.f32 %v3026_v25, %v2674_v58  ;;  %v2672_v26 = vadd.f32 %v2671_v59, %v10002_v52  ;;  %v3962_v1 = vld [vmem:[%s8048_s25 + $0xa0] sm:$0xff]  ;;  %v8796_v59 = vmul.f32 0.0051020407, %v8136_v34  ;;  %v10012_v53 = vld [vmem:[#allocation87_spill] sm:$0xff] }
 0x517   : > { %v3665_v11 = vadd.f32 %v3664_v6, %v3418_v41  ;;  %v4345_v41 = vsub.f32 %v4025_v8, %v4281_v36  ;;  %v4740_v58 = vmul.f32 %v4464_v29, %v10005_v44  ;;  %v3769_v25 = vmul.f32 0.0051020407, %v8148_v49  ;;  %v3028_v44 = vpop.f32.mrf.mxu1 }
 0x518   : > { %10001 = vst [vmem:[#allocation98_spill] sm:$0xff] %v8779_v18  ;;  %v3421_v48 = vmul.f32 %v8779_v18, %v8779_v18  ;;  %v8790_v22 = vadd.f32 %v3024_v19, %v2672_v26 }
 0x51a   : > { %10003 = vst [vmem:[#allocation120_spill] sm:$0xff] %v8790_v22  ;;  %v3668_v19 = vsel %vm3043_vm0, %v3421_v48, 0.0  ;;  %v3420_v52 = vmul.f32 %v8790_v22, %v8790_v22  ;;  %v4469_v48 = vpop.permute.xlu0 %4468 }
 0x51d   : > { %3282 = vadd.xlane.f32.xlu1 %v3281_v3  ;;  %v3284_v3 = vsel %vm3043_vm0, %v8779_v18, 0.0 }
 0x51e   : > { %v3285_v30 = vadd.f32 %v3284_v3, %v8790_v22  ;;  %v3833_v3 = vmul.f32 %v8796_v59, %v8796_v59 }
 0x520   : > { %v3897_v29 = vsub.f32 %v3769_v25, %v3833_v3  ;;  %v10008_v25 = vld [vmem:[#allocation88_spill] sm:$0xff]  ;;  %v10009_v3 = vld [vmem:[#allocation109_spill] sm:$0xff] }
 0x521   : > { %3666 = vadd.xlane.f32.xlu1 %v3665_v11 }
 0x522   : > { %v4092_v49 = vadd.f32 1e-05, %v3897_v29  ;;  %v10010_v29 = vld [vmem:[#allocation108_spill] sm:$0xff] }
 0x523   : > { %v5592_v11 = vpop.eup %5591 }
 0x524   : > { %v4219_v34 = vmul.f32 %v5592_v11, %v3962_v1  ;;  %5593 = vrsqrt.f32 %v4092_v49  ;;  %v2675_v11 = vpop.f32.mrf.mxu0  ;;  %v4282_v1 = vmul.f32 %v8753_v16, %v8728_v27  ;;  %v4742_v49 = vmul.f32 %v4469_v48, %v10010_v29  ;;  %v10016_v29 = vld [vmem:[#allocation90_spill] sm:$0xff] }
 0x525   : > { %v2676_v38 = vadd.f32 %v2675_v11, %v10012_v53 }
 0x52c   : > { %v8782_v28 = vpop.xlane.xlu1 %3266 }
 0x530   : > { %v8792_v6 = vpop.xlane.xlu1 %3650 }
 0x532   : > { %4931 = vperm.xlu1 %5550, %v4345_v41   ;;  %v3669_v41 = vadd.f32 %v3668_v19, %v3420_v52  ;;  %v5594_v52 = vpop.eup %5593 }
 0x534   : > { %v4912_v26 = vpop.permute.xlu1 %4911  ;;  %3286 = vadd.xlane.f32.xlu0 %v3285_v30  ;;  %v4026_v30 = vld [vmem:[%s8065_s28 + $0x98] sm:$0xff] }
 0x535   : > { %v5187_v36 = vadd.f32 %v4912_v26, %v4739_v4  ;;  %v5188_v8 = vadd.f32 %v4912_v26, %v4740_v58  ;;  %v2677_v4 = vpop.f32.mrf.mxu0  ;;  %v4346_v19 = vsub.f32 %v4026_v30, %v4282_v1  ;;  %v10013_v1 = vld [vmem:[#allocation51_spill] sm:$0xff] }
 0x536   : > { %4493 = vperm.xlu1 %5550, %v4219_v34   ;;  %v2678_v26 = vadd.f32 %v2677_v4, %v10008_v25  ;;  %v8831_v30 = vmul.f32 0.0051020407, %v10013_v1  ;;  %v10014_v4 = vld [vmem:[#allocation126_spill] sm:$0xff] }
 0x537   : > { %5315 = vst [vmem:[%s8304_s11 + $0xe0] sm:$0xff] %v5187_v36  ;;  %5316 = vst.msk [vmem:[%s8304_s11 + $0xe8] sm:$0xff] %vm3043_vm0, %v5188_v8  ;;  %v3963_v36 = vld [vmem:[%s8048_s25 + $0xa8] sm:$0xff]  ;;  %v3030_v8 = vpop.f32.mrf.mxu1 }
 0x538   : > { %3670 = vadd.xlane.f32.xlu0 %v3669_v41  ;;  %v4741_v41 = vmul.f32 %v4469_v48, %v10009_v3  ;;  %v8821_v22 = vmul.f32 %v5594_v52, %v3963_v36  ;;  %v8823_v57 = vadd.f32 %v3030_v8, %v2678_v26  ;;  %v3770_v48 = vmul.f32 0.0051020407, %v10014_v4  ;;  %v10018_v4 = vld [vmem:[#allocation89_spill] sm:$0xff] }
 0x539   : > { %v8838_v52 = vadd.f32 %v3028_v44, %v2676_v38  ;;  %v3834_v53 = vmul.f32 %v8831_v30, %v8831_v30  ;;  %v3034_v44 = vpop.f32.mrf.mxu1 }
 0x53a   : > { %10011 = vst [vmem:[#allocation100_spill] sm:$0xff] %v8823_v57 }
 0x53b   : > { %10015 = vst [vmem:[#allocation79_spill] sm:$0xff] %v8838_v52  ;;  %v3898_v25 = vsub.f32 %v3770_v48, %v3834_v53  ;;  %v3422_v36 = vmul.f32 %v8838_v52, %v8838_v52  ;;  %v4027_v53 = vld [vmem:[%s8065_s28 + $0xa0] sm:$0xff] }
 0x53d   : > { %v4093_v3 = vadd.f32 1e-05, %v3898_v25 }
 0x53f   : > { %5595 = vrsqrt.f32 %v4093_v3 }
 0x543   : > { %v8810_v33 = vpop.xlane.xlu0 %3270 }
 0x544   : > { %10006 = vst [vmem:[#allocation80_spill] sm:$0xff] %v8810_v33 }
 0x547   : > { %v8815_v58 = vpop.xlane.xlu0 %3654 }
 0x548   : > { %10007 = vst [vmem:[#allocation101_spill] sm:$0xff] %v8815_v58 }
 0x54e   : > { %4936 = vperm.xlu0 %5549, %v4346_v19   ;;  %v3423_v19 = vmul.f32 %v8823_v57, %v8823_v57 }
 0x54f   : > { %v4917_v18 = vpop.permute.xlu0 %4916 }
 0x550   : > { %v5189_v16 = vadd.f32 %v4917_v18, %v4741_v41  ;;  %v5190_v27 = vadd.f32 %v4917_v18, %v4742_v49  ;;  %v3288_v18 = vsel %vm3043_vm0, %v8823_v57, 0.0  ;;  %v3672_v26 = vsel %vm3043_vm0, %v3423_v19, 0.0  ;;  %v2681_v41 = vpop.f32.mrf.mxu0 }
 0x551   : > { %v3289_v11 = vadd.f32 %v3288_v18, %v8838_v52  ;;  %v3673_v8 = vadd.f32 %v3672_v26, %v3422_v36  ;;  %v2682_v48 = vadd.f32 %v2681_v41, %v10018_v4  ;;  %v4283_v18 = vmul.f32 %v4219_v34, %v8763_v42  ;;  %v10022_v4 = vld [vmem:[#allocation111_spill] sm:$0xff] }
 0x552   : > { %5317 = vst [vmem:[%s8304_s11 + $0xf0] sm:$0xff] %v5189_v16  ;;  %5318 = vst.msk [vmem:[%s8304_s11 + $0xf8] sm:$0xff] %vm3043_vm0, %v5190_v27  ;;  %4498 = vperm.xlu0 %5549, %v8821_v22   ;;  %v2683_v38 = vpop.f32.mrf.mxu0  ;;  %v3036_v16 = vpop.f32.mrf.mxu1 }
 0x553   : > { %v2684_v49 = vadd.f32 %v2683_v38, %v10016_v29  ;;  %v4474_v27 = vpop.permute.xlu1 %4473  ;;  %v8862_v38 = vadd.f32 %v3034_v44, %v2682_v48  ;;  %v4347_v41 = vsub.f32 %v4027_v53, %v4283_v18 }
 0x555   : > { %v8847_v1 = vadd.f32 %v3036_v16, %v2684_v49  ;;  %10021 = vst [vmem:[#allocation122_spill] sm:$0xff] %v8862_v38  ;;  %v5596_v49 = vpop.eup %5595  ;;  %v3964_v16 = vld [vmem:[%s8048_s25 + $0xb0] sm:$0xff]  ;;  %v3424_v18 = vmul.f32 %v8862_v38, %v8862_v38 }
 0x557   : > { %10017 = vst [vmem:[#allocation49_spill] sm:$0xff] %v8847_v1  ;;  %v3425_v26 = vmul.f32 %v8847_v1, %v8847_v1  ;;  %v3292_v36 = vsel %vm3043_vm0, %v8847_v1, 0.0  ;;  %v10023_v1 = vld [vmem:[#allocation110_spill] sm:$0xff] }
 0x558   : > { %v3293_v34 = vadd.f32 %v3292_v36, %v8862_v38  ;;  %v4744_v57 = vmul.f32 %v4474_v27, %v10023_v1  ;;  %v10025_v1 = vld [vmem:[#allocation133_spill] sm:$0xff] }
 0x559   : > { %v3676_v44 = vsel %vm3043_vm0, %v3425_v26, 0.0  ;;  %v3773_v26 = vmul.f32 0.0051020407, %v10025_v1  ;;  %v4284_v1 = vmul.f32 %v8821_v22, %v8796_v59  ;;  %v10034_v59 = vld [vmem:[#allocation113_spill] sm:$0xff] }
 0x55a   : > { %3290 = vadd.xlane.f32.xlu1 %v3289_v11  ;;  %v10019_v11 = vld [vmem:[#allocation127_spill] sm:$0xff]  ;;  %v3677_v36 = vadd.f32 %v3676_v44, %v3424_v18 }
 0x55b   : > { %v8855_v25 = vmul.f32 0.0051020407, %v10019_v11  ;;  %v4743_v11 = vmul.f32 %v4474_v27, %v10022_v4  ;;  %v10029_v18 = vld [vmem:[#allocation139_spill] sm:$0xff] }
 0x55d   : > { %v3835_v42 = vmul.f32 %v8855_v25, %v8855_v25 }
 0x55e   : > { %3674 = vadd.xlane.f32.xlu1 %v3673_v8  ;;  %v10020_v8 = vld [vmem:[#allocation129_spill] sm:$0xff] }
 0x55f   : > { %v3771_v3 = vmul.f32 0.0051020407, %v10020_v8  ;;  %v8875_v8 = vmul.f32 %v5596_v49, %v3964_v16 }
 0x561   : > { %v3899_v48 = vsub.f32 %v3771_v3, %v3835_v42 }
 0x563   : > { %v4094_v27 = vadd.f32 1e-05, %v3899_v48  ;;  %v2685_v48 = vpop.f32.mrf.mxu0 }
 0x565   : > { %5597 = vrsqrt.f32 %v4094_v27 }
 0x569   : > { %v8850_v19 = vpop.xlane.xlu1 %3274 }
 0x56d   : > { %v8864_v29 = vpop.xlane.xlu1 %3658 }
 0x56f   : > { %4941 = vperm.xlu1 %5550, %v4347_v41   ;;  %v10024_v41 = vld [vmem:[#allocation131_spill] sm:$0xff] }
 0x570   : > { %v8878_v54 = vmul.f32 0.0051020407, %v10024_v41 }
 0x571   : > { %v4922_v53 = vpop.permute.xlu1 %4921  ;;  %3294 = vadd.xlane.f32.xlu0 %v3293_v34  ;;  %v10027_v34 = vld [vmem:[#allocation137_spill] sm:$0xff] }
 0x572   : > { %v5191_v52 = vadd.f32 %v4922_v53, %v4743_v11  ;;  %v5192_v2 = vadd.f32 %v4922_v53, %v4744_v57  ;;  %v3837_v3 = vmul.f32 %v8878_v54, %v8878_v54  ;;  %v10026_v57 = vld [vmem:[#allocation135_spill] sm:$0xff]  ;;  %v3775_v4 = vmul.f32 0.0051020407, %v10027_v34  ;;  %v3038_v34 = vpop.f32.mrf.mxu1 }
 0x573   : > { %4503 = vperm.xlu1 %5550, %v8875_v8   ;;  %v8888_v16 = vmul.f32 0.0051020407, %v10026_v57  ;;  %v8896_v53 = vmul.f32 0.0051020407, %v10029_v18  ;;  %v2687_v57 = vpop.f32.mrf.mxu0 }
 0x574   : > { %5319 = vst [vmem:[%s8304_s11 + $0x100] sm:$0xff] %v5191_v52  ;;  %5320 = vst.msk [vmem:[%s8304_s11 + $0x108] sm:$0xff] %vm3043_vm0, %v5192_v2  ;;  %v3901_v49 = vsub.f32 %v3773_v26, %v3837_v3  ;;  %v4479_v52 = vpop.permute.xlu0 %4478  ;;  %v5598_v26 = vpop.eup %5597  ;;  %v4028_v3 = vld [vmem:[%s8065_s28 + $0xa8] sm:$0xff] }
 0x575   : > { %3678 = vadd.xlane.f32.xlu0 %v3677_v36  ;;  %v3839_v2 = vmul.f32 %v8888_v16, %v8888_v16  ;;  %v10030_v36 = vld [vmem:[#allocation141_spill] sm:$0xff]  ;;  %v4348_v18 = vsub.f32 %v4028_v3, %v4284_v1  ;;  %v3040_v22 = vpop.f32.mrf.mxu1  ;;  %v4745_v21 = vmul.f32 %v4479_v52, %v10034_v59  ;;  %v4746_v24 = vmul.f32 %v4479_v52, %v10035_v17  ;;  %v4030_v52 = vld [vmem:[%s8065_s28 + $0xb8] sm:$0xff] }
 0x576   : > { %v4096_v42 = vadd.f32 1e-05, %v3901_v49  ;;  %v3777_v27 = vmul.f32 0.0051020407, %v10030_v36  ;;  %v3965_v49 = vld [vmem:[%s8048_s25 + $0xb8] sm:$0xff]  ;;  %v10033_v36 = vld [vmem:[#allocation142_spill] sm:$0xff] }
 0x577   : > { %v3903_v11 = vsub.f32 %v3775_v4, %v3839_v2  ;;  %v4222_v38 = vmul.f32 %v5598_v26, %v3965_v49  ;;  %v8909_v40 = vmul.f32 0.0051020407, %v10033_v36  ;;  %v10038_v36 = vld [vmem:[#allocation130_spill] sm:$0xff] }
 0x578   : > { %5599 = vrsqrt.f32 %v4096_v42  ;;  %v3841_v42 = vmul.f32 %v8896_v53, %v8896_v53 }
 0x579   : > { %v4098_v41 = vadd.f32 1e-05, %v3903_v11  ;;  %v10032_v11 = vld [vmem:[#allocation92_spill] sm:$0xff]  ;;  %v3843_v17 = vmul.f32 %v8909_v40, %v8909_v40 }
 0x57a   : > { %v3905_v2 = vsub.f32 %v3777_v27, %v3841_v42  ;;  %v2688_v56 = vadd.f32 %v2687_v57, %v10032_v11  ;;  %v10037_v27 = vld [vmem:[#allocation53_spill] sm:$0xff]  ;;  %v4286_v42 = vmul.f32 %v4222_v38, %v8855_v25 }
 0x57b   : > { %5601 = vrsqrt.f32 %v4098_v41  ;;  %v8914_v41 = vmul.f32 0.0051020407, %v10036_v37  ;;  %v3779_v1 = vmul.f32 0.0051020407, %v10037_v27  ;;  %v10040_v37 = vld [vmem:[#allocation91_spill] sm:$0xff] }
 0x57c   : > { %v4100_v3 = vadd.f32 1e-05, %v3905_v2  ;;  %v8919_v59 = vadd.f32 %v3040_v22, %v2688_v56  ;;  %v4350_v25 = vsub.f32 %v4030_v52, %v4286_v42 }
 0x57e   : > { %10039 = vst [vmem:[#allocation123_spill] sm:$0xff] %v8919_v59  ;;  %5603 = vrsqrt.f32 %v4100_v3  ;;  %v3427_v22 = vmul.f32 %v8919_v59, %v8919_v59  ;;  %v10044_v3 = vld [vmem:[#allocation149_spill] sm:$0xff] }
 0x57f   : > { %v3781_v42 = vmul.f32 0.0051020407, %v10044_v3 }
 0x580   : > { %v8893_v44 = vpop.xlane.xlu0 %3278 }
 0x581   : > { %10028 = vst [vmem:[#allocation82_spill] sm:$0xff] %v8893_v44  ;;  %v2686_v44 = vadd.f32 %v2685_v48, %v10040_v37  ;;  %v3296_v48 = vsel %vm3043_vm0, %v8919_v59, 0.0  ;;  %v3969_v37 = vld [vmem:[%s8048_s25 + $0xd8] sm:$0xff] }
 0x582   : > { %v10048_v59 = vld [vmem:[#allocation56_spill] sm:$0xff] }
 0x583   : > { %v8935_v27 = vadd.f32 %v3038_v34, %v2686_v44  ;;  %v3680_v34 = vsel %vm3043_vm0, %v3427_v22, 0.0 }
 0x584   : > { %v8905_v4 = vpop.xlane.xlu0 %3662 }
 0x585   : > { %10031 = vst [vmem:[#allocation81_spill] sm:$0xff] %v8905_v4  ;;  %v5600_v11 = vpop.eup %5599  ;;  %v3772_v4 = vmul.f32 0.0051020407, %v10038_v36  ;;  %10041 = vst [vmem:[#allocation103_spill] sm:$0xff] %v8935_v27 }
 0x58b   : > { %4946 = vperm.xlu0 %5549, %v4348_v18   ;;  %v3967_v18 = vld [vmem:[%s8048_s25 + $0xc8] sm:$0xff] }
 0x58c   : > { %v4927_v26 = vpop.permute.xlu0 %4926  ;;  %v4224_v56 = vmul.f32 %v5600_v11, %v3967_v18  ;;  %v4032_v11 = vld [vmem:[%s8065_s28 + $0xc8] sm:$0xff] }
 0x58d   : > { %v5193_v49 = vadd.f32 %v4927_v26, %v4745_v21  ;;  %v5194_v57 = vadd.f32 %v4927_v26, %v4746_v24  ;;  %v3836_v24 = vmul.f32 %v8914_v41, %v8914_v41  ;;  %v3907_v21 = vsub.f32 %v3779_v1, %v3843_v17  ;;  %v10042_v26 = vld [vmem:[#allocation147_spill] sm:$0xff]  ;;  %v5602_v17 = vpop.eup %5601  ;;  %v10045_v18 = vld [vmem:[#allocation134_spill] sm:$0xff] }
 0x58e   : > { %v4288_v36 = vmul.f32 %v4224_v56, %v8878_v54  ;;  %v3774_v44 = vmul.f32 0.0051020407, %v10045_v18  ;;  %v10047_v18 = vld [vmem:[#allocation136_spill] sm:$0xff] }
 0x58f   : > { %5321 = vst [vmem:[%s8304_s11 + $0x110] sm:$0xff] %v5193_v49  ;;  %5322 = vst.msk [vmem:[%s8304_s11 + $0x118] sm:$0xff] %vm3043_vm0, %v5194_v57  ;;  %4508 = vperm.xlu0 %5549, %v4222_v38   ;;  %v3900_v2 = vsub.f32 %v3772_v4, %v3836_v24  ;;  %v8938_v38 = vmul.f32 0.0051020407, %v10042_v26  ;;  %v10043_v49 = vld [vmem:[#allocation132_spill] sm:$0xff]  ;;  %v3297_v4 = vadd.f32 %v3296_v48, %v8935_v27 }
 0x590   : > { %v8941_v57 = vmul.f32 0.0051020407, %v10043_v49  ;;  %v4102_v1 = vadd.f32 1e-05, %v3907_v21  ;;  %v3426_v24 = vmul.f32 %v8935_v27, %v8935_v27  ;;  %v4226_v26 = vmul.f32 %v5602_v17, %v3969_v37  ;;  %v10046_v49 = vld [vmem:[#allocation151_spill] sm:$0xff]  ;;  %v4034_v17 = vld [vmem:[%s8065_s28 + $0xd8] sm:$0xff] }
 0x591   : > { %v4095_v52 = vadd.f32 1e-05, %v3900_v2  ;;  %v3845_v21 = vmul.f32 %v8938_v38, %v8938_v38  ;;  %v4352_v2 = vsub.f32 %v4032_v11, %v4288_v36  ;;  %v8957_v3 = vmul.f32 0.0051020407, %v10046_v49  ;;  %v10049_v36 = vld [vmem:[#allocation138_spill] sm:$0xff]  ;;  %v10052_v49 = vld [vmem:[#allocation155_spill] sm:$0xff] }
 0x592   : > { %5605 = vrsqrt.f32 %v4102_v1  ;;  %v3681_v48 = vadd.f32 %v3680_v34, %v3426_v24  ;;  %v3783_v27 = vmul.f32 0.0051020407, %v10048_v59  ;;  %v4290_v1 = vmul.f32 %v4226_v26, %v8888_v16  ;;  %v10050_v24 = vld [vmem:[#allocation140_spill] sm:$0xff] }
 0x593   : > { %4956 = vperm.xlu0 %5549, %v4350_v25   ;;  %v3838_v25 = vmul.f32 %v8941_v57, %v8941_v57  ;;  %v3909_v54 = vsub.f32 %v3781_v42, %v3845_v21  ;;  %5607 = vrsqrt.f32 %v4095_v52  ;;  %v5604_v42 = vpop.eup %5603  ;;  %v3776_v34 = vmul.f32 0.0051020407, %v10049_v36  ;;  %v3971_v52 = vld [vmem:[%s8048_s25 + $0xe8] sm:$0xff] }
 0x594   : > { %v8972_v21 = vmul.f32 0.0051020407, %v10050_v24  ;;  %v4354_v16 = vsub.f32 %v4034_v17, %v4290_v1 }
 0x595   : > { %v3902_v22 = vsub.f32 %v3774_v44, %v3838_v25  ;;  %v3847_v44 = vmul.f32 %v8957_v3, %v8957_v3  ;;  %v4228_v25 = vmul.f32 %v5604_v42, %v3971_v52  ;;  %v4036_v52 = vld [vmem:[%s8065_s28 + $0xe8] sm:$0xff] }
 0x596   : > { %v3842_v36 = vmul.f32 %v8972_v21, %v8972_v21 }
 0x597   : > { %4518 = vperm.xlu0 %5549, %v4224_v56   ;;  %3298 = vadd.xlane.f32.xlu1 %v3297_v4  ;;  %v8960_v56 = vmul.f32 0.0051020407, %v10047_v18  ;;  %v4104_v4 = vadd.f32 1e-05, %v3909_v54  ;;  %v4097_v11 = vadd.f32 1e-05, %v3902_v22  ;;  %v3911_v59 = vsub.f32 %v3783_v27, %v3847_v44 }
 0x598   : > { %v8976_v18 = vmul.f32 0.0051020407, %v10052_v49  ;;  %v10053_v27 = vld [vmem:[#allocation156_spill] sm:$0xff]  ;;  %v4292_v42 = vmul.f32 %v4228_v25, %v8896_v53  ;;  %v4285_v44 = vmul.f32 %v8875_v8, %v8831_v30  ;;  %v10054_v8 = vld [vmem:[#allocation159_spill] sm:$0xff] }
 0x599   : > { %v3840_v37 = vmul.f32 %v8960_v56, %v8960_v56  ;;  %5609 = vrsqrt.f32 %v4104_v4  ;;  %v4106_v4 = vadd.f32 1e-05, %v3911_v59  ;;  %v3785_v1 = vmul.f32 0.0051020407, %v10053_v27  ;;  %v3966_v59 = vld [vmem:[%s8048_s25 + $0xc0] sm:$0xff] }
 0x59a   : > { %5611 = vrsqrt.f32 %v4097_v11  ;;  %v3973_v11 = vld [vmem:[%s8048_s25 + $0xf8] sm:$0xff]  ;;  %v4356_v53 = vsub.f32 %v4036_v52, %v4292_v42  ;;  %v10058_v52 = vld [vmem:[#allocation114_spill] sm:$0xff] }
 0x59b   : > { %4966 = vperm.xlu0 %5549, %v4352_v2   ;;  %3682 = vadd.xlane.f32.xlu1 %v3681_v48  ;;  %v3904_v54 = vsub.f32 %v3776_v34, %v3840_v37  ;;  %v4484_v2 = vpop.permute.xlu1 %4483  ;;  %v10051_v48 = vld [vmem:[#allocation54_spill] sm:$0xff]  ;;  %5613 = vrsqrt.f32 %v4106_v4 }
 0x59c   : > { %v3778_v22 = vmul.f32 0.0051020407, %v10051_v48  ;;  %v4029_v48 = vld [vmem:[%s8065_s28 + $0xb0] sm:$0xff] }
 0x59d   : > { %v4099_v34 = vadd.f32 1e-05, %v3904_v54  ;;  %v4349_v58 = vsub.f32 %v4029_v48, %v4285_v44  ;;  %v4748_v44 = vmul.f32 %v4484_v2, %v10058_v52 }
 0x59e   : > { %v3906_v24 = vsub.f32 %v3778_v22, %v3842_v36  ;;  %v8995_v22 = vmul.f32 0.0051020407, %v10054_v8  ;;  %v10055_v36 = vld [vmem:[#allocation144_spill] sm:$0xff] }
 0x59f   : > { %4528 = vperm.xlu0 %5549, %v4226_v26   ;;  %v5606_v26 = vpop.eup %5605  ;;  %5615 = vrsqrt.f32 %v4099_v34 }
 0x5a0   : > { %v5608_v37 = vpop.eup %5607  ;;  %v4230_v49 = vmul.f32 %v5606_v26, %v3973_v11  ;;  %v4101_v30 = vadd.f32 1e-05, %v3906_v24  ;;  %v10057_v11 = vld [vmem:[#allocation115_spill] sm:$0xff]  ;;  %v10059_v24 = vld [vmem:[#allocation145_spill] sm:$0xff] }
 0x5a1   : > { %v4223_v33 = vmul.f32 %v5608_v37, %v3966_v59  ;;  %v4747_v34 = vmul.f32 %v4484_v2, %v10057_v11  ;;  %v4038_v59 = vld [vmem:[%s8065_s28 + $0xf8] sm:$0xff]  ;;  %v3968_v2 = vld [vmem:[%s8048_s25 + $0xd0] sm:$0xff] }
 0x5a2   : > { %v4294_v26 = vmul.f32 %v4230_v49, %v8909_v40  ;;  %5617 = vrsqrt.f32 %v4101_v30 }
 0x5a3   : > { %4976 = vperm.xlu0 %5549, %v4354_v16   ;;  %v3849_v16 = vmul.f32 %v8976_v18, %v8976_v18 }
 0x5a5   : > { %v3913_v27 = vsub.f32 %v3785_v1, %v3849_v16  ;;  %v10056_v1 = vld [vmem:[#allocation160_spill] sm:$0xff]  ;;  %v3780_v16 = vmul.f32 0.0051020407, %v10059_v24 }
 0x5a6   : > { %v8983_v17 = vpop.xlane.xlu1 %3282  ;;  %v3787_v42 = vmul.f32 0.0051020407, %v10056_v1  ;;  %v5610_v37 = vpop.eup %5609  ;;  %v4031_v1 = vld [vmem:[%s8065_s28 + $0xc0] sm:$0xff] }
 0x5a7   : > { %4538 = vperm.xlu0 %5549, %v4228_v25   ;;  %v8998_v25 = vmul.f32 0.0051020407, %v10055_v36  ;;  %v4108_v4 = vadd.f32 1e-05, %v3913_v27  ;;  %v5612_v40 = vpop.eup %5611  ;;  %v3851_v27 = vmul.f32 %v8995_v22, %v8995_v22 }
 0x5a9   : > { %v3844_v11 = vmul.f32 %v8998_v25, %v8998_v25  ;;  %5619 = vrsqrt.f32 %v4108_v4  ;;  %v3915_v52 = vsub.f32 %v3787_v42, %v3851_v27  ;;  %v3977_v27 = vld [vmem:[%s8048_s25 + $0x118] sm:$0xff] }
 0x5aa   : > { %v8992_v54 = vpop.xlane.xlu1 %3666 }
 0x5ab   : > { %4986 = vperm.xlu0 %5549, %v4356_v53   ;;  %v3975_v53 = vld [vmem:[%s8048_s25 + $0x108] sm:$0xff]  ;;  %v3908_v24 = vsub.f32 %v3780_v16, %v3844_v11  ;;  %v4110_v42 = vadd.f32 1e-05, %v3915_v52  ;;  %v5614_v16 = vpop.eup %5613  ;;  %v9035_v52 = vpop.permute.xlu0 %4488 }
 0x5ac   : > { %4951 = vperm.xlu1 %5550, %v4349_v58   ;;  %v4287_v58 = vmul.f32 %v4223_v33, %v8914_v41  ;;  %v4358_v41 = vsub.f32 %v4038_v59, %v4294_v26  ;;  %v4232_v30 = vmul.f32 %v5610_v37, %v3975_v53  ;;  %v10063_v26 = vld [vmem:[#allocation164_spill] sm:$0xff] }
 0x5ad   : > { %v3789_v59 = vmul.f32 0.0051020407, %v10063_v26  ;;  %v4103_v53 = vadd.f32 1e-05, %v3908_v24  ;;  %5621 = vrsqrt.f32 %v4110_v42  ;;  %v4234_v24 = vmul.f32 %v5614_v16, %v3977_v27  ;;  %v10065_v42 = vld [vmem:[#allocation153_spill] sm:$0xff]  ;;  %v4042_v27 = vld [vmem:[%s8065_s28 + $0x118] sm:$0xff] }
 0x5ae   : > { %v4932_v48 = vpop.permute.xlu1 %4931  ;;  %v4296_v37 = vmul.f32 %v4232_v30, %v8938_v38  ;;  %v3784_v26 = vmul.f32 0.0051020407, %v10065_v42  ;;  %v3791_v16 = vmul.f32 0.0051020407, %v8371_v5 }
 0x5af   : > { %v5195_v8 = vadd.f32 %v4932_v48, %v4747_v34  ;;  %v5196_v36 = vadd.f32 %v4932_v48, %v4748_v44  ;;  %4548 = vperm.xlu0 %5549, %v4230_v49   ;;  %v9018_v34 = vmul.f32 0.0051020407, %v10060_v43  ;;  %v4351_v49 = vsub.f32 %v4031_v1, %v4287_v58  ;;  %v10061_v48 = vld [vmem:[#allocation162_spill] sm:$0xff]  ;;  %v4033_v1 = vld [vmem:[%s8065_s28 + $0xd0] sm:$0xff] }
 0x5b0   : > { %4513 = vperm.xlu1 %5550, %v4223_v33   ;;  %v4225_v44 = vmul.f32 %v5612_v40, %v3968_v2  ;;  %v9021_v51 = vmul.f32 0.0051020407, %v10061_v48  ;;  %v10062_v33 = vld [vmem:[#allocation150_spill] sm:$0xff]  ;;  %v3970_v2 = vld [vmem:[%s8048_s25 + $0xe0] sm:$0xff]  ;;  %5623 = vrsqrt.f32 %v4103_v53 }
 0x5b1   : > { %5323 = vst [vmem:[%s8304_s11 + $0x120] sm:$0xff] %v5195_v8  ;;  %5324 = vst.msk [vmem:[%s8304_s11 + $0x128] sm:$0xff] %vm3043_vm0, %v5196_v36  ;;  %v3782_v4 = vmul.f32 0.0051020407, %v10062_v33  ;;  %v3846_v43 = vmul.f32 %v9018_v34, %v9018_v34  ;;  %v4040_v58 = vld [vmem:[%s8065_s28 + $0x108] sm:$0xff]  ;;  %v5616_v8 = vpop.eup %5615 }
 0x5b2   : > { %v4289_v40 = vmul.f32 %v4225_v44, %v8941_v57  ;;  %v3853_v36 = vmul.f32 %v9021_v51, %v9021_v51  ;;  %v4227_v33 = vmul.f32 %v5616_v8, %v3970_v2  ;;  %v4035_v2 = vld [vmem:[%s8065_s28 + $0xe0] sm:$0xff] }
 0x5b3   : > { %4996 = vperm.xlu0 %5549, %v4358_v41   ;;  %v3910_v11 = vsub.f32 %v3782_v4, %v3846_v43  ;;  %v4360_v41 = vsub.f32 %v4040_v58, %v4296_v37  ;;  %v4298_v43 = vmul.f32 %v4234_v24, %v8957_v3 }
 0x5b4   : > { %4961 = vperm.xlu1 %5550, %v4351_v49   ;;  %v3917_v38 = vsub.f32 %v3789_v59, %v3853_v36  ;;  %v10064_v49 = vld [vmem:[#allocation152_spill] sm:$0xff]  ;;  %v4353_v48 = vsub.f32 %v4033_v1, %v4289_v40  ;;  %v3972_v59 = vld [vmem:[%s8048_s25 + $0xf0] sm:$0xff]  ;;  %v4291_v8 = vmul.f32 %v4227_v33, %v8960_v56  ;;  %v3979_v36 = vld [vmem:[%s8048_s25 + $0x128] sm:$0xff] }
 0x5b5   : > { %v9038_v57 = vmul.f32 0.0051020407, %v10064_v49  ;;  %v4105_v4 = vadd.f32 1e-05, %v3910_v11 }
 0x5b6   : > { %v4112_v37 = vadd.f32 1e-05, %v3917_v38 }
 0x5b7   : > { %4558 = vperm.xlu0 %5549, %v4232_v30   ;;  %v9041_v30 = vmul.f32 0.0051020407, %v8366_v50  ;;  %v3848_v50 = vmul.f32 %v9038_v57, %v9038_v57  ;;  %5625 = vrsqrt.f32 %v4105_v4  ;;  %v10067_v4 = vld [vmem:[#allocation158_spill] sm:$0xff] }
 0x5b8   : > { %4523 = vperm.xlu1 %5550, %v4225_v44   ;;  %v5618_v44 = vpop.eup %5617  ;;  %5627 = vrsqrt.f32 %v4112_v37  ;;  %v4037_v37 = vld [vmem:[%s8065_s28 + $0xf0] sm:$0xff] }
 0x5b9   : > { %v5620_v58 = vpop.eup %5619  ;;  %v3855_v1 = vmul.f32 %v9041_v30, %v9041_v30  ;;  %v4229_v11 = vmul.f32 %v5618_v44, %v3972_v59  ;;  %v3912_v5 = vsub.f32 %v3784_v26, %v3848_v50  ;;  %v9063_v44 = vmul.f32 0.0051020407, %v8438_v31 }
 0x5ba   : > { %v4236_v49 = vmul.f32 %v5620_v58, %v3979_v36  ;;  %v3786_v26 = vmul.f32 0.0051020407, %v10067_v4  ;;  %v5622_v50 = vpop.eup %5621  ;;  %v4044_v36 = vld [vmem:[%s8065_s28 + $0x128] sm:$0xff] }
 0x5bb   : > { %5006 = vperm.xlu0 %5549, %v4360_v41   ;;  %v3919_v3 = vsub.f32 %v3791_v16, %v3855_v1  ;;  %v4362_v41 = vsub.f32 %v4042_v27, %v4298_v43  ;;  %v3793_v43 = vmul.f32 0.0051020407, %v8441_v14  ;;  %v4107_v27 = vadd.f32 1e-05, %v3912_v5  ;;  %v3981_v1 = vld [vmem:[%s8048_s25 + $0x138] sm:$0xff] }
 0x5bc   : > { %4971 = vperm.xlu1 %5550, %v4353_v48   ;;  %v10066_v48 = vld [vmem:[#allocation55_spill] sm:$0xff]  ;;  %v4300_v58 = vmul.f32 %v4236_v49, %v8976_v18  ;;  %v10069_v18 = vld [vmem:[#allocation116_spill] sm:$0xff]  ;;  %v4238_v4 = vmul.f32 %v5622_v50, %v3981_v1 }
 0x5bd   : > { %v3287_v53 = vpop.xlane.xlu0 %3286  ;;  %v9058_v42 = vmul.f32 0.0051020407, %v10066_v48  ;;  %v4114_v16 = vadd.f32 1e-05, %v3919_v3  ;;  %v10068_v48 = vld [vmem:[#allocation5_spill] sm:$0xff]  ;;  %v4750_v5 = vmul.f32 %v9035_v52, %v10069_v18  ;;  %v3976_v50 = vld [vmem:[%s8048_s25 + $0x110] sm:$0xff] }
 0x5be   : > { %v9049_v40 = vmul.f32 0.0051020407, %v3287_v53  ;;  %v4749_v14 = vmul.f32 %v9035_v52, %v10068_v48  ;;  %v9103_v18 = vmul.f32 0.0051020407, %v8578_v13  ;;  %v3790_v13 = vmul.f32 0.0051020407, %v8360_v10 }
 0x5bf   : > { %4568 = vperm.xlu0 %5549, %v4234_v24   ;;  %v4355_v24 = vsub.f32 %v4035_v2, %v4291_v8  ;;  %v3850_v31 = vmul.f32 %v9058_v42, %v9058_v42  ;;  %v3857_v2 = vmul.f32 %v9063_v44, %v9063_v44 }
 0x5c0   : > { %4533 = vperm.xlu1 %5550, %v4227_v33   ;;  %v3872_v56 = vmul.f32 %v9049_v40, %v9049_v40  ;;  %v4293_v33 = vmul.f32 %v4229_v11, %v8972_v21  ;;  %v5624_v21 = vpop.eup %5623 }
 0x5c1   : > { %v3671_v38 = vpop.xlane.xlu0 %3670  ;;  %v3914_v3 = vsub.f32 %v3786_v26, %v3850_v31 }
 0x5c2   : > { %v3808_v53 = vmul.f32 0.0051020407, %v3671_v38  ;;  %v4357_v38 = vsub.f32 %v4037_v37, %v4293_v33  ;;  %v10070_v37 = vld [vmem:[#allocation161_spill] sm:$0xff] }
 0x5c3   : > { %5016 = vperm.xlu0 %5549, %v4362_v41   ;;  %v3974_v41 = vld [vmem:[%s8048_s25 + $0x100] sm:$0xff]  ;;  %v4109_v52 = vadd.f32 1e-05, %v3914_v3  ;;  %v9085_v31 = vmul.f32 0.0051020407, %v10070_v37 }
 0x5c4   : > { %v3936_v59 = vsub.f32 %v3808_v53, %v3872_v56  ;;  %4981 = vperm.xlu1 %5550, %v4355_v24   ;;  %v3921_v56 = vsub.f32 %v3793_v43, %v3857_v2  ;;  %v4364_v24 = vsub.f32 %v4044_v36, %v4300_v58  ;;  %v4231_v26 = vmul.f32 %v5624_v21, %v3974_v41  ;;  %v4046_v36 = vld [vmem:[%s8065_s28 + $0x138] sm:$0xff]  ;;  %v3983_v21 = vld [vmem:[%s8048_s25 + $0x148] sm:$0xff] }
 0x5c5   : > { %v3795_v43 = vmul.f32 0.0051020407, %v8512_v45  ;;  %v4302_v58 = vmul.f32 %v4238_v4, %v8995_v22  ;;  %v3852_v45 = vmul.f32 %v9085_v31, %v9085_v31 }
 0x5c6   : > { %v4131_v8 = vadd.f32 1e-05, %v3936_v59  ;;  %v9082_v59 = vmul.f32 0.0051020407, %v8507_v12  ;;  %v4295_v1 = vmul.f32 %v4231_v26, %v8998_v25 }
 0x5c7   : > { %4578 = vperm.xlu0 %5549, %v4236_v49   ;;  %v4366_v3 = vsub.f32 %v4046_v36, %v4302_v58  ;;  %v3861_v58 = vmul.f32 %v9103_v18, %v9103_v18  ;;  %v9128_v36 = vmul.f32 0.0051020407, %v8406_v46 }
 0x5c8   : > { %5629 = vrsqrt.f32 %v4131_v8  ;;  %4543 = vperm.xlu1 %5550, %v4229_v11   ;;  %v5626_v11 = vpop.eup %5625  ;;  %v3859_v2 = vmul.f32 %v9082_v59, %v9082_v59 }
 0x5c9   : > { %5631 = vrsqrt.f32 %v4114_v16  ;;  %v4937_v53 = vpop.permute.xlu0 %4936  ;;  %v4116_v16 = vadd.f32 1e-05, %v3921_v56  ;;  %v5628_v12 = vpop.eup %5627  ;;  %v4233_v22 = vmul.f32 %v5626_v11, %v3976_v50  ;;  %v9107_v56 = vmul.f32 0.0051020407, %v8344_v60  ;;  %v4048_v11 = vld [vmem:[%s8065_s28 + $0x148] sm:$0xff] }
 0x5ca   : > { %5633 = vrsqrt.f32 %v4107_v27  ;;  %v5197_v49 = vadd.f32 %v4937_v53, %v4749_v14  ;;  %v5198_v33 = vadd.f32 %v4937_v53, %v4750_v5  ;;  %v10071_v27 = vld [vmem:[#allocation163_spill] sm:$0xff]  ;;  %v3923_v41 = vsub.f32 %v3795_v43, %v3859_v2  ;;  %v4002_v5 = vld [vmem:[%s8048_s25 + $0x1e0] sm:$0xff] }
 0x5cb   : > { %5026 = vperm.xlu0 %5549, %v4364_v24   ;;  %v3788_v8 = vmul.f32 0.0051020407, %v10071_v27  ;;  %5635 = vrsqrt.f32 %v4109_v52  ;;  %v4240_v48 = vmul.f32 %v5628_v12, %v3983_v21  ;;  %v4297_v53 = vmul.f32 %v4233_v22, %v9018_v34  ;;  %v3978_v34 = vld [vmem:[%s8048_s25 + $0x120] sm:$0xff] }
 0x5cc   : > { %5325 = vst [vmem:[%s8304_s11 + $0x130] sm:$0xff] %v5197_v49  ;;  %5326 = vst.msk [vmem:[%s8304_s11 + $0x138] sm:$0xff] %vm3043_vm0, %v5198_v33  ;;  %4991 = vperm.xlu1 %5550, %v4357_v38   ;;  %v4039_v38 = vld [vmem:[%s8065_s28 + $0x100] sm:$0xff]  ;;  %5637 = vrsqrt.f32 %v4116_v16  ;;  %v3797_v49 = vmul.f32 0.0051020407, %v8588_v47  ;;  %v3985_v16 = vld [vmem:[%s8048_s25 + $0x158] sm:$0xff]  ;;  %v3854_v47 = vmul.f32 %v9107_v56, %v9107_v56 }
 0x5cd   : > { %v3916_v14 = vsub.f32 %v3788_v8, %v3852_v45  ;;  %v4359_v25 = vsub.f32 %v4039_v38, %v4295_v1  ;;  %v4304_v33 = vmul.f32 %v4240_v48, %v9021_v51  ;;  %v9131_v21 = vmul.f32 0.0051020407, %v8646_v39 }
 0x5ce   : > { %v3925_v10 = vsub.f32 %v3797_v49, %v3861_v58  ;;  %v3918_v8 = vsub.f32 %v3790_v13, %v3854_v47  ;;  %v3799_v45 = vmul.f32 0.0051020407, %v8656_v35  ;;  %v4045_v58 = vld [vmem:[%s8065_s28 + $0x130] sm:$0xff]  ;;  %v4052_v47 = vld [vmem:[%s8065_s28 + $0x168] sm:$0xff] }
 0x5cf   : > { %4588 = vperm.xlu0 %5549, %v4238_v4   ;;  %v4118_v4 = vadd.f32 1e-05, %v3923_v41  ;;  %v4111_v37 = vadd.f32 1e-05, %v3916_v14  ;;  %v4368_v12 = vsub.f32 %v4048_v11, %v4304_v33  ;;  %v3980_v41 = vld [vmem:[%s8048_s25 + $0x130] sm:$0xff]  ;;  %v4050_v14 = vld [vmem:[%s8065_s28 + $0x158] sm:$0xff] }
 0x5d0   : > { %4553 = vperm.xlu1 %5550, %v4231_v26   ;;  %v4041_v26 = vld [vmem:[%s8065_s28 + $0x110] sm:$0xff]  ;;  %v4120_v38 = vadd.f32 1e-05, %v3925_v10  ;;  %v4113_v46 = vadd.f32 1e-05, %v3918_v8 }
 0x5d1   : > { %v4361_v51 = vsub.f32 %v4041_v26, %v4297_v53  ;;  %5639 = vrsqrt.f32 %v4118_v4  ;;  %v4043_v53 = vld [vmem:[%s8065_s28 + $0x120] sm:$0xff] }
 0x5d2   : > { %5641 = vrsqrt.f32 %v4111_v37  ;;  %v9151_v37 = vmul.f32 0.0051020407, %v8472_v20 }
 0x5d3   : > { %5036 = vperm.xlu0 %5549, %v4366_v3   ;;  %5643 = vrsqrt.f32 %v4120_v38  ;;  %v10073_v38 = vld [vmem:[#allocation6_spill] sm:$0xff] }
 0x5d4   : > { %5001 = vperm.xlu1 %5550, %v4359_v25   ;;  %v3987_v25 = vld [vmem:[%s8048_s25 + $0x168] sm:$0xff]  ;;  %5645 = vrsqrt.f32 %v4113_v46  ;;  %v9173_v46 = vmul.f32 0.0051020407, %v8538_v23 }
 0x5d5   : > { %v5630_v24 = vpop.eup %5629 }
 0x5d6   : > { %v5632_v52 = vpop.eup %5631  ;;  %v9116_v43 = vmul.f32 %v5630_v24, %v4002_v5  ;;  %v4494_v5 = vpop.permute.xlu1 %4493 }
 0x5d7   : > { %v5634_v60 = vpop.eup %5633  ;;  %4598 = vperm.xlu0 %5549, %v4240_v48   ;;  %v4242_v27 = vmul.f32 %v5632_v52, %v3985_v16  ;;  %v3856_v48 = vmul.f32 %v9128_v36, %v9128_v36  ;;  %v3801_v16 = vmul.f32 0.0051020407, %v8724_v9  ;;  %v3858_v9 = vmul.f32 %v9151_v37, %v9151_v37 }
 0x5d8   : > { %4563 = vperm.xlu1 %5550, %v4233_v22   ;;  %v9125_v50 = vmul.f32 %v9116_v43, %v9049_v40  ;;  %v4235_v1 = vmul.f32 %v5634_v60, %v3978_v34  ;;  %v3792_v40 = vmul.f32 0.0051020407, %v8418_v61  ;;  %v5636_v2 = vpop.eup %5635  ;;  %v3863_v61 = vmul.f32 %v9131_v21, %v9131_v21 }
 0x5d9   : > { %v4306_v22 = vmul.f32 %v4242_v27, %v9041_v30  ;;  %v5638_v3 = vpop.eup %5637  ;;  %v4237_v35 = vmul.f32 %v5636_v2, %v3980_v41  ;;  %v9170_v41 = vmul.f32 0.0051020407, %v8782_v28  ;;  %v3796_v28 = vmul.f32 0.0051020407, %v8543_v15 }
 0x5da   : > { %v4299_v39 = vmul.f32 %v4235_v1, %v9038_v57  ;;  %v3920_v24 = vsub.f32 %v3792_v40, %v3856_v48  ;;  %v3927_v30 = vsub.f32 %v3799_v45, %v3863_v61  ;;  %v4244_v49 = vmul.f32 %v5638_v3, %v3987_v25  ;;  %v10072_v40 = vld [vmem:[#allocation117_spill] sm:$0xff] }
 0x5db   : > { %5046 = vperm.xlu0 %5549, %v4368_v12   ;;  %v4370_v4 = vsub.f32 %v4050_v14, %v4306_v22  ;;  %v9146_v57 = vmul.f32 0.0051020407, %v8714_v62  ;;  %v4301_v13 = vmul.f32 %v4237_v35, %v9058_v42  ;;  %v3794_v62 = vmul.f32 0.0051020407, %v8477_v0 }
 0x5dc   : > { %5011 = vperm.xlu1 %5550, %v4361_v51   ;;  %v4363_v33 = vsub.f32 %v4043_v53, %v4299_v39  ;;  %v4115_v52 = vadd.f32 1e-05, %v3920_v24  ;;  %v4122_v11 = vadd.f32 1e-05, %v3927_v30  ;;  %v4308_v60 = vmul.f32 %v4244_v49, %v9063_v44  ;;  %v3989_v51 = vld [vmem:[%s8048_s25 + $0x178] sm:$0xff] }
 0x5dd   : > { %v3865_v12 = vmul.f32 %v9146_v57, %v9146_v57  ;;  %v4365_v42 = vsub.f32 %v4045_v58, %v4301_v13  ;;  %v4751_v2 = vmul.f32 %v4494_v5, %v10072_v40  ;;  %v4752_v45 = vmul.f32 %v4494_v5, %v10073_v38  ;;  %v4054_v24 = vld [vmem:[%s8065_s28 + $0x178] sm:$0xff] }
 0x5de   : > { %v5640_v34 = vpop.eup %5639  ;;  %5647 = vrsqrt.f32 %v4115_v52  ;;  %v4372_v8 = vsub.f32 %v4052_v47, %v4308_v60  ;;  %v3803_v25 = vmul.f32 0.0051020407, %v8792_v6  ;;  %v3984_v6 = vld [vmem:[%s8048_s25 + $0x150] sm:$0xff]  ;;  %v9194_v60 = vmul.f32 0.0051020407, %v8606_v63 }
 0x5df   : > { %4608 = vperm.xlu0 %5549, %v4242_v27   ;;  %v5642_v10 = vpop.eup %5641  ;;  %v3982_v27 = vld [vmem:[%s8048_s25 + $0x140] sm:$0xff]  ;;  %5649 = vrsqrt.f32 %v4122_v11  ;;  %v3929_v44 = vsub.f32 %v3801_v16, %v3865_v12  ;;  %v4246_v0 = vmul.f32 %v5640_v34, %v3989_v51  ;;  %v9191_v16 = vmul.f32 0.0051020407, %v8850_v19 }
 0x5e0   : > { %4573 = vperm.xlu1 %5550, %v4235_v1   ;;  %v3922_v1 = vsub.f32 %v3794_v62, %v3858_v9  ;;  %v4239_v22 = vmul.f32 %v5642_v10, %v3982_v27  ;;  %v5644_v5 = vpop.eup %5643  ;;  %v3805_v62 = vmul.f32 0.0051020407, %v8864_v29  ;;  %v3986_v51 = vld [vmem:[%s8048_s25 + $0x160] sm:$0xff]  ;;  %v3798_v27 = vmul.f32 0.0051020407, %v8611_v7  ;;  %v4056_v9 = vld [vmem:[%s8065_s28 + $0x188] sm:$0xff]  ;;  %v4499_v29 = vpop.permute.xlu0 %4498 }
 0x5e1   : > { %v4124_v39 = vadd.f32 1e-05, %v3929_v44  ;;  %v4310_v61 = vmul.f32 %v4246_v0, %v9082_v59  ;;  %v5646_v30 = vpop.eup %5645  ;;  %v3860_v59 = vmul.f32 %v9173_v46, %v9173_v46  ;;  %v3869_v63 = vmul.f32 %v9191_v16, %v9191_v16  ;;  %v4049_v44 = vld [vmem:[%s8065_s28 + $0x150] sm:$0xff] }
 0x5e2   : > { %v4117_v53 = vadd.f32 1e-05, %v3922_v1  ;;  %v4303_v23 = vmul.f32 %v4239_v22, %v9085_v31  ;;  %v4241_v11 = vmul.f32 %v5646_v30, %v3984_v6  ;;  %v9212_v38 = vmul.f32 0.0051020407, %v8674_v55  ;;  %v10074_v6 = vld [vmem:[#allocation78_spill] sm:$0xff] }
 0x5e3   : > { %v9148_v26 = vpop.xlane.xlu1 %3290  ;;  %5056 = vperm.xlu0 %5549, %v4370_v4   ;;  %v3867_v4 = vmul.f32 %v9170_v41, %v9170_v41  ;;  %5651 = vrsqrt.f32 %v4124_v39  ;;  %v3924_v31 = vsub.f32 %v3796_v28, %v3860_v59  ;;  %v4051_v39 = vld [vmem:[%s8065_s28 + $0x160] sm:$0xff]  ;;  %v9234_v59 = vmul.f32 0.0051020407, %v10074_v6 }
 0x5e4   : > { %5021 = vperm.xlu1 %5550, %v4363_v33   ;;  %v4374_v33 = vsub.f32 %v4054_v24, %v4310_v61  ;;  %5653 = vrsqrt.f32 %v4117_v53  ;;  %v4305_v19 = vmul.f32 %v4241_v11, %v9107_v56  ;;  %v3995_v53 = vld [vmem:[%s8048_s25 + $0x1a8] sm:$0xff]  ;;  %v3988_v24 = vld [vmem:[%s8048_s25 + $0x170] sm:$0xff] }
 0x5e5   : > { %v3931_v15 = vsub.f32 %v3803_v25, %v3867_v4  ;;  %v4119_v12 = vadd.f32 1e-05, %v3924_v31 }
 0x5e6   : > { %v4369_v40 = vsub.f32 %v4049_v44, %v4305_v19  ;;  %v3866_v44 = vmul.f32 %v9234_v59, %v9234_v59 }
 0x5e7   : > { %v9162_v20 = vpop.xlane.xlu1 %3674  ;;  %4618 = vperm.xlu0 %5549, %v4244_v49   ;;  %v4047_v49 = vld [vmem:[%s8065_s28 + $0x140] sm:$0xff]  ;;  %v4126_v34 = vadd.f32 1e-05, %v3931_v15 }
 0x5e8   : > { %4583 = vperm.xlu1 %5550, %v4237_v35   ;;  %v3991_v35 = vld [vmem:[%s8048_s25 + $0x188] sm:$0xff]  ;;  %v4367_v13 = vsub.f32 %v4047_v49, %v4303_v23  ;;  %v3809_v15 = vmul.f32 0.0051020407, %v9162_v20 }
 0x5e9   : > { %v4248_v52 = vmul.f32 %v5644_v5, %v3991_v35  ;;  %5655 = vrsqrt.f32 %v4126_v34  ;;  %v4058_v5 = vld [vmem:[%s8065_s28 + $0x198] sm:$0xff] }
 0x5ea   : > { %5657 = vrsqrt.f32 %v4119_v12 }
 0x5eb   : > { %v4942_v3 = vpop.permute.xlu1 %4941  ;;  %5066 = vperm.xlu0 %5549, %v4372_v8   ;;  %v5648_v58 = vpop.eup %5647  ;;  %v4312_v47 = vmul.f32 %v4248_v52, %v9103_v18  ;;  %v3862_v8 = vmul.f32 %v9194_v60, %v9194_v60 }
 0x5ec   : > { %v5199_v48 = vadd.f32 %v4942_v3, %v4751_v2  ;;  %v5200_v14 = vadd.f32 %v4942_v3, %v4752_v45  ;;  %5031 = vperm.xlu1 %5550, %v4365_v42   ;;  %v5650_v10 = vpop.eup %5649  ;;  %v3993_v42 = vld [vmem:[%s8048_s25 + $0x198] sm:$0xff]  ;;  %v4243_v18 = vmul.f32 %v5648_v58, %v3986_v51  ;;  %v9209_v2 = vmul.f32 0.0051020407, %v8983_v17 }
 0x5ed   : > { %v4376_v1 = vsub.f32 %v4056_v9, %v4312_v47  ;;  %v4250_v7 = vmul.f32 %v5650_v10, %v3993_v42  ;;  %v3926_v56 = vsub.f32 %v3798_v27, %v3862_v8  ;;  %v3800_v17 = vmul.f32 0.0051020407, %v8679_v32  ;;  %v4060_v10 = vld [vmem:[%s8065_s28 + $0x1a8] sm:$0xff]  ;;  %v3997_v27 = vld [vmem:[%s8048_s25 + $0x1b8] sm:$0xff] }
 0x5ee   : > { %5327 = vst [vmem:[%s8304_s11 + $0x140] sm:$0xff] %v5199_v48  ;;  %5328 = vst.msk [vmem:[%s8304_s11 + $0x148] sm:$0xff] %vm3043_vm0, %v5200_v14  ;;  %v3807_v48 = vmul.f32 0.0051020407, %v8992_v54  ;;  %v3871_v28 = vmul.f32 %v9209_v2, %v9209_v2  ;;  %v9229_v32 = vmul.f32 0.0051020407, %v9148_v26 }
 0x5ef   : > { %4628 = vperm.xlu0 %5549, %v4246_v0   ;;  %v3933_v0 = vsub.f32 %v3805_v62, %v3869_v63  ;;  %v4314_v14 = vmul.f32 %v4250_v7, %v9131_v21  ;;  %v4121_v61 = vadd.f32 1e-05, %v3926_v56  ;;  %v10077_v62 = vld [vmem:[#allocation77_spill] sm:$0xff]  ;;  %v4053_v63 = vld [vmem:[%s8065_s28 + $0x170] sm:$0xff]  ;;  %v10078_v56 = vld [vmem:[#allocation80_spill] sm:$0xff] }
 0x5f0   : > { %4593 = vperm.xlu1 %5550, %v4239_v22   ;;  %v4307_v22 = vmul.f32 %v4243_v18, %v9128_v36  ;;  %v5652_v25 = vpop.eup %5651  ;;  %v3864_v36 = vmul.f32 %v9212_v38, %v9212_v38  ;;  %v3935_v21 = vsub.f32 %v3807_v48, %v3871_v28  ;;  %v3802_v47 = vmul.f32 0.0051020407, %v10077_v62  ;;  %v4062_v28 = vld [vmem:[%s8065_s28 + $0x1b8] sm:$0xff] }
 0x5f1   : > { %v4128_v3 = vadd.f32 1e-05, %v3933_v0  ;;  %v5654_v55 = vpop.eup %5653  ;;  %v4378_v23 = vsub.f32 %v4058_v5, %v4314_v14  ;;  %v4252_v35 = vmul.f32 %v5652_v25, %v3995_v53  ;;  %v3873_v51 = vmul.f32 %v9229_v32, %v9229_v32  ;;  %v10080_v14 = vld [vmem:[#allocation12_spill] sm:$0xff]  ;;  %v10081_v5 = vld [vmem:[#allocation101_spill] sm:$0xff] }
 0x5f2   : > { %v4371_v54 = vsub.f32 %v4051_v39, %v4307_v22  ;;  %v3928_v30 = vsub.f32 %v3800_v17, %v3864_v36  ;;  %v4245_v49 = vmul.f32 %v5654_v55, %v3988_v24  ;;  %v3804_v53 = vmul.f32 0.0051020407, %v10081_v5  ;;  %v3999_v36 = vld [vmem:[%s8048_s25 + $0x1c8] sm:$0xff]  ;;  %v4066_v5 = vld [vmem:[%s8065_s28 + $0x1d8] sm:$0xff] }
 0x5f3   : > { %5076 = vperm.xlu0 %5549, %v4374_v33   ;;  %5659 = vrsqrt.f32 %v4128_v3  ;;  %v4130_v33 = vadd.f32 1e-05, %v3935_v21  ;;  %v3937_v8 = vsub.f32 %v3809_v15, %v3873_v51  ;;  %v10079_v3 = vld [vmem:[#allocation11_spill] sm:$0xff] }
 0x5f4   : > { %5041 = vperm.xlu1 %5550, %v4367_v13   ;;  %5661 = vrsqrt.f32 %v4121_v61  ;;  %v10076_v13 = vld [vmem:[#allocation8_spill] sm:$0xff]  ;;  %v4123_v34 = vadd.f32 1e-05, %v3928_v30  ;;  %v4309_v12 = vmul.f32 %v4245_v49, %v9151_v37  ;;  %v3930_v37 = vsub.f32 %v3802_v47, %v3866_v44  ;;  %v3992_v30 = vld [vmem:[%s8048_s25 + $0x190] sm:$0xff] }
 0x5f5   : > { %v4754_v26 = vmul.f32 %v4499_v29, %v10076_v13  ;;  %5663 = vrsqrt.f32 %v4130_v33  ;;  %v4132_v22 = vadd.f32 1e-05, %v3937_v8  ;;  %v4057_v44 = vld [vmem:[%s8065_s28 + $0x190] sm:$0xff]  ;;  %v3994_v8 = vld [vmem:[%s8048_s25 + $0x1a0] sm:$0xff] }
 0x5f6   : > { %v5656_v58 = vpop.eup %5655  ;;  %5665 = vrsqrt.f32 %v4123_v34  ;;  %v4125_v17 = vadd.f32 1e-05, %v3930_v37 }
 0x5f7   : > { %4638 = vperm.xlu0 %5549, %v4248_v52   ;;  %v10075_v52 = vld [vmem:[#allocation7_spill] sm:$0xff]  ;;  %v5658_v9 = vpop.eup %5657  ;;  %5667 = vrsqrt.f32 %v4132_v22 }
 0x5f8   : > { %4603 = vperm.xlu1 %5550, %v4241_v11   ;;  %v4753_v31 = vmul.f32 %v4499_v29, %v10075_v52  ;;  %v4316_v11 = vmul.f32 %v4252_v35, %v9146_v57  ;;  %v3990_v57 = vld [vmem:[%s8048_s25 + $0x180] sm:$0xff]  ;;  %5669 = vrsqrt.f32 %v4125_v17  ;;  %v10086_v22 = vld [vmem:[#allocation19_spill] sm:$0xff] }
 0x5fa   : > { %v9214_v45 = vpop.xlane.xlu0 %3294  ;;  %v4380_v29 = vsub.f32 %v4060_v10, %v4316_v11 }
 0x5fb   : > { %5086 = vperm.xlu0 %5549, %v4376_v1   ;;  %v4373_v1 = vsub.f32 %v4053_v63, %v4309_v12 }
 0x5fc   : > { %5051 = vperm.xlu1 %5550, %v4369_v40   ;;  %v9254_v40 = vmul.f32 0.0051020407, %v10078_v56 }
 0x5fe   : > { %v9231_v4 = vpop.xlane.xlu0 %3678 }
 0x5ff   : > { %4648 = vperm.xlu0 %5549, %v4250_v7   ;;  %v4247_v7 = vmul.f32 %v5658_v9, %v3990_v57 }
 0x600   : > { %4613 = vperm.xlu1 %5550, %v4243_v18   ;;  %v4254_v18 = vmul.f32 %v5656_v58, %v3997_v27  ;;  %v5660_v61 = vpop.eup %5659  ;;  %v10084_v58 = vld [vmem:[#allocation16_spill] sm:$0xff]  ;;  %v4064_v27 = vld [vmem:[%s8065_s28 + $0x1c8] sm:$0xff] }
 0x601   : > { %v4311_v24 = vmul.f32 %v4247_v7, %v9173_v46  ;;  %v4256_v6 = vmul.f32 %v5660_v61, %v3999_v36  ;;  %v4059_v36 = vld [vmem:[%s8065_s28 + $0x1a0] sm:$0xff] }
 0x602   : > { %v4318_v25 = vmul.f32 %v4254_v18, %v9170_v41  ;;  %v3868_v41 = vmul.f32 %v9254_v40, %v9254_v40 }
 0x603   : > { %5096 = vperm.xlu0 %5549, %v4378_v23   ;;  %v4320_v62 = vmul.f32 %v4256_v6, %v9191_v16 }
 0x604   : > { %5061 = vperm.xlu1 %5550, %v4371_v54   ;;  %v5662_v54 = vpop.eup %5661  ;;  %v3932_v46 = vsub.f32 %v3804_v53, %v3868_v41 }
 0x605   : > { %v4249_v52 = vmul.f32 %v5662_v54, %v3992_v30  ;;  %v5664_v47 = vpop.eup %5663  ;;  %v3996_v54 = vld [vmem:[%s8048_s25 + $0x1b0] sm:$0xff] }
 0x606   : > { %v4947_v20 = vpop.permute.xlu0 %4946  ;;  %v4127_v51 = vadd.f32 1e-05, %v3932_v46 }
 0x607   : > { %v5201_v19 = vadd.f32 %v4947_v20, %v4753_v31  ;;  %v5202_v42 = vadd.f32 %v4947_v20, %v4754_v26  ;;  %4658 = vperm.xlu0 %5549, %v4252_v35   ;;  %v4055_v35 = vld [vmem:[%s8065_s28 + $0x180] sm:$0xff]  ;;  %v10082_v31 = vld [vmem:[#allocation82_spill] sm:$0xff]  ;;  %v10083_v26 = vld [vmem:[#allocation15_spill] sm:$0xff]  ;;  %v4313_v9 = vmul.f32 %v4249_v52, %v9194_v60 }
 0x608   : > { %4623 = vperm.xlu1 %5550, %v4245_v49   ;;  %v4382_v49 = vsub.f32 %v4062_v28, %v4318_v25  ;;  %v4375_v33 = vsub.f32 %v4055_v35, %v4311_v24  ;;  %v9271_v13 = vmul.f32 0.0051020407, %v10082_v31  ;;  %v10085_v20 = vld [vmem:[#allocation81_spill] sm:$0xff]  ;;  %5671 = vrsqrt.f32 %v4127_v51  ;;  %v4003_v25 = vld [vmem:[%s8048_s25 + $0x1e8] sm:$0xff]  ;;  %v10089_v31 = vld [vmem:[#allocation24_spill] sm:$0xff] }
 0x609   : > { %5329 = vst [vmem:[%s8304_s11 + $0x150] sm:$0xff] %v5201_v19  ;;  %5330 = vst.msk [vmem:[%s8304_s11 + $0x158] sm:$0xff] %vm3043_vm0, %v5202_v42  ;;  %v3806_v10 = vmul.f32 0.0051020407, %v10085_v20  ;;  %v4001_v19 = vld [vmem:[%s8048_s25 + $0x1d8] sm:$0xff]  ;;  %v5666_v42 = vpop.eup %5665  ;;  %v10091_v20 = vld [vmem:[#allocation9_spill] sm:$0xff] }
 0x60a   : > { %v4509_v0 = vpop.permute.xlu0 %4508  ;;  %v3870_v16 = vmul.f32 %v9271_v13, %v9271_v13  ;;  %v5668_v56 = vpop.eup %5667 }
 0x60b   : > { %5106 = vperm.xlu0 %5549, %v4380_v29   ;;  %v4757_v48 = vmul.f32 %v4509_v0, %v10079_v3  ;;  %v4758_v39 = vmul.f32 %v4509_v0, %v10080_v14  ;;  %v4384_v29 = vsub.f32 %v4064_v27, %v4320_v62  ;;  %v4377_v0 = vsub.f32 %v4057_v44, %v4313_v9 }
 0x60c   : > { %5071 = vperm.xlu1 %5550, %v4373_v1   ;;  %v3934_v60 = vsub.f32 %v3806_v10, %v3870_v16  ;;  %v4251_v1 = vmul.f32 %v5666_v42, %v3994_v8  ;;  %v3810_v62 = vmul.f32 0.0051020407, %v9231_v4  ;;  %v3998_v42 = vld [vmem:[%s8048_s25 + $0x1c0] sm:$0xff] }
 0x60e   : > { %v4957_v55 = vpop.permute.xlu0 %4956  ;;  %v4129_v61 = vadd.f32 1e-05, %v3934_v60  ;;  %v4315_v53 = vmul.f32 %v4251_v1, %v9212_v38 }
 0x60f   : > { %v5205_v21 = vadd.f32 %v4957_v55, %v4757_v48  ;;  %v5206_v23 = vadd.f32 %v4957_v55, %v4758_v39  ;;  %4668 = vperm.xlu0 %5549, %v4254_v18   ;;  %v4258_v18 = vmul.f32 %v5664_v47, %v4001_v19  ;;  %v10087_v48 = vld [vmem:[#allocation20_spill] sm:$0xff]  ;;  %v5670_v55 = vpop.eup %5669  ;;  %v4068_v47 = vld [vmem:[%s8065_s28 + $0x1e8] sm:$0xff]  ;;  %v4061_v19 = vld [vmem:[%s8065_s28 + $0x1b0] sm:$0xff] }
 0x610   : > { %4633 = vperm.xlu1 %5550, %v4247_v7   ;;  %v4504_v7 = vpop.permute.xlu1 %4503  ;;  %5673 = vrsqrt.f32 %v4129_v61  ;;  %v4379_v41 = vsub.f32 %v4059_v36, %v4315_v53  ;;  %v4253_v38 = vmul.f32 %v5670_v55, %v3996_v54  ;;  %v10095_v61 = vld [vmem:[#allocation13_spill] sm:$0xff] }
 0x611   : > { %5333 = vst [vmem:[%s8304_s11 + $0x170] sm:$0xff] %v5205_v21  ;;  %5334 = vst.msk [vmem:[%s8304_s11 + $0x178] sm:$0xff] %vm3043_vm0, %v5206_v23  ;;  %v4322_v39 = vmul.f32 %v4258_v18, %v9209_v2  ;;  %v4260_v23 = vmul.f32 %v5668_v56, %v4003_v25  ;;  %v4756_v10 = vmul.f32 %v4504_v7, %v10091_v20  ;;  %v4063_v55 = vld [vmem:[%s8065_s28 + $0x1c0] sm:$0xff] }
 0x612   : > { %v4519_v15 = vpop.permute.xlu0 %4518 }
 0x613   : > { %5116 = vperm.xlu0 %5549, %v4382_v49   ;;  %v4761_v11 = vmul.f32 %v4519_v15, %v10083_v26  ;;  %v4762_v34 = vmul.f32 %v4519_v15, %v10084_v58  ;;  %v4386_v35 = vsub.f32 %v4066_v5, %v4322_v39  ;;  %v9301_v49 = vmul.f32 0.0051020407, %v9214_v45  ;;  %v10090_v58 = vld [vmem:[#allocation10_spill] sm:$0xff] }
 0x614   : > { %5081 = vperm.xlu1 %5550, %v4375_v33   ;;  %v4324_v46 = vmul.f32 %v4260_v23, %v9229_v32  ;;  %v10088_v33 = vld [vmem:[#allocation23_spill] sm:$0xff]  ;;  %v4317_v32 = vmul.f32 %v4253_v38, %v9234_v59  ;;  %v10094_v39 = vld [vmem:[#allocation14_spill] sm:$0xff] }
 0x615   : > { %v5672_v51 = vpop.eup %5671  ;;  %v3874_v4 = vmul.f32 %v9301_v49, %v9301_v49 }
 0x616   : > { %v4967_v12 = vpop.permute.xlu0 %4966  ;;  %v4388_v8 = vsub.f32 %v4068_v47, %v4324_v46  ;;  %v4255_v60 = vmul.f32 %v5672_v51, %v3998_v42 }
 0x617   : > { %v5209_v63 = vadd.f32 %v4967_v12, %v4761_v11  ;;  %v5210_v57 = vadd.f32 %v4967_v12, %v4762_v34  ;;  %4678 = vperm.xlu0 %5549, %v4256_v6   ;;  %v4755_v34 = vmul.f32 %v4504_v7, %v10090_v58  ;;  %v3938_v16 = vsub.f32 %v3810_v62, %v3874_v4  ;;  %v10093_v7 = vld [vmem:[#allocation28_spill] sm:$0xff]  ;;  %v4065_v62 = vld [vmem:[%s8065_s28 + $0x1d0] sm:$0xff] }
 0x618   : > { %4643 = vperm.xlu1 %5550, %v4249_v52   ;;  %v10101_v4 = vld [vmem:[#allocation36_spill] sm:$0xff] }
 0x619   : > { %5337 = vst [vmem:[%s8304_s11 + $0x190] sm:$0xff] %v5209_v63  ;;  %5338 = vst.msk [vmem:[%s8304_s11 + $0x198] sm:$0xff] %vm3043_vm0, %v5210_v57 }
 0x61a   : > { %v4529_v37 = vpop.permute.xlu0 %4528 }
 0x61b   : > { %5126 = vperm.xlu0 %5549, %v4384_v29   ;;  %v4765_v3 = vmul.f32 %v4529_v37, %v10086_v22  ;;  %v4766_v14 = vmul.f32 %v4529_v37, %v10087_v48  ;;  %v4133_v22 = vadd.f32 1e-05, %v3938_v16  ;;  %v4319_v48 = vmul.f32 %v4255_v60, %v9254_v40 }
 0x61c   : > { %5091 = vperm.xlu1 %5550, %v4377_v0   ;;  %v10092_v0 = vld [vmem:[#allocation27_spill] sm:$0xff] }
 0x61e   : > { %v4977_v17 = vpop.permute.xlu0 %4976 }
 0x61f   : > { %v5213_v28 = vadd.f32 %v4977_v17, %v4765_v3  ;;  %v5214_v24 = vadd.f32 %v4977_v17, %v4766_v14  ;;  %4688 = vperm.xlu0 %5549, %v4258_v18   ;;  %v4381_v18 = vsub.f32 %v4061_v19, %v4317_v32  ;;  %v5674_v14 = vpop.eup %5673  ;;  %v10100_v19 = vld [vmem:[#allocation35_spill] sm:$0xff] }
 0x620   : > { %4653 = vperm.xlu1 %5550, %v4251_v1   ;;  %v3299_v21 = vpop.xlane.xlu1 %3298 }
 0x621   : > { %5341 = vst [vmem:[%s8304_s11 + $0x1b0] sm:$0xff] %v5213_v28  ;;  %5342 = vst.msk [vmem:[%s8304_s11 + $0x1b8] sm:$0xff] %vm3043_vm0, %v5214_v24  ;;  %v9298_v2 = vmul.f32 0.0051020407, %v3299_v21  ;;  %v4000_v28 = vld [vmem:[%s8048_s25 + $0x1d0] sm:$0xff]  ;;  %v4383_v21 = vsub.f32 %v4063_v55, %v4319_v48 }
 0x622   : > { %v4539_v30 = vpop.permute.xlu0 %4538 }
 0x623   : > { %5136 = vperm.xlu0 %5549, %v4386_v35   ;;  %v3875_v15 = vmul.f32 %v9298_v2, %v9298_v2  ;;  %v4769_v52 = vmul.f32 %v4539_v30, %v10088_v33  ;;  %v4770_v26 = vmul.f32 %v4539_v30, %v10089_v31  ;;  %v10096_v30 = vld [vmem:[#allocation31_spill] sm:$0xff] }
 0x624   : > { %5101 = vperm.xlu1 %5550, %v4379_v41   ;;  %v3683_v6 = vpop.xlane.xlu1 %3682 }
 0x625   : > { %v3811_v11 = vmul.f32 0.0051020407, %v3683_v6 }
 0x626   : > { %v4987_v45 = vpop.permute.xlu0 %4986 }
 0x627   : > { %v3939_v12 = vsub.f32 %v3811_v11, %v3875_v15  ;;  %v5217_v27 = vadd.f32 %v4987_v45, %v4769_v52  ;;  %v5218_v9 = vadd.f32 %v4987_v45, %v4770_v26  ;;  %4698 = vperm.xlu0 %5549, %v4260_v23   ;;  %v4257_v23 = vmul.f32 %v5674_v14, %v4000_v28  ;;  %v4005_v15 = vld [vmem:[%s8048_s25 + $0x1f8] sm:$0xff]  ;;  %v10098_v52 = vld [vmem:[#allocation18_spill] sm:$0xff]  ;;  %v10099_v26 = vld [vmem:[#allocation17_spill] sm:$0xff] }
 0x628   : > { %4663 = vperm.xlu1 %5550, %v4253_v38   ;;  %v4952_v63 = vpop.permute.xlu1 %4951  ;;  %v10097_v38 = vld [vmem:[#allocation32_spill] sm:$0xff] }
 0x629   : > { %v4134_v57 = vadd.f32 1e-05, %v3939_v12  ;;  %5345 = vst [vmem:[%s8304_s11 + $0x1d0] sm:$0xff] %v5217_v27  ;;  %5346 = vst.msk [vmem:[%s8304_s11 + $0x1d8] sm:$0xff] %vm3043_vm0, %v5218_v9  ;;  %v5203_v59 = vadd.f32 %v4952_v63, %v4755_v34  ;;  %v5204_v44 = vadd.f32 %v4952_v63, %v4756_v10  ;;  %v4321_v33 = vmul.f32 %v4257_v23, %v9271_v13  ;;  %v4070_v12 = vld [vmem:[%s8065_s28 + $0x1f8] sm:$0xff] }
 0x62a   : > { %v4549_v29 = vpop.permute.xlu0 %4548 }
 0x62b   : > { %5675 = vrsqrt.f32 %v4134_v57  ;;  %5331 = vst [vmem:[%s8304_s11 + $0x160] sm:$0xff] %v5203_v59  ;;  %5332 = vst.msk [vmem:[%s8304_s11 + $0x168] sm:$0xff] %vm3043_vm0, %v5204_v44  ;;  %5146 = vperm.xlu0 %5549, %v4388_v8   ;;  %v4773_v1 = vmul.f32 %v4549_v29, %v10092_v0  ;;  %v4774_v56 = vmul.f32 %v4549_v29, %v10093_v7  ;;  %v10102_v8 = vld [vmem:[#allocation22_spill] sm:$0xff]  ;;  %v10103_v29 = vld [vmem:[#allocation21_spill] sm:$0xff] }
 0x62c   : > { %5111 = vperm.xlu1 %5550, %v4381_v18   ;;  %v4514_v37 = vpop.permute.xlu1 %4513  ;;  %5677 = vrsqrt.f32 %v4133_v22  ;;  %v4385_v10 = vsub.f32 %v4065_v62, %v4321_v33  ;;  %v4004_v0 = vld [vmem:[%s8048_s25 + $0x1f0] sm:$0xff]  ;;  %v10110_v33 = vld [vmem:[#allocation30_spill] sm:$0xff] }
 0x62d   : > { %v4759_v25 = vmul.f32 %v4514_v37, %v10094_v39  ;;  %v4760_v17 = vmul.f32 %v4514_v37, %v10095_v61  ;;  %v10104_v39 = vld [vmem:[#allocation39_spill] sm:$0xff] }
 0x62e   : > { %v4997_v3 = vpop.permute.xlu0 %4996 }
 0x62f   : > { %v5221_v5 = vadd.f32 %v4997_v3, %v4773_v1  ;;  %v5222_v53 = vadd.f32 %v4997_v3, %v4774_v56 }
 0x630   : > { %4673 = vperm.xlu1 %5550, %v4255_v60   ;;  %v4962_v24 = vpop.permute.xlu1 %4961 }
 0x631   : > { %5349 = vst [vmem:[%s8304_s11 + $0x1f0] sm:$0xff] %v5221_v5  ;;  %5350 = vst.msk [vmem:[%s8304_s11 + $0x1f8] sm:$0xff] %vm3043_vm0, %v5222_v53  ;;  %v5207_v36 = vadd.f32 %v4962_v24, %v4759_v25  ;;  %v5208_v54 = vadd.f32 %v4962_v24, %v4760_v17  ;;  %v10105_v25 = vld [vmem:[#allocation40_spill] sm:$0xff]  ;;  %v10106_v53 = vld [vmem:[#allocation26_spill] sm:$0xff] }
 0x632   : > { %v4559_v40 = vpop.permute.xlu0 %4558 }
 0x633   : > { %5335 = vst [vmem:[%s8304_s11 + $0x180] sm:$0xff] %v5207_v36  ;;  %5336 = vst.msk [vmem:[%s8304_s11 + $0x188] sm:$0xff] %vm3043_vm0, %v5208_v54  ;;  %v4777_v41 = vmul.f32 %v4559_v40, %v10096_v30  ;;  %v4778_v6 = vmul.f32 %v4559_v40, %v10097_v38  ;;  %v4069_v54 = vld [vmem:[%s8065_s28 + $0x1f0] sm:$0xff] }
 0x634   : > { %5121 = vperm.xlu1 %5550, %v4383_v21   ;;  %v4524_v35 = vpop.permute.xlu1 %4523 }
 0x635   : > { %v4763_v31 = vmul.f32 %v4524_v35, %v10098_v52  ;;  %v4764_v11 = vmul.f32 %v4524_v35, %v10099_v26 }
 0x636   : > { %v5007_v46 = vpop.permute.xlu0 %5006 }
 0x637   : > { %v5225_v58 = vadd.f32 %v5007_v46, %v4777_v41  ;;  %v5226_v34 = vadd.f32 %v5007_v46, %v4778_v6  ;;  %v10108_v41 = vld [vmem:[#allocation43_spill] sm:$0xff]  ;;  %v10109_v6 = vld [vmem:[#allocation44_spill] sm:$0xff] }
 0x638   : > { %v5676_v45 = vpop.eup %5675  ;;  %4683 = vperm.xlu1 %5550, %v4257_v23   ;;  %v4972_v47 = vpop.permute.xlu1 %4971 }
 0x639   : > { %5353 = vst [vmem:[%s8304_s11 + $0x210] sm:$0xff] %v5225_v58  ;;  %5354 = vst.msk [vmem:[%s8304_s11 + $0x218] sm:$0xff] %vm3043_vm0, %v5226_v34  ;;  %v5211_v32 = vadd.f32 %v4972_v47, %v4763_v31  ;;  %v5212_v51 = vadd.f32 %v4972_v47, %v4764_v11  ;;  %v4262_v20 = vmul.f32 %v5676_v45, %v4005_v15  ;;  %v5678_v44 = vpop.eup %5677  ;;  %v10111_v31 = vld [vmem:[#allocation29_spill] sm:$0xff] }
 0x63a   : > { %v4569_v13 = vpop.permute.xlu0 %4568  ;;  %v4261_v48 = vmul.f32 %v5678_v44, %v4004_v0  ;;  %v10118_v0 = vld [vmem:[#allocation38_spill] sm:$0xff] }
 0x63b   : > { %5339 = vst [vmem:[%s8304_s11 + $0x1a0] sm:$0xff] %v5211_v32  ;;  %5340 = vst.msk [vmem:[%s8304_s11 + $0x1a8] sm:$0xff] %vm3043_vm0, %v5212_v51  ;;  %4708 = vperm.xlu0 %5549, %v4262_v20   ;;  %v4326_v27 = vmul.f32 %v4262_v20, %v9298_v2  ;;  %v4781_v42 = vmul.f32 %v4569_v13, %v10100_v19  ;;  %v4782_v63 = vmul.f32 %v4569_v13, %v10101_v4  ;;  %v4067_v2 = vld [vmem:[%s8065_s28 + $0x1e0] sm:$0xff]  ;;  %v10112_v51 = vld [vmem:[#allocation47_spill] sm:$0xff] }
 0x63c   : > { %5131 = vperm.xlu1 %5550, %v4385_v10   ;;  %v4534_v9 = vpop.permute.xlu1 %4533  ;;  %v4387_v3 = vsub.f32 %v4067_v2, %v9125_v50  ;;  %v4325_v5 = vmul.f32 %v4261_v48, %v9301_v49  ;;  %v10107_v50 = vld [vmem:[#allocation25_spill] sm:$0xff]  ;;  %v10113_v13 = vld [vmem:[#allocation48_spill] sm:$0xff] }
 0x63d   : > { %v4390_v57 = vsub.f32 %v4070_v12, %v4326_v27  ;;  %v4767_v16 = vmul.f32 %v4534_v9, %v10102_v8  ;;  %v4768_v18 = vmul.f32 %v4534_v9, %v10103_v29  ;;  %v10114_v27 = vld [vmem:[#allocation34_spill] sm:$0xff]  ;;  %v10115_v19 = vld [vmem:[#allocation33_spill] sm:$0xff] }
 0x63e   : > { %v5017_v59 = vpop.permute.xlu0 %5016  ;;  %v4389_v30 = vsub.f32 %v4069_v54, %v4325_v5  ;;  %v10116_v29 = vld [vmem:[#allocation125_spill] sm:$0xff]  ;;  %v10121_v5 = vld [vmem:[#allocation154_spill] sm:$0xff] }
 0x63f   : > { %v5229_v60 = vadd.f32 %v5017_v59, %v4781_v42  ;;  %v5230_v37 = vadd.f32 %v5017_v59, %v4782_v63  ;;  %5156 = vperm.xlu0 %5549, %v4390_v57  }
 0x640   : > { %4693 = vperm.xlu1 %5550, %v9116_v43   ;;  %v4982_v1 = vpop.permute.xlu1 %4981 }
 0x641   : > { %5357 = vst [vmem:[%s8304_s11 + $0x230] sm:$0xff] %v5229_v60  ;;  %5358 = vst.msk [vmem:[%s8304_s11 + $0x238] sm:$0xff] %vm3043_vm0, %v5230_v37  ;;  %v5215_v7 = vadd.f32 %v4982_v1, %v4767_v16  ;;  %v5216_v56 = vadd.f32 %v4982_v1, %v4768_v18  ;;  %v10117_v60 = vld [vmem:[#allocation52_spill] sm:$0xff] }
 0x642   : > { %v4579_v22 = vpop.permute.xlu0 %4578 }
 0x643   : > { %5343 = vst [vmem:[%s8304_s11 + $0x1c0] sm:$0xff] %v5215_v7  ;;  %5344 = vst.msk [vmem:[%s8304_s11 + $0x1c8] sm:$0xff] %vm3043_vm0, %v5216_v56  ;;  %v4785_v43 = vmul.f32 %v4579_v22, %v10104_v39  ;;  %v4786_v61 = vmul.f32 %v4579_v22, %v10105_v25  ;;  %v10119_v7 = vld [vmem:[#allocation37_spill] sm:$0xff] }
 0x644   : > { %5141 = vperm.xlu1 %5550, %v4387_v3   ;;  %v4544_v14 = vpop.permute.xlu1 %4543 }
 0x645   : > { %v4771_v55 = vmul.f32 %v4544_v14, %v10106_v53  ;;  %v4772_v28 = vmul.f32 %v4544_v14, %v10107_v50  ;;  %v10122_v50 = vld [vmem:[#allocation42_spill] sm:$0xff] }
 0x646   : > { %v5027_v17 = vpop.permute.xlu0 %5026 }
 0x647   : > { %v5233_v24 = vadd.f32 %v5027_v17, %v4785_v43  ;;  %v5234_v36 = vadd.f32 %v5027_v17, %v4786_v61  ;;  %v10120_v61 = vld [vmem:[#allocation157_spill] sm:$0xff] }
 0x648   : > { %4703 = vperm.xlu1 %5550, %v4261_v48   ;;  %v4992_v40 = vpop.permute.xlu1 %4991 }
 0x649   : > { %5361 = vst [vmem:[%s8304_s11 + $0x250] sm:$0xff] %v5233_v24  ;;  %5362 = vst.msk [vmem:[%s8304_s11 + $0x258] sm:$0xff] %vm3043_vm0, %v5234_v36  ;;  %v5219_v21 = vadd.f32 %v4992_v40, %v4771_v55  ;;  %v5220_v23 = vadd.f32 %v4992_v40, %v4772_v28  ;;  %v10123_v24 = vld [vmem:[#allocation41_spill] sm:$0xff] }
 0x64a   : > { %v4589_v35 = vpop.permute.xlu0 %4588 }
 0x64b   : > { %5347 = vst [vmem:[%s8304_s11 + $0x1e0] sm:$0xff] %v5219_v21  ;;  %5348 = vst.msk [vmem:[%s8304_s11 + $0x1e8] sm:$0xff] %vm3043_vm0, %v5220_v23  ;;  %v4789_v38 = vmul.f32 %v4589_v35, %v10108_v41  ;;  %v4790_v46 = vmul.f32 %v4589_v35, %v10109_v6  ;;  %v10124_v41 = vld [vmem:[#allocation57_spill] sm:$0xff]  ;;  %v10125_v6 = vld [vmem:[#allocation58_spill] sm:$0xff] }
 0x64c   : > { %5151 = vperm.xlu1 %5550, %v4389_v30   ;;  %v4554_v49 = vpop.permute.xlu1 %4553 }
 0x64d   : > { %v4775_v52 = vmul.f32 %v4554_v49, %v10110_v33  ;;  %v4776_v26 = vmul.f32 %v4554_v49, %v10111_v31  ;;  %v10126_v33 = vld [vmem:[#allocation46_spill] sm:$0xff]  ;;  %v10127_v31 = vld [vmem:[#allocation45_spill] sm:$0xff] }
 0x64e   : > { %v5037_v15 = vpop.permute.xlu0 %5036 }
 0x64f   : > { %v5237_v11 = vadd.f32 %v5037_v15, %v4789_v38  ;;  %v5238_v58 = vadd.f32 %v5037_v15, %v4790_v46 }
 0x650   : > { %v5002_v34 = vpop.permute.xlu1 %5001 }
 0x651   : > { %5365 = vst [vmem:[%s8304_s11 + $0x270] sm:$0xff] %v5237_v11  ;;  %5366 = vst.msk [vmem:[%s8304_s11 + $0x278] sm:$0xff] %vm3043_vm0, %v5238_v58  ;;  %v5223_v62 = vadd.f32 %v5002_v34, %v4775_v52  ;;  %v5224_v45 = vadd.f32 %v5002_v34, %v4776_v26 }
 0x652   : > { %v4599_v47 = vpop.permute.xlu0 %4598 }
 0x653   : > { %5351 = vst [vmem:[%s8304_s11 + $0x200] sm:$0xff] %v5223_v62  ;;  %5352 = vst.msk [vmem:[%s8304_s11 + $0x208] sm:$0xff] %vm3043_vm0, %v5224_v45  ;;  %v4793_v20 = vmul.f32 %v4599_v47, %v10112_v51  ;;  %v4794_v10 = vmul.f32 %v4599_v47, %v10113_v13  ;;  %v10128_v51 = vld [vmem:[#allocation96_spill] sm:$0xff]  ;;  %v10129_v13 = vld [vmem:[#allocation62_spill] sm:$0xff] }
 0x654   : > { %v4564_v32 = vpop.permute.xlu1 %4563 }
 0x655   : > { %v4779_v9 = vmul.f32 %v4564_v32, %v10114_v27  ;;  %v4780_v42 = vmul.f32 %v4564_v32, %v10115_v19  ;;  %v10130_v27 = vld [vmem:[#allocation121_spill] sm:$0xff]  ;;  %v10131_v19 = vld [vmem:[#allocation119_spill] sm:$0xff] }
 0x656   : > { %v5047_v12 = vpop.permute.xlu0 %5046 }
 0x657   : > { %v5241_v4 = vadd.f32 %v5047_v12, %v4793_v20  ;;  %v5242_v63 = vadd.f32 %v5047_v12, %v4794_v10 }
 0x658   : > { %v5012_v57 = vpop.permute.xlu1 %5011 }
 0x659   : > { %5369 = vst [vmem:[%s8304_s11 + $0x290] sm:$0xff] %v5241_v4  ;;  %5370 = vst.msk [vmem:[%s8304_s11 + $0x298] sm:$0xff] %vm3043_vm0, %v5242_v63  ;;  %v5227_v59 = vadd.f32 %v5012_v57, %v4779_v9  ;;  %v5228_v44 = vadd.f32 %v5012_v57, %v4780_v42 }
 0x65a   : > { %v4609_v8 = vpop.permute.xlu0 %4608 }
 0x65b   : > { %5355 = vst [vmem:[%s8304_s11 + $0x220] sm:$0xff] %v5227_v59  ;;  %5356 = vst.msk [vmem:[%s8304_s11 + $0x228] sm:$0xff] %vm3043_vm0, %v5228_v44  ;;  %v4797_v18 = vmul.f32 %v4609_v8, %v10116_v29  ;;  %v4798_v37 = vmul.f32 %v4609_v8, %v10117_v60  ;;  %v10132_v29 = vld [vmem:[#allocation63_spill] sm:$0xff]  ;;  %v10133_v60 = vld [vmem:[#allocation64_spill] sm:$0xff] }
 0x65c   : > { %v4574_v16 = vpop.permute.xlu1 %4573 }
 0x65d   : > { %v4783_v1 = vmul.f32 %v4574_v16, %v10118_v0  ;;  %v4784_v56 = vmul.f32 %v4574_v16, %v10119_v7  ;;  %v10134_v0 = vld [vmem:[#allocation146_spill] sm:$0xff]  ;;  %v10135_v7 = vld [vmem:[#allocation143_spill] sm:$0xff] }
 0x65e   : > { %v5057_v2 = vpop.permute.xlu0 %5056 }
 0x65f   : > { %v5245_v22 = vadd.f32 %v5057_v2, %v4797_v18  ;;  %v5246_v3 = vadd.f32 %v5057_v2, %v4798_v37 }
 0x660   : > { %v5022_v48 = vpop.permute.xlu1 %5021 }
 0x661   : > { %5373 = vst [vmem:[%s8304_s11 + $0x2b0] sm:$0xff] %v5245_v22  ;;  %5374 = vst.msk [vmem:[%s8304_s11 + $0x2b8] sm:$0xff] %vm3043_vm0, %v5246_v3  ;;  %v5231_v14 = vadd.f32 %v5022_v48, %v4783_v1  ;;  %v5232_v39 = vadd.f32 %v5022_v48, %v4784_v56 }
 0x662   : > { %v4619_v43 = vpop.permute.xlu0 %4618 }
 0x663   : > { %5359 = vst [vmem:[%s8304_s11 + $0x240] sm:$0xff] %v5231_v14  ;;  %5360 = vst.msk [vmem:[%s8304_s11 + $0x248] sm:$0xff] %vm3043_vm0, %v5232_v39  ;;  %v4801_v17 = vmul.f32 %v4619_v43, %v10120_v61  ;;  %v4802_v53 = vmul.f32 %v4619_v43, %v10121_v5  ;;  %v10136_v61 = vld [vmem:[#allocation68_spill] sm:$0xff]  ;;  %v10137_v5 = vld [vmem:[#allocation65_spill] sm:$0xff] }
 0x664   : > { %v4584_v25 = vpop.permute.xlu1 %4583 }
 0x665   : > { %v4787_v28 = vmul.f32 %v4584_v25, %v10122_v50  ;;  %v4788_v36 = vmul.f32 %v4584_v25, %v10123_v24  ;;  %v10138_v50 = vld [vmem:[#allocation93_spill] sm:$0xff]  ;;  %v10139_v24 = vld [vmem:[#allocation94_spill] sm:$0xff] }
 0x666   : > { %v5067_v55 = vpop.permute.xlu0 %5066 }
 0x667   : > { %v5249_v54 = vadd.f32 %v5067_v55, %v4801_v17  ;;  %v5250_v40 = vadd.f32 %v5067_v55, %v4802_v53 }
 0x668   : > { %v5032_v21 = vpop.permute.xlu1 %5031 }
 0x669   : > { %5377 = vst [vmem:[%s8304_s11 + $0x2d0] sm:$0xff] %v5249_v54  ;;  %5378 = vst.msk [vmem:[%s8304_s11 + $0x2d8] sm:$0xff] %vm3043_vm0, %v5250_v40  ;;  %v5235_v23 = vadd.f32 %v5032_v21, %v4787_v28  ;;  %v5236_v35 = vadd.f32 %v5032_v21, %v4788_v36 }
 0x66a   : > { %v4629_v30 = vpop.permute.xlu0 %4628 }
 0x66b   : > { %5363 = vst [vmem:[%s8304_s11 + $0x260] sm:$0xff] %v5235_v23  ;;  %5364 = vst.msk [vmem:[%s8304_s11 + $0x268] sm:$0xff] %vm3043_vm0, %v5236_v35  ;;  %v4805_v38 = vmul.f32 %v4629_v30, %v10124_v41  ;;  %v4806_v46 = vmul.f32 %v4629_v30, %v10125_v6  ;;  %v10140_v41 = vld [vmem:[#allocation72_spill] sm:$0xff]  ;;  %v10141_v6 = vld [vmem:[#allocation69_spill] sm:$0xff] }
 0x66c   : > { %v4594_v49 = vpop.permute.xlu1 %4593 }
 0x66d   : > { %v4791_v52 = vmul.f32 %v4594_v49, %v10126_v33  ;;  %v4792_v26 = vmul.f32 %v4594_v49, %v10127_v31  ;;  %v10142_v33 = vld [vmem:[#allocation59_spill] sm:$0xff]  ;;  %v10143_v31 = vld [vmem:[#allocation60_spill] sm:$0xff] }
 0x66e   : > { %v5077_v15 = vpop.permute.xlu0 %5076 }
 0x66f   : > { %v5253_v11 = vadd.f32 %v5077_v15, %v4805_v38  ;;  %v5254_v58 = vadd.f32 %v5077_v15, %v4806_v46 }
 0x670   : > { %v5042_v34 = vpop.permute.xlu1 %5041 }
 0x671   : > { %5381 = vst [vmem:[%s8304_s11 + $0x2f0] sm:$0xff] %v5253_v11  ;;  %5382 = vst.msk [vmem:[%s8304_s11 + $0x2f8] sm:$0xff] %vm3043_vm0, %v5254_v58  ;;  %v5239_v62 = vadd.f32 %v5042_v34, %v4791_v52  ;;  %v5240_v45 = vadd.f32 %v5042_v34, %v4792_v26 }
 0x672   : > { %v4639_v47 = vpop.permute.xlu0 %4638 }
 0x673   : > { %5367 = vst [vmem:[%s8304_s11 + $0x280] sm:$0xff] %v5239_v62  ;;  %5368 = vst.msk [vmem:[%s8304_s11 + $0x288] sm:$0xff] %vm3043_vm0, %v5240_v45  ;;  %v4809_v20 = vmul.f32 %v4639_v47, %v10128_v51  ;;  %v4810_v10 = vmul.f32 %v4639_v47, %v10129_v13  ;;  %v10144_v51 = vld [vmem:[#allocation76_spill] sm:$0xff]  ;;  %v10145_v13 = vld [vmem:[#allocation73_spill] sm:$0xff] }
 0x674   : > { %v4604_v32 = vpop.permute.xlu1 %4603 }
 0x675   : > { %v4795_v9 = vmul.f32 %v4604_v32, %v10130_v27  ;;  %v4796_v42 = vmul.f32 %v4604_v32, %v10131_v19  ;;  %v10146_v27 = vld [vmem:[#allocation61_spill] sm:$0xff]  ;;  %v10147_v19 = vld [vmem:[#allocation95_spill] sm:$0xff] }
 0x676   : > { %v5087_v12 = vpop.permute.xlu0 %5086 }
 0x677   : > { %v5257_v4 = vadd.f32 %v5087_v12, %v4809_v20  ;;  %v5258_v63 = vadd.f32 %v5087_v12, %v4810_v10 }
 0x678   : > { %v5052_v57 = vpop.permute.xlu1 %5051 }
 0x679   : > { %5385 = vst [vmem:[%s8304_s11 + $0x310] sm:$0xff] %v5257_v4  ;;  %5386 = vst.msk [vmem:[%s8304_s11 + $0x318] sm:$0xff] %vm3043_vm0, %v5258_v63  ;;  %v5243_v59 = vadd.f32 %v5052_v57, %v4795_v9  ;;  %v5244_v44 = vadd.f32 %v5052_v57, %v4796_v42 }
 0x67a   : > { %v4649_v8 = vpop.permute.xlu0 %4648 }
 0x67b   : > { %5371 = vst [vmem:[%s8304_s11 + $0x2a0] sm:$0xff] %v5243_v59  ;;  %5372 = vst.msk [vmem:[%s8304_s11 + $0x2a8] sm:$0xff] %vm3043_vm0, %v5244_v44  ;;  %v4813_v18 = vmul.f32 %v4649_v8, %v10132_v29  ;;  %v4814_v37 = vmul.f32 %v4649_v8, %v10133_v60  ;;  %v10148_v29 = vld [vmem:[#allocation99_spill] sm:$0xff]  ;;  %v10149_v60 = vld [vmem:[#allocation118_spill] sm:$0xff] }
 0x67c   : > { %v4614_v16 = vpop.permute.xlu1 %4613 }
 0x67d   : > { %v4799_v1 = vmul.f32 %v4614_v16, %v10134_v0  ;;  %v4800_v56 = vmul.f32 %v4614_v16, %v10135_v7  ;;  %v10150_v0 = vld [vmem:[#allocation66_spill] sm:$0xff]  ;;  %v10151_v7 = vld [vmem:[#allocation97_spill] sm:$0xff] }
 0x67e   : > { %v5097_v2 = vpop.permute.xlu0 %5096 }
 0x67f   : > { %v5261_v22 = vadd.f32 %v5097_v2, %v4813_v18  ;;  %v5262_v3 = vadd.f32 %v5097_v2, %v4814_v37 }
 0x680   : > { %v5062_v48 = vpop.permute.xlu1 %5061 }
 0x681   : > { %5389 = vst [vmem:[%s8304_s11 + $0x330] sm:$0xff] %v5261_v22  ;;  %5390 = vst.msk [vmem:[%s8304_s11 + $0x338] sm:$0xff] %vm3043_vm0, %v5262_v3  ;;  %v5247_v14 = vadd.f32 %v5062_v48, %v4799_v1  ;;  %v5248_v39 = vadd.f32 %v5062_v48, %v4800_v56 }
 0x682   : > { %v4659_v43 = vpop.permute.xlu0 %4658 }
 0x683   : > { %5375 = vst [vmem:[%s8304_s11 + $0x2c0] sm:$0xff] %v5247_v14  ;;  %5376 = vst.msk [vmem:[%s8304_s11 + $0x2c8] sm:$0xff] %vm3043_vm0, %v5248_v39  ;;  %v4817_v17 = vmul.f32 %v4659_v43, %v10136_v61  ;;  %v4818_v53 = vmul.f32 %v4659_v43, %v10137_v5  ;;  %v10152_v61 = vld [vmem:[#allocation79_spill] sm:$0xff]  ;;  %v10153_v5 = vld [vmem:[#allocation100_spill] sm:$0xff] }
 0x684   : > { %v4624_v25 = vpop.permute.xlu1 %4623 }
 0x685   : > { %v4803_v28 = vmul.f32 %v4624_v25, %v10138_v50  ;;  %v4804_v36 = vmul.f32 %v4624_v25, %v10139_v24  ;;  %v10154_v50 = vld [vmem:[#allocation70_spill] sm:$0xff]  ;;  %v10155_v24 = vld [vmem:[#allocation67_spill] sm:$0xff] }
 0x686   : > { %v5107_v55 = vpop.permute.xlu0 %5106 }
 0x687   : > { %v5265_v54 = vadd.f32 %v5107_v55, %v4817_v17  ;;  %v5266_v40 = vadd.f32 %v5107_v55, %v4818_v53 }
 0x688   : > { %v5072_v21 = vpop.permute.xlu1 %5071 }
 0x689   : > { %5393 = vst [vmem:[%s8304_s11 + $0x350] sm:$0xff] %v5265_v54  ;;  %5394 = vst.msk [vmem:[%s8304_s11 + $0x358] sm:$0xff] %vm3043_vm0, %v5266_v40  ;;  %v5251_v23 = vadd.f32 %v5072_v21, %v4803_v28  ;;  %v5252_v35 = vadd.f32 %v5072_v21, %v4804_v36 }
 0x68a   : > { %v4669_v30 = vpop.permute.xlu0 %4668 }
 0x68b   : > { %5379 = vst [vmem:[%s8304_s11 + $0x2e0] sm:$0xff] %v5251_v23  ;;  %5380 = vst.msk [vmem:[%s8304_s11 + $0x2e8] sm:$0xff] %vm3043_vm0, %v5252_v35  ;;  %v4821_v38 = vmul.f32 %v4669_v30, %v10140_v41  ;;  %v4822_v46 = vmul.f32 %v4669_v30, %v10141_v6 }
 0x68c   : > { %v4634_v49 = vpop.permute.xlu1 %4633 }
 0x68d   : > { %v4807_v52 = vmul.f32 %v4634_v49, %v10142_v33  ;;  %v4808_v26 = vmul.f32 %v4634_v49, %v10143_v31  ;;  %v10156_v49 = vld [vmem:[#allocation74_spill] sm:$0xff] }
 0x68e   : > { %v5117_v15 = vpop.permute.xlu0 %5116 }
 0x68f   : > { %v5269_v11 = vadd.f32 %v5117_v15, %v4821_v38  ;;  %v5270_v58 = vadd.f32 %v5117_v15, %v4822_v46  ;;  %v10157_v38 = vld [vmem:[#allocation71_spill] sm:$0xff] }
 0x690   : > { %v5082_v34 = vpop.permute.xlu1 %5081 }
 0x691   : > { %5397 = vst [vmem:[%s8304_s11 + $0x370] sm:$0xff] %v5269_v11  ;;  %5398 = vst.msk [vmem:[%s8304_s11 + $0x378] sm:$0xff] %vm3043_vm0, %v5270_v58  ;;  %v5255_v62 = vadd.f32 %v5082_v34, %v4807_v52  ;;  %v5256_v45 = vadd.f32 %v5082_v34, %v4808_v26  ;;  %v10158_v26 = vld [vmem:[#allocation50_spill] sm:$0xff]  ;;  %v10159_v58 = vld [vmem:[#allocation75_spill] sm:$0xff] }
 0x692   : > { %v4679_v47 = vpop.permute.xlu0 %4678 }
 0x693   : > { %5383 = vst [vmem:[%s8304_s11 + $0x300] sm:$0xff] %v5255_v62  ;;  %5384 = vst.msk [vmem:[%s8304_s11 + $0x308] sm:$0xff] %vm3043_vm0, %v5256_v45  ;;  %v4825_v20 = vmul.f32 %v4679_v47, %v10144_v51  ;;  %v4826_v10 = vmul.f32 %v4679_v47, %v10145_v13  ;;  %v10160_v45 = vld [vmem:[#allocation103_spill] sm:$0xff] }
 0x694   : > { %v4644_v32 = vpop.permute.xlu1 %4643 }
 0x695   : > { %v4811_v9 = vmul.f32 %v4644_v32, %v10146_v27  ;;  %v4812_v42 = vmul.f32 %v4644_v32, %v10147_v19  ;;  %v10161_v32 = vld [vmem:[#allocation123_spill] sm:$0xff]  ;;  %v10162_v19 = vld [vmem:[#allocation120_spill] sm:$0xff] }
 0x696   : > { %v5127_v12 = vpop.permute.xlu0 %5126 }
 0x697   : > { %v5273_v4 = vadd.f32 %v5127_v12, %v4825_v20  ;;  %v5274_v63 = vadd.f32 %v5127_v12, %v4826_v10 }
 0x698   : > { %v5092_v57 = vpop.permute.xlu1 %5091 }
 0x699   : > { %5401 = vst [vmem:[%s8304_s11 + $0x390] sm:$0xff] %v5273_v4  ;;  %5402 = vst.msk [vmem:[%s8304_s11 + $0x398] sm:$0xff] %vm3043_vm0, %v5274_v63  ;;  %v5259_v59 = vadd.f32 %v5092_v57, %v4811_v9  ;;  %v5260_v44 = vadd.f32 %v5092_v57, %v4812_v42  ;;  %v10163_v4 = vld [vmem:[#allocation98_spill] sm:$0xff] }
 0x69a   : > { %v4689_v8 = vpop.permute.xlu0 %4688 }
 0x69b   : > { %5387 = vst [vmem:[%s8304_s11 + $0x320] sm:$0xff] %v5259_v59  ;;  %5388 = vst.msk [vmem:[%s8304_s11 + $0x328] sm:$0xff] %vm3043_vm0, %v5260_v44  ;;  %v4829_v18 = vmul.f32 %v4689_v8, %v10148_v29  ;;  %v4830_v37 = vmul.f32 %v4689_v8, %v10149_v60 }
 0x69c   : > { %v4654_v16 = vpop.permute.xlu1 %4653 }
 0x69d   : > { %v4815_v1 = vmul.f32 %v4654_v16, %v10150_v0  ;;  %v4816_v56 = vmul.f32 %v4654_v16, %v10151_v7  ;;  %v10164_v16 = vld [vmem:[#allocation122_spill] sm:$0xff] }
 0x69e   : > { %v5137_v2 = vpop.permute.xlu0 %5136 }
 0x69f   : > { %v5277_v22 = vadd.f32 %v5137_v2, %v4829_v18  ;;  %v5278_v3 = vadd.f32 %v5137_v2, %v4830_v37  ;;  %v10165_v18 = vld [vmem:[#allocation49_spill] sm:$0xff] }
 0x6a0   : > { %v5102_v48 = vpop.permute.xlu1 %5101 }
 0x6a1   : > { %5405 = vst [vmem:[%s8304_s11 + $0x3b0] sm:$0xff] %v5277_v22  ;;  %5406 = vst.msk [vmem:[%s8304_s11 + $0x3b8] sm:$0xff] %vm3043_vm0, %v5278_v3  ;;  %v5263_v14 = vadd.f32 %v5102_v48, %v4815_v1  ;;  %v5264_v39 = vadd.f32 %v5102_v48, %v4816_v56 }
 0x6a2   : > { %v4699_v43 = vpop.permute.xlu0 %4698 }
 0x6a3   : > { %5391 = vst [vmem:[%s8304_s11 + $0x340] sm:$0xff] %v5263_v14  ;;  %5392 = vst.msk [vmem:[%s8304_s11 + $0x348] sm:$0xff] %vm3043_vm0, %v5264_v39  ;;  %v4833_v17 = vmul.f32 %v4699_v43, %v10152_v61  ;;  %v4834_v53 = vmul.f32 %v4699_v43, %v10153_v5 }
 0x6a4   : > { %v4664_v25 = vpop.permute.xlu1 %4663 }
 0x6a5   : > { %v4819_v28 = vmul.f32 %v4664_v25, %v10154_v50  ;;  %v4820_v36 = vmul.f32 %v4664_v25, %v10155_v24 }
 0x6a6   : > { %v5147_v55 = vpop.permute.xlu0 %5146 }
 0x6a7   : > { %v5281_v54 = vadd.f32 %v5147_v55, %v4833_v17  ;;  %v5282_v40 = vadd.f32 %v5147_v55, %v4834_v53 }
 0x6a8   : > { %v5112_v21 = vpop.permute.xlu1 %5111 }
 0x6a9   : > { %5409 = vst [vmem:[%s8304_s11 + $0x3d0] sm:$0xff] %v5281_v54  ;;  %5410 = vst.msk [vmem:[%s8304_s11 + $0x3d8] sm:$0xff] %vm3043_vm0, %v5282_v40  ;;  %v5267_v23 = vadd.f32 %v5112_v21, %v4819_v28  ;;  %v5268_v35 = vadd.f32 %v5112_v21, %v4820_v36 }
 0x6ab   : > { %5395 = vst [vmem:[%s8304_s11 + $0x360] sm:$0xff] %v5267_v23  ;;  %5396 = vst.msk [vmem:[%s8304_s11 + $0x368] sm:$0xff] %vm3043_vm0, %v5268_v35 }
 0x6ac   : > { %v4674_v30 = vpop.permute.xlu1 %4673 }
 0x6ad   : > { %v4823_v41 = vmul.f32 %v4674_v30, %v10156_v49  ;;  %v4824_v6 = vmul.f32 %v4674_v30, %v10157_v38 }
 0x6b0   : > { %v5122_v46 = vpop.permute.xlu1 %5121 }
 0x6b1   : > { %v5271_v15 = vadd.f32 %v5122_v46, %v4823_v41  ;;  %v5272_v33 = vadd.f32 %v5122_v46, %v4824_v6 }
 0x6b3   : > { %5399 = vst [vmem:[%s8304_s11 + $0x380] sm:$0xff] %v5271_v15  ;;  %5400 = vst.msk [vmem:[%s8304_s11 + $0x388] sm:$0xff] %vm3043_vm0, %v5272_v33 }
 0x6b4   : > { %v4684_v52 = vpop.permute.xlu1 %4683 }
 0x6b5   : > { %v4827_v11 = vmul.f32 %v4684_v52, %v10158_v26  ;;  %v4828_v34 = vmul.f32 %v4684_v52, %v10159_v58 }
 0x6b6   : > { %v4709_v31 = vpop.permute.xlu0 %4708 }
 0x6b7   : > { %v4837_v47 = vmul.f32 %v4709_v31, %v10160_v45  ;;  %v4838_v51 = vmul.f32 %v4709_v31, %v10161_v32 }
 0x6b8   : > { %v5132_v62 = vpop.permute.xlu1 %5131 }
 0x6b9   : > { %v5275_v20 = vadd.f32 %v5132_v62, %v4827_v11  ;;  %v5276_v13 = vadd.f32 %v5132_v62, %v4828_v34 }
 0x6ba   : > { %v5157_v10 = vpop.permute.xlu0 %5156 }
 0x6bb   : > { %5403 = vst [vmem:[%s8304_s11 + $0x3a0] sm:$0xff] %v5275_v20  ;;  %5404 = vst.msk [vmem:[%s8304_s11 + $0x3a8] sm:$0xff] %vm3043_vm0, %v5276_v13  ;;  %v5285_v12 = vadd.f32 %v5157_v10, %v4837_v47  ;;  %v5286_v27 = vadd.f32 %v5157_v10, %v4838_v51 }
 0x6bc   : > { %v4694_v9 = vpop.permute.xlu1 %4693 }
 0x6bd   : > { %5413 = vst [vmem:[%s8304_s11 + $0x3f0] sm:$0xff] %v5285_v12  ;;  %5414 = vst.msk [vmem:[%s8304_s11 + $0x3f8] sm:$0xff] %vm3043_vm0, %v5286_v27  ;;  %v4831_v42 = vmul.f32 %v4694_v9, %v10162_v19  ;;  %v4832_v63 = vmul.f32 %v4694_v9, %v10163_v4 }
 0x6c0   : > { %v5142_v57 = vpop.permute.xlu1 %5141 }
 0x6c1   : > { %v5279_v59 = vadd.f32 %v5142_v57, %v4831_v42  ;;  %v5280_v44 = vadd.f32 %v5142_v57, %v4832_v63 }
 0x6c3   : > { %5407 = vst [vmem:[%s8304_s11 + $0x3c0] sm:$0xff] %v5279_v59  ;;  %5408 = vst.msk [vmem:[%s8304_s11 + $0x3c8] sm:$0xff] %vm3043_vm0, %v5280_v44 }
 0x6c4   : > { %v4704_v8 = vpop.permute.xlu1 %4703 }
 0x6c5   : > { %v4835_v29 = vmul.f32 %v4704_v8, %v10164_v16  ;;  %v4836_v60 = vmul.f32 %v4704_v8, %v10165_v18 }
 0x6c8   : > { %v5152_v37 = vpop.permute.xlu1 %5151 }
 0x6c9   : > { %v5283_v2 = vadd.f32 %v5152_v37, %v4835_v29  ;;  %v5284_v0 = vadd.f32 %v5152_v37, %v4836_v60 }
 0x6cb   : > { %5411 = vst [vmem:[%s8304_s11 + $0x3e0] sm:$0xff] %v5283_v2  ;;  %5412 = vst.msk [vmem:[%s8304_s11 + $0x3e8] sm:$0xff] %vm3043_vm0, %v5284_v0 }
 0x6cc PF: > { %p14_p9 = scmp.ge.s32.totalorder %s5794_s20, 4   ;;  %s10166_s15 = smov %s5733_s16 }
 0x6cd   : > { %s10167_s16 = smov %s5737_s17  ;;  %s10168_s17 = smov %s5804_s23 }
 0x6ce   : > { %s10169_s18 = smov %s5794_s20  ;;  %16 = sbr.rel (!%p14_p9) target bundleno = 3 (0x3), region = 78 }
 0x6d3   :  { %5439 = vsyncpa [#allocation3], 1 }
 0x6d4   :  { %5441 = vsyncpa [#allocation3 + $0x1], 1 }

</bundles_post_ra>
